<compile_context>
chip_gen: v7x
topology: tpu7x:2x2x1
jax: 0.10.0
libtpu: 0.0.40
codegen_flags: <defaults>
</compile_context>

<pallas_src>
import jax
import jax.numpy as jnp
from jax import lax
from jax.experimental import pallas as pl
from jax.experimental.pallas import tpu as pltpu

# Scaled-down, lane-friendly stand-in for the real config
# (n_embd=576, n_head=8, n_layer=10, block_size=192, vocab~70).
N_EMBD = 256                      # C   (multiple of 128 -> lane dense)
N_HEAD = 2                        # H
HEAD_SIZE = N_EMBD // N_HEAD      # 128 -> per-head slices are whole lane tiles
N_LAYER = 2
BLOCK_SIZE = 32
VOCAB_SIZE = 128                  # multiple of 128 -> lane-dense logits
LN_EPS = 1e-5                     # torch.nn.LayerNorm default
NEG_MASK = -1e30                  # finite mask value (defensive vs -inf)


def _layernorm(x, gamma, beta, eps=LN_EPS):
    # x: (N, C) fp32; gamma/beta: (1, C) fp32.  One-pass stats.
    mu = jnp.mean(x, axis=-1, keepdims=True)
    ms = jnp.mean(x * x, axis=-1, keepdims=True)
    var = jnp.maximum(ms - mu * mu, 0.0)
    return (x - mu) * lax.rsqrt(var + eps) * gamma + beta


def gpt_kernel(tok_ref, pos_ref,
               wqkv_ref, wo_ref, bo_ref, ln1g_ref, ln1b_ref,
               w1_ref, b1_ref, w2_ref, b2_ref, ln2g_ref, ln2b_ref,
               lnfg_ref, lnfb_ref, wlm_ref, blm_ref,
               logits_ref, x_scratch, attn_scratch, mask_scratch):
    l = pl.program_id(0)
    B, T, C = tok_ref.shape
    N = B * T
    H, hs = N_HEAD, HEAD_SIZE
    V = wlm_ref.shape[1]
    scale = float(hs) ** -0.5

    # ---- step 0: fold token+pos embedding add; build causal mask ONCE ----
    @pl.when(l == 0)
    def _():
        x0 = (tok_ref[...].astype(jnp.float32)
              + pos_ref[...].astype(jnp.float32)[None])
        x_scratch[...] = x0.reshape(N, C)
        row = lax.broadcasted_iota(jnp.int32, (T, T), 0)
        col = lax.broadcasted_iota(jnp.int32, (T, T), 1)
        mask_scratch[...] = jnp.where(col <= row, 0.0, NEG_MASK)

    x = x_scratch[...]                          # (N, C) fp32, VMEM-resident
    mask = mask_scratch[...][None]              # (1, T, T) additive causal mask

    # ---- multi-head self-attention ----
    # fused QKV projection: one MXU pass instead of three
    qkv = jnp.dot(x.astype(jnp.bfloat16), wqkv_ref[0],
                  preferred_element_type=jnp.float32)            # (N, 3C) fp32
    # fold 1/sqrt(hs) into q (N*hs elems) rather than the scores (B*H*T*T)
    q_all = (qkv[:, :C] * scale).astype(jnp.bfloat16)
    k_all = qkv[:, C:2 * C].astype(jnp.bfloat16)
    v_all = qkv[:, 2 * C:].astype(jnp.bfloat16)

    # Short static loop over heads.  Every column slice is a whole lane tile
    # (hs = 128) and every reshape only touches leading dims (no relayout);
    # the batched einsums keep the batch dim leading (supported pattern).
    for h in range(H):
        sl = slice(h * hs, (h + 1) * hs)
        q = q_all[:, sl].reshape(B, T, hs)
        k = k_all[:, sl].reshape(B, T, hs)
        v = v_all[:, sl].reshape(B, T, hs)
        # contraction on the last dim of both operands -> no materialized k^T
        s = jnp.einsum('bqd,bkd->bqk', q, k,
                       preferred_element_type=jnp.float32) + mask  # (B, T, T)
        s = s - jnp.max(s, axis=-1, keepdims=True)
        p = jnp.exp(s)
        p = p * pl.reciprocal(jnp.sum(p, axis=-1, keepdims=True), approx=True)
        # attention dropout -> identity in eval
        o = jnp.einsum('bqk,bkd->bqd', p.astype(jnp.bfloat16), v,
                       preferred_element_type=jnp.float32)         # (B, T, hs)
        # head "concat" = direct lane-aligned store into the bf16 scratch
        attn_scratch[:, sl] = o.reshape(N, hs).astype(jnp.bfloat16)

    # output projection (+ dropout -> identity)
    attn = jnp.dot(attn_scratch[...], wo_ref[0],
                   preferred_element_type=jnp.float32) + bo_ref[0]

    # post-norm residual 1 (matches the reference Block: x = ln1(x + sa(x)))
    x1 = _layernorm(x + attn, ln1g_ref[0], ln1b_ref[0])

    # ---- feed-forward: Linear -> ReLU -> Linear (+ dropout -> identity) ----
    h1 = jnp.dot(x1.astype(jnp.bfloat16), w1_ref[0],
                 preferred_element_type=jnp.float32) + b1_ref[0]
    h1 = jnp.maximum(h1, 0.0)
    ff = jnp.dot(h1.astype(jnp.bfloat16), w2_ref[0],
                 preferred_element_type=jnp.float32) + b2_ref[0]

    # post-norm residual 2: x = ln2(x + ffwd(x))
    x2 = _layernorm(x1 + ff, ln2g_ref[0], ln2b_ref[0])
    x_scratch[...] = x2

    # ---- last step: ln_f + lm_head folded in; bf16 logits writeback ----
    @pl.when(l == pl.num_programs(0) - 1)
    def _():
        xn = _layernorm(x2, lnfg_ref[...], lnfb_ref[...])
        logits = jnp.dot(xn.astype(jnp.bfloat16), wlm_ref[...],
                         preferred_element_type=jnp.float32) + blm_ref[...]
        logits_ref[...] = logits.reshape(B, T, V).astype(logits_ref.dtype)


def gpt_forward(index, params):
    """Forward pass (targets=None path => logits only, in bf16)."""
    B, T = index.shape
    assert T % 8 == 0 and T <= BLOCK_SIZE  # TODO(synk): pad T for arbitrary lengths
    C, F, V, L = N_EMBD, 4 * N_EMBD, VOCAB_SIZE, N_LAYER

    tok = params["tok"][index]          # (B, T, C) bf16 embedding gather (JAX glue)
    pos = params["pos"][:T]             # (T, C) bf16
    lyr = params["layers"]
    hd = params["head"]

    per_layer = lambda s1, s2: pl.BlockSpec((1, s1, s2), lambda l: (l, 0, 0))
    full2 = lambda s0, s1: pl.BlockSpec((s0, s1), lambda l: (0, 0))

    return pl.pallas_call(
        gpt_kernel,
        out_shape=jax.ShapeDtypeStruct((B, T, V), jnp.bfloat16),
        grid=(L,),
        in_specs=[
            pl.BlockSpec((B, T, C), lambda l: (0, 0, 0)),   # tok_emb
            full2(T, C),                                    # pos_emb
            per_layer(C, 3 * C),                            # wqkv (fused)
            per_layer(C, C),                                # wo
            per_layer(1, C),                                # bo
            per_layer(1, C), per_layer(1, C),               # ln1 gamma/beta
            per_layer(C, F), per_layer(1, F),               # ffn w1, b1
            per_layer(F, C), per_layer(1, C),               # ffn w2, b2
            per_layer(1, C), per_layer(1, C),               # ln2 gamma/beta
            full2(1, C), full2(1, C),                       # ln_f gamma/beta
            full2(C, V), full2(1, V),                       # lm_head W, b
        ],
        out_specs=pl.BlockSpec((B, T, V), lambda l: (0, 0, 0)),
        scratch_shapes=[
            pltpu.VMEM((B * T, C), jnp.float32),    # residual stream x
            pltpu.VMEM((B * T, C), jnp.bfloat16),   # per-head attn outputs
            pltpu.VMEM((T, T), jnp.float32),        # hoisted causal mask
        ],
        compiler_params=pltpu.CompilerParams(
            dimension_semantics=("arbitrary",)),            # layers carry state
    )(tok, pos,
      lyr["wqkv"], lyr["wo"], lyr["bo"], lyr["ln1g"], lyr["ln1b"],
      lyr["w1"], lyr["b1"], lyr["w2"], lyr["b2"], lyr["ln2g"], lyr["ln2b"],
      hd["lnfg"], hd["lnfb"], hd["wlm"], hd["blm"])


def init_params(key):
    """Mirrors _init_weights: N(0, 0.02) weights/embeddings, zero biases,
    LayerNorm ones/zeros.  Matmul weights & embeddings stored in bf16
    (pre-transposed to (in, out)); biases and LN params in fp32."""
    C, F, V, L = N_EMBD, 4 * N_EMBD, VOCAB_SIZE, N_LAYER

    def nrm(k, shape, dtype=jnp.bfloat16):
        return (0.02 * jax.random.normal(k, shape, jnp.float32)).astype(dtype)

    keys = jax.random.split(key, 9)
    wq = nrm(keys[2], (L, C, C), jnp.float32)
    wk = nrm(keys[3], (L, C, C), jnp.float32)
    wv = nrm(keys[4], (L, C, C), jnp.float32)
    wqkv = jnp.concatenate([wq, wk, wv], axis=-1).astype(jnp.bfloat16)

    params = {
        "tok": nrm(keys[0], (V, C)),
        "pos": nrm(keys[1], (BLOCK_SIZE, C)),
        "layers": {
            "wqkv": wqkv,                                   # (L, C, 3C)
            "wo": nrm(keys[5], (L, C, C)),
            "bo": jnp.zeros((L, 1, C), jnp.float32),
            "ln1g": jnp.ones((L, 1, C), jnp.float32),
            "ln1b": jnp.zeros((L, 1, C), jnp.float32),
            "w1": nrm(keys[6], (L, C, F)),
            "b1": jnp.zeros((L, 1, F), jnp.float32),
            "w2": nrm(keys[7], (L, F, C)),
            "b2": jnp.zeros((L, 1, C), jnp.float32),
            "ln2g": jnp.ones((L, 1, C), jnp.float32),
            "ln2b": jnp.zeros((L, 1, C), jnp.float32),
        },
        "head": {
            "lnfg": jnp.ones((1, C), jnp.float32),
            "lnfb": jnp.zeros((1, C), jnp.float32),
            "wlm": nrm(keys[8], (C, V)),
            "blm": jnp.zeros((1, V), jnp.float32),
        },
    }
    return params


if __name__ == "__main__":
    key = jax.random.PRNGKey(0)
    pkey, dkey = jax.random.split(key)
    params = init_params(pkey)

    # B*T = 128 rows per weight fetch (review: more tokens per streamed layer).
    B, T = 4, 32
    index = jax.random.randint(dkey, (B, T), 0, VOCAB_SIZE, dtype=jnp.int32)

    logits = jax.jit(gpt_forward)(index, params)
    jax.block_until_ready(logits)
    assert logits.shape == (B, T, VOCAB_SIZE)
    assert logits.dtype == jnp.bfloat16
    assert bool(jnp.all(jnp.isfinite(logits.astype(jnp.float32))))
    print("KERNEL_OK")
</pallas_src>

<mosaic_0001>
module attributes {stable_mosaic.version = 11 : i64} {
  func.func @gpt_kernel(%arg0: i32, %arg1: memref<4x32x256xbf16, #tpu.memory_space<vmem>>, %arg2: memref<32x256xbf16, #tpu.memory_space<vmem>>, %arg3: memref<1x256x768xbf16, #tpu.memory_space<vmem>>, %arg4: memref<1x256x256xbf16, #tpu.memory_space<vmem>>, %arg5: memref<1x1x256xf32, #tpu.memory_space<vmem>>, %arg6: memref<1x1x256xf32, #tpu.memory_space<vmem>>, %arg7: memref<1x1x256xf32, #tpu.memory_space<vmem>>, %arg8: memref<1x256x1024xbf16, #tpu.memory_space<vmem>>, %arg9: memref<1x1x1024xf32, #tpu.memory_space<vmem>>, %arg10: memref<1x1024x256xbf16, #tpu.memory_space<vmem>>, %arg11: memref<1x1x256xf32, #tpu.memory_space<vmem>>, %arg12: memref<1x1x256xf32, #tpu.memory_space<vmem>>, %arg13: memref<1x1x256xf32, #tpu.memory_space<vmem>>, %arg14: memref<1x256xf32, #tpu.memory_space<vmem>>, %arg15: memref<1x256xf32, #tpu.memory_space<vmem>>, %arg16: memref<256x128xbf16, #tpu.memory_space<vmem>>, %arg17: memref<1x128xf32, #tpu.memory_space<vmem>>, %arg18: memref<4x32x128xbf16, #tpu.memory_space<vmem>>, %arg19: memref<128x256xf32, #tpu.memory_space<vmem>>, %arg20: memref<128x256xbf16, #tpu.memory_space<vmem>>, %arg21: memref<32x32xf32, #tpu.memory_space<vmem>>) attributes {dimension_semantics = [#tpu.dimension_semantics<arbitrary>], iteration_bounds = array<i64: 2>, scalar_prefetch = 0 : i64, scratch_operands = 3 : i64, tpu.core_type = #tpu.core_type<tc>, window_params = [{pipeline_mode = #tpu.pipeline_mode<synchronous>, transform_indices = @transform_0, window_bounds = array<i64: 4, 32, 256>}, {pipeline_mode = #tpu.pipeline_mode<synchronous>, transform_indices = @transform_1, window_bounds = array<i64: 32, 256>}, {transform_indices = @transform_2, window_bounds = array<i64: 1, 256, 768>}, {transform_indices = @transform_3, window_bounds = array<i64: 1, 256, 256>}, {transform_indices = @transform_4, window_bounds = array<i64: 1, 1, 256>}, {transform_indices = @transform_5, window_bounds = array<i64: 1, 1, 256>}, {transform_indices = @transform_6, window_bounds = array<i64: 1, 1, 256>}, {transform_indices = @transform_7, window_bounds = array<i64: 1, 256, 1024>}, {transform_indices = @transform_8, window_bounds = array<i64: 1, 1, 1024>}, {transform_indices = @transform_9, window_bounds = array<i64: 1, 1024, 256>}, {transform_indices = @transform_10, window_bounds = array<i64: 1, 1, 256>}, {transform_indices = @transform_11, window_bounds = array<i64: 1, 1, 256>}, {transform_indices = @transform_12, window_bounds = array<i64: 1, 1, 256>}, {pipeline_mode = #tpu.pipeline_mode<synchronous>, transform_indices = @transform_13, window_bounds = array<i64: 1, 256>}, {pipeline_mode = #tpu.pipeline_mode<synchronous>, transform_indices = @transform_14, window_bounds = array<i64: 1, 256>}, {pipeline_mode = #tpu.pipeline_mode<synchronous>, transform_indices = @transform_15, window_bounds = array<i64: 256, 128>}, {pipeline_mode = #tpu.pipeline_mode<synchronous>, transform_indices = @transform_16, window_bounds = array<i64: 1, 128>}, {pipeline_mode = #tpu.pipeline_mode<synchronous>, transform_indices = @transform_17, window_bounds = array<i64: 4, 32, 128>}]} {
    %c0_i32 = arith.constant 0 : i32
    %0 = arith.cmpi eq, %arg0, %c0_i32 : i32
    %1 = arith.extui %0 : i1 to i32
    %c0_i32_0 = arith.constant 0 : i32
    %2 = arith.cmpi ne, %1, %c0_i32_0 : i32
    scf.if %2 {
      %c0_70 = arith.constant 0 : index
      %c0_71 = arith.constant 0 : index
      %c0_72 = arith.constant 0 : index
      %154 = vector.load %arg1[%c0_70, %c0_71, %c0_72] : memref<4x32x256xbf16, #tpu.memory_space<vmem>>, vector<4x32x256xbf16>
      %155 = arith.extf %154 : vector<4x32x256xbf16> to vector<4x32x256xf32>
      %c0_73 = arith.constant 0 : index
      %c0_74 = arith.constant 0 : index
      %156 = vector.load %arg2[%c0_73, %c0_74] : memref<32x256xbf16, #tpu.memory_space<vmem>>, vector<32x256xbf16>
      %157 = arith.extf %156 : vector<32x256xbf16> to vector<32x256xf32>
      %158 = vector.shape_cast %157 : vector<32x256xf32> to vector<1x32x256xf32>
      %159 = vector.broadcast %158 : vector<1x32x256xf32> to vector<4x32x256xf32>
      %160 = arith.addf %155, %159 : vector<4x32x256xf32>
      %161 = vector.shape_cast %160 : vector<4x32x256xf32> to vector<128x256xf32>
      %c0_75 = arith.constant 0 : index
      %c0_76 = arith.constant 0 : index
      %162 = vector.load %arg19[%c0_75, %c0_76] : memref<128x256xf32, #tpu.memory_space<vmem>>, vector<128x256xf32>
      tpu.vector_store %arg19[%c0_75, %c0_76], %161 {strides = array<i32>} : memref<128x256xf32, #tpu.memory_space<vmem>>, vector<128x256xf32>,
      %163 = tpu.iota {dimensions = array<i32: 0>} : vector<32x32xi32>
      %164 = tpu.iota {dimensions = array<i32: 1>} : vector<32x32xi32>
      %165 = arith.cmpi sle, %164, %163 : vector<32x32xi32>
      %cst_77 = arith.constant 0.000000e+00 : f32
      %cst_78 = arith.constant -1.000000e+30 : f32
      %166 = vector.broadcast %cst_77 : f32 to vector<32x32xf32>
      %167 = vector.broadcast %cst_78 : f32 to vector<32x32xf32>
      %168 = arith.select %165, %166, %167 : vector<32x32xi1>, vector<32x32xf32>
      %c0_79 = arith.constant 0 : index
      %c0_80 = arith.constant 0 : index
      %169 = vector.load %arg21[%c0_79, %c0_80] : memref<32x32xf32, #tpu.memory_space<vmem>>, vector<32x32xf32>
      tpu.vector_store %arg21[%c0_79, %c0_80], %168 {strides = array<i32>} : memref<32x32xf32, #tpu.memory_space<vmem>>, vector<32x32xf32>,
    } else {
    }
    %c0 = arith.constant 0 : index
    %c0_1 = arith.constant 0 : index
    %3 = vector.load %arg19[%c0, %c0_1] : memref<128x256xf32, #tpu.memory_space<vmem>>, vector<128x256xf32>
    %c0_2 = arith.constant 0 : index
    %c0_3 = arith.constant 0 : index
    %4 = vector.load %arg21[%c0_2, %c0_3] : memref<32x32xf32, #tpu.memory_space<vmem>>, vector<32x32xf32>
    %5 = vector.shape_cast %4 : vector<32x32xf32> to vector<1x32x32xf32>
    %6 = arith.truncf %3 : vector<128x256xf32> to vector<128x256xbf16>
    %c0_4 = arith.constant 0 : index
    %c0_5 = arith.constant 0 : index
    %c0_6 = arith.constant 0 : index
    %7 = vector.load %arg3[%c0_4, %c0_5, %c0_6] : memref<1x256x768xbf16, #tpu.memory_space<vmem>>, vector<1x256x768xbf16>
    %8 = vector.shape_cast %7 : vector<1x256x768xbf16> to vector<256x768xbf16>
    %cst = arith.constant dense<0.000000e+00> : vector<128x768xf32>
    %9 = tpu.matmul %6, %8, %cst {dimension_numbers = #tpu.dot_dimension_numbers<[1], [0], [0], [1], [0, 0, 1, 1], [], []>} : vector<128x256xbf16>, vector<256x768xbf16>, vector<128x768xf32> -> vector<128x768xf32>
    %10 = vector.extract_strided_slice %9 {offsets = [0, 0], sizes = [128, 256], strides = [1, 1]} : vector<128x768xf32> to vector<128x256xf32>
    %cst_7 = arith.constant 0.0883883461 : f32
    %11 = vector.broadcast %cst_7 : f32 to vector<128x256xf32>
    %12 = arith.mulf %10, %11 : vector<128x256xf32>
    %13 = arith.truncf %12 : vector<128x256xf32> to vector<128x256xbf16>
    %14 = vector.extract_strided_slice %9 {offsets = [0, 256], sizes = [128, 256], strides = [1, 1]} : vector<128x768xf32> to vector<128x256xf32>
    %15 = arith.truncf %14 : vector<128x256xf32> to vector<128x256xbf16>
    %16 = vector.extract_strided_slice %9 {offsets = [0, 512], sizes = [128, 256], strides = [1, 1]} : vector<128x768xf32> to vector<128x256xf32>
    %17 = arith.truncf %16 : vector<128x256xf32> to vector<128x256xbf16>
    %18 = vector.extract_strided_slice %13 {offsets = [0, 0], sizes = [128, 128], strides = [1, 1]} : vector<128x256xbf16> to vector<128x128xbf16>
    %19 = vector.shape_cast %18 : vector<128x128xbf16> to vector<4x32x128xbf16>
    %20 = vector.extract_strided_slice %15 {offsets = [0, 0], sizes = [128, 128], strides = [1, 1]} : vector<128x256xbf16> to vector<128x128xbf16>
    %21 = vector.shape_cast %20 : vector<128x128xbf16> to vector<4x32x128xbf16>
    %22 = vector.extract_strided_slice %17 {offsets = [0, 0], sizes = [128, 128], strides = [1, 1]} : vector<128x256xbf16> to vector<128x128xbf16>
    %23 = vector.shape_cast %22 : vector<128x128xbf16> to vector<4x32x128xbf16>
    "tpu.trace_start"() <{level = 10 : i32, message = "bqd,bkd->bqk"}> : () -> ()
    %cst_8 = arith.constant dense<0.000000e+00> : vector<4x32x32xf32>
    %24 = tpu.matmul %19, %21, %cst_8 {dimension_numbers = #tpu.dot_dimension_numbers<[2], [2], [1], [1], [0, 0, 0, 1, 1, 1], [0], [0]>} : vector<4x32x128xbf16>, vector<4x32x128xbf16>, vector<4x32x32xf32> -> vector<4x32x32xf32>
    "tpu.trace_stop"() : () -> ()
    %25 = vector.broadcast %5 : vector<1x32x32xf32> to vector<4x32x32xf32>
    %26 = arith.addf %24, %25 : vector<4x32x32xf32>
    %cst_9 = arith.constant dense<0xFF800000> : vector<4x32xf32>
    %27 = vector.multi_reduction <maximumf>, %26, %cst_9 [2] : vector<4x32x32xf32> to vector<4x32xf32>
    %28 = vector.shape_cast %27 : vector<4x32xf32> to vector<4x32x1xf32>
    %29 = vector.broadcast %28 : vector<4x32x1xf32> to vector<4x32x32xf32>
    %30 = arith.subf %26, %29 : vector<4x32x32xf32>
    %31 = math.exp %30 : vector<4x32x32xf32>
    %cst_10 = arith.constant dense<0.000000e+00> : vector<4x32xf32>
    %32 = vector.multi_reduction <add>, %31, %cst_10 [2] : vector<4x32x32xf32> to vector<4x32xf32>
    %33 = vector.shape_cast %32 : vector<4x32xf32> to vector<4x32x1xf32>
    %34 = tpu.reciprocal %33 {approx = true} : vector<4x32x1xf32> -> vector<4x32x1xf32>
    %35 = vector.broadcast %34 : vector<4x32x1xf32> to vector<4x32x32xf32>
    %36 = arith.mulf %31, %35 : vector<4x32x32xf32>
    %37 = arith.truncf %36 : vector<4x32x32xf32> to vector<4x32x32xbf16>
    "tpu.trace_start"() <{level = 10 : i32, message = "bqk,bkd->bqd"}> : () -> ()
    %cst_11 = arith.constant dense<0.000000e+00> : vector<4x32x128xf32>
    %38 = tpu.matmul %37, %23, %cst_11 {dimension_numbers = #tpu.dot_dimension_numbers<[2], [1], [1], [2], [0, 0, 0, 1, 1, 2], [0], [0]>} : vector<4x32x32xbf16>, vector<4x32x128xbf16>, vector<4x32x128xf32> -> vector<4x32x128xf32>
    "tpu.trace_stop"() : () -> ()
    %39 = vector.shape_cast %38 : vector<4x32x128xf32> to vector<128x128xf32>
    %40 = arith.truncf %39 : vector<128x128xf32> to vector<128x128xbf16>
    %c0_12 = arith.constant 0 : index
    %c0_13 = arith.constant 0 : index
    %41 = vector.load %arg20[%c0_12, %c0_13] : memref<128x256xbf16, #tpu.memory_space<vmem>>, vector<128x128xbf16>
    tpu.vector_store %arg20[%c0_12, %c0_13], %40 {strides = array<i32>} : memref<128x256xbf16, #tpu.memory_space<vmem>>, vector<128x128xbf16>,
    %42 = vector.extract_strided_slice %13 {offsets = [0, 128], sizes = [128, 128], strides = [1, 1]} : vector<128x256xbf16> to vector<128x128xbf16>
    %43 = vector.shape_cast %42 : vector<128x128xbf16> to vector<4x32x128xbf16>
    %44 = vector.extract_strided_slice %15 {offsets = [0, 128], sizes = [128, 128], strides = [1, 1]} : vector<128x256xbf16> to vector<128x128xbf16>
    %45 = vector.shape_cast %44 : vector<128x128xbf16> to vector<4x32x128xbf16>
    %46 = vector.extract_strided_slice %17 {offsets = [0, 128], sizes = [128, 128], strides = [1, 1]} : vector<128x256xbf16> to vector<128x128xbf16>
    %47 = vector.shape_cast %46 : vector<128x128xbf16> to vector<4x32x128xbf16>
    "tpu.trace_start"() <{level = 10 : i32, message = "bqd,bkd->bqk"}> : () -> ()
    %cst_14 = arith.constant dense<0.000000e+00> : vector<4x32x32xf32>
    %48 = tpu.matmul %43, %45, %cst_14 {dimension_numbers = #tpu.dot_dimension_numbers<[2], [2], [1], [1], [0, 0, 0, 1, 1, 1], [0], [0]>} : vector<4x32x128xbf16>, vector<4x32x128xbf16>, vector<4x32x32xf32> -> vector<4x32x32xf32>
    "tpu.trace_stop"() : () -> ()
    %49 = vector.broadcast %5 : vector<1x32x32xf32> to vector<4x32x32xf32>
    %50 = arith.addf %48, %49 : vector<4x32x32xf32>
    %cst_15 = arith.constant dense<0xFF800000> : vector<4x32xf32>
    %51 = vector.multi_reduction <maximumf>, %50, %cst_15 [2] : vector<4x32x32xf32> to vector<4x32xf32>
    %52 = vector.shape_cast %51 : vector<4x32xf32> to vector<4x32x1xf32>
    %53 = vector.broadcast %52 : vector<4x32x1xf32> to vector<4x32x32xf32>
    %54 = arith.subf %50, %53 : vector<4x32x32xf32>
    %55 = math.exp %54 : vector<4x32x32xf32>
    %cst_16 = arith.constant dense<0.000000e+00> : vector<4x32xf32>
    %56 = vector.multi_reduction <add>, %55, %cst_16 [2] : vector<4x32x32xf32> to vector<4x32xf32>
    %57 = vector.shape_cast %56 : vector<4x32xf32> to vector<4x32x1xf32>
    %58 = tpu.reciprocal %57 {approx = true} : vector<4x32x1xf32> -> vector<4x32x1xf32>
    %59 = vector.broadcast %58 : vector<4x32x1xf32> to vector<4x32x32xf32>
    %60 = arith.mulf %55, %59 : vector<4x32x32xf32>
    %61 = arith.truncf %60 : vector<4x32x32xf32> to vector<4x32x32xbf16>
    "tpu.trace_start"() <{level = 10 : i32, message = "bqk,bkd->bqd"}> : () -> ()
    %cst_17 = arith.constant dense<0.000000e+00> : vector<4x32x128xf32>
    %62 = tpu.matmul %61, %47, %cst_17 {dimension_numbers = #tpu.dot_dimension_numbers<[2], [1], [1], [2], [0, 0, 0, 1, 1, 2], [0], [0]>} : vector<4x32x32xbf16>, vector<4x32x128xbf16>, vector<4x32x128xf32> -> vector<4x32x128xf32>
    "tpu.trace_stop"() : () -> ()
    %63 = vector.shape_cast %62 : vector<4x32x128xf32> to vector<128x128xf32>
    %64 = arith.truncf %63 : vector<128x128xf32> to vector<128x128xbf16>
    %c0_18 = arith.constant 0 : index
    %c128 = arith.constant 128 : index
    %65 = vector.load %arg20[%c0_18, %c128] : memref<128x256xbf16, #tpu.memory_space<vmem>>, vector<128x128xbf16>
    tpu.vector_store %arg20[%c0_18, %c128], %64 {strides = array<i32>} : memref<128x256xbf16, #tpu.memory_space<vmem>>, vector<128x128xbf16>,
    %c0_19 = arith.constant 0 : index
    %c0_20 = arith.constant 0 : index
    %66 = vector.load %arg20[%c0_19, %c0_20] : memref<128x256xbf16, #tpu.memory_space<vmem>>, vector<128x256xbf16>
    %c0_21 = arith.constant 0 : index
    %c0_22 = arith.constant 0 : index
    %c0_23 = arith.constant 0 : index
    %67 = vector.load %arg4[%c0_21, %c0_22, %c0_23] : memref<1x256x256xbf16, #tpu.memory_space<vmem>>, vector<1x256x256xbf16>
    %68 = vector.shape_cast %67 : vector<1x256x256xbf16> to vector<256x256xbf16>
    %cst_24 = arith.constant dense<0.000000e+00> : vector<128x256xf32>
    %69 = tpu.matmul %66, %68, %cst_24 {dimension_numbers = #tpu.dot_dimension_numbers<[1], [0], [0], [1], [0, 0, 1, 1], [], []>} : vector<128x256xbf16>, vector<256x256xbf16>, vector<128x256xf32> -> vector<128x256xf32>
    %c0_25 = arith.constant 0 : index
    %c0_26 = arith.constant 0 : index
    %c0_27 = arith.constant 0 : index
    %70 = vector.load %arg5[%c0_25, %c0_26, %c0_27] : memref<1x1x256xf32, #tpu.memory_space<vmem>>, vector<1x1x256xf32>
    %71 = vector.shape_cast %70 : vector<1x1x256xf32> to vector<1x256xf32>
    %72 = vector.broadcast %71 : vector<1x256xf32> to vector<128x256xf32>
    %73 = arith.addf %69, %72 : vector<128x256xf32>
    %74 = arith.addf %3, %73 : vector<128x256xf32>
    %c0_28 = arith.constant 0 : index
    %c0_29 = arith.constant 0 : index
    %c0_30 = arith.constant 0 : index
    %75 = vector.load %arg6[%c0_28, %c0_29, %c0_30] : memref<1x1x256xf32, #tpu.memory_space<vmem>>, vector<1x1x256xf32>
    %76 = vector.shape_cast %75 : vector<1x1x256xf32> to vector<1x256xf32>
    %c0_31 = arith.constant 0 : index
    %c0_32 = arith.constant 0 : index
    %c0_33 = arith.constant 0 : index
    %77 = vector.load %arg7[%c0_31, %c0_32, %c0_33] : memref<1x1x256xf32, #tpu.memory_space<vmem>>, vector<1x1x256xf32>
    %78 = vector.shape_cast %77 : vector<1x1x256xf32> to vector<1x256xf32>
    %cst_34 = arith.constant dense<0.000000e+00> : vector<128xf32>
    %79 = vector.multi_reduction <add>, %74, %cst_34 [1] : vector<128x256xf32> to vector<128xf32>
    %80 = vector.shape_cast %79 : vector<128xf32> to vector<128x1xf32>
    %cst_35 = arith.constant 2.560000e+02 : f32
    %81 = vector.broadcast %cst_35 : f32 to vector<128x1xf32>
    %82 = arith.divf %80, %81 : vector<128x1xf32>
    %83 = arith.mulf %74, %74 : vector<128x256xf32>
    %cst_36 = arith.constant dense<0.000000e+00> : vector<128xf32>
    %84 = vector.multi_reduction <add>, %83, %cst_36 [1] : vector<128x256xf32> to vector<128xf32>
    %85 = vector.shape_cast %84 : vector<128xf32> to vector<128x1xf32>
    %cst_37 = arith.constant 2.560000e+02 : f32
    %86 = vector.broadcast %cst_37 : f32 to vector<128x1xf32>
    %87 = arith.divf %85, %86 : vector<128x1xf32>
    %88 = arith.mulf %82, %82 : vector<128x1xf32>
    %89 = arith.subf %87, %88 : vector<128x1xf32>
    %cst_38 = arith.constant 0.000000e+00 : f32
    %90 = vector.broadcast %cst_38 : f32 to vector<128x1xf32>
    %91 = arith.maximumf %89, %90 : vector<128x1xf32>
    %92 = vector.broadcast %82 : vector<128x1xf32> to vector<128x256xf32>
    %93 = arith.subf %74, %92 : vector<128x256xf32>
    %cst_39 = arith.constant 9.99999974E-6 : f32
    %94 = vector.broadcast %cst_39 : f32 to vector<128x1xf32>
    %95 = arith.addf %91, %94 : vector<128x1xf32>
    %96 = math.rsqrt %95 : vector<128x1xf32>
    %97 = vector.broadcast %96 : vector<128x1xf32> to vector<128x256xf32>
    %98 = arith.mulf %93, %97 : vector<128x256xf32>
    %99 = vector.broadcast %76 : vector<1x256xf32> to vector<128x256xf32>
    %100 = arith.mulf %98, %99 : vector<128x256xf32>
    %101 = vector.broadcast %78 : vector<1x256xf32> to vector<128x256xf32>
    %102 = arith.addf %100, %101 : vector<128x256xf32>
    %103 = arith.truncf %102 : vector<128x256xf32> to vector<128x256xbf16>
    %c0_40 = arith.constant 0 : index
    %c0_41 = arith.constant 0 : index
    %c0_42 = arith.constant 0 : index
    %104 = vector.load %arg8[%c0_40, %c0_41, %c0_42] : memref<1x256x1024xbf16, #tpu.memory_space<vmem>>, vector<1x256x1024xbf16>
    %105 = vector.shape_cast %104 : vector<1x256x1024xbf16> to vector<256x1024xbf16>
    %cst_43 = arith.constant dense<0.000000e+00> : vector<128x1024xf32>
    %106 = tpu.matmul %103, %105, %cst_43 {dimension_numbers = #tpu.dot_dimension_numbers<[1], [0], [0], [1], [0, 0, 1, 1], [], []>} : vector<128x256xbf16>, vector<256x1024xbf16>, vector<128x1024xf32> -> vector<128x1024xf32>
    %c0_44 = arith.constant 0 : index
    %c0_45 = arith.constant 0 : index
    %c0_46 = arith.constant 0 : index
    %107 = vector.load %arg9[%c0_44, %c0_45, %c0_46] : memref<1x1x1024xf32, #tpu.memory_space<vmem>>, vector<1x1x1024xf32>
    %108 = vector.shape_cast %107 : vector<1x1x1024xf32> to vector<1x1024xf32>
    %109 = vector.broadcast %108 : vector<1x1024xf32> to vector<128x1024xf32>
    %110 = arith.addf %106, %109 : vector<128x1024xf32>
    %cst_47 = arith.constant 0.000000e+00 : f32
    %111 = vector.broadcast %cst_47 : f32 to vector<128x1024xf32>
    %112 = arith.maximumf %110, %111 : vector<128x1024xf32>
    %113 = arith.truncf %112 : vector<128x1024xf32> to vector<128x1024xbf16>
    %c0_48 = arith.constant 0 : index
    %c0_49 = arith.constant 0 : index
    %c0_50 = arith.constant 0 : index
    %114 = vector.load %arg10[%c0_48, %c0_49, %c0_50] : memref<1x1024x256xbf16, #tpu.memory_space<vmem>>, vector<1x1024x256xbf16>
    %115 = vector.shape_cast %114 : vector<1x1024x256xbf16> to vector<1024x256xbf16>
    %cst_51 = arith.constant dense<0.000000e+00> : vector<128x256xf32>
    %116 = tpu.matmul %113, %115, %cst_51 {dimension_numbers = #tpu.dot_dimension_numbers<[1], [0], [0], [1], [0, 0, 1, 1], [], []>} : vector<128x1024xbf16>, vector<1024x256xbf16>, vector<128x256xf32> -> vector<128x256xf32>
    %c0_52 = arith.constant 0 : index
    %c0_53 = arith.constant 0 : index
    %c0_54 = arith.constant 0 : index
    %117 = vector.load %arg11[%c0_52, %c0_53, %c0_54] : memref<1x1x256xf32, #tpu.memory_space<vmem>>, vector<1x1x256xf32>
    %118 = vector.shape_cast %117 : vector<1x1x256xf32> to vector<1x256xf32>
    %119 = vector.broadcast %118 : vector<1x256xf32> to vector<128x256xf32>
    %120 = arith.addf %116, %119 : vector<128x256xf32>
    %121 = arith.addf %102, %120 : vector<128x256xf32>
    %c0_55 = arith.constant 0 : index
    %c0_56 = arith.constant 0 : index
    %c0_57 = arith.constant 0 : index
    %122 = vector.load %arg12[%c0_55, %c0_56, %c0_57] : memref<1x1x256xf32, #tpu.memory_space<vmem>>, vector<1x1x256xf32>
    %123 = vector.shape_cast %122 : vector<1x1x256xf32> to vector<1x256xf32>
    %c0_58 = arith.constant 0 : index
    %c0_59 = arith.constant 0 : index
    %c0_60 = arith.constant 0 : index
    %124 = vector.load %arg13[%c0_58, %c0_59, %c0_60] : memref<1x1x256xf32, #tpu.memory_space<vmem>>, vector<1x1x256xf32>
    %125 = vector.shape_cast %124 : vector<1x1x256xf32> to vector<1x256xf32>
    %cst_61 = arith.constant dense<0.000000e+00> : vector<128xf32>
    %126 = vector.multi_reduction <add>, %121, %cst_61 [1] : vector<128x256xf32> to vector<128xf32>
    %127 = vector.shape_cast %126 : vector<128xf32> to vector<128x1xf32>
    %cst_62 = arith.constant 2.560000e+02 : f32
    %128 = vector.broadcast %cst_62 : f32 to vector<128x1xf32>
    %129 = arith.divf %127, %128 : vector<128x1xf32>
    %130 = arith.mulf %121, %121 : vector<128x256xf32>
    %cst_63 = arith.constant dense<0.000000e+00> : vector<128xf32>
    %131 = vector.multi_reduction <add>, %130, %cst_63 [1] : vector<128x256xf32> to vector<128xf32>
    %132 = vector.shape_cast %131 : vector<128xf32> to vector<128x1xf32>
    %cst_64 = arith.constant 2.560000e+02 : f32
    %133 = vector.broadcast %cst_64 : f32 to vector<128x1xf32>
    %134 = arith.divf %132, %133 : vector<128x1xf32>
    %135 = arith.mulf %129, %129 : vector<128x1xf32>
    %136 = arith.subf %134, %135 : vector<128x1xf32>
    %cst_65 = arith.constant 0.000000e+00 : f32
    %137 = vector.broadcast %cst_65 : f32 to vector<128x1xf32>
    %138 = arith.maximumf %136, %137 : vector<128x1xf32>
    %139 = vector.broadcast %129 : vector<128x1xf32> to vector<128x256xf32>
    %140 = arith.subf %121, %139 : vector<128x256xf32>
    %cst_66 = arith.constant 9.99999974E-6 : f32
    %141 = vector.broadcast %cst_66 : f32 to vector<128x1xf32>
    %142 = arith.addf %138, %141 : vector<128x1xf32>
    %143 = math.rsqrt %142 : vector<128x1xf32>
    %144 = vector.broadcast %143 : vector<128x1xf32> to vector<128x256xf32>
    %145 = arith.mulf %140, %144 : vector<128x256xf32>
    %146 = vector.broadcast %123 : vector<1x256xf32> to vector<128x256xf32>
    %147 = arith.mulf %145, %146 : vector<128x256xf32>
    %148 = vector.broadcast %125 : vector<1x256xf32> to vector<128x256xf32>
    %149 = arith.addf %147, %148 : vector<128x256xf32>
    %c0_67 = arith.constant 0 : index
    %c0_68 = arith.constant 0 : index
    %150 = vector.load %arg19[%c0_67, %c0_68] : memref<128x256xf32, #tpu.memory_space<vmem>>, vector<128x256xf32>
    tpu.vector_store %arg19[%c0_67, %c0_68], %149 {strides = array<i32>} : memref<128x256xf32, #tpu.memory_space<vmem>>, vector<128x256xf32>,
    %c1_i32 = arith.constant 1 : i32
    %151 = arith.cmpi eq, %arg0, %c1_i32 : i32
    %152 = arith.extui %151 : i1 to i32
    %c0_i32_69 = arith.constant 0 : i32
    %153 = arith.cmpi ne, %152, %c0_i32_69 : i32
    scf.if %153 {
      %c0_70 = arith.constant 0 : index
      %c0_71 = arith.constant 0 : index
      %154 = vector.load %arg14[%c0_70, %c0_71] : memref<1x256xf32, #tpu.memory_space<vmem>>, vector<1x256xf32>
      %c0_72 = arith.constant 0 : index
      %c0_73 = arith.constant 0 : index
      %155 = vector.load %arg15[%c0_72, %c0_73] : memref<1x256xf32, #tpu.memory_space<vmem>>, vector<1x256xf32>
      %cst_74 = arith.constant dense<0.000000e+00> : vector<128xf32>
      %156 = vector.multi_reduction <add>, %149, %cst_74 [1] : vector<128x256xf32> to vector<128xf32>
      %157 = vector.shape_cast %156 : vector<128xf32> to vector<128x1xf32>
      %cst_75 = arith.constant 2.560000e+02 : f32
      %158 = vector.broadcast %cst_75 : f32 to vector<128x1xf32>
      %159 = arith.divf %157, %158 : vector<128x1xf32>
      %160 = arith.mulf %149, %149 : vector<128x256xf32>
      %cst_76 = arith.constant dense<0.000000e+00> : vector<128xf32>
      %161 = vector.multi_reduction <add>, %160, %cst_76 [1] : vector<128x256xf32> to vector<128xf32>
      %162 = vector.shape_cast %161 : vector<128xf32> to vector<128x1xf32>
      %cst_77 = arith.constant 2.560000e+02 : f32
      %163 = vector.broadcast %cst_77 : f32 to vector<128x1xf32>
      %164 = arith.divf %162, %163 : vector<128x1xf32>
      %165 = arith.mulf %159, %159 : vector<128x1xf32>
      %166 = arith.subf %164, %165 : vector<128x1xf32>
      %cst_78 = arith.constant 0.000000e+00 : f32
      %167 = vector.broadcast %cst_78 : f32 to vector<128x1xf32>
      %168 = arith.maximumf %166, %167 : vector<128x1xf32>
      %169 = vector.broadcast %159 : vector<128x1xf32> to vector<128x256xf32>
      %170 = arith.subf %149, %169 : vector<128x256xf32>
      %cst_79 = arith.constant 9.99999974E-6 : f32
      %171 = vector.broadcast %cst_79 : f32 to vector<128x1xf32>
      %172 = arith.addf %168, %171 : vector<128x1xf32>
      %173 = math.rsqrt %172 : vector<128x1xf32>
      %174 = vector.broadcast %173 : vector<128x1xf32> to vector<128x256xf32>
      %175 = arith.mulf %170, %174 : vector<128x256xf32>
      %176 = vector.broadcast %154 : vector<1x256xf32> to vector<128x256xf32>
      %177 = arith.mulf %175, %176 : vector<128x256xf32>
      %178 = vector.broadcast %155 : vector<1x256xf32> to vector<128x256xf32>
      %179 = arith.addf %177, %178 : vector<128x256xf32>
      %180 = arith.truncf %179 : vector<128x256xf32> to vector<128x256xbf16>
      %c0_80 = arith.constant 0 : index
      %c0_81 = arith.constant 0 : index
      %181 = vector.load %arg16[%c0_80, %c0_81] : memref<256x128xbf16, #tpu.memory_space<vmem>>, vector<256x128xbf16>
      %cst_82 = arith.constant dense<0.000000e+00> : vector<128x128xf32>
      %182 = tpu.matmul %180, %181, %cst_82 {dimension_numbers = #tpu.dot_dimension_numbers<[1], [0], [0], [1], [0, 0, 1, 1], [], []>} : vector<128x256xbf16>, vector<256x128xbf16>, vector<128x128xf32> -> vector<128x128xf32>
      %c0_83 = arith.constant 0 : index
      %c0_84 = arith.constant 0 : index
      %183 = vector.load %arg17[%c0_83, %c0_84] : memref<1x128xf32, #tpu.memory_space<vmem>>, vector<1x128xf32>
      %184 = vector.broadcast %183 : vector<1x128xf32> to vector<128x128xf32>
      %185 = arith.addf %182, %184 : vector<128x128xf32>
      %186 = vector.shape_cast %185 : vector<128x128xf32> to vector<4x32x128xf32>
      %187 = arith.truncf %186 : vector<4x32x128xf32> to vector<4x32x128xbf16>
      %c0_85 = arith.constant 0 : index
      %c0_86 = arith.constant 0 : index
      %c0_87 = arith.constant 0 : index
      %188 = vector.load %arg18[%c0_85, %c0_86, %c0_87] : memref<4x32x128xbf16, #tpu.memory_space<vmem>>, vector<4x32x128xbf16>
      tpu.vector_store %arg18[%c0_85, %c0_86, %c0_87], %187 {strides = array<i32>} : memref<4x32x128xbf16, #tpu.memory_space<vmem>>, vector<4x32x128xbf16>,
    } else {
    }
    return
  }
  func.func @transform_0(%arg0: i32) -> (i32, i32, i32) {
    %c0_i32 = arith.constant 0 : i32
    %c0_i32_0 = arith.constant 0 : i32
    %c0_i32_1 = arith.constant 0 : i32
    %c0_i32_2 = arith.constant 0 : i32
    return %c0_i32, %c0_i32_0, %c0_i32_1 : i32, i32, i32
  }
  func.func @transform_1(%arg0: i32) -> (i32, i32) {
    %c0_i32 = arith.constant 0 : i32
    %c0_i32_0 = arith.constant 0 : i32
    %c0_i32_1 = arith.constant 0 : i32
    return %c0_i32, %c0_i32_0 : i32, i32
  }
  func.func @transform_2(%arg0: i32) -> (i32, i32, i32) {
    %c0_i32 = arith.constant 0 : i32
    %c0_i32_0 = arith.constant 0 : i32
    %c0_i32_1 = arith.constant 0 : i32
    return %arg0, %c0_i32, %c0_i32_0 : i32, i32, i32
  }
  func.func @transform_3(%arg0: i32) -> (i32, i32, i32) {
    %c0_i32 = arith.constant 0 : i32
    %c0_i32_0 = arith.constant 0 : i32
    %c0_i32_1 = arith.constant 0 : i32
    return %arg0, %c0_i32, %c0_i32_0 : i32, i32, i32
  }
  func.func @transform_4(%arg0: i32) -> (i32, i32, i32) {
    %c0_i32 = arith.constant 0 : i32
    %c0_i32_0 = arith.constant 0 : i32
    %c0_i32_1 = arith.constant 0 : i32
    return %arg0, %c0_i32, %c0_i32_0 : i32, i32, i32
  }
  func.func @transform_5(%arg0: i32) -> (i32, i32, i32) {
    %c0_i32 = arith.constant 0 : i32
    %c0_i32_0 = arith.constant 0 : i32
    %c0_i32_1 = arith.constant 0 : i32
    return %arg0, %c0_i32, %c0_i32_0 : i32, i32, i32
  }
  func.func @transform_6(%arg0: i32) -> (i32, i32, i32) {
    %c0_i32 = arith.constant 0 : i32
    %c0_i32_0 = arith.constant 0 : i32
    %c0_i32_1 = arith.constant 0 : i32
    return %arg0, %c0_i32, %c0_i32_0 : i32, i32, i32
  }
  func.func @transform_7(%arg0: i32) -> (i32, i32, i32) {
    %c0_i32 = arith.constant 0 : i32
    %c0_i32_0 = arith.constant 0 : i32
    %c0_i32_1 = arith.constant 0 : i32
    return %arg0, %c0_i32, %c0_i32_0 : i32, i32, i32
  }
  func.func @transform_8(%arg0: i32) -> (i32, i32, i32) {
    %c0_i32 = arith.constant 0 : i32
    %c0_i32_0 = arith.constant 0 : i32
    %c0_i32_1 = arith.constant 0 : i32
    return %arg0, %c0_i32, %c0_i32_0 : i32, i32, i32
  }
  func.func @transform_9(%arg0: i32) -> (i32, i32, i32) {
    %c0_i32 = arith.constant 0 : i32
    %c0_i32_0 = arith.constant 0 : i32
    %c0_i32_1 = arith.constant 0 : i32
    return %arg0, %c0_i32, %c0_i32_0 : i32, i32, i32
  }
  func.func @transform_10(%arg0: i32) -> (i32, i32, i32) {
    %c0_i32 = arith.constant 0 : i32
    %c0_i32_0 = arith.constant 0 : i32
    %c0_i32_1 = arith.constant 0 : i32
    return %arg0, %c0_i32, %c0_i32_0 : i32, i32, i32
  }
  func.func @transform_11(%arg0: i32) -> (i32, i32, i32) {
    %c0_i32 = arith.constant 0 : i32
    %c0_i32_0 = arith.constant 0 : i32
    %c0_i32_1 = arith.constant 0 : i32
    return %arg0, %c0_i32, %c0_i32_0 : i32, i32, i32
  }
  func.func @transform_12(%arg0: i32) -> (i32, i32, i32) {
    %c0_i32 = arith.constant 0 : i32
    %c0_i32_0 = arith.constant 0 : i32
    %c0_i32_1 = arith.constant 0 : i32
    return %arg0, %c0_i32, %c0_i32_0 : i32, i32, i32
  }
  func.func @transform_13(%arg0: i32) -> (i32, i32) {
    %c0_i32 = arith.constant 0 : i32
    %c0_i32_0 = arith.constant 0 : i32
    %c0_i32_1 = arith.constant 0 : i32
    return %c0_i32, %c0_i32_0 : i32, i32
  }
  func.func @transform_14(%arg0: i32) -> (i32, i32) {
    %c0_i32 = arith.constant 0 : i32
    %c0_i32_0 = arith.constant 0 : i32
    %c0_i32_1 = arith.constant 0 : i32
    return %c0_i32, %c0_i32_0 : i32, i32
  }
  func.func @transform_15(%arg0: i32) -> (i32, i32) {
    %c0_i32 = arith.constant 0 : i32
    %c0_i32_0 = arith.constant 0 : i32
    %c0_i32_1 = arith.constant 0 : i32
    return %c0_i32, %c0_i32_0 : i32, i32
  }
  func.func @transform_16(%arg0: i32) -> (i32, i32) {
    %c0_i32 = arith.constant 0 : i32
    %c0_i32_0 = arith.constant 0 : i32
    %c0_i32_1 = arith.constant 0 : i32
    return %c0_i32, %c0_i32_0 : i32, i32
  }
  func.func @transform_17(%arg0: i32) -> (i32, i32, i32) {
    %c0_i32 = arith.constant 0 : i32
    %c0_i32_0 = arith.constant 0 : i32
    %c0_i32_1 = arith.constant 0 : i32
    %c0_i32_2 = arith.constant 0 : i32
    return %c0_i32, %c0_i32_0, %c0_i32_1 : i32, i32, i32
  }
}

</mosaic_0001>

<bundles_post_ra>
// kernel: gpt_forward.1
= control target key start
LH: loop header
LB: loop body
LE: loop exit
PB: predicated region body
PF: predicated region fallthrough
CT: control target
= control target key end

     0   :  { %s13829_s0 = inlined_call_operand.vmem [shape: bf16[4,32,256], index: 0, kind: input, shape index: {}]   ;;  %s13830_s1 = inlined_call_operand.vmem [shape: bf16[32,256], index: 1, kind: input, shape index: {}]   ;;  %s13831_s2 = inlined_call_operand.hbm [shape: bf16[2,256,768], index: 2, kind: input, shape index: {}]   ;;  %s13832_s3 = inlined_call_operand.vmem [shape: bf16[2,256,256], index: 3, kind: input, shape index: {}]   ;;  %s13833_s4 = inlined_call_operand.vmem [shape: f32[2,1,256], index: 4, kind: input, shape index: {}]   ;;  %s13834_s5 = inlined_call_operand.vmem [shape: f32[2,1,256], index: 5, kind: input, shape index: {}]   ;;  %s13835_s6 = inlined_call_operand.vmem [shape: f32[2,1,256], index: 6, kind: input, shape index: {}]   ;;  %s13836_s7 = inlined_call_operand.hbm [shape: bf16[2,256,1024], index: 7, kind: input, shape index: {}]   ;;  %s13837_s8 = inlined_call_operand.vmem [shape: f32[2,1,1024], index: 8, kind: input, shape index: {}]   ;;  %s13838_s9 = inlined_call_operand.hbm [shape: bf16[2,1024,256], index: 9, kind: input, shape index: {}]   ;;  %s13839_s10 = inlined_call_operand.vmem [shape: f32[2,1,256], index: 10, kind: input, shape index: {}]   ;;  %s13840_s11 = inlined_call_operand.vmem [shape: f32[2,1,256], index: 11, kind: input, shape index: {}]   ;;  %s13841_s12 = inlined_call_operand.vmem [shape: f32[2,1,256], index: 12, kind: input, shape index: {}]   ;;  %s13842_s13 = inlined_call_operand.vmem [shape: f32[1,256], index: 13, kind: input, shape index: {}]   ;;  %s13843_s14 = inlined_call_operand.vmem [shape: f32[1,256], index: 14, kind: input, shape index: {}]   ;;  %s13844_s15 = inlined_call_operand.vmem [shape: bf16[256,128], index: 15, kind: input, shape index: {}]   ;;  %s13845_s16 = inlined_call_operand.vmem [shape: f32[1,128], index: 16, kind: input, shape index: {}]   ;;  %s13846_s17 = inlined_call_operand.hbm [shape: bf16[4,32,128], index: 17, kind: output, shape index: {}]  }
   0x1   :  { %13967 = sst [smem:[#allocation63_spill]] %s13829_s0 }
   0x2   :  { %13968 = sst [smem:[#allocation64_spill]] %s13830_s1 }
   0x3   :  { %13969 = sst [smem:[#allocation65_spill]] %s13831_s2 }
   0x4   :  { %13970 = sst [smem:[#allocation66_spill]] %s13832_s3 }
   0x5   :  { %13971 = sst [smem:[#allocation67_spill]] %s13836_s7 }
   0x6   :  { %13972 = sst [smem:[#allocation68_spill]] %s13838_s9 }
   0x7   :  { %13973 = sst [smem:[#allocation69_spill]] %s13842_s13 }
   0x8   :  { %13974 = sst [smem:[#allocation70_spill]] %s13843_s14 }
   0x9   :  { %13975 = sst [smem:[#allocation71_spill]] %s13844_s15 }
   0xa   :  { %13976 = sst [smem:[#allocation72_spill]] %s13845_s16 }
   0xb   :  { %13977 = sst [smem:[#allocation73_spill]] %s13846_s17 }
   0xc   :  { %22 = vsyncpa [#allocation6], 0 }
   0xd   :  { %24 = vsyncpa [#allocation6 + $0x1], 0 }
   0xe   :  { %25 = vsyncpa [#allocation9], 0 }
   0xf   :  { %27 = vsyncpa [#allocation9 + $0x1], 0 }
  0x10   :  { %28 = vsyncpa [#allocation7], 0  ;;  %s9984_s24 = smov 0   ;;  %s9986_s25 = smov 0  }
  0x11   :  { %s9988_s26 = smov 0   ;;  %s9990_s27 = smov 0  }
  0x12 LB: > { %13978 = sst [smem:[#allocation15_spill]] %s9875_s26  ;;  %s10003_s28 = sadd.s32 4294967295, %s9879_s27   ;;  %s9879_s27 = sphi %s9990_s27, %s14209_s27   ;;  %s9875_s26 = sphi %s9988_s26, %s14211_s26   ;;  %s9871_s25 = sphi %s9986_s25, %s14213_s25   ;;  %s9867_s24 = sphi %s9984_s24, %s14212_s24  }
  0x13   : > { %s10006_s29 = sadd.s32 1, %s9879_s27   ;;  %s83_s30 = sadd.s32 1, %s9875_s26 }
  0x14   : > { %13979 = sst [smem:[#allocation16_spill]] %s10006_s29  ;;  %s80_s0 = ssub.s32 %s9879_s27, %s10006_s29 }
  0x15   : > { %p81_p0 = scmp.eq.s32.totalorder %s80_s0, 0  ;;  %p90_p1 = scmp.ne.s32.totalorder %s9875_s26, %s9871_s25 }
  0x16   : > { %p91_p2 = scmp.eq.s32.totalorder %s9879_s27, 0  ;;  %p96_p3 = scmp.ne.s32.totalorder %s9871_s25, %s9867_s24 }
  0x17   : > { %s10016_s18 = scalar_select %p81_p0, %s9875_s26, %s83_s30  }
  0x18   : > { %p92_p4 = por %p91_p2, %p90_p1  ;;  %p97_p5 = scmp.eq.s32.totalorder %s10003_s28, 0 }
  0x19   : > { %13980 = sst [smem:[#allocation17_spill]] %s10016_s18  ;;  %p9020_p6 = scmp.lt.s32.totalorder %s9879_s27, 2 }
  0x1a   : > { %p10020_p7 = por %p97_p5, %p96_p3  ;;  %s10025_s1 = sand.u32 1, %s9875_s26  }
  0x1b   : > { %p10027_p8 = pnand %p9020_p6, %p92_p4  ;;  %s553_s21 = sand.u32 1, %s9879_s27  }
  0x1c   : > { %s13981_s19 = scalar_select %p10020_p7, 1, 0 }
  0x1d   : > { %s13853_s22 = sshll.u32 %s10025_s1, 10  ;;  %s13854_s23 = sshll.u32 %s9879_s27, 14 }
  0x1e   : > { %s557_s24 = scalar_lea.vmem [#allocation8], %s13853_s22  ;;  %s13983_s7 = sld [smem:[#allocation67_spill]] }
  0x1f   : > { %s564_s0 = sshll.u32 %s557_s24, 4  ;;  %s10045_s26 = scalar_lea.sflag [#allocation9], %s553_s21  ;;  %s10043_s0 = int_to_ptr.vmem [resolvable:$true] %s564_s0 }
  0x20   : > { %p10051_p10 = pneg %p10027_p8 }
  0x24   : > { %s10041_s29 = scalar_lea.hbm %s13983_s7, %s13854_s23  ;;  %s9726_s30 = scalar_lea.hbm %s13983_s7, 32768 }
  0x25   : > { %s9721_s17 = scalar_lea.hbm %s10041_s29, 16384  ;;  %p9727_p13 = scmp.lt.u32.totalorder %s10041_s29, %s13983_s7 }
  0x26   : > { %p9722_p9 = scmp.ne.s32.totalorder %s10041_s29, %s9721_s17  ;;  %p9728_p0 = scmp.lt.u32.totalorder %s9726_s30, %s9721_s17 }
  0x27   : > { %p9730_p2 = scmp.lt.u32.totalorder %s9721_s17, %s10041_s29 }
  0x28   : > { %p9724_p11 = pnand %p10051_p10, %p9722_p9  ;;  %p9729_p1 = por %p9728_p0, %p9727_p13 }
  0x2a   : > { %p9725_p12 = pneg %p9724_p11  ;;  %p9731_p3 = por %p9730_p2, %p9729_p1 }
  0x2c   : > { %p9732_p4 = pnand %p9731_p3, %p9725_p12 }
  0x2e   : > { %9735 = shalt.err (!%p9732_p4)
}
  0x2f   : > { %s9736_s21 = scalar_lea.vmem %s10043_s0, 16384  ;;  %s9881_s18 = smov [#allocation8]  }
  0x30   : > { %p9737_p5 = scmp.ne.s32.totalorder %s10043_s0, %s9736_s21  ;;  %s9741_s24 = sshll.u32 %s9881_s18, 4  ;;  %s9742_s24 = int_to_ptr.vmem [resolvable:$false] %s9741_s24 }
  0x31   : > { %s9743_s16 = scalar_lea.vmem %s9742_s24, 32768  ;;  %p9744_p11 = scmp.lt.s32.totalorder %s10043_s0, %s9742_s24 }
  0x32   : > { %p9739_p6 = pnand %p9737_p5, %p10051_p10  ;;  %p9745_p7 = scmp.lt.s32.totalorder %s9743_s16, %s9736_s21 }
  0x34   : > { %p9740_p9 = pneg %p9739_p6  ;;  %p9746_p13 = por %p9745_p7, %p9744_p11 }
  0x36   : > { %p9747_p0 = pnand %p9746_p13, %p9740_p9 }
  0x38   : > { %9750 = shalt.err (!%p9747_p0)
}
  0x39   : > { %s9882_s17 = smov 512   ;;  %s9883_s23 = smov 32  }
  0x3a   : > { %9016 = dma.hbm_to_vmem [thread:$0]  (!%p10027_p8), %s10041_s29, 16384, %s10043_s0, %s10045_s26, %s9882_s17, %s9882_s17, %s9883_s23  }
  0x3b   : > { %s13985_s30 = sshll.u32 %s9879_s27, 14  ;;  %s13986_s9 = sld [smem:[#allocation68_spill]] }
  0x3c   : > { %s13987_s16 = sshll.u32 %s10025_s1, 10  ;;  %p8048_p7 = scmp.ge.s32.totalorder %s9879_s27, 1 }
  0x3d   : > { %s585_s7 = scalar_lea.vmem [#allocation10], %s13987_s16  ;;  %p621_p12 = scmp.lt.s32.totalorder %s9879_s27, 3 }
  0x3e   : > { %s592_s14 = sshll.u32 %s585_s7, 4  ;;  %s8997_s13 = smul.u32 768, %s10025_s1  ;;  %s10085_s14 = int_to_ptr.vmem [resolvable:$true] %s592_s14 }
  0x3f   : > { %p10089_p1 = pnand %p8048_p7, %p621_p12  ;;  %s8998_s29 = smul.u32 12288, %s9879_s27 }
  0x40   : > { %s13989_s2 = sld [smem:[#allocation65_spill]]  ;;  %s507_s7 = scalar_lea.vmem [#allocation5], %s8997_s13 }
  0x41   : > { %s10080_s24 = scalar_lea.hbm %s13986_s9, %s13985_s30  ;;  %s514_s30 = sshll.u32 %s507_s7, 4  ;;  %s10099_s30 = int_to_ptr.vmem [resolvable:$true] %s514_s30 }
  0x42   : > { %s13988_s15 = scalar_select %p10089_p1, 1, 0 }
  0x43   : > { %s504_s21 = scalar_lea.sflag [#allocation6], %s10025_s1 }
  0x46   : > { %s10097_s23 = scalar_lea.hbm %s13989_s2, %s8998_s29  ;;  %s9756_s0 = scalar_lea.hbm %s13989_s2, 24576 }
  0x47   : > { %s9751_s18 = scalar_lea.hbm %s10097_s23, 12288  ;;  %p9757_p5 = scmp.lt.u32.totalorder %s10097_s23, %s13989_s2 }
  0x48   : > { %p9752_p2 = scmp.ne.s32.totalorder %s10097_s23, %s9751_s18  ;;  %p9758_p6 = scmp.lt.u32.totalorder %s9756_s0, %s9751_s18 }
  0x49   : > { %p9760_p11 = scmp.lt.u32.totalorder %s9751_s18, %s10097_s23 }
  0x4a   : > { %p9754_p3 = pnand %p9752_p2, %p10051_p10  ;;  %p9759_p9 = por %p9758_p6, %p9757_p5 }
  0x4c   : > { %p9755_p4 = pneg %p9754_p3  ;;  %p9761_p13 = por %p9760_p11, %p9759_p9 }
  0x4e   : > { %p9762_p0 = pnand %p9761_p13, %p9755_p4 }
  0x50   : > { %9765 = shalt.err (!%p9762_p0)
}
  0x51   : > { %s9766_s13 = scalar_lea.vmem %s10099_s30, 12288  ;;  %s9884_s7 = smov [#allocation5]  }
  0x52   : > { %p9767_p7 = scmp.ne.s32.totalorder %s10099_s30, %s9766_s13  ;;  %s9771_s27 = sshll.u32 %s9884_s7, 4  ;;  %s9772_s27 = int_to_ptr.vmem [resolvable:$false] %s9771_s27 }
  0x53   : > { %s9773_s16 = scalar_lea.vmem %s9772_s27, 24576  ;;  %p9774_p3 = scmp.lt.s32.totalorder %s10099_s30, %s9772_s27 }
  0x54   : > { %p9769_p12 = pnand %p9767_p7, %p10051_p10  ;;  %p9775_p1 = scmp.lt.s32.totalorder %s9773_s16, %s9766_s13 }
  0x56   : > { %p9770_p2 = pneg %p9769_p12  ;;  %p9776_p5 = por %p9775_p1, %p9774_p3 }
  0x58   : > { %p9777_p6 = pnand %p9776_p5, %p9770_p2 }
  0x5a   : > { %9780 = shalt.err (!%p9777_p6)
}
  0x5b   : > { %s9885_s18 = smov 384   ;;  %s9886_s0 = smov 24  }
  0x5c   : > { %9013 = dma.hbm_to_vmem [thread:$0]  (!%p10027_p8), %s10097_s23, 12288, %s10099_s30, %s504_s21, %s9885_s18, %s9885_s18, %s9886_s0  }
  0x5d   : > { %s9781_s29 = scalar_lea.hbm %s10080_s24, 16384  ;;  %s9786_s7 = scalar_lea.hbm %s13986_s9, 32768 }
  0x5e   : > { %p9782_p4 = scmp.ne.s32.totalorder %s10080_s24, %s9781_s29  ;;  %p9787_p11 = scmp.lt.u32.totalorder %s10080_s24, %s13986_s9 }
  0x5f   : > { %p9788_p13 = scmp.lt.u32.totalorder %s9786_s7, %s9781_s29  ;;  %p9790_p7 = scmp.lt.u32.totalorder %s9781_s29, %s10080_s24 }
  0x60   : > { %p9784_p1 = pnand %p9782_p4, %p10051_p10 }
  0x61   : > { %p9789_p0 = por %p9788_p13, %p9787_p11 }
  0x62   : > { %p9785_p9 = pneg %p9784_p1 }
  0x63   : > { %p9791_p12 = por %p9790_p7, %p9789_p0 }
  0x65   : > { %p9792_p2 = pnand %p9791_p12, %p9785_p9 }
  0x67   : > { %9795 = shalt.err (!%p9792_p2)
}
  0x68   : > { %s9796_s1 = scalar_lea.vmem %s10085_s14, 16384  ;;  %s9887_s23 = smov [#allocation10]  }
  0x69   : > { %p9797_p3 = scmp.ne.s32.totalorder %s10085_s14, %s9796_s1  ;;  %s9801_s30 = sshll.u32 %s9887_s23, 4  ;;  %s9802_s30 = int_to_ptr.vmem [resolvable:$false] %s9801_s30 }
  0x6a   : > { %s9803_s21 = scalar_lea.vmem %s9802_s30, 32768  ;;  %p9804_p4 = scmp.lt.s32.totalorder %s10085_s14, %s9802_s30 }
  0x6b   : > { %p9799_p5 = pnand %p9797_p3, %p10051_p10  ;;  %p9805_p1 = scmp.lt.s32.totalorder %s9803_s21, %s9796_s1 }
  0x6d   : > { %p9800_p6 = pneg %p9799_p5  ;;  %p9806_p11 = por %p9805_p1, %p9804_p4 }
  0x6f   : > { %p9807_p13 = pnand %p9806_p11, %p9800_p6 }
  0x71   : > { %9810 = shalt.err (!%p9807_p13)
}
  0x72   : > { %s9888_s18 = smov 128   ;;  %s9889_s0 = smov 8  }
  0x73   : > { %9019 = dma.hbm_to_vmem [thread:$0]  (!%p10027_p8), %s10080_s24, 16384, %s10085_s14, %s10045_s26, %s9888_s18, %s9888_s18, %s9889_s0  }
  0x74   : > { %p13990_p10 = scmp.ne.s32.totalorder %s13988_s15, 0 }
  0x76   : > { %625 = sbr.rel (%p13990_p10) target bundleno = 3628 (0xe2c), region = 88 }
  0x7d   : > { %s627_s22 = sand.u32 1, %s9871_s25   ;;  %p13991_p9 = scmp.ne.s32.totalorder %s13981_s19, 0 }
  0x7e   : > { %s8999_s29 = smul.u32 768, %s627_s22  ;;  %s628_s17 = scalar_lea.sflag [#allocation6], %s627_s22 }
  0x80   : > { %s10150_s13 = scalar_lea.vmem [#allocation5], %s8999_s29 }
  0x81   : > { %9854 = dma.done.wait (%p13991_p9), %s628_s17, 12288  }
  0x82   : > { %9856 = vsyncadd (%p13991_p9), %s628_s17, 4294955008  ;;  %s636_s7 = sand.u32 1, %s10003_s28   ;;  %s8049_s20 = sshll.u32 %s627_s22, 10 }
  0x83   : > { %s637_s14 = scalar_lea.sflag [#allocation9], %s636_s7  ;;  %s10157_s26 = scalar_lea.vmem [#allocation8], %s8049_s20 }
  0x84   : > { %9858 = dma.done.wait (%p13991_p9), %s637_s14, 32768  }
  0x85   : > { %9860 = vsyncadd (%p13991_p9), %s637_s14, 4294934528  ;;  %p738_p8 = scmp.lt.s32.totalorder %s10003_s28, 1  ;;  %s13992_s3 = sld [smem:[#allocation66_spill]] }
  0x86   : > { %s10201_s29 = scalar_lea.vmem [#allocation10], %s8049_s20  ;;  %p8060_p0 = scmp.ne.s32.totalorder %s10003_s28, 0 }
  0x87   : > { %s739_s15 = scalar_select %p738_p8, %s10003_s28, 1 }
  0x88   : > { %775 = sbr.rel (%p8060_p0) target bundleno = 170 (0xaa), region = 104  ;;  %s13993_s16 = sld [smem:[#allocation63_spill]] (!%p8060_p0)  ;;  %v900_v3 = vlaneseq (!%p8060_p0)  ;;  %vm915_vm0 = vcmask (!%p8060_p0), 261120  }
  0x89   : > { %s8501_s24 = sshll.u32 %s739_s15, 8  ;;  %s10165_s27 = sshll.u32 %s739_s15, 1 }
  0x8a   : > { %s754_s7 = scalar_lea.vmem %s13835_s6, %s10165_s27  ;;  %s8056_s14 = sshll.u32 %s739_s15, 3 }
  0x8b   : > { %s10170_s23 = scalar_lea.vmem %s13992_s3, %s8501_s24  ;;  %s762_s2 = scalar_lea.vmem %s13839_s10, %s10165_s27 }
  0x8c   : > { %s10191_s3 = scalar_lea.vmem %s13837_s8, %s8056_s14  ;;  %s766_s21 = scalar_lea.vmem %s13840_s11, %s10165_s27 }
  0x8d   : > { %s770_s22 = scalar_lea.vmem %s13841_s12, %s10165_s27  ;;  %s13994_s1 = sld [smem:[#allocation64_spill]] (!%p8060_p0) }
  0x8e   : > { %v776_v0 = vld [vmem:[%s13993_s16] sm:$0xff] (!%p8060_p0)  ;;  %v777_v2 = vld [vmem:[%s13993_s16 + $0x8] sm:$0xff] (!%p8060_p0)  ;;  %v778_v9 = vld [vmem:[%s13993_s16 + $0x10] sm:$0xff] (!%p8060_p0) }
  0x8f   : > { %v792_v4 = vunpack.c.l.bf16 %v776_v0  ;;  %v793_v6 = vunpack.c.h.bf16 %v776_v0  ;;  %v794_v11 = vunpack.c.l.bf16 %v777_v2  ;;  %v795_v13 = vunpack.c.h.bf16 %v777_v2  ;;  %v779_v15 = vld [vmem:[%s13993_s16 + $0x18] sm:$0xff]  ;;  %v780_v21 = vld [vmem:[%s13993_s16 + $0x20] sm:$0xff]  ;;  %v781_v26 = vld [vmem:[%s13993_s16 + $0x28] sm:$0xff] }
  0x90   : > { %v796_v19 = vunpack.c.l.bf16 %v778_v9  ;;  %v797_v24 = vunpack.c.h.bf16 %v778_v9  ;;  %v782_v27 = vld [vmem:[%s13993_s16 + $0x30] sm:$0xff]  ;;  %v798_v29 = vunpack.c.l.bf16 %v779_v15  ;;  %v799_v31 = vunpack.c.h.bf16 %v779_v15  ;;  %v783_v36 = vld [vmem:[%s13993_s16 + $0x38] sm:$0xff]  ;;  %v784_v41 = vld [vmem:[%s13993_s16 + $0x40] sm:$0xff] }
  0x91   : > { %v800_v34 = vunpack.c.l.bf16 %v780_v21  ;;  %v801_v35 = vunpack.c.h.bf16 %v780_v21  ;;  %v802_v38 = vunpack.c.l.bf16 %v781_v26  ;;  %v803_v39 = vunpack.c.h.bf16 %v781_v26  ;;  %v785_v46 = vld [vmem:[%s13993_s16 + $0x48] sm:$0xff]  ;;  %v786_v47 = vld [vmem:[%s13993_s16 + $0x50] sm:$0xff]  ;;  %v787_v56 = vld [vmem:[%s13993_s16 + $0x58] sm:$0xff] }
  0x92   : > { %v804_v40 = vunpack.c.l.bf16 %v782_v27  ;;  %v805_v45 = vunpack.c.h.bf16 %v782_v27  ;;  %v806_v51 = vunpack.c.l.bf16 %v783_v36  ;;  %v807_v53 = vunpack.c.h.bf16 %v783_v36  ;;  %v788_v61 = vld [vmem:[%s13993_s16 + $0x60] sm:$0xff]  ;;  %v789_v2 = vld [vmem:[%s13993_s16 + $0x68] sm:$0xff] }
  0x93   : > { %v824_v1 = vld [vmem:[%s13994_s1] sm:$0xff]  ;;  %v825_v8 = vld [vmem:[%s13994_s1 + $0x8] sm:$0xff]  ;;  %v826_v10 = vld [vmem:[%s13994_s1 + $0x10] sm:$0xff]  ;;  %v808_v54 = vunpack.c.l.bf16 %v784_v41  ;;  %v809_v55 = vunpack.c.h.bf16 %v784_v41  ;;  %v810_v58 = vunpack.c.l.bf16 %v785_v46  ;;  %v811_v59 = vunpack.c.h.bf16 %v785_v46 }
  0x94   : > { %v10213_v5 = vunpack.c.l.bf16 %v824_v1  ;;  %v10215_v7 = vunpack.c.h.bf16 %v824_v1  ;;  %v10226_v12 = vunpack.c.l.bf16 %v825_v8  ;;  %v10228_v14 = vunpack.c.h.bf16 %v825_v8  ;;  %v827_v16 = vld [vmem:[%s13994_s1 + $0x18] sm:$0xff] }
  0x95   : > { %v10238_v20 = vunpack.c.l.bf16 %v826_v10  ;;  %v10245_v25 = vunpack.c.h.bf16 %v826_v10  ;;  %v10254_v30 = vunpack.c.l.bf16 %v827_v16  ;;  %v10257_v33 = vunpack.c.h.bf16 %v827_v16 }
  0x96   : > { %v836_v17 = vadd.f32 %v10213_v5, %v792_v4  ;;  %v837_v18 = vadd.f32 %v10215_v7, %v793_v6  ;;  %v838_v22 = vadd.f32 %v10226_v12, %v794_v11  ;;  %v839_v23 = vadd.f32 %v10228_v14, %v795_v13  ;;  %v790_v4 = vld [vmem:[%s13993_s16 + $0x70] sm:$0xff] }
  0x97   : > { %v840_v28 = vadd.f32 %v10238_v20, %v796_v19  ;;  %v841_v32 = vadd.f32 %v10245_v25, %v797_v24  ;;  %v842_v37 = vadd.f32 %v10254_v30, %v798_v29  ;;  %v843_v42 = vadd.f32 %v10257_v33, %v799_v31 }
  0x98   : > { %868 = vst [vmem:[#allocation2] sm:$0xff] %v836_v17  ;;  %869 = vst [vmem:[#allocation2 + $0x8] sm:$0xff] %v837_v18  ;;  %v844_v43 = vadd.f32 %v10213_v5, %v800_v34  ;;  %v845_v44 = vadd.f32 %v10215_v7, %v801_v35  ;;  %v846_v48 = vadd.f32 %v10226_v12, %v802_v38  ;;  %v812_v60 = vunpack.c.l.bf16 %v786_v47  ;;  %v791_v17 = vld [vmem:[%s13993_s16 + $0x78] sm:$0xff] }
  0x99   : > { %870 = vst [vmem:[#allocation2 + $0x10] sm:$0xff] %v838_v22  ;;  %871 = vst [vmem:[#allocation2 + $0x18] sm:$0xff] %v839_v23  ;;  %v847_v49 = vadd.f32 %v10228_v14, %v803_v39  ;;  %v848_v50 = vadd.f32 %v10238_v20, %v804_v40  ;;  %v849_v52 = vadd.f32 %v10245_v25, %v805_v45  ;;  %v813_v1 = vunpack.c.h.bf16 %v786_v47 }
  0x9a   : > { %872 = vst [vmem:[#allocation2 + $0x20] sm:$0xff] %v840_v28  ;;  %873 = vst [vmem:[#allocation2 + $0x28] sm:$0xff] %v841_v32  ;;  %v850_v57 = vadd.f32 %v10254_v30, %v806_v51  ;;  %v851_v62 = vadd.f32 %v10257_v33, %v807_v53  ;;  %v852_v63 = vadd.f32 %v10213_v5, %v808_v54  ;;  %v814_v10 = vunpack.c.l.bf16 %v787_v56 }
  0x9b   : > { %874 = vst [vmem:[#allocation2 + $0x30] sm:$0xff] %v842_v37  ;;  %875 = vst [vmem:[#allocation2 + $0x38] sm:$0xff] %v843_v42  ;;  %v853_v0 = vadd.f32 %v10215_v7, %v809_v55  ;;  %v854_v6 = vadd.f32 %v10226_v12, %v810_v58  ;;  %v855_v8 = vadd.f32 %v10228_v14, %v811_v59  ;;  %v815_v13 = vunpack.c.h.bf16 %v787_v56 }
  0x9c   : > { %876 = vst [vmem:[#allocation2 + $0x40] sm:$0xff] %v844_v43  ;;  %877 = vst [vmem:[#allocation2 + $0x48] sm:$0xff] %v845_v44  ;;  %v856_v9 = vadd.f32 %v10238_v20, %v812_v60  ;;  %v857_v11 = vadd.f32 %v10245_v25, %v813_v1  ;;  %v816_v15 = vunpack.c.l.bf16 %v788_v61  ;;  %v817_v16 = vunpack.c.h.bf16 %v788_v61 }
  0x9d   : > { %878 = vst [vmem:[#allocation2 + $0x50] sm:$0xff] %v846_v48  ;;  %879 = vst [vmem:[#allocation2 + $0x58] sm:$0xff] %v847_v49  ;;  %v858_v18 = vadd.f32 %v10254_v30, %v814_v10  ;;  %v818_v19 = vunpack.c.l.bf16 %v789_v2  ;;  %v819_v21 = vunpack.c.h.bf16 %v789_v2  ;;  %v820_v22 = vunpack.c.l.bf16 %v790_v4 }
  0x9e   : > { %880 = vst [vmem:[#allocation2 + $0x60] sm:$0xff] %v848_v50  ;;  %881 = vst [vmem:[#allocation2 + $0x68] sm:$0xff] %v849_v52  ;;  %v859_v23 = vadd.f32 %v10257_v33, %v815_v13  ;;  %v860_v24 = vadd.f32 %v10213_v5, %v816_v15  ;;  %v861_v26 = vadd.f32 %v10215_v7, %v817_v16  ;;  %v821_v27 = vunpack.c.h.bf16 %v790_v4 }
  0x9f   : > { %882 = vst [vmem:[#allocation2 + $0x70] sm:$0xff] %v850_v57  ;;  %883 = vst [vmem:[#allocation2 + $0x78] sm:$0xff] %v851_v62  ;;  %v862_v28 = vadd.f32 %v10226_v12, %v818_v19  ;;  %v863_v29 = vadd.f32 %v10228_v14, %v819_v21  ;;  %v864_v31 = vadd.f32 %v10238_v20, %v820_v22  ;;  %v822_v32 = vunpack.c.l.bf16 %v791_v17 }
  0xa0   : > { %884 = vst [vmem:[#allocation2 + $0x80] sm:$0xff] %v852_v63  ;;  %885 = vst [vmem:[#allocation2 + $0x88] sm:$0xff] %v853_v0  ;;  %v865_v34 = vadd.f32 %v10245_v25, %v821_v27  ;;  %v823_v35 = vunpack.c.h.bf16 %v791_v17  ;;  %v901_v36 = vshrl.u32 %v900_v3, 7  ;;  %v906_v5 = vand.u32 127, %v900_v3 }
  0xa1   : > { %886 = vst [vmem:[#allocation2 + $0x90] sm:$0xff] %v854_v6  ;;  %887 = vst [vmem:[#allocation2 + $0x98] sm:$0xff] %v855_v8  ;;  %v866_v7 = vadd.f32 %v10254_v30, %v822_v32  ;;  %v9890_v37 = vmov -1e+30  }
  0xa2   : > { %888 = vst [vmem:[#allocation2 + $0xa0] sm:$0xff] %v856_v9  ;;  %889 = vst [vmem:[#allocation2 + $0xa8] sm:$0xff] %v857_v11  ;;  %v867_v12 = vadd.f32 %v10257_v33, %v823_v35  ;;  %vm907_vm1 = vcmp.le.s32.totalorder %v906_v5, %v901_v36  ;;  %v902_v14 = vadd.s32 8, %v901_v36  ;;  %v903_v20 = vadd.s32 16, %v901_v36 }
  0xa3   : > { %890 = vst [vmem:[#allocation2 + $0xb0] sm:$0xff] %v858_v18  ;;  %891 = vst [vmem:[#allocation2 + $0xb8] sm:$0xff] %v859_v23  ;;  %v911_v25 = vsel %vm907_vm1, 0.0, %v9890_v37  ;;  %v904_v38 = vadd.s32 24, %v901_v36 }
  0xa4   : > { %892 = vst [vmem:[#allocation2 + $0xc0] sm:$0xff] %v860_v24  ;;  %893 = vst [vmem:[#allocation2 + $0xc8] sm:$0xff] %v861_v26  ;;  %vm908_vm2 = vcmp.le.s32.totalorder %v906_v5, %v902_v14  ;;  %vm909_vm3 = vcmp.le.s32.totalorder %v906_v5, %v903_v20 }
  0xa5   : > { %894 = vst [vmem:[#allocation2 + $0xd0] sm:$0xff] %v862_v28  ;;  %895 = vst [vmem:[#allocation2 + $0xd8] sm:$0xff] %v863_v29  ;;  %v912_v3 = vsel %vm908_vm2, 0.0, %v9890_v37  ;;  %v913_v39 = vsel %vm909_vm3, 0.0, %v9890_v37  ;;  %vm910_vm4 = vcmp.le.s32.totalorder %v906_v5, %v904_v38 }
  0xa6   : > { %896 = vst [vmem:[#allocation2 + $0xe0] sm:$0xff] %v864_v31  ;;  %897 = vst [vmem:[#allocation2 + $0xe8] sm:$0xff] %v865_v34  ;;  %v914_v30 = vsel %vm910_vm4, 0.0, %v9890_v37 }
  0xa7   : > { %898 = vst [vmem:[#allocation2 + $0xf0] sm:$0xff] %v866_v7  ;;  %899 = vst [vmem:[#allocation2 + $0xf8] sm:$0xff] %v867_v12 }
  0xa8   : > { %916 = vst.msk [vmem:[#allocation4] sm:$0xff] %vm915_vm0, %v911_v25  ;;  %917 = vst.msk [vmem:[#allocation4 + $0x8] sm:$0xff] %vm915_vm0, %v912_v3 }
  0xa9   : > { %918 = vst.msk [vmem:[#allocation4 + $0x10] sm:$0xff] %vm915_vm0, %v913_v39  ;;  %919 = vst.msk [vmem:[#allocation4 + $0x18] sm:$0xff] %vm915_vm0, %v914_v30 }
  0xaa PF: > { %v9065_v33 = vld [vmem:[%s10150_s13 + $0x4] ss:$24 sps:$4 sm:$0xff]   ;;  %v9067_v40 = vld [vmem:[%s10150_s13] ss:$24 sps:$4 sm:$0xff]   ;;  %v9068_v41 = vld [vmem:[%s10150_s13 + $0x34] ss:$24 sps:$4 sm:$0xff]   ;;  %s14015_s15 = scalar_lea.vmem %s13833_s4, %s10165_s27  ;;  %s14032_s14 = scalar_lea.vmem %s13834_s5, %s10165_s27 }
  0xab   : > { %1548 = vmatprep.subr.bf16.mxu1 %v9065_v33  ;;  %v9070_v42 = vld [vmem:[%s10150_s13 + $0x30] ss:$24 sps:$4 sm:$0xff]   ;;  %v9071_v43 = vld [vmem:[%s10150_s13 + $0x64] ss:$24 sps:$4 sm:$0xff]   ;;  %v9073_v44 = vld [vmem:[%s10150_s13 + $0x60] ss:$24 sps:$4 sm:$0xff]  }
  0xac   : > { %1549 = vmatpush1.bf16.msra.mxu1 %v9067_v40  ;;  %v9074_v45 = vld [vmem:[%s10150_s13 + $0x94] ss:$24 sps:$4 sm:$0xff]   ;;  %v9076_v46 = vld [vmem:[%s10150_s13 + $0x90] ss:$24 sps:$4 sm:$0xff]   ;;  %v9077_v47 = vld [vmem:[%s10150_s13 + $0xc4] ss:$24 sps:$4 sm:$0xff]  }
  0xad   : > { %1550 = vmatprep.subr.bf16.mxu1 %v9068_v41  ;;  %v9079_v48 = vld [vmem:[%s10150_s13 + $0xc0] ss:$24 sps:$4 sm:$0xff]   ;;  %v9080_v49 = vld [vmem:[%s10150_s13 + $0xf4] ss:$24 sps:$4 sm:$0xff]   ;;  %v9082_v50 = vld [vmem:[%s10150_s13 + $0xf0] ss:$24 sps:$4 sm:$0xff]  }
  0xae   : > { %v9083_v51 = vld [vmem:[%s10150_s13 + $0x124] ss:$24 sps:$4 sm:$0xff]   ;;  %v921_v52 = vld [vmem:[#allocation2 + $0x8] sm:$0xff]  ;;  %v9085_v55 = vld [vmem:[%s10150_s13 + $0x120] ss:$24 sps:$4 sm:$0xff]   ;;  %vm2163_vm5 = vcmask 261120  }
  0xaf   : > { %v923_v53 = vld [vmem:[#allocation2 + $0x18] sm:$0xff]  ;;  %v9086_v56 = vld [vmem:[%s10150_s13 + $0x154] ss:$24 sps:$4 sm:$0xff]   ;;  %v9088_v57 = vld [vmem:[%s10150_s13 + $0x150] ss:$24 sps:$4 sm:$0xff]   ;;  %p8461_p7 = scmp.ne.s32.totalorder %s10003_s28, 1 }
  0xb0   : > { %1551 = vmatpush1.bf16.msra.mxu1 %v9070_v42  ;;  %v10331_v54 = vpack.c.bf16 %v923_v53, %v921_v52  ;;  %v9089_v58 = vld [vmem:[%s10150_s13 + $0x184] ss:$24 sps:$4 sm:$0xff]   ;;  %v9091_v59 = vld [vmem:[%s10150_s13 + $0x180] ss:$24 sps:$4 sm:$0xff]   ;;  %v9092_v60 = vld [vmem:[%s10150_s13 + $0x1b4] ss:$24 sps:$4 sm:$0xff]  }
  0xb1   : > { %1552 = vmatprep.subr.bf16.mxu1 %v9071_v43  ;;  %v9094_v61 = vld [vmem:[%s10150_s13 + $0x1b0] ss:$24 sps:$4 sm:$0xff]   ;;  %v9095_v62 = vld [vmem:[%s10150_s13 + $0x1e4] ss:$24 sps:$4 sm:$0xff]   ;;  %v9097_v63 = vld [vmem:[%s10150_s13 + $0x1e0] ss:$24 sps:$4 sm:$0xff]  }
  0xb2   : > { %1580 = vmatprep.mubr.bf16.mxu1 %v10331_v54  ;;  %1806 = vmatprep.mubr.bf16.mxu0 %v10331_v54  ;;  %v9098_v0 = vld [vmem:[%s10150_s13 + $0x214] ss:$24 sps:$4 sm:$0xff]   ;;  %v9100_v1 = vld [vmem:[%s10150_s13 + $0x210] ss:$24 sps:$4 sm:$0xff]   ;;  %v9101_v2 = vld [vmem:[%s10150_s13 + $0x244] ss:$24 sps:$4 sm:$0xff]  }
  0xb3   : > { %v9103_v4 = vld [vmem:[%s10150_s13 + $0x240] ss:$24 sps:$4 sm:$0xff]   ;;  %v9104_v6 = vld [vmem:[%s10150_s13 + $0x274] ss:$24 sps:$4 sm:$0xff]   ;;  %v9106_v8 = vld [vmem:[%s10150_s13 + $0x270] ss:$24 sps:$4 sm:$0xff]  }
  0xb4   : > { %1553 = vmatpush1.bf16.msra.mxu1 %v9073_v44  ;;  %v9107_v9 = vld [vmem:[%s10150_s13 + $0x2a4] ss:$24 sps:$4 sm:$0xff]   ;;  %v9109_v10 = vld [vmem:[%s10150_s13 + $0x2a0] ss:$24 sps:$4 sm:$0xff]   ;;  %v9110_v11 = vld [vmem:[%s10150_s13 + $0x2d4] ss:$24 sps:$4 sm:$0xff]  }
  0xb5   : > { %1554 = vmatprep.subr.bf16.mxu1 %v9074_v45  ;;  %v9112_v13 = vld [vmem:[%s10150_s13 + $0x2d0] ss:$24 sps:$4 sm:$0xff]   ;;  %v920_v15 = vld [vmem:[#allocation2] sm:$0xff]  ;;  %v10355_v16 = vld [vmem:[%s10150_s13 + $0x14] ss:$24 sps:$4 sm:$0xff]   ;;  %s14200_s20 = sld [smem:[#allocation70_spill]] (!%p8461_p7) }
  0xb6   : > { %v922_v17 = vld [vmem:[#allocation2 + $0x10] sm:$0xff]  ;;  %v9115_v18 = vld [vmem:[%s10150_s13 + $0xc] ss:$24 sps:$4 sm:$0xff]   ;;  %v927_v22 = vld [vmem:[#allocation2 + $0x38] sm:$0xff]  ;;  %1774 = vmatprep.subr.bf16.mxu0 %v10355_v16  ;;  %s14207_s30 = sld [smem:[#allocation72_spill]] (!%p8461_p7) }
  0xb7   : > { %v10359_v19 = vld [vmem:[%s10150_s13 + $0x10] ss:$24 sps:$4 sm:$0xff]   ;;  %v10362_v23 = vld [vmem:[%s10150_s13 + $0x44] ss:$24 sps:$4 sm:$0xff]   ;;  %v10366_v24 = vpack.c.bf16 %v922_v17, %v920_v15  ;;  %v10374_v29 = vld [vmem:[%s10150_s13 + $0x40] ss:$24 sps:$4 sm:$0xff]  }
  0xb8   : > { %1555 = vmatpush1.bf16.msra.mxu1 %v9076_v46  ;;  %v925_v21 = vld [vmem:[#allocation2 + $0x28] sm:$0xff]  ;;  %1775 = vmatpush1.bf16.msra.mxu0 %v10359_v19  ;;  %v9118_v27 = vld [vmem:[%s10150_s13 + $0x3c] ss:$24 sps:$4 sm:$0xff]   ;;  %v9116_v32 = vld [vmem:[%s10150_s13 + $0x38] ss:$24 sps:$4 sm:$0xff]  }
  0xb9   : > { %1556 = vmatprep.subr.bf16.mxu1 %v9077_v47  ;;  %v9113_v26 = vld [vmem:[%s10150_s13 + $0x8] ss:$24 sps:$4 sm:$0xff]   ;;  %1776 = vmatprep.subr.bf16.mxu0 %v10362_v23  ;;  %v10371_v28 = vpack.c.bf16 %v927_v22, %v925_v21  ;;  %v10377_v31 = vld [vmem:[%s10150_s13 + $0x74] ss:$24 sps:$4 sm:$0xff]   ;;  %v931_v7 = vld [vmem:[#allocation2 + $0x58] sm:$0xff] }
  0xba   : > { %v924_v34 = vld [vmem:[#allocation2 + $0x20] sm:$0xff]  ;;  %v926_v35 = vld [vmem:[#allocation2 + $0x30] sm:$0xff]  ;;  %v929_v5 = vld [vmem:[#allocation2 + $0x48] sm:$0xff] }
  0xbb   : > { %v9121_v36 = vld [vmem:[%s10150_s13 + $0x6c] ss:$24 sps:$4 sm:$0xff]   ;;  %v10386_v12 = vld [vmem:[%s10150_s13 + $0x70] ss:$24 sps:$4 sm:$0xff]   ;;  %v10392_v20 = vpack.c.bf16 %v926_v35, %v924_v34  ;;  %v9124_v25 = vld [vmem:[%s10150_s13 + $0x9c] ss:$24 sps:$4 sm:$0xff]   ;;  %v10397_v38 = vpack.c.bf16 %v931_v7, %v929_v5 }
  0xbc   : > { %1557 = vmatpush1.bf16.msra.mxu1 %v9079_v48  ;;  %1777 = vmatpush1.bf16.msra.mxu0 %v10374_v29  ;;  %v10389_v14 = vld [vmem:[%s10150_s13 + $0xa4] ss:$24 sps:$4 sm:$0xff]   ;;  %v9119_v37 = vld [vmem:[%s10150_s13 + $0x68] ss:$24 sps:$4 sm:$0xff]   ;;  %v10403_v39 = vld [vmem:[%s10150_s13 + $0xd4] ss:$24 sps:$4 sm:$0xff]  }
  0xbd   : > { %1558 = vmatprep.subr.bf16.mxu1 %v9080_v49  ;;  %1778 = vmatprep.subr.bf16.mxu0 %v10377_v31  ;;  %v10400_v3 = vld [vmem:[%s10150_s13 + $0xa0] ss:$24 sps:$4 sm:$0xff]   ;;  %v930_v40 = vld [vmem:[#allocation2 + $0x50] sm:$0xff]  ;;  %v9127_v41 = vld [vmem:[%s10150_s13 + $0xcc] ss:$24 sps:$4 sm:$0xff]  }
  0xbe   : > { %v9122_v30 = vld [vmem:[%s10150_s13 + $0x98] ss:$24 sps:$4 sm:$0xff]   ;;  %v928_v33 = vld [vmem:[#allocation2 + $0x40] sm:$0xff]  ;;  %v933_v42 = vld [vmem:[#allocation2 + $0x68] sm:$0xff] }
  0xbf   : > { %v935_v43 = vld [vmem:[#allocation2 + $0x78] sm:$0xff]  ;;  %v10410_v44 = vld [vmem:[%s10150_s13 + $0xd0] ss:$24 sps:$4 sm:$0xff]   ;;  %v10422_v48 = vpack.c.bf16 %v930_v40, %v928_v33  ;;  %v932_v53 = vld [vmem:[#allocation2 + $0x60] sm:$0xff] }
  0xc0   : > { %1559 = vmatpush1.bf16.msra.mxu1 %v9082_v50  ;;  %1779 = vmatpush1.bf16.msra.mxu0 %v10386_v12  ;;  %v10413_v45 = vld [vmem:[%s10150_s13 + $0x104] ss:$24 sps:$4 sm:$0xff]   ;;  %v9125_v46 = vld [vmem:[%s10150_s13 + $0xc8] ss:$24 sps:$4 sm:$0xff]   ;;  %v10426_v50 = vld [vmem:[%s10150_s13 + $0x134] ss:$24 sps:$4 sm:$0xff]  }
  0xc1   : > { %1560 = vmatprep.subr.bf16.mxu1 %v9083_v51  ;;  %1780 = vmatprep.subr.bf16.mxu0 %v10389_v14  ;;  %v10419_v47 = vld [vmem:[%s10150_s13 + $0x100] ss:$24 sps:$4 sm:$0xff]   ;;  %v9130_v49 = vld [vmem:[%s10150_s13 + $0xfc] ss:$24 sps:$4 sm:$0xff]   ;;  %v10429_v51 = vpack.c.bf16 %v935_v43, %v933_v42  ;;  %v9145_v5 = vld [vmem:[%s10150_s13 + $0x1ec] ss:$24 sps:$4 sm:$0xff]  }
  0xc2   : > { %v9128_v52 = vld [vmem:[%s10150_s13 + $0xf8] ss:$24 sps:$4 sm:$0xff]   ;;  %v10465_v15 = vld [vmem:[%s10150_s13 + $0x1c4] ss:$24 sps:$4 sm:$0xff]   ;;  %v9137_v17 = vld [vmem:[%s10150_s13 + $0x188] ss:$24 sps:$4 sm:$0xff]  }
  0xc3   : > { %v9142_v22 = vld [vmem:[%s10150_s13 + $0x1bc] ss:$24 sps:$4 sm:$0xff]   ;;  %v940_v34 = vld [vmem:[#allocation2 + $0xa0] sm:$0xff]  ;;  %v945_v7 = vld [vmem:[#allocation2 + $0xc8] sm:$0xff] }
  0xc4   : > { %1561 = vmatpush1.bf16.msra.mxu1 %v9085_v55  ;;  %1781 = vmatpush1.bf16.msra.mxu0 %v10400_v3  ;;  %v934_v55 = vld [vmem:[#allocation2 + $0x70] sm:$0xff]  ;;  %v10497_v33 = vld [vmem:[%s10150_s13 + $0x220] ss:$24 sps:$4 sm:$0xff]  }
  0xc5   : > { %1562 = vmatprep.subr.bf16.mxu1 %v9086_v56  ;;  %1782 = vmatprep.subr.bf16.mxu0 %v10403_v39  ;;  %v10433_v56 = vld [vmem:[%s10150_s13 + $0x130] ss:$24 sps:$4 sm:$0xff]   ;;  %v10504_v42 = vld [vmem:[%s10150_s13 + $0x254] ss:$24 sps:$4 sm:$0xff]  }
  0xc6   : > { %v942_v35 = vld [vmem:[#allocation2 + $0xb0] sm:$0xff] }
  0xc7   : > { %v10500_v40 = vpack.c.bf16 %v942_v35, %v940_v34  ;;  %v10543_v34 = vld [vmem:[%s10150_s13 + $0x2e4] ss:$24 sps:$4 sm:$0xff]   ;;  %v9155_v35 = vld [vmem:[%s10150_s13 + $0x2a8] ss:$24 sps:$4 sm:$0xff]  }
  0xc8   : > { %1563 = vmatpush1.bf16.msra.mxu1 %v9088_v57  ;;  %1783 = vmatpush1.bf16.msra.mxu0 %v10410_v44  ;;  %v9133_v57 = vld [vmem:[%s10150_s13 + $0x12c] ss:$24 sps:$4 sm:$0xff]  }
  0xc9   : > { %1564 = vmatprep.subr.bf16.mxu1 %v9089_v58  ;;  %1784 = vmatprep.subr.bf16.mxu0 %v10413_v45  ;;  %v937_v58 = vld [vmem:[#allocation2 + $0x88] sm:$0xff] }
  0xcc   : > { %1565 = vmatpush1.bf16.msra.mxu1 %v9091_v59  ;;  %1785 = vmatpush1.bf16.msra.mxu0 %v10419_v47  ;;  %v939_v59 = vld [vmem:[#allocation2 + $0x98] sm:$0xff] }
  0xcd   : > { %1566 = vmatprep.subr.bf16.mxu1 %v9092_v60  ;;  %v10439_v60 = vld [vmem:[%s10150_s13 + $0x164] ss:$24 sps:$4 sm:$0xff]   ;;  %1786 = vmatprep.subr.bf16.mxu0 %v10426_v50 }
  0xd0   : > { %1567 = vmatpush1.bf16.msra.mxu1 %v9094_v61  ;;  %v9131_v61 = vld [vmem:[%s10150_s13 + $0x128] ss:$24 sps:$4 sm:$0xff]   ;;  %1787 = vmatpush1.bf16.msra.mxu0 %v10433_v56 }
  0xd1   : > { %1568 = vmatprep.subr.bf16.mxu1 %v9095_v62  ;;  %v10445_v62 = vld [vmem:[%s10150_s13 + $0x160] ss:$24 sps:$4 sm:$0xff]   ;;  %1788 = vmatprep.subr.bf16.mxu0 %v10439_v60 }
  0xd4   : > { %1569 = vmatpush1.bf16.msra.mxu1 %v9097_v63  ;;  %v10448_v63 = vpack.c.bf16 %v934_v55, %v932_v53  ;;  %1789 = vmatpush1.bf16.msra.mxu0 %v10445_v62  ;;  %v10511_v53 = vld [vmem:[%s10150_s13 + $0x250] ss:$24 sps:$4 sm:$0xff]   ;;  %v9151_v55 = vld [vmem:[%s10150_s13 + $0x24c] ss:$24 sps:$4 sm:$0xff]  }
  0xd5   : > { %1570 = vmatprep.subr.bf16.mxu1 %v9098_v0  ;;  %v9136_v0 = vld [vmem:[%s10150_s13 + $0x15c] ss:$24 sps:$4 sm:$0xff]  }
  0xd8   : > { %1571 = vmatpush1.bf16.msra.mxu1 %v9100_v1  ;;  %v10452_v1 = vld [vmem:[%s10150_s13 + $0x194] ss:$24 sps:$4 sm:$0xff]  }
  0xd9   : > { %1572 = vmatprep.subr.bf16.mxu1 %v9101_v2  ;;  %v10455_v2 = vpack.c.bf16 %v939_v59, %v937_v58  ;;  %1790 = vmatprep.subr.bf16.mxu0 %v10452_v1  ;;  %v951_v58 = vld [vmem:[#allocation2 + $0xf8] sm:$0xff] }
  0xda   : > { %v10517_v59 = vld [vmem:[%s10150_s13 + $0x284] ss:$24 sps:$4 sm:$0xff]  }
  0xdc   : > { %1573 = vmatpush1.bf16.msra.mxu1 %v9103_v4  ;;  %v9134_v4 = vld [vmem:[%s10150_s13 + $0x158] ss:$24 sps:$4 sm:$0xff]  }
  0xdd   : > { %1574 = vmatprep.subr.bf16.mxu1 %v9104_v6  ;;  %v936_v6 = vld [vmem:[#allocation2 + $0x80] sm:$0xff] }
  0xe0   : > { %1575 = vmatpush1.bf16.msra.mxu1 %v9106_v8  ;;  %v938_v8 = vld [vmem:[#allocation2 + $0x90] sm:$0xff] }
  0xe1   : > { %1576 = vmatprep.subr.bf16.mxu1 %v9107_v9  ;;  %v10459_v9 = vld [vmem:[%s10150_s13 + $0x190] ss:$24 sps:$4 sm:$0xff]   ;;  %v10474_v21 = vpack.c.bf16 %v938_v8, %v936_v6  ;;  %v9154_v6 = vld [vmem:[%s10150_s13 + $0x27c] ss:$24 sps:$4 sm:$0xff]  }
  0xe2   : > { %1791 = vmatpush1.bf16.msra.mxu0 %v10459_v9  ;;  %v10530_v8 = vld [vmem:[%s10150_s13 + $0x2b4] ss:$24 sps:$4 sm:$0xff]  }
  0xe3   : > { %1792 = vmatprep.subr.bf16.mxu0 %v10465_v15 }
  0xe4   : > { %1577 = vmatpush1.bf16.msra.mxu1 %v9109_v10  ;;  %v9139_v10 = vld [vmem:[%s10150_s13 + $0x18c] ss:$24 sps:$4 sm:$0xff]  }
  0xe5   : > { %1578 = vmatprep.subr.bf16.mxu1 %v9110_v11  ;;  %v941_v11 = vld [vmem:[#allocation2 + $0xa8] sm:$0xff] }
  0xe8   : > { %1579 = vmatpush1.bf16.msra.mxu1 %v9112_v13  ;;  %v943_v13 = vld [vmem:[#allocation2 + $0xb8] sm:$0xff] }
  0xe9   : > { %1661 = vmatprep.subr.bf16.mxu1 %v9115_v18  ;;  %v10471_v18 = vld [vmem:[%s10150_s13 + $0x1c0] ss:$24 sps:$4 sm:$0xff]  }
  0xea   : > { %1793 = vmatpush1.bf16.msra.mxu0 %v10471_v18 }
  0xeb   : > { %1581 = vmatmul.mubr.bf16.vlgmr.msra.gmra.mrb[0].mxu1 %v10366_v24 }
  0xec   : > { %1662 = vmatpush1.bf16.msra.mxu1 %v9113_v26  ;;  %1590 = vmatprep.mubr.bf16.mxu1 %v10371_v28  ;;  %v10478_v26 = vld [vmem:[%s10150_s13 + $0x1f4] ss:$24 sps:$4 sm:$0xff]  }
  0xed   : > { %1663 = vmatprep.subr.bf16.mxu1 %v9118_v27  ;;  %v10481_v27 = vpack.c.bf16 %v943_v13, %v941_v11  ;;  %1794 = vmatprep.subr.bf16.mxu0 %v10478_v26  ;;  %v9152_v11 = vld [vmem:[%s10150_s13 + $0x278] ss:$24 sps:$4 sm:$0xff]   ;;  %v948_v13 = vld [vmem:[#allocation2 + $0xe0] sm:$0xff] }
  0xf0   : > { %1664 = vmatpush1.bf16.msra.mxu1 %v9116_v32  ;;  %v9140_v32 = vld [vmem:[%s10150_s13 + $0x1b8] ss:$24 sps:$4 sm:$0xff]  }
  0xf1   : > { %1665 = vmatprep.subr.bf16.mxu1 %v9121_v36  ;;  %v10485_v36 = vld [vmem:[%s10150_s13 + $0x1f0] ss:$24 sps:$4 sm:$0xff]  }
  0xf2   : > { %1795 = vmatpush1.bf16.msra.mxu0 %v10485_v36 }
  0xf3   : > { %1591 = vmatmul.mubr.bf16.gmra.mrb[4].mxu1 %v10392_v20 }
  0xf4   : > { %1666 = vmatpush1.bf16.msra.mxu1 %v9119_v37  ;;  %1600 = vmatprep.mubr.bf16.mxu1 %v10397_v38  ;;  %v947_v37 = vld [vmem:[#allocation2 + $0xd8] sm:$0xff] }
  0xf5   : > { %1667 = vmatprep.subr.bf16.mxu1 %v9124_v25  ;;  %v10491_v25 = vld [vmem:[%s10150_s13 + $0x224] ss:$24 sps:$4 sm:$0xff]   ;;  %v10507_v43 = vpack.c.bf16 %v947_v37, %v945_v7 }
  0xf6   : > { %1796 = vmatprep.subr.bf16.mxu0 %v10491_v25  ;;  %v9160_v37 = vld [vmem:[%s10150_s13 + $0x2dc] ss:$24 sps:$4 sm:$0xff]  }
  0xf7   : > { %1797 = vmatpush1.bf16.msra.mxu0 %v10497_v33 }
  0xf8   : > { %1668 = vmatpush1.bf16.msra.mxu1 %v9122_v30  ;;  %v9143_v30 = vld [vmem:[%s10150_s13 + $0x1e8] ss:$24 sps:$4 sm:$0xff]   ;;  %1798 = vmatprep.subr.bf16.mxu0 %v10504_v42 }
  0xf9   : > { %1669 = vmatprep.subr.bf16.mxu1 %v9127_v41  ;;  %v9148_v41 = vld [vmem:[%s10150_s13 + $0x21c] ss:$24 sps:$4 sm:$0xff]  }
  0xfb   : > { %1601 = vmatmul.mubr.bf16.gmra.mrb[8].mxu1 %v10422_v48  ;;  %1799 = vmatpush1.bf16.msra.mxu0 %v10511_v53 }
  0xfc   : > { %1670 = vmatpush1.bf16.msra.mxu1 %v9125_v46  ;;  %1610 = vmatprep.mubr.bf16.mxu1 %v10429_v51  ;;  %v9146_v46 = vld [vmem:[%s10150_s13 + $0x218] ss:$24 sps:$4 sm:$0xff]  }
  0xfd   : > { %1671 = vmatprep.subr.bf16.mxu1 %v9130_v49  ;;  %v944_v49 = vld [vmem:[#allocation2 + $0xc0] sm:$0xff]  ;;  %1800 = vmatprep.subr.bf16.mxu0 %v10517_v59 }
 0x100   : > { %1672 = vmatpush1.bf16.msra.mxu1 %v9128_v52  ;;  %v946_v52 = vld [vmem:[#allocation2 + $0xd0] sm:$0xff] }
 0x101   : > { %1673 = vmatprep.subr.bf16.mxu1 %v9133_v57  ;;  %v949_v57 = vld [vmem:[#allocation2 + $0xe8] sm:$0xff] }
 0x103   : > { %1611 = vmatmul.mubr.bf16.gmra.mrb[12].mxu1 %v10448_v63 }
 0x104   : > { %1674 = vmatpush1.bf16.msra.mxu1 %v9131_v61  ;;  %1620 = vmatprep.mubr.bf16.mxu1 %v10455_v2  ;;  %v9149_v61 = vld [vmem:[%s10150_s13 + $0x248] ss:$24 sps:$4 sm:$0xff]  }
 0x105   : > { %1675 = vmatprep.subr.bf16.mxu1 %v9136_v0  ;;  %v10523_v0 = vld [vmem:[%s10150_s13 + $0x280] ss:$24 sps:$4 sm:$0xff]  }
 0x106   : > { %1801 = vmatpush1.bf16.msra.mxu0 %v10523_v0 }
 0x107   : > { %1802 = vmatprep.subr.bf16.mxu0 %v10530_v8 }
 0x108   : > { %1676 = vmatpush1.bf16.msra.mxu1 %v9134_v4  ;;  %v10526_v4 = vpack.c.bf16 %v946_v52, %v944_v49 }
 0x109   : > { %1677 = vmatprep.subr.bf16.mxu1 %v9139_v10  ;;  %v10533_v10 = vpack.c.bf16 %v951_v58, %v949_v57 }
 0x10b   : > { %1621 = vmatmul.mubr.bf16.gmra.mrb[16].mxu1 %v10474_v21 }
 0x10c   : > { %1678 = vmatpush1.bf16.msra.mxu1 %v9137_v17  ;;  %1630 = vmatprep.mubr.bf16.mxu1 %v10481_v27  ;;  %v950_v17 = vld [vmem:[#allocation2 + $0xf0] sm:$0xff] }
 0x10d   : > { %1679 = vmatprep.subr.bf16.mxu1 %v9142_v22  ;;  %v10537_v22 = vld [vmem:[%s10150_s13 + $0x2b0] ss:$24 sps:$4 sm:$0xff]   ;;  %v10552_v7 = vpack.c.bf16 %v950_v17, %v948_v13 }
 0x10e   : > { %1803 = vmatpush1.bf16.msra.mxu0 %v10537_v22 }
 0x10f   : > { %1804 = vmatprep.subr.bf16.mxu0 %v10543_v34 }
 0x110   : > { %1680 = vmatpush1.bf16.msra.mxu1 %v9140_v32  ;;  %v9157_v32 = vld [vmem:[%s10150_s13 + $0x2ac] ss:$24 sps:$4 sm:$0xff]  }
 0x111   : > { %1681 = vmatprep.subr.bf16.mxu1 %v9145_v5  ;;  %v10549_v5 = vld [vmem:[%s10150_s13 + $0x2e0] ss:$24 sps:$4 sm:$0xff]  }
 0x112   : > { %1805 = vmatpush1.bf16.msra.mxu0 %v10549_v5 }
 0x113   : > { %1631 = vmatmul.mubr.bf16.gmra.mrb[20].mxu1 %v10500_v40 }
 0x114   : > { %1682 = vmatpush1.bf16.msra.mxu1 %v9143_v30  ;;  %1640 = vmatprep.mubr.bf16.mxu1 %v10507_v43  ;;  %v9158_v30 = vld [vmem:[%s10150_s13 + $0x2d8] ss:$24 sps:$4 sm:$0xff]  }
 0x115   : > { %1683 = vmatprep.subr.bf16.mxu1 %v9148_v41  ;;  %1807 = vmatmul.mubr.bf16.vlgmr.msra.gmra.mrb[0].mxu0 %v10366_v24 }
 0x116   : > { %1816 = vmatprep.mubr.bf16.mxu0 %v10371_v28 }
 0x118   : > { %1684 = vmatpush1.bf16.msra.mxu1 %v9146_v46 }
 0x119   : > { %1685 = vmatprep.subr.bf16.mxu1 %v9151_v55 }
 0x11b   : > { %1641 = vmatmul.mubr.bf16.gmra.mrb[24].mxu1 %v10526_v4 }
 0x11c   : > { %1686 = vmatpush1.bf16.msra.mxu1 %v9149_v61  ;;  %1650 = vmatprep.mubr.bf16.mxu1 %v10533_v10 }
 0x11d   : > { %1687 = vmatprep.subr.bf16.mxu1 %v9154_v6  ;;  %1817 = vmatmul.mubr.bf16.gmra.mrb[4].mxu0 %v10392_v20 }
 0x11e   : > { %1826 = vmatprep.mubr.bf16.mxu0 %v10397_v38 }
 0x120   : > { %1688 = vmatpush1.bf16.msra.mxu1 %v9152_v11 }
 0x121   : > { %1689 = vmatprep.subr.bf16.mxu1 %v9157_v32 }
 0x123   : > { %1651 = vmatmul.mubr.bf16.gmra.mrb[28].mxu1 %v10552_v7 }
 0x124   : > { %1690 = vmatpush1.bf16.msra.mxu1 %v9155_v35  ;;  %1693 = vmatprep.mubr.bf16.mxu1 %v10331_v54 }
 0x125   : > { %1691 = vmatprep.subr.bf16.mxu1 %v9160_v37  ;;  %1827 = vmatmul.mubr.bf16.gmra.mrb[8].mxu0 %v10422_v48 }
 0x126   : > { %1836 = vmatprep.mubr.bf16.mxu0 %v10429_v51 }
 0x128   : > { %1692 = vmatpush1.bf16.msra.mxu1 %v9158_v30 }
 0x129   : > { %8821 = vmatprep.subr.bf16.mxu1 %v10355_v16 }
 0x12b   : > { %1694 = vmatmul.mubr.bf16.vlgmr.msra.gmra.mrb[32].mxu1 %v10366_v24 }
 0x12c   : > { %1703 = vmatprep.mubr.bf16.mxu1 %v10371_v28  ;;  %8837 = vmatpush1.bf16.msra.mxu1 %v10359_v19 }
 0x12d   : > { %8822 = vmatprep.subr.bf16.mxu1 %v10362_v23  ;;  %1837 = vmatmul.mubr.bf16.gmra.mrb[12].mxu0 %v10448_v63 }
 0x130   : > { %8838 = vmatpush1.bf16.msra.mxu1 %v10374_v29 }
 0x131   : > { %8823 = vmatprep.subr.bf16.mxu1 %v10377_v31 }
 0x133   : > { %1704 = vmatmul.mubr.bf16.gmra.mrb[36].mxu1 %v10392_v20 }
 0x134   : > { %1713 = vmatprep.mubr.bf16.mxu1 %v10397_v38  ;;  %8839 = vmatpush1.bf16.msra.mxu1 %v10386_v12 }
 0x135   : > { %8824 = vmatprep.subr.bf16.mxu1 %v10389_v14 }
 0x138   : > { %8840 = vmatpush1.bf16.msra.mxu1 %v10400_v3 }
 0x139   : > { %8825 = vmatprep.subr.bf16.mxu1 %v10403_v39 }
 0x13b   : > { %1714 = vmatmul.mubr.bf16.gmra.mrb[40].mxu1 %v10422_v48 }
 0x13c   : > { %1723 = vmatprep.mubr.bf16.mxu1 %v10429_v51  ;;  %8841 = vmatpush1.bf16.msra.mxu1 %v10410_v44 }
 0x13d   : > { %8826 = vmatprep.subr.bf16.mxu1 %v10413_v45 }
 0x140   : > { %8842 = vmatpush1.bf16.msra.mxu1 %v10419_v47 }
 0x141   : > { %8827 = vmatprep.subr.bf16.mxu1 %v10426_v50 }
 0x143   : > { %1724 = vmatmul.mubr.bf16.gmra.mrb[44].mxu1 %v10448_v63 }
 0x144   : > { %1733 = vmatprep.mubr.bf16.mxu1 %v10455_v2  ;;  %8843 = vmatpush1.bf16.msra.mxu1 %v10433_v56 }
 0x145   : > { %8828 = vmatprep.subr.bf16.mxu1 %v10439_v60 }
 0x148   : > { %8844 = vmatpush1.bf16.msra.mxu1 %v10445_v62 }
 0x149   : > { %8829 = vmatprep.subr.bf16.mxu1 %v10452_v1 }
 0x14b   : > { %1734 = vmatmul.mubr.bf16.gmra.mrb[48].mxu1 %v10474_v21 }
 0x14c   : > { %1743 = vmatprep.mubr.bf16.mxu1 %v10481_v27  ;;  %8845 = vmatpush1.bf16.msra.mxu1 %v10459_v9 }
 0x14d   : > { %8830 = vmatprep.subr.bf16.mxu1 %v10465_v15 }
 0x150   : > { %8846 = vmatpush1.bf16.msra.mxu1 %v10471_v18 }
 0x151   : > { %8831 = vmatprep.subr.bf16.mxu1 %v10478_v26 }
 0x153   : > { %1744 = vmatmul.mubr.bf16.gmra.mrb[52].mxu1 %v10500_v40 }
 0x154   : > { %1753 = vmatprep.mubr.bf16.mxu1 %v10507_v43  ;;  %8847 = vmatpush1.bf16.msra.mxu1 %v10485_v36 }
 0x155   : > { %8832 = vmatprep.subr.bf16.mxu1 %v10491_v25 }
 0x158   : > { %8848 = vmatpush1.bf16.msra.mxu1 %v10497_v33 }
 0x159   : > { %8833 = vmatprep.subr.bf16.mxu1 %v10504_v42 }
 0x15b   : > { %1754 = vmatmul.mubr.bf16.gmra.mrb[56].mxu1 %v10526_v4 }
 0x15c   : > { %1763 = vmatprep.mubr.bf16.mxu1 %v10533_v10  ;;  %8849 = vmatpush1.bf16.msra.mxu1 %v10511_v53 }
 0x15d   : > { %8834 = vmatprep.subr.bf16.mxu1 %v10517_v59 }
 0x160   : > { %8850 = vmatpush1.bf16.msra.mxu1 %v10523_v0 }
 0x161   : > { %8835 = vmatprep.subr.bf16.mxu1 %v10530_v8 }
 0x163   : > { %1764 = vmatmul.mubr.bf16.gmra.mrb[60].mxu1 %v10552_v7 }
 0x164   : > { %8851 = vmatpush1.bf16.msra.mxu1 %v10537_v22  ;;  %1846 = vmatprep.mubr.bf16.mxu1 %v10455_v2 }
 0x165   : > { %8836 = vmatprep.subr.bf16.mxu1 %v10543_v34 }
 0x168   : > { %8852 = vmatpush1.bf16.msra.mxu1 %v10549_v5 }
 0x16b   : > { %1847 = vmatmul.mubr.bf16.vlgmr.msra.gmra.mrb[64].mxu1 %v10474_v21 }
 0x16c   : > { %1856 = vmatprep.mubr.bf16.mxu1 %v10481_v27 }
 0x173   : > { %1857 = vmatmul.mubr.bf16.gmra.mrb[68].mxu1 %v10500_v40 }
 0x174   : > { %1866 = vmatprep.mubr.bf16.mxu1 %v10507_v43 }
 0x17b   : > { %1867 = vmatmul.mubr.bf16.gmra.mrb[72].mxu1 %v10526_v4 }
 0x17c   : > { %1876 = vmatprep.mubr.bf16.mxu1 %v10533_v10 }
 0x183   : > { %1877 = vmatmul.mubr.bf16.gmra.mrb[76].mxu1 %v10552_v7 }
 0x1be   : > { %v1582_v54 = vpop.f32.mrb[0].mxu1 }
 0x1bf   : > { %v1584_v16 = vpop.f32.mrb[1].mxu1  ;;  %v1887_v23 = vmul.f32 0.088388346, %v1582_v54 }
 0x1c0   : > { %v1586_v19 = vpop.f32.mrb[2].mxu1  ;;  %v10622_v29 = vmul.f32 0.088388346, %v1584_v16 }
 0x1c1   : > { %v1889_v24 = vmul.f32 0.088388346, %v1586_v19  ;;  %v1588_v28 = vpop.f32.mrb[3].mxu1 }
 0x1c2   : > { %v10624_v31 = vmul.f32 0.088388346, %v1588_v28 }
 0x1c3   : > { %v1919_v12 = vpack.c.bf16 %v1889_v24, %v1887_v23 }
 0x1c5   : > { %8697 = vmatprep.mubr.bf16.mxu1 %v1919_v12 }
 0x1c6   : > { %v1592_v20 = vpop.f32.mrb[4].mxu1 }
 0x1c7   : > { %v1594_v38 = vpop.f32.mrb[5].mxu1  ;;  %v10628_v39 = vmul.f32 0.088388346, %v1592_v20 }
 0x1c8   : > { %v1596_v3 = vpop.f32.mrb[6].mxu1  ;;  %v10632_v47 = vmul.f32 0.088388346, %v1594_v38 }
 0x1c9   : > { %v10630_v44 = vmul.f32 0.088388346, %v1596_v3  ;;  %v1598_v45 = vpop.f32.mrb[7].mxu1 }
 0x1ca   : > { %v10634_v48 = vmul.f32 0.088388346, %v1598_v45 }
 0x1cb   : > { %v1921_v50 = vpack.c.bf16 %v10630_v44, %v10628_v39 }
 0x1ce   : > { %v1602_v56 = vpop.f32.mrb[8].mxu1 }
 0x1cf   : > { %v1604_v60 = vpop.f32.mrb[9].mxu1  ;;  %v10640_v63 = vmul.f32 0.088388346, %v1602_v56 }
 0x1d0   : > { %v1606_v62 = vpop.f32.mrb[10].mxu1  ;;  %v10644_v9 = vmul.f32 0.088388346, %v1604_v60 }
 0x1d1   : > { %v10642_v1 = vmul.f32 0.088388346, %v1606_v62  ;;  %v1608_v2 = vpop.f32.mrb[11].mxu1 }
 0x1d2   : > { %v10646_v15 = vmul.f32 0.088388346, %v1608_v2 }
 0x1d3   : > { %v1923_v18 = vpack.c.bf16 %v10642_v1, %v10640_v63 }
 0x1d6   : > { %v1612_v26 = vpop.f32.mrb[12].mxu1 }
 0x1d7   : > { %v1614_v27 = vpop.f32.mrb[13].mxu1  ;;  %v10652_v25 = vmul.f32 0.088388346, %v1612_v26 }
 0x1d8   : > { %v1616_v36 = vpop.f32.mrb[14].mxu1  ;;  %v10656_v41 = vmul.f32 0.088388346, %v1614_v27 }
 0x1d9   : > { %v10654_v33 = vmul.f32 0.088388346, %v1616_v36  ;;  %v1618_v40 = vpop.f32.mrb[15].mxu1 }
 0x1da   : > { %v10658_v42 = vmul.f32 0.088388346, %v1618_v40 }
 0x1db   : > { %v1925_v43 = vpack.c.bf16 %v10654_v33, %v10652_v25 }
 0x1de   : > { %v1622_v49 = vpop.f32.mrb[16].mxu1 }
 0x1df   : > { %v1624_v52 = vpop.f32.mrb[17].mxu1  ;;  %v10664_v55 = vmul.f32 0.088388346, %v1622_v49 }
 0x1e0   : > { %v1626_v53 = vpop.f32.mrb[18].mxu1  ;;  %v10668_v59 = vmul.f32 0.088388346, %v1624_v52 }
 0x1e1   : > { %v10666_v57 = vmul.f32 0.088388346, %v1626_v53  ;;  %v1628_v58 = vpop.f32.mrb[19].mxu1 }
 0x1e2   : > { %v10670_v61 = vmul.f32 0.088388346, %v1628_v58 }
 0x1e3   : > { %v1927_v0 = vpack.c.bf16 %v10666_v57, %v10664_v55 }
 0x1e6   : > { %v1632_v6 = vpop.f32.mrb[20].mxu1 }
 0x1e7   : > { %v1634_v8 = vpop.f32.mrb[21].mxu1  ;;  %v10676_v11 = vmul.f32 0.088388346, %v1632_v6 }
 0x1e8   : > { %v1636_v10 = vpop.f32.mrb[22].mxu1  ;;  %v10680_v22 = vmul.f32 0.088388346, %v1634_v8  ;;  %v1808_v3 = vpop.f32.mrb[0].mxu0 }
 0x1e9   : > { %v10678_v13 = vmul.f32 0.088388346, %v1636_v10  ;;  %v1638_v17 = vpop.f32.mrb[23].mxu1  ;;  %v1810_v62 = vpop.f32.mrb[1].mxu0 }
 0x1ea   : > { %v10682_v32 = vmul.f32 0.088388346, %v1638_v17  ;;  %v1812_v27 = vpop.f32.mrb[2].mxu0 }
 0x1eb   : > { %v1929_v34 = vpack.c.bf16 %v10678_v13, %v10676_v11  ;;  %v10710_v40 = vpack.c.bf16 %v1812_v27, %v1808_v3  ;;  %v1814_v49 = vpop.f32.mrb[3].mxu0 }
 0x1ec   : > { %v10714_v53 = vpack.c.bf16 %v1814_v49, %v1810_v62 }
 0x1ee   : > { %v1642_v5 = vpop.f32.mrb[24].mxu1 }
 0x1ef   : > { %v1644_v7 = vpop.f32.mrb[25].mxu1  ;;  %v10688_v30 = vmul.f32 0.088388346, %v1642_v5 }
 0x1f0   : > { %v1646_v37 = vpop.f32.mrb[26].mxu1  ;;  %v10692_v19 = vmul.f32 0.088388346, %v1644_v7  ;;  %v1818_v10 = vpop.f32.mrb[4].mxu0 }
 0x1f1   : > { %v10690_v54 = vmul.f32 0.088388346, %v1646_v37  ;;  %v1648_v16 = vpop.f32.mrb[27].mxu1  ;;  %v1820_v7 = vpop.f32.mrb[5].mxu0 }
 0x1f2   : > { %v10694_v23 = vmul.f32 0.088388346, %v1648_v16  ;;  %v1822_v16 = vpop.f32.mrb[6].mxu0 }
 0x1f3   : > { %v1931_v24 = vpack.c.bf16 %v10690_v54, %v10688_v30 }
 0x1f6   : > { %v1652_v12 = vpop.f32.mrb[28].mxu1 }
 0x1f7   : > { %v1654_v20 = vpop.f32.mrb[29].mxu1  ;;  %v10700_v45 = vmul.f32 0.088388346, %v1652_v12  ;;  %v10718_v12 = vpack.c.bf16 %v1822_v16, %v1818_v10 }
 0x1f8   : > { %v1656_v38 = vpop.f32.mrb[30].mxu1  ;;  %v10704_v2 = vmul.f32 0.088388346, %v1654_v20  ;;  %v1824_v20 = vpop.f32.mrb[7].mxu0 }
 0x1f9   : > { %v10702_v56 = vmul.f32 0.088388346, %v1656_v38  ;;  %v1658_v60 = vpop.f32.mrb[31].mxu1  ;;  %v10720_v38 = vpack.c.bf16 %v1824_v20, %v1820_v7  ;;  %v1828_v27 = vpop.f32.mrb[8].mxu0 }
 0x1fa   : > { %v10706_v26 = vmul.f32 0.088388346, %v1658_v60  ;;  %v1830_v28 = vpop.f32.mrb[9].mxu0 }
 0x1fb   : > { %v1933_v36 = vpack.c.bf16 %v10702_v56, %v10700_v45 }
 0x1fe   : > { %v1695_v58 = vpop.f32.mrb[32].mxu1 }
 0x1ff   : > { %v1697_v6 = vpop.f32.mrb[33].mxu1 }
 0x200   : > { %v1699_v8 = vpop.f32.mrb[34].mxu1 }
 0x201   : > { %v1935_v17 = vpack.c.bf16 %v1699_v8, %v1695_v58  ;;  %v1701_v5 = vpop.f32.mrb[35].mxu1  ;;  %v1832_v8 = vpop.f32.mrb[10].mxu0 }
 0x202   : > { %v10716_v37 = vpack.c.bf16 %v1701_v5, %v1697_v6  ;;  %v1955_v6 = vpack.c.bf16 %v1832_v8, %v1828_v27  ;;  %v1834_v5 = vpop.f32.mrb[11].mxu0 }
 0x203   : > { %8693 = vmatprep.subr.bf16.mxu1 %v1935_v17  ;;  %v10724_v10 = vpack.c.bf16 %v1834_v5, %v1830_v28  ;;  %v1838_v20 = vpop.f32.mrb[12].mxu0 }
 0x204   : > { %8694 = vmatpush3.bf16.xpose.msra.mxu1 %v1935_v17  ;;  %8733 = vmatprep.subr.bf16.mxu0 %v1955_v6 }
 0x205   : > { %8734 = vmatpush3.bf16.msra.mxu0 %v1955_v6 }
 0x206   : > { %v1705_v3 = vpop.f32.mrb[36].mxu1 }
 0x207   : > { %v1707_v60 = vpop.f32.mrb[37].mxu1 }
 0x208   : > { %v1709_v62 = vpop.f32.mrb[38].mxu1 }
 0x209   : > { %v1937_v49 = vpack.c.bf16 %v1709_v62, %v1705_v3  ;;  %v1711_v52 = vpop.f32.mrb[39].mxu1  ;;  %v10726_v3 = vpop.f32.mrb[13].mxu0 }
 0x20a   : > { %v10722_v58 = vpack.c.bf16 %v1711_v52, %v1707_v60  ;;  %v1842_v52 = vpop.f32.mrb[14].mxu0 }
 0x20b   : > { %8695 = vmatprep.subr.bf16.mxu1 %v1937_v49  ;;  %v1957_v28 = vpack.c.bf16 %v1842_v52, %v1838_v20 }
 0x20c   : > { %8696 = vmatpush3.bf16.xpose.msra.mxu1 %v1937_v49 }
 0x20d   : > { %8735 = vmatprep.subr.bf16.mxu0 %v1957_v28 }
 0x20e   : > { %v1715_v17 = vpop.f32.mrb[40].mxu1  ;;  %8736 = vmatpush3.bf16.msra.mxu0 %v1957_v28 }
 0x20f   : > { %v1717_v7 = vpop.f32.mrb[41].mxu1 }
 0x210   : > { %v1719_v16 = vpop.f32.mrb[42].mxu1 }
 0x211   : > { %v1939_v35 = vpack.c.bf16 %v1719_v16, %v1715_v17  ;;  %v1721_v46 = vpop.f32.mrb[43].mxu1 }
 0x212   : > { %v10728_v62 = vpack.c.bf16 %v1721_v46, %v1717_v7 }
 0x213   : > { %8698 = vmatmul.mubr.bf16.vlgmr.msra.gmra.mrb[80].mxu1 %v1921_v50  ;;  %8701 = vmatprep.subr.bf16.mxu1 %v1939_v35 }
 0x214   : > { %8702 = vmatpush3.bf16.xpose.msra.mxu1 %v1939_v35  ;;  %8705 = vmatprep.mubr.bf16.mxu1 %v1923_v18 }
 0x216   : > { %v1725_v60 = vpop.f32.mrb[44].mxu1 }
 0x217   : > { %v1727_v27 = vpop.f32.mrb[45].mxu1 }
 0x218   : > { %v1729_v49 = vpop.f32.mrb[46].mxu1 }
 0x219   : > { %v1941_v8 = vpack.c.bf16 %v1729_v49, %v1725_v60  ;;  %v1731_v46 = vpop.f32.mrb[47].mxu1 }
 0x21a   : > { %v10736_v6 = vpack.c.bf16 %v1731_v46, %v1727_v27 }
 0x21b   : > { %8703 = vmatprep.subr.bf16.mxu1 %v1941_v8 }
 0x21c   : > { %8704 = vmatpush3.bf16.xpose.msra.mxu1 %v1941_v8 }
 0x21e   : > { %v1735_v39 = vpop.f32.mrb[48].mxu1 }
 0x21f   : > { %v1737_v44 = vpop.f32.mrb[49].mxu1 }
 0x220   : > { %v1739_v50 = vpop.f32.mrb[50].mxu1 }
 0x221   : > { %v1943_v5 = vpack.c.bf16 %v1739_v50, %v1735_v39  ;;  %v1741_v35 = vpop.f32.mrb[51].mxu1 }
 0x222   : > { %v10738_v17 = vpack.c.bf16 %v1741_v35, %v1737_v44 }
 0x223   : > { %8706 = vmatmul.mubr.bf16.vlgmr.msra.gmra.mrb[84].mxu1 %v1925_v43  ;;  %8709 = vmatprep.subr.bf16.mxu1 %v1943_v5 }
 0x224   : > { %8710 = vmatpush3.bf16.xpose.msra.mxu1 %v1943_v5  ;;  %8713 = vmatprep.mubr.bf16.mxu1 %v1927_v0 }
 0x226   : > { %v1745_v63 = vpop.f32.mrb[52].mxu1 }
 0x227   : > { %v1747_v1 = vpop.f32.mrb[53].mxu1 }
 0x228   : > { %v1749_v18 = vpop.f32.mrb[54].mxu1 }
 0x229   : > { %v1945_v7 = vpack.c.bf16 %v1749_v18, %v1745_v63  ;;  %v1751_v16 = vpop.f32.mrb[55].mxu1 }
 0x22a   : > { %v10746_v20 = vpack.c.bf16 %v1751_v16, %v1747_v1 }
 0x22b   : > { %8711 = vmatprep.subr.bf16.mxu1 %v1945_v7 }
 0x22c   : > { %8712 = vmatpush3.bf16.xpose.msra.mxu1 %v1945_v7 }
 0x22e   : > { %v1755_v52 = vpop.f32.mrb[56].mxu1 }
 0x22f   : > { %v1757_v28 = vpop.f32.mrb[57].mxu1 }
 0x230   : > { %v1759_v60 = vpop.f32.mrb[58].mxu1 }
 0x231   : > { %v1947_v25 = vpack.c.bf16 %v1759_v60, %v1755_v52  ;;  %v1761_v33 = vpop.f32.mrb[59].mxu1  ;;  %v10783_v60 = vld [vmem:[#allocation4 + $0x10] sm:$0xff] }
 0x232   : > { %v10748_v43 = vpack.c.bf16 %v1761_v33, %v1757_v28  ;;  %13997 = vst [vmem:[#allocation20_spill] sm:$0xff] %v10783_v60 }
 0x233   : > { %8714 = vmatmul.mubr.bf16.vlgmr.msra.gmra.mrb[88].mxu1 %v1929_v34  ;;  %8717 = vmatprep.subr.bf16.mxu1 %v1947_v25 }
 0x234   : > { %8718 = vmatpush3.bf16.xpose.msra.mxu1 %v1947_v25  ;;  %8721 = vmatprep.mubr.bf16.mxu1 %v1931_v24  ;;  %v10785_v25 = vld [vmem:[#allocation4] sm:$0xff] }
 0x236   : > { %v1765_v55 = vpop.f32.mrb[60].mxu1 }
 0x237   : > { %v1767_v57 = vpop.f32.mrb[61].mxu1 }
 0x238   : > { %v1769_v0 = vpop.f32.mrb[62].mxu1 }
 0x239   : > { %v1949_v27 = vpack.c.bf16 %v1769_v0, %v1765_v55  ;;  %v1771_v49 = vpop.f32.mrb[63].mxu1  ;;  %v10787_v55 = vld [vmem:[#allocation4 + $0x18] sm:$0xff] }
 0x23a   : > { %v10756_v8 = vpack.c.bf16 %v1771_v49, %v1767_v57  ;;  %13998 = vst [vmem:[#allocation21_spill] sm:$0xff] %v10787_v55 }
 0x23b   : > { %8719 = vmatprep.subr.bf16.mxu1 %v1949_v27 }
 0x23c   : > { %8720 = vmatpush3.bf16.xpose.msra.mxu1 %v1949_v27  ;;  %v10792_v27 = vld [vmem:[#allocation4 + $0x8] sm:$0xff] }
 0x23d   : > { %8725 = vmatprep.subr.bf16.mxu1 %v10710_v40  ;;  %13999 = vst [vmem:[#allocation22_spill] sm:$0xff] %v10792_v27 }
 0x23e   : > { %v1848_v46 = vpop.f32.mrb[64].mxu1 }
 0x23f   : > { %v1850_v11 = vpop.f32.mrb[65].mxu1 }
 0x240   : > { %v1852_v13 = vpop.f32.mrb[66].mxu1 }
 0x241   : > { %v10759_v34 = vpack.c.bf16 %v1852_v13, %v1848_v46  ;;  %v1854_v39 = vpop.f32.mrb[67].mxu1 }
 0x242   : > { %v10761_v44 = vpack.c.bf16 %v1854_v39, %v1850_v11 }
 0x243   : > { %8722 = vmatmul.mubr.bf16.vlgmr.msra.gmra.mrb[92].mxu1 %v1933_v36 }
 0x244   : > { %8726 = vmatpush3.bf16.msra.mxu1 %v10710_v40 }
 0x245   : > { %8727 = vmatprep.subr.bf16.mxu1 %v10718_v12 }
 0x246   : > { %v1858_v30 = vpop.f32.mrb[68].mxu1 }
 0x247   : > { %v1860_v54 = vpop.f32.mrb[69].mxu1 }
 0x248   : > { %8728 = vmatpush3.bf16.msra.mxu1 %v10718_v12  ;;  %v1862_v24 = vpop.f32.mrb[70].mxu1 }
 0x249   : > { %8741 = vmatprep.subr.bf16.mxu1 %v10759_v34  ;;  %v10770_v50 = vpack.c.bf16 %v1862_v24, %v1858_v30  ;;  %v1864_v5 = vpop.f32.mrb[71].mxu1 }
 0x24a   : > { %v10772_v35 = vpack.c.bf16 %v1864_v5, %v1860_v54 }
 0x24c   : > { %13995 = vst [vmem:[#allocation18_spill] sm:$0xff] %v10772_v35 }
 0x24e   : > { %v1868_v63 = vpop.f32.mrb[72].mxu1 }
 0x24f   : > { %v1870_v1 = vpop.f32.mrb[73].mxu1 }
 0x250   : > { %v1872_v45 = vpop.f32.mrb[74].mxu1 }
 0x251   : > { %v10774_v56 = vpack.c.bf16 %v1872_v45, %v1868_v63  ;;  %v1874_v36 = vpop.f32.mrb[75].mxu1 }
 0x252   : > { %v10776_v40 = vpack.c.bf16 %v1874_v36, %v1870_v1 }
 0x253   : > { %8749 = vmatprep.subr.bf16.mxu0 %v10774_v56 }
 0x256   : > { %v1878_v18 = vpop.f32.mrb[76].mxu1 }
 0x257   : > { %v1880_v12 = vpop.f32.mrb[77].mxu1 }
 0x258   : > { %v1882_v7 = vpop.f32.mrb[78].mxu1 }
 0x259   : > { %v10779_v16 = vpack.c.bf16 %v1882_v7, %v1878_v18  ;;  %v1884_v52 = vpop.f32.mrb[79].mxu1 }
 0x25a   : > { %v10781_v28 = vpack.c.bf16 %v1884_v52, %v1880_v12 }
 0x25c   : > { %13996 = vst [vmem:[#allocation19_spill] sm:$0xff] %v10781_v28 }
 0x2e6   : > { %v8699_v33 = vpop.f32.mrb[80].mxu1 }
 0x2e7   : > { %v10790_v57 = vadd.f32 %v8699_v33, %v10783_v60  ;;  %v2001_v0 = vpop.f32.mrb[81].mxu1 }
 0x2e8   : > { %v10795_v49 = vadd.f32 %v2001_v0, %v10785_v25  ;;  %v8700_v46 = vpop.f32.mrb[82].mxu1 }
 0x2e9   : > { %v10798_v11 = vadd.f32 %v8700_v46, %v10787_v55  ;;  %v2004_v13 = vpop.f32.mrb[83].mxu1  ;;  %v2170_v39 = vsel %vm2163_vm5, %v10790_v57, -inf }
 0x2ea   : > { %v10803_v30 = vadd.f32 %v2004_v13, %v10792_v27  ;;  %2171 = vmax.xlane.f32.xlu1 %v2170_v39  ;;  %v2164_v54 = vsel %vm2163_vm5, %v10795_v49, -inf }
 0x2eb   : > { %2165 = vmax.xlane.f32.xlu0 %v2164_v54  ;;  %v2173_v24 = vsel %vm2163_vm5, %v10798_v11, -inf }
 0x2ec   : > { %v2167_v5 = vsel %vm2163_vm5, %v10803_v30, -inf }
 0x2ee   : > { %2174 = vmax.xlane.f32.xlu1 %v2173_v24 }
 0x2ef   : > { %2168 = vmax.xlane.f32.xlu0 %v2167_v5 }
 0x2f6   : > { %v8707_v63 = vpop.f32.mrb[84].mxu1 }
 0x2f7   : > { %v2050_v1 = vpop.f32.mrb[85].mxu1 }
 0x2f8   : > { %v10812_v45 = vadd.f32 %v2050_v1, %v10785_v25  ;;  %v8708_v36 = vpop.f32.mrb[86].mxu1 }
 0x2f9   : > { %v2053_v18 = vpop.f32.mrb[87].mxu1 }
 0x2fa   : > { %v10815_v12 = vadd.f32 %v2053_v18, %v10792_v27  ;;  %v2176_v7 = vsel %vm2163_vm5, %v10812_v45, -inf }
 0x2fb   : > { %2177 = vmax.xlane.f32.xlu0 %v2176_v7  ;;  %v10838_v7 = vadd.f32 %v8707_v63, %v10783_v60 }
 0x2fc   : > { %v2179_v52 = vsel %vm2163_vm5, %v10815_v12, -inf }
 0x2fd   : > { %2180 = vmax.xlane.f32.xlu1 %v2179_v52 }
 0x306   : > { %v8715_v33 = vpop.f32.mrb[88].mxu1 }
 0x307   : > { %v10822_v0 = vadd.f32 %v8715_v33, %v10783_v60  ;;  %v2099_v46 = vpop.f32.mrb[89].mxu1  ;;  %v10843_v33 = vadd.f32 %v8708_v36, %v10787_v55 }
 0x308   : > { %v8716_v13 = vpop.f32.mrb[90].mxu1  ;;  %v10825_v39 = vadd.f32 %v2099_v46, %v10785_v25 }
 0x309   : > { %v10828_v54 = vadd.f32 %v8716_v13, %v10787_v55  ;;  %v2102_v24 = vpop.f32.mrb[91].mxu1  ;;  %v2194_v5 = vsel %vm2163_vm5, %v10822_v0, -inf  ;;  %v2182_v13 = vsel %vm2163_vm5, %v10838_v7, -inf }
 0x30a   : > { %2195 = vmax.xlane.f32.xlu0 %v2194_v5  ;;  %v10833_v1 = vadd.f32 %v2102_v24, %v10792_v27  ;;  %v2188_v52 = vsel %vm2163_vm5, %v10825_v39, -inf  ;;  %v2185_v24 = vsel %vm2163_vm5, %v10843_v33, -inf }
 0x30b   : > { %v2197_v18 = vsel %vm2163_vm5, %v10828_v54, -inf }
 0x30c   : > { %2198 = vmax.xlane.f32.xlu1 %v2197_v18  ;;  %v2191_v46 = vsel %vm2163_vm5, %v10833_v1, -inf }
 0x30e   : > { %2189 = vmax.xlane.f32.xlu0 %v2188_v52 }
 0x310   : > { %2192 = vmax.xlane.f32.xlu1 %v2191_v46 }
 0x312   : > { %2183 = vmax.xlane.f32.xlu0 %v2182_v13 }
 0x314   : > { %2186 = vmax.xlane.f32.xlu1 %v2185_v24 }
 0x316   : > { %v8723_v63 = vpop.f32.mrb[92].mxu1 }
 0x317   : > { %v2148_v5 = vpop.f32.mrb[93].mxu1  ;;  %v10855_v21 = vadd.f32 %v8723_v63, %v10783_v60 }
 0x318   : > { %v10852_v18 = vadd.f32 %v2148_v5, %v10785_v25  ;;  %v8724_v52 = vpop.f32.mrb[94].mxu1 }
 0x319   : > { %v2151_v36 = vpop.f32.mrb[95].mxu1  ;;  %v10863_v4 = vadd.f32 %v8724_v52, %v10787_v55  ;;  %v2206_v5 = vsel %vm2163_vm5, %v10855_v21, -inf }
 0x31a   : > { %v10858_v46 = vadd.f32 %v2151_v36, %v10792_v27  ;;  %v2200_v13 = vsel %vm2163_vm5, %v10852_v18, -inf }
 0x31b   : > { %2201 = vmax.xlane.f32.xlu0 %v2200_v13  ;;  %v2209_v63 = vsel %vm2163_vm5, %v10863_v4, -inf }
 0x31c   : > { %v2203_v24 = vsel %vm2163_vm5, %v10858_v46, -inf }
 0x31d   : > { %2204 = vmax.xlane.f32.xlu1 %v2203_v24 }
 0x31f   : > { %2207 = vmax.xlane.f32.xlu0 %v2206_v5 }
 0x321   : > { %2210 = vmax.xlane.f32.xlu1 %v2209_v63 }
 0x377   : > { %v2172_v36 = vpop.xlane.xlu1 %2171 }
 0x378   : > { %v2214_v51 = vsub.f32 %v10790_v57, %v2172_v36  ;;  %v2166_v14 = vpop.xlane.xlu0 %2165 }
 0x379   : > { %v2212_v13 = vsub.f32 %v10795_v49, %v2166_v14 }
 0x37a   : > { %v2232_v52 = vmul.f32 1.442695, %v2214_v51 }
 0x37b   : > { %v2228_v28 = vmul.f32 1.442695, %v2212_v13  ;;  %v2175_v35 = vpop.xlane.xlu1 %2174 }
 0x37c   : > { %v2215_v55 = vsub.f32 %v10798_v11, %v2175_v35  ;;  %v2169_v24 = vpop.xlane.xlu0 %2168 }
 0x37d   : > { %9449 = vpow2.f32 %v2228_v28  ;;  %v2213_v27 = vsub.f32 %v10803_v30, %v2169_v24 }
 0x37e   : > { %9451 = vpow2.f32 %v2232_v52  ;;  %v2234_v5 = vmul.f32 1.442695, %v2215_v55 }
 0x37f   : > { %v2230_v60 = vmul.f32 1.442695, %v2213_v27 }
 0x381   : > { %9453 = vpow2.f32 %v2230_v60 }
 0x382   : > { %9455 = vpow2.f32 %v2234_v5 }
 0x387   : > { %v10875_v63 = vpop.eup %9449 }
 0x388   : > { %v2178_v57 = vpop.xlane.xlu0 %2177  ;;  %v2260_v14 = vsel %vm2163_vm5, %v10875_v63, 0.0  ;;  %v10879_v51 = vpop.eup %9451 }
 0x389   : > { %v2216_v49 = vsub.f32 %v10812_v45, %v2178_v57  ;;  %2261 = vadd.xlane.f32.xlu0 %v2260_v14  ;;  %v2266_v60 = vsel %vm2163_vm5, %v10879_v51, 0.0 }
 0x38a   : > { %v2181_v35 = vpop.xlane.xlu1 %2180 }
 0x38b   : > { %v10882_v28 = vpop.eup %9453  ;;  %v2236_v11 = vmul.f32 1.442695, %v2216_v49  ;;  %v2217_v55 = vsub.f32 %v10815_v12, %v2181_v35 }
 0x38c   : > { %v2263_v27 = vsel %vm2163_vm5, %v10882_v28, 0.0  ;;  %v10889_v30 = vpop.eup %9455 }
 0x38d   : > { %9457 = vpow2.f32 %v2236_v11  ;;  %v2238_v36 = vmul.f32 1.442695, %v2217_v55  ;;  %2267 = vadd.xlane.f32.xlu0 %v2266_v60  ;;  %2264 = vadd.xlane.f32.xlu1 %v2263_v27  ;;  %v2269_v45 = vsel %vm2163_vm5, %v10889_v30, 0.0 }
 0x38f   : > { %9459 = vpow2.f32 %v2238_v36 }
 0x391   : > { %2270 = vadd.xlane.f32.xlu1 %v2269_v45 }
 0x397   : > { %v10893_v13 = vpop.eup %9457  ;;  %v2196_v12 = vpop.xlane.xlu0 %2195 }
 0x398   : > { %v2222_v52 = vsub.f32 %v10822_v0, %v2196_v12  ;;  %v2272_v24 = vsel %vm2163_vm5, %v10893_v13, 0.0 }
 0x399   : > { %v10898_v5 = vpop.eup %9459  ;;  %v2199_v57 = vpop.xlane.xlu1 %2198  ;;  %2273 = vadd.xlane.f32.xlu0 %v2272_v24 }
 0x39a   : > { %v2248_v14 = vmul.f32 1.442695, %v2222_v52  ;;  %v2223_v49 = vsub.f32 %v10828_v54, %v2199_v57  ;;  %v2275_v35 = vsel %vm2163_vm5, %v10898_v5, 0.0 }
 0x39b   : > { %2276 = vadd.xlane.f32.xlu1 %v2275_v35  ;;  %v2190_v11 = vpop.xlane.xlu0 %2189 }
 0x39c   : > { %9461 = vpow2.f32 %v2248_v14  ;;  %v2250_v55 = vmul.f32 1.442695, %v2223_v49  ;;  %v2220_v60 = vsub.f32 %v10825_v39, %v2190_v11 }
 0x39d   : > { %v2193_v0 = vpop.xlane.xlu1 %2192 }
 0x39e   : > { %9463 = vpow2.f32 %v2250_v55  ;;  %v2244_v27 = vmul.f32 1.442695, %v2220_v60  ;;  %v2221_v36 = vsub.f32 %v10833_v1, %v2193_v0 }
 0x39f   : > { %v2184_v45 = vpop.xlane.xlu0 %2183 }
 0x3a0   : > { %9465 = vpow2.f32 %v2244_v27  ;;  %v2246_v12 = vmul.f32 1.442695, %v2221_v36  ;;  %v2218_v52 = vsub.f32 %v10838_v7, %v2184_v45 }
 0x3a1   : > { %v2187_v54 = vpop.xlane.xlu1 %2186 }
 0x3a2   : > { %9467 = vpow2.f32 %v2246_v12  ;;  %v2240_v24 = vmul.f32 1.442695, %v2218_v52  ;;  %v2219_v57 = vsub.f32 %v10843_v33, %v2187_v54 }
 0x3a4   : > { %9469 = vpow2.f32 %v2240_v24  ;;  %v2242_v14 = vmul.f32 1.442695, %v2219_v57 }
 0x3a6   : > { %v10907_v49 = vpop.eup %9461  ;;  %9471 = vpow2.f32 %v2242_v14 }
 0x3a7   : > { %v2290_v39 = vsel %vm2163_vm5, %v10907_v49, 0.0 }
 0x3a8   : > { %v10911_v35 = vpop.eup %9463  ;;  %2291 = vadd.xlane.f32.xlu0 %v2290_v39  ;;  %v2202_v1 = vpop.xlane.xlu0 %2201 }
 0x3a9   : > { %v2224_v11 = vsub.f32 %v10852_v18, %v2202_v1  ;;  %v2293_v7 = vsel %vm2163_vm5, %v10911_v35, 0.0 }
 0x3aa   : > { %v10916_v55 = vpop.eup %9465  ;;  %v2205_v33 = vpop.xlane.xlu1 %2204  ;;  %2294 = vadd.xlane.f32.xlu1 %v2293_v7 }
 0x3ab   : > { %v2252_v60 = vmul.f32 1.442695, %v2224_v11  ;;  %v2225_v0 = vsub.f32 %v10858_v46, %v2205_v33  ;;  %v2284_v27 = vsel %vm2163_vm5, %v10916_v55, 0.0 }
 0x3ac   : > { %v10921_v36 = vpop.eup %9467  ;;  %2285 = vadd.xlane.f32.xlu0 %v2284_v27  ;;  %v2208_v45 = vpop.xlane.xlu0 %2207 }
 0x3ad   : > { %9473 = vpow2.f32 %v2252_v60  ;;  %v2254_v12 = vmul.f32 1.442695, %v2225_v0  ;;  %v2226_v18 = vsub.f32 %v10855_v21, %v2208_v45  ;;  %v2287_v52 = vsel %vm2163_vm5, %v10921_v36, 0.0 }
 0x3ae   : > { %v10926_v54 = vpop.eup %9469  ;;  %v2211_v24 = vpop.xlane.xlu1 %2210  ;;  %2288 = vadd.xlane.f32.xlu1 %v2287_v52 }
 0x3af   : > { %9475 = vpow2.f32 %v2254_v12  ;;  %v2256_v46 = vmul.f32 1.442695, %v2226_v18  ;;  %v2227_v57 = vsub.f32 %v10863_v4, %v2211_v24  ;;  %v2278_v14 = vsel %vm2163_vm5, %v10926_v54, 0.0  ;;  %v1844_v12 = vpop.f32.mrb[15].mxu0 }
 0x3b0   : > { %v10931_v39 = vpop.eup %9471  ;;  %2279 = vadd.xlane.f32.xlu0 %v2278_v14  ;;  %v10952_v18 = vpack.c.bf16 %v1844_v12, %v10726_v3 }
 0x3b1   : > { %9477 = vpow2.f32 %v2256_v46  ;;  %v2258_v1 = vmul.f32 1.442695, %v2227_v57  ;;  %v2281_v21 = vsel %vm2163_vm5, %v10931_v39, 0.0 }
 0x3b2   : > { %2282 = vadd.xlane.f32.xlu1 %v2281_v21 }
 0x3b3   : > { %9479 = vpow2.f32 %v2258_v1 }
 0x3b7   : > { %v10935_v11 = vpop.eup %9473 }
 0x3b8   : > { %v2296_v7 = vsel %vm2163_vm5, %v10935_v11, 0.0 }
 0x3b9   : > { %v10939_v33 = vpop.eup %9475  ;;  %2297 = vadd.xlane.f32.xlu0 %v2296_v7 }
 0x3ba   : > { %v2299_v4 = vsel %vm2163_vm5, %v10939_v33, 0.0 }
 0x3bb   : > { %v10943_v60 = vpop.eup %9477  ;;  %2300 = vadd.xlane.f32.xlu1 %v2299_v4 }
 0x3bc   : > { %v2302_v0 = vsel %vm2163_vm5, %v10943_v60, 0.0 }
 0x3bd   : > { %v10947_v27 = vpop.eup %9479  ;;  %2303 = vadd.xlane.f32.xlu0 %v2302_v0 }
 0x3be   : > { %v2305_v45 = vsel %vm2163_vm5, %v10947_v27, 0.0 }
 0x3bf   : > { %2306 = vadd.xlane.f32.xlu1 %v2305_v45 }
 0x416   : > { %v2262_v52 = vpop.xlane.xlu0 %2261 }
 0x417   : > { %9481 = vrcp.f32 %v2262_v52 }
 0x41a   : > { %v2265_v24 = vpop.xlane.xlu1 %2264  ;;  %v2268_v46 = vpop.xlane.xlu0 %2267 }
 0x41b   : > { %9483 = vrcp.f32 %v2265_v24 }
 0x41c   : > { %9485 = vrcp.f32 %v2268_v46 }
 0x41e   : > { %v2271_v57 = vpop.xlane.xlu1 %2270 }
 0x41f   : > { %9487 = vrcp.f32 %v2271_v57 }
 0x421   : > { %v9482_v14 = vpop.eup %9481 }
 0x422   : > { %v2324_v7 = vmul.f32 %v9482_v14, %v10875_v63 }
 0x425   : > { %v9484_v1 = vpop.eup %9483 }
 0x426   : > { %v2274_v21 = vpop.xlane.xlu0 %2273  ;;  %v2325_v4 = vmul.f32 %v9484_v1, %v10882_v28  ;;  %v9486_v0 = vpop.eup %9485 }
 0x427   : > { %9489 = vrcp.f32 %v2274_v21  ;;  %v2326_v52 = vmul.f32 %v9486_v0, %v10879_v51 }
 0x428   : > { %v2277_v45 = vpop.xlane.xlu1 %2276  ;;  %v2340_v3 = vpack.c.bf16 %v2325_v4, %v2324_v7 }
 0x429   : > { %v9488_v12 = vpop.eup %9487  ;;  %9491 = vrcp.f32 %v2277_v45 }
 0x42a   : > { %v2327_v24 = vmul.f32 %v9488_v12, %v10889_v30  ;;  %8729 = vmatprep.mubr.msk.bf16.mxu1 %vm2163_vm5, %v2340_v3 }
 0x42c   : > { %v2341_v46 = vpack.c.bf16 %v2327_v24, %v2326_v52 }
 0x42e   : > { %8730 = vmatmul.mubr.msk.bf16.vlgmr.msra.gmra.mrb[96].mxu1 %vm2163_vm5, %v2341_v46 }
 0x42f   : > { %8742 = vmatpush3.bf16.msra.mxu1 %v10759_v34 }
 0x430   : > { %8743 = vmatprep.subr.bf16.mxu1 %v10770_v50 }
 0x431   : > { %v9490_v63 = vpop.eup %9489 }
 0x432   : > { %v2328_v57 = vmul.f32 %v9490_v63, %v10893_v13 }
 0x433   : > { %v9492_v28 = vpop.eup %9491  ;;  %8744 = vmatpush3.bf16.msra.mxu1 %v10770_v50 }
 0x434   : > { %8757 = vmatprep.subr.bf16.mxu1 %v10716_v37  ;;  %v2329_v51 = vmul.f32 %v9492_v28, %v10898_v5 }
 0x435   : > { %v2292_v30 = vpop.xlane.xlu0 %2291 }
 0x436   : > { %v2342_v14 = vpack.c.bf16 %v2329_v51, %v2328_v57 }
 0x437   : > { %v2295_v1 = vpop.xlane.xlu1 %2294 }
 0x438   : > { %8737 = vmatprep.mubr.msk.bf16.mxu0 %vm2163_vm5, %v2342_v14  ;;  %9493 = vrcp.f32 %v2295_v1 }
 0x439   : > { %v2286_v21 = vpop.xlane.xlu0 %2285 }
 0x43a   : > { %9495 = vrcp.f32 %v2286_v21 }
 0x43b   : > { %9497 = vrcp.f32 %v2292_v30  ;;  %v2289_v34 = vpop.xlane.xlu1 %2288 }
 0x43c   : > { %9499 = vrcp.f32 %v2289_v34 }
 0x43d   : > { %v2280_v7 = vpop.xlane.xlu0 %2279 }
 0x43e   : > { %9501 = vrcp.f32 %v2280_v7 }
 0x43f   : > { %v2283_v50 = vpop.xlane.xlu1 %2282 }
 0x440   : > { %9503 = vrcp.f32 %v2283_v50 }
 0x442   : > { %v9494_v4 = vpop.eup %9493 }
 0x443   : > { %v2335_v5 = vmul.f32 %v9494_v4, %v10911_v35 }
 0x444   : > { %v9496_v0 = vpop.eup %9495 }
 0x445   : > { %v9498_v13 = vpop.eup %9497  ;;  %v2332_v12 = vmul.f32 %v9496_v0, %v10916_v55 }
 0x446   : > { %v9500_v45 = vpop.eup %9499  ;;  %v2298_v3 = vpop.xlane.xlu0 %2297  ;;  %v2334_v46 = vmul.f32 %v9498_v13, %v10907_v49  ;;  %v14000_v49 = vpack.c.bf16 %v10624_v31, %v10622_v29 }
 0x447   : > { %9505 = vrcp.f32 %v2298_v3  ;;  %v2333_v52 = vmul.f32 %v9500_v45, %v10921_v36 }
 0x448   : > { %v9502_v24 = vpop.eup %9501  ;;  %v2301_v63 = vpop.xlane.xlu1 %2300  ;;  %v2345_v30 = vpack.c.bf16 %v2335_v5, %v2334_v46  ;;  %v14008_v5 = vld [vmem:[#allocation20_spill] sm:$0xff] }
 0x449   : > { %9507 = vrcp.f32 %v2301_v63  ;;  %v2344_v28 = vpack.c.bf16 %v2333_v52, %v2332_v12  ;;  %v2330_v14 = vmul.f32 %v9502_v24, %v10926_v54  ;;  %v14009_v12 = vld [vmem:[#allocation22_spill] sm:$0xff]  ;;  %v14010_v63 = vld [vmem:[#allocation21_spill] sm:$0xff] }
 0x44a   : > { %v9504_v57 = vpop.eup %9503  ;;  %v2304_v51 = vpop.xlane.xlu0 %2303 }
 0x44b   : > { %v2331_v1 = vmul.f32 %v9504_v57, %v10931_v39  ;;  %9509 = vrcp.f32 %v2304_v51  ;;  %8745 = vmatprep.mubr.msk.bf16.mxu1 %vm2163_vm5, %v2344_v28 }
 0x44c   : > { %v2307_v35 = vpop.xlane.xlu1 %2306  ;;  %8746 = vmatmul.mubr.msk.bf16.vlgmr.msra.gmra.mrb[100].mxu1 %vm2163_vm5, %v2345_v30 }
 0x44d   : > { %v2343_v55 = vpack.c.bf16 %v2331_v1, %v2330_v14  ;;  %9511 = vrcp.f32 %v2307_v35  ;;  %8758 = vmatpush3.bf16.xpose.msra.mxu1 %v10716_v37  ;;  %8761 = vmatprep.mubr.bf16.mxu1 %v14000_v49 }
 0x44e   : > { %8759 = vmatprep.subr.bf16.mxu1 %v10722_v58 }
 0x44f   : > { %8738 = vmatmul.mubr.msk.bf16.vlgmr.msra.gmra.mrb[16].mxu0 %vm2163_vm5, %v2343_v55 }
 0x450   : > { %8750 = vmatpush3.bf16.msra.mxu0 %v10774_v56 }
 0x451   : > { %v9506_v36 = vpop.eup %9505  ;;  %8751 = vmatprep.subr.bf16.mxu0 %v10779_v16 }
 0x452   : > { %v2336_v39 = vmul.f32 %v9506_v36, %v10935_v11  ;;  %v14001_v11 = vpack.c.bf16 %v10634_v48, %v10632_v47  ;;  %v14004_v47 = vpack.c.bf16 %v10658_v42, %v10656_v41  ;;  %v14005_v48 = vpack.c.bf16 %v10682_v32, %v10680_v22 }
 0x453   : > { %v9508_v54 = vpop.eup %9507 }
 0x454   : > { %8752 = vmatpush3.bf16.msra.mxu0 %v10779_v16  ;;  %v2337_v37 = vmul.f32 %v9508_v54, %v10939_v33  ;;  %v14003_v33 = vpack.c.bf16 %v10646_v15, %v10644_v9  ;;  %v14006_v9 = vpack.c.bf16 %v10694_v23, %v10692_v19  ;;  %v14007_v15 = vpack.c.bf16 %v10706_v26, %v10704_v2 }
 0x455   : > { %v9510_v21 = vpop.eup %9509  ;;  %8760 = vmatpush3.bf16.xpose.msra.mxu1 %v10722_v58  ;;  %8765 = vmatprep.subr.bf16.mxu0 %v10728_v62  ;;  %v14002_v58 = vpack.c.bf16 %v10670_v61, %v10668_v59 }
 0x456   : > { %8773 = vmatprep.subr.bf16.mxu1 %v10738_v17  ;;  %v2346_v29 = vpack.c.bf16 %v2337_v37, %v2336_v39  ;;  %v2338_v56 = vmul.f32 %v9510_v21, %v10943_v60 }
 0x457   : > { %v9512_v31 = vpop.eup %9511 }
 0x458   : > { %v2339_v34 = vmul.f32 %v9512_v31, %v10947_v27  ;;  %8753 = vmatprep.mubr.msk.bf16.mxu0 %vm2163_vm5, %v2346_v29 }
 0x45a   : > { %v2347_v16 = vpack.c.bf16 %v2339_v34, %v2338_v56 }
 0x45c   : > { %8762 = vmatmul.mubr.bf16.vlgmr.msra.gmra.mrb[104].mxu1 %v14001_v11  ;;  %8754 = vmatmul.mubr.msk.bf16.vlgmr.msra.gmra.mrb[20].mxu0 %vm2163_vm5, %v2347_v16 }
 0x45d   : > { %8766 = vmatpush3.bf16.xpose.msra.mxu0 %v10728_v62  ;;  %8774 = vmatpush3.bf16.xpose.msra.mxu1 %v10738_v17 }
 0x45e   : > { %8777 = vmatprep.mubr.bf16.mxu1 %v14002_v58  ;;  %8767 = vmatprep.subr.bf16.mxu0 %v10736_v6 }
 0x45f   : > { %8769 = vmatprep.mubr.bf16.mxu0 %v14003_v33  ;;  %8775 = vmatprep.subr.bf16.mxu1 %v10746_v20 }
 0x465   : > { %8768 = vmatpush3.bf16.xpose.msra.mxu0 %v10736_v6  ;;  %8776 = vmatpush3.bf16.xpose.msra.mxu1 %v10746_v20 }
 0x466   : > { %8781 = vmatprep.subr.bf16.mxu0 %v10748_v43  ;;  %8789 = vmatprep.subr.bf16.mxu1 %v10714_v53 }
 0x46c   : > { %8770 = vmatmul.mubr.bf16.vlgmr.msra.gmra.mrb[24].mxu0 %v14004_v47  ;;  %8778 = vmatmul.mubr.bf16.vlgmr.msra.gmra.mrb[108].mxu1 %v14005_v48 }
 0x46d   : > { %8782 = vmatpush3.bf16.xpose.msra.mxu0 %v10748_v43  ;;  %8785 = vmatprep.mubr.bf16.mxu0 %v14006_v9 }
 0x46e   : > { %8790 = vmatpush3.bf16.msra.mxu1 %v10714_v53  ;;  %8783 = vmatprep.subr.bf16.mxu0 %v10756_v8 }
 0x46f   : > { %8791 = vmatprep.subr.bf16.mxu1 %v10720_v38 }
 0x472   : > { %8792 = vmatpush3.bf16.msra.mxu1 %v10720_v38 }
 0x473   : > { %8805 = vmatprep.subr.bf16.mxu1 %v10761_v44 }
 0x475   : > { %8784 = vmatpush3.bf16.xpose.msra.mxu0 %v10756_v8 }
 0x476   : > { %8797 = vmatprep.subr.bf16.mxu0 %v10724_v10 }
 0x47c   : > { %8786 = vmatmul.mubr.bf16.vlgmr.msra.gmra.mrb[28].mxu0 %v14007_v15 }
 0x47d   : > { %8798 = vmatpush3.bf16.msra.mxu0 %v10724_v10 }
 0x47e   : > { %8799 = vmatprep.subr.bf16.mxu0 %v10952_v18 }
 0x481   : > { %8800 = vmatpush3.bf16.msra.mxu0 %v10952_v18 }
 0x482   : > { %8813 = vmatprep.subr.bf16.mxu0 %v10776_v40 }
 0x501   : > { %v11034_v41 = vpop.f32.mrb[96].mxu1 }
 0x502   : > { %v11036_v42 = vpop.f32.mrb[97].mxu1 }
 0x503   : > { %v11038_v59 = vpop.f32.mrb[98].mxu1 }
 0x504   : > { %v2569_v61 = vpack.c.bf16 %v11038_v59, %v11034_v41  ;;  %v11042_v22 = vpop.f32.mrb[99].mxu1 }
 0x505   : > { %v2568_v32 = vpack.c.bf16 %v11042_v22, %v11036_v42 }
 0x51f   : > { %v11046_v19 = vpop.f32.mrb[100].mxu1 }
 0x520   : > { %v11048_v23 = vpop.f32.mrb[101].mxu1 }
 0x521   : > { %v11050_v2 = vpop.f32.mrb[102].mxu1 }
 0x522   : > { %v2573_v26 = vpack.c.bf16 %v11050_v2, %v11046_v19  ;;  %v11054_v53 = vpop.f32.mrb[16].mxu0  ;;  %v11056_v38 = vpop.f32.mrb[103].mxu1 }
 0x523   : > { %v2572_v10 = vpack.c.bf16 %v11056_v38, %v11048_v23  ;;  %v11060_v62 = vpop.f32.mrb[17].mxu0  ;;  %v3974_v23 = vld [vmem:[%s10157_s26] sm:$0xff]  ;;  %v3975_v38 = vld [vmem:[%s10157_s26 + $0x8] sm:$0xff] }
 0x524   : > { %v11062_v6 = vpop.f32.mrb[18].mxu0 }
 0x525   : > { %v2571_v17 = vpack.c.bf16 %v11062_v6, %v11054_v53  ;;  %v11066_v20 = vpop.f32.mrb[19].mxu0  ;;  %v3978_v53 = vld [vmem:[%s10157_s26 + $0x20] sm:$0xff] }
 0x526   : > { %v2570_v43 = vpack.c.bf16 %v11066_v20, %v11060_v62  ;;  %v8205_v19 = vcombine.low %v3974_v23, %v3978_v53  ;;  %v8206_v2 = vcombine.high %v3974_v23, %v3978_v53  ;;  %v3986_v6 = vld [vmem:[%s10157_s26 + $0x60] sm:$0xff]  ;;  %v3250_v23 = vlaneseq }
 0x528   : > { %v11360_v53 = vshrl.u32 %v3250_v23, 7 }
 0x52a   : > { %14013 = vst [vmem:[#allocation20_spill] sm:$0xff] %v11360_v53 }
 0x52f   : > { %v8763_v8 = vpop.f32.mrb[104].mxu1  ;;  %v11070_v60 = vpop.f32.mrb[20].mxu0 }
 0x530   : > { %v2618_v27 = vpop.f32.mrb[105].mxu1  ;;  %v11072_v18 = vpop.f32.mrb[21].mxu0  ;;  %v11084_v3 = vadd.f32 %v8763_v8, %v14008_v5 }
 0x531   : > { %v11075_v7 = vadd.f32 %v2618_v27, %v10785_v25  ;;  %v8764_v50 = vpop.f32.mrb[106].mxu1  ;;  %v11077_v4 = vpop.f32.mrb[22].mxu0 }
 0x532   : > { %v2575_v0 = vpack.c.bf16 %v11077_v4, %v11070_v60  ;;  %v2621_v13 = vpop.f32.mrb[107].mxu1  ;;  %v11081_v45 = vpop.f32.mrb[23].mxu0  ;;  %v11094_v28 = vadd.f32 %v8764_v50, %v14010_v63  ;;  %v2786_v51 = vsel %vm2163_vm5, %v11084_v3, -inf  ;;  %v3994_v4 = vld [vmem:[%s10157_s26 + $0xa0] sm:$0xff] }
 0x533   : > { %v11087_v52 = vadd.f32 %v2621_v13, %v14009_v12  ;;  %v2574_v24 = vpack.c.bf16 %v11081_v45, %v11072_v18  ;;  %v2780_v46 = vsel %vm2163_vm5, %v11075_v7, -inf }
 0x534   : > { %2781 = vmax.xlane.f32.xlu0 %v2780_v46  ;;  %v2789_v30 = vsel %vm2163_vm5, %v11094_v28, -inf }
 0x535   : > { %v2783_v57 = vsel %vm2163_vm5, %v11087_v52, -inf }
 0x536   : > { %2784 = vmax.xlane.f32.xlu1 %v2783_v57 }
 0x538   : > { %2787 = vmax.xlane.f32.xlu0 %v2786_v51 }
 0x53a   : > { %2790 = vmax.xlane.f32.xlu1 %v2789_v30 }
 0x53f   : > { %v8771_v14 = vpop.f32.mrb[24].mxu0  ;;  %v8779_v1 = vpop.f32.mrb[108].mxu1 }
 0x540   : > { %v2667_v35 = vpop.f32.mrb[25].mxu0  ;;  %v2716_v55 = vpop.f32.mrb[109].mxu1  ;;  %v11106_v21 = vadd.f32 %v8771_v14, %v14008_v5  ;;  %v11129_v47 = vadd.f32 %v8779_v1, %v14008_v5 }
 0x541   : > { %v11103_v49 = vadd.f32 %v2667_v35, %v10785_v25  ;;  %v8772_v36 = vpop.f32.mrb[26].mxu0  ;;  %v8780_v54 = vpop.f32.mrb[110].mxu1  ;;  %v11119_v16 = vadd.f32 %v2716_v55, %v10785_v25 }
 0x542   : > { %v2670_v39 = vpop.f32.mrb[27].mxu0  ;;  %v2719_v37 = vpop.f32.mrb[111].mxu1  ;;  %v11114_v56 = vadd.f32 %v8772_v36, %v14010_v63  ;;  %v2798_v11 = vsel %vm2163_vm5, %v11106_v21, -inf  ;;  %v11134_v9 = vadd.f32 %v8780_v54, %v14010_v63  ;;  %v2810_v27 = vsel %vm2163_vm5, %v11129_v47, -inf }
 0x543   : > { %v11109_v29 = vadd.f32 %v2670_v39, %v14009_v12  ;;  %v2792_v31 = vsel %vm2163_vm5, %v11103_v49, -inf  ;;  %v11124_v58 = vadd.f32 %v2719_v37, %v14009_v12  ;;  %v2804_v48 = vsel %vm2163_vm5, %v11119_v16, -inf }
 0x544   : > { %2793 = vmax.xlane.f32.xlu0 %v2792_v31  ;;  %v2801_v33 = vsel %vm2163_vm5, %v11114_v56, -inf  ;;  %v2813_v57 = vsel %vm2163_vm5, %v11134_v9, -inf }
 0x545   : > { %v2795_v34 = vsel %vm2163_vm5, %v11109_v29, -inf  ;;  %v2807_v15 = vsel %vm2163_vm5, %v11124_v58, -inf }
 0x546   : > { %2796 = vmax.xlane.f32.xlu1 %v2795_v34 }
 0x548   : > { %2799 = vmax.xlane.f32.xlu0 %v2798_v11 }
 0x54a   : > { %2802 = vmax.xlane.f32.xlu1 %v2801_v33 }
 0x54c   : > { %2805 = vmax.xlane.f32.xlu0 %v2804_v48 }
 0x54e   : > { %2808 = vmax.xlane.f32.xlu1 %v2807_v15 }
 0x54f   : > { %v8787_v8 = vpop.f32.mrb[28].mxu0 }
 0x550   : > { %v2765_v50 = vpop.f32.mrb[29].mxu0  ;;  %2811 = vmax.xlane.f32.xlu0 %v2810_v27  ;;  %v11146_v30 = vadd.f32 %v8787_v8, %v14008_v5 }
 0x551   : > { %v11141_v13 = vadd.f32 %v2765_v50, %v10785_v25  ;;  %v8788_v46 = vpop.f32.mrb[30].mxu0 }
 0x552   : > { %v2768_v51 = vpop.f32.mrb[31].mxu0  ;;  %2814 = vmax.xlane.f32.xlu1 %v2813_v57  ;;  %v11154_v35 = vadd.f32 %v8788_v46, %v14010_v63  ;;  %v2822_v55 = vsel %vm2163_vm5, %v11146_v30, -inf }
 0x553   : > { %v11149_v14 = vadd.f32 %v2768_v51, %v14009_v12  ;;  %v2816_v1 = vsel %vm2163_vm5, %v11141_v13, -inf }
 0x554   : > { %2817 = vmax.xlane.f32.xlu0 %v2816_v1  ;;  %v2825_v5 = vsel %vm2163_vm5, %v11154_v35, -inf }
 0x555   : > { %v2819_v25 = vsel %vm2163_vm5, %v11149_v14, -inf }
 0x556   : > { %2820 = vmax.xlane.f32.xlu1 %v2819_v25 }
 0x558   : > { %2823 = vmax.xlane.f32.xlu0 %v2822_v55 }
 0x55a   : > { %2826 = vmax.xlane.f32.xlu1 %v2825_v5 }
 0x5c1   : > { %v2782_v12 = vpop.xlane.xlu0 %2781 }
 0x5c2   : > { %v2828_v36 = vsub.f32 %v11075_v7, %v2782_v12 }
 0x5c3   : > { %v2785_v54 = vpop.xlane.xlu1 %2784 }
 0x5c4   : > { %v2844_v39 = vmul.f32 1.442695, %v2828_v36  ;;  %v2829_v63 = vsub.f32 %v11087_v52, %v2785_v54 }
 0x5c5   : > { %v2788_v37 = vpop.xlane.xlu0 %2787 }
 0x5c6   : > { %9513 = vpow2.f32 %v2844_v39  ;;  %v2846_v31 = vmul.f32 1.442695, %v2829_v63  ;;  %v2830_v34 = vsub.f32 %v11084_v3, %v2788_v37 }
 0x5c7   : > { %v2791_v11 = vpop.xlane.xlu1 %2790 }
 0x5c8   : > { %9515 = vpow2.f32 %v2846_v31  ;;  %v2848_v33 = vmul.f32 1.442695, %v2830_v34  ;;  %v2831_v48 = vsub.f32 %v11094_v28, %v2791_v11 }
 0x5ca   : > { %9517 = vpow2.f32 %v2848_v33  ;;  %v2850_v15 = vmul.f32 1.442695, %v2831_v48 }
 0x5cc   : > { %9519 = vpow2.f32 %v2850_v15 }
 0x5d0   : > { %v11166_v8 = vpop.eup %9513 }
 0x5d1   : > { %v2794_v7 = vpop.xlane.xlu0 %2793  ;;  %v2876_v27 = vsel %vm2163_vm5, %v11166_v8, 0.0 }
 0x5d2   : > { %v11170_v52 = vpop.eup %9515  ;;  %v2832_v50 = vsub.f32 %v11103_v49, %v2794_v7  ;;  %2877 = vadd.xlane.f32.xlu0 %v2876_v27 }
 0x5d3   : > { %v2797_v3 = vpop.xlane.xlu1 %2796  ;;  %v2879_v46 = vsel %vm2163_vm5, %v11170_v52, 0.0 }
 0x5d4   : > { %v11175_v57 = vpop.eup %9517  ;;  %v2852_v28 = vmul.f32 1.442695, %v2832_v50  ;;  %v2833_v51 = vsub.f32 %v11109_v29, %v2797_v3  ;;  %2880 = vadd.xlane.f32.xlu1 %v2879_v46 }
 0x5d5   : > { %v2800_v1 = vpop.xlane.xlu0 %2799  ;;  %v2882_v25 = vsel %vm2163_vm5, %v11175_v57, 0.0 }
 0x5d6   : > { %v11180_v55 = vpop.eup %9519  ;;  %9521 = vpow2.f32 %v2852_v28  ;;  %v2854_v5 = vmul.f32 1.442695, %v2833_v51  ;;  %v2834_v49 = vsub.f32 %v11106_v21, %v2800_v1  ;;  %2883 = vadd.xlane.f32.xlu0 %v2882_v25 }
 0x5d7   : > { %v2803_v12 = vpop.xlane.xlu1 %2802  ;;  %v2885_v36 = vsel %vm2163_vm5, %v11180_v55, 0.0 }
 0x5d8   : > { %9523 = vpow2.f32 %v2854_v5  ;;  %v2856_v54 = vmul.f32 1.442695, %v2834_v49  ;;  %v2835_v29 = vsub.f32 %v11114_v56, %v2803_v12  ;;  %2886 = vadd.xlane.f32.xlu1 %v2885_v36 }
 0x5d9   : > { %v2806_v39 = vpop.xlane.xlu0 %2805 }
 0x5da   : > { %9525 = vpow2.f32 %v2856_v54  ;;  %v2858_v63 = vmul.f32 1.442695, %v2835_v29  ;;  %v2836_v37 = vsub.f32 %v11119_v16, %v2806_v39 }
 0x5db   : > { %v2809_v31 = vpop.xlane.xlu1 %2808 }
 0x5dc   : > { %9527 = vpow2.f32 %v2858_v63  ;;  %v2860_v34 = vmul.f32 1.442695, %v2836_v37  ;;  %v2837_v21 = vsub.f32 %v11124_v58, %v2809_v31 }
 0x5dd   : > { %v2812_v11 = vpop.xlane.xlu0 %2811 }
 0x5de   : > { %9529 = vpow2.f32 %v2860_v34  ;;  %v2862_v33 = vmul.f32 1.442695, %v2837_v21  ;;  %v2838_v48 = vsub.f32 %v11129_v47, %v2812_v11 }
 0x5df   : > { %v2815_v15 = vpop.xlane.xlu1 %2814 }
 0x5e0   : > { %v11189_v7 = vpop.eup %9521  ;;  %9531 = vpow2.f32 %v2862_v33  ;;  %v2864_v56 = vmul.f32 1.442695, %v2838_v48  ;;  %v2839_v27 = vsub.f32 %v11134_v9, %v2815_v15 }
 0x5e1   : > { %v2818_v50 = vpop.xlane.xlu0 %2817  ;;  %v2888_v16 = vsel %vm2163_vm5, %v11189_v7, 0.0 }
 0x5e2   : > { %v11194_v3 = vpop.eup %9523  ;;  %9533 = vpow2.f32 %v2864_v56  ;;  %v2866_v58 = vmul.f32 1.442695, %v2839_v27  ;;  %v2840_v46 = vsub.f32 %v11141_v13, %v2818_v50  ;;  %2889 = vadd.xlane.f32.xlu0 %v2888_v16 }
 0x5e3   : > { %v2821_v28 = vpop.xlane.xlu1 %2820  ;;  %v2891_v47 = vsel %vm2163_vm5, %v11194_v3, 0.0 }
 0x5e4   : > { %v11199_v51 = vpop.eup %9525  ;;  %9535 = vpow2.f32 %v2866_v58  ;;  %v2868_v1 = vmul.f32 1.442695, %v2840_v46  ;;  %v2841_v9 = vsub.f32 %v11149_v14, %v2821_v28  ;;  %2892 = vadd.xlane.f32.xlu1 %v2891_v47 }
 0x5e5   : > { %v2824_v25 = vpop.xlane.xlu0 %2823  ;;  %v2894_v5 = vsel %vm2163_vm5, %v11199_v51, 0.0 }
 0x5e6   : > { %v11204_v49 = vpop.eup %9527  ;;  %9537 = vpow2.f32 %v2868_v1  ;;  %v2870_v13 = vmul.f32 1.442695, %v2841_v9  ;;  %v2842_v12 = vsub.f32 %v11146_v30, %v2824_v25  ;;  %2895 = vadd.xlane.f32.xlu0 %v2894_v5 }
 0x5e7   : > { %v2827_v36 = vpop.xlane.xlu1 %2826  ;;  %v2897_v54 = vsel %vm2163_vm5, %v11204_v49, 0.0 }
 0x5e8   : > { %v11209_v29 = vpop.eup %9529  ;;  %9539 = vpow2.f32 %v2870_v13  ;;  %v2872_v14 = vmul.f32 1.442695, %v2842_v12  ;;  %v2843_v39 = vsub.f32 %v11154_v35, %v2827_v36  ;;  %2898 = vadd.xlane.f32.xlu1 %v2897_v54 }
 0x5e9   : > { %v2900_v63 = vsel %vm2163_vm5, %v11209_v29, 0.0 }
 0x5ea   : > { %v11214_v37 = vpop.eup %9531  ;;  %9541 = vpow2.f32 %v2872_v14  ;;  %v2874_v31 = vmul.f32 1.442695, %v2843_v39  ;;  %2901 = vadd.xlane.f32.xlu0 %v2900_v63 }
 0x5eb   : > { %v2903_v30 = vsel %vm2163_vm5, %v11214_v37, 0.0 }
 0x5ec   : > { %v11218_v34 = vpop.eup %9533  ;;  %9543 = vpow2.f32 %v2874_v31  ;;  %2904 = vadd.xlane.f32.xlu1 %v2903_v30 }
 0x5ed   : > { %v2906_v21 = vsel %vm2163_vm5, %v11218_v34, 0.0 }
 0x5ee   : > { %v11222_v35 = vpop.eup %9535  ;;  %2907 = vadd.xlane.f32.xlu0 %v2906_v21 }
 0x5ef   : > { %v2909_v11 = vsel %vm2163_vm5, %v11222_v35, 0.0 }
 0x5f0   : > { %v11226_v33 = vpop.eup %9537  ;;  %2910 = vadd.xlane.f32.xlu1 %v2909_v11 }
 0x5f1   : > { %v2912_v48 = vsel %vm2163_vm5, %v11226_v33, 0.0 }
 0x5f2   : > { %v11230_v15 = vpop.eup %9539  ;;  %2913 = vadd.xlane.f32.xlu0 %v2912_v48  ;;  %v9211_v48 = vld [vmem:[%s10170_s23 + $0x4] ss:$8 sps:$4 sm:$0xff]  }
 0x5f3   : > { %v2915_v56 = vsel %vm2163_vm5, %v11230_v15, 0.0 }
 0x5f4   : > { %v11234_v27 = vpop.eup %9541  ;;  %2916 = vadd.xlane.f32.xlu1 %v2915_v56 }
 0x5f5   : > { %v2918_v50 = vsel %vm2163_vm5, %v11234_v27, 0.0 }
 0x5f6   : > { %v11238_v16 = vpop.eup %9543  ;;  %2919 = vadd.xlane.f32.xlu0 %v2918_v50 }
 0x5f7   : > { %v2921_v58 = vsel %vm2163_vm5, %v11238_v16, 0.0 }
 0x5f8   : > { %2922 = vadd.xlane.f32.xlu1 %v2921_v58 }
 0x65f   : > { %v2878_v46 = vpop.xlane.xlu0 %2877 }
 0x660   : > { %9545 = vrcp.f32 %v2878_v46 }
 0x661   : > { %v2881_v28 = vpop.xlane.xlu1 %2880 }
 0x662   : > { %9547 = vrcp.f32 %v2881_v28 }
 0x663   : > { %v2884_v47 = vpop.xlane.xlu0 %2883 }
 0x664   : > { %9549 = vrcp.f32 %v2884_v47 }
 0x665   : > { %v2887_v1 = vpop.xlane.xlu1 %2886 }
 0x666   : > { %9551 = vrcp.f32 %v2887_v1 }
 0x66a   : > { %v9546_v9 = vpop.eup %9545 }
 0x66b   : > { %v2940_v5 = vmul.f32 %v9546_v9, %v11166_v8 }
 0x66c   : > { %v9548_v25 = vpop.eup %9547 }
 0x66d   : > { %v2941_v13 = vmul.f32 %v9548_v25, %v11170_v52  ;;  %v14011_v52 = vld [vmem:[#allocation18_spill] sm:$0xff] }
 0x66e   : > { %v9550_v12 = vpop.eup %9549 }
 0x66f   : > { %v2890_v36 = vpop.xlane.xlu0 %2889  ;;  %v2956_v54 = vpack.c.bf16 %v2941_v13, %v2940_v5  ;;  %v2942_v39 = vmul.f32 %v9550_v12, %v11175_v57 }
 0x670   : > { %v9552_v14 = vpop.eup %9551  ;;  %9553 = vrcp.f32 %v2890_v36 }
 0x671   : > { %v2943_v63 = vmul.f32 %v9552_v14, %v11180_v55  ;;  %v2893_v31 = vpop.xlane.xlu1 %2892  ;;  %8793 = vmatprep.mubr.msk.bf16.mxu1 %vm2163_vm5, %v2956_v54 }
 0x672   : > { %9555 = vrcp.f32 %v2893_v31 }
 0x673   : > { %v2896_v30 = vpop.xlane.xlu0 %2895  ;;  %v2957_v21 = vpack.c.bf16 %v2943_v63, %v2942_v39 }
 0x674   : > { %9557 = vrcp.f32 %v2896_v30 }
 0x675   : > { %v2899_v8 = vpop.xlane.xlu1 %2898  ;;  %8794 = vmatmul.mubr.msk.bf16.vlgmr.msra.gmra.mrb[112].mxu1 %vm2163_vm5, %v2957_v21 }
 0x676   : > { %9559 = vrcp.f32 %v2899_v8  ;;  %8806 = vmatpush3.bf16.msra.mxu1 %v10761_v44 }
 0x677   : > { %8807 = vmatprep.subr.bf16.mxu1 %v14011_v52  ;;  %v2902_v11 = vpop.xlane.xlu0 %2901 }
 0x678   : > { %9561 = vrcp.f32 %v2902_v11 }
 0x679   : > { %v2905_v57 = vpop.xlane.xlu1 %2904 }
 0x67a   : > { %v9554_v55 = vpop.eup %9553  ;;  %9563 = vrcp.f32 %v2905_v57  ;;  %8808 = vmatpush3.bf16.msra.mxu1 %v14011_v52  ;;  %v9214_v52 = vld [vmem:[%s10170_s23 + $0x14] ss:$8 sps:$4 sm:$0xff]  }
 0x67b   : > { %v2908_v56 = vpop.xlane.xlu0 %2907  ;;  %3420 = vmatprep.subr.bf16.mxu1 %v9211_v48  ;;  %v2944_v46 = vmul.f32 %v9554_v55, %v11189_v7  ;;  %v9217_v55 = vld [vmem:[%s10170_s23 + $0x24] ss:$8 sps:$4 sm:$0xff]  }
 0x67c   : > { %v9556_v50 = vpop.eup %9555  ;;  %9565 = vrcp.f32 %v2908_v56 }
 0x67d   : > { %v2911_v58 = vpop.xlane.xlu1 %2910  ;;  %v2945_v28 = vmul.f32 %v9556_v50, %v11194_v3 }
 0x67e   : > { %v9558_v44 = vpop.eup %9557  ;;  %9567 = vrcp.f32 %v2911_v58 }
 0x67f   : > { %v2914_v47 = vpop.xlane.xlu0 %2913  ;;  %v2958_v1 = vpack.c.bf16 %v2945_v28, %v2944_v46  ;;  %v2946_v25 = vmul.f32 %v9558_v44, %v11199_v51  ;;  %v9220_v46 = vld [vmem:[%s10170_s23 + $0x34] ss:$8 sps:$4 sm:$0xff]   ;;  %v9218_v28 = vld [vmem:[%s10170_s23 + $0x30] ss:$8 sps:$4 sm:$0xff]  }
 0x680   : > { %v9560_v9 = vpop.eup %9559  ;;  %9569 = vrcp.f32 %v2914_v47  ;;  %v9226_v44 = vld [vmem:[%s10170_s23 + $0x54] ss:$8 sps:$4 sm:$0xff]   ;;  %v9224_v47 = vld [vmem:[%s10170_s23 + $0x50] ss:$8 sps:$4 sm:$0xff]  }
 0x681   : > { %v2947_v5 = vmul.f32 %v9560_v9, %v11204_v49  ;;  %v2917_v13 = vpop.xlane.xlu1 %2916  ;;  %8801 = vmatprep.mubr.msk.bf16.mxu0 %vm2163_vm5, %v2958_v1  ;;  %v14012_v49 = vld [vmem:[#allocation19_spill] sm:$0xff] }
 0x682   : > { %v9562_v12 = vpop.eup %9561  ;;  %9571 = vrcp.f32 %v2917_v13  ;;  %v9229_v1 = vld [vmem:[%s10170_s23 + $0x64] ss:$8 sps:$4 sm:$0xff]   ;;  %v9227_v9 = vld [vmem:[%s10170_s23 + $0x60] ss:$8 sps:$4 sm:$0xff]  }
 0x683   : > { %v2920_v36 = vpop.xlane.xlu0 %2919  ;;  %v2959_v54 = vpack.c.bf16 %v2947_v5, %v2946_v25  ;;  %v2948_v14 = vmul.f32 %v9562_v12, %v11209_v29  ;;  %v9209_v29 = vld [vmem:[%s10170_s23] ss:$8 sps:$4 sm:$0xff]   ;;  %v9232_v25 = vld [vmem:[%s10170_s23 + $0x74] ss:$8 sps:$4 sm:$0xff]   ;;  %v9230_v5 = vld [vmem:[%s10170_s23 + $0x70] ss:$8 sps:$4 sm:$0xff]  }
 0x684   : > { %v9564_v7 = vpop.eup %9563  ;;  %9573 = vrcp.f32 %v2920_v36  ;;  %v9235_v13 = vld [vmem:[%s10170_s23 + $0x84] ss:$8 sps:$4 sm:$0xff]   ;;  %v9233_v12 = vld [vmem:[%s10170_s23 + $0x80] ss:$8 sps:$4 sm:$0xff]   ;;  %v9238_v36 = vld [vmem:[%s10170_s23 + $0x94] ss:$8 sps:$4 sm:$0xff]  }
 0x685   : > { %v2923_v3 = vpop.xlane.xlu1 %2922  ;;  %8802 = vmatmul.mubr.msk.bf16.vlgmr.msra.gmra.mrb[32].mxu0 %vm2163_vm5, %v2959_v54  ;;  %v2949_v51 = vmul.f32 %v9564_v7, %v11214_v37  ;;  %v9236_v54 = vld [vmem:[%s10170_s23 + $0x90] ss:$8 sps:$4 sm:$0xff]   ;;  %v9241_v7 = vld [vmem:[%s10170_s23 + $0xa4] ss:$8 sps:$4 sm:$0xff]  }
 0x686   : > { %v9566_v39 = vpop.eup %9565  ;;  %9575 = vrcp.f32 %v2923_v3  ;;  %8814 = vmatpush3.bf16.msra.mxu0 %v10776_v40  ;;  %v9239_v3 = vld [vmem:[%s10170_s23 + $0xa0] ss:$8 sps:$4 sm:$0xff]  }
 0x687   : > { %8815 = vmatprep.subr.bf16.mxu0 %v14012_v49  ;;  %v2960_v63 = vpack.c.bf16 %v2949_v51, %v2948_v14  ;;  %v2950_v30 = vmul.f32 %v9566_v39, %v11218_v34  ;;  %v9244_v14 = vld [vmem:[%s10170_s23 + $0xb4] ss:$8 sps:$4 sm:$0xff]   ;;  %v9242_v51 = vld [vmem:[%s10170_s23 + $0xb0] ss:$8 sps:$4 sm:$0xff]   ;;  %v9247_v39 = vld [vmem:[%s10170_s23 + $0xc4] ss:$8 sps:$4 sm:$0xff]  }
 0x688   : > { %v9568_v31 = vpop.eup %9567 }
 0x689   : > { %v2951_v21 = vmul.f32 %v9568_v31, %v11222_v35  ;;  %8809 = vmatprep.mubr.msk.bf16.mxu1 %vm2163_vm5, %v2960_v63  ;;  %v9212_v35 = vld [vmem:[%s10170_s23 + $0x10] ss:$8 sps:$4 sm:$0xff]   ;;  %v9250_v63 = vld [vmem:[%s10170_s23 + $0xd4] ss:$8 sps:$4 sm:$0xff]  }
 0x68a   : > { %v9570_v8 = vpop.eup %9569  ;;  %8816 = vmatpush3.bf16.msra.mxu0 %v14012_v49  ;;  %v9245_v49 = vld [vmem:[%s10170_s23 + $0xc0] ss:$8 sps:$4 sm:$0xff]   ;;  %v9248_v31 = vld [vmem:[%s10170_s23 + $0xd0] ss:$8 sps:$4 sm:$0xff]  }
 0x68b   : > { %v2961_v37 = vpack.c.bf16 %v2951_v21, %v2950_v30  ;;  %v2952_v11 = vmul.f32 %v9570_v8, %v11226_v33  ;;  %v9215_v33 = vld [vmem:[%s10170_s23 + $0x20] ss:$8 sps:$4 sm:$0xff]   ;;  %v9253_v30 = vld [vmem:[%s10170_s23 + $0xe4] ss:$8 sps:$4 sm:$0xff]   ;;  %v9256_v8 = vld [vmem:[%s10170_s23 + $0xf4] ss:$8 sps:$4 sm:$0xff]   ;;  %4784 = vmatprep.subr.bf16.mxu0 %v8206_v2 }
 0x68c   : > { %v9572_v40 = vpop.eup %9571  ;;  %v9251_v21 = vld [vmem:[%s10170_s23 + $0xe0] ss:$8 sps:$4 sm:$0xff]   ;;  %v11371_v2 = vsub.s32 1, %v11360_v53 }
 0x68d   : > { %8810 = vmatmul.mubr.msk.bf16.vlgmr.msra.gmra.mrb[116].mxu1 %vm2163_vm5, %v2961_v37  ;;  %v2953_v34 = vmul.f32 %v9572_v40, %v11230_v15 }
 0x68e   : > { %v9574_v48 = vpop.eup %9573  ;;  %3421 = vmatpush1.bf16.msra.mxu1 %v9209_v29  ;;  %v9254_v29 = vld [vmem:[%s10170_s23 + $0xf0] ss:$8 sps:$4 sm:$0xff]   ;;  %14016 = vst [vmem:[#allocation21_spill] sm:$0xff] %v11371_v2 }
 0x68f   : > { %v2962_v57 = vpack.c.bf16 %v2953_v34, %v2952_v11  ;;  %3422 = vmatprep.subr.bf16.mxu1 %v9214_v52  ;;  %v2954_v50 = vmul.f32 %v9574_v48, %v11234_v27  ;;  %v9223_v27 = vld [vmem:[%s10170_s23 + $0x44] ss:$8 sps:$4 sm:$0xff]  }
 0x690   : > { %v9576_v56 = vpop.eup %9575 }
 0x691   : > { %v2955_v58 = vmul.f32 %v9576_v56, %v11238_v16  ;;  %8817 = vmatprep.mubr.msk.bf16.mxu0 %vm2163_vm5, %v2962_v57  ;;  %v9221_v16 = vld [vmem:[%s10170_s23 + $0x40] ss:$8 sps:$4 sm:$0xff]  }
 0x692   : > { %3423 = vmatpush1.bf16.msra.mxu1 %v9212_v35 }
 0x693   : > { %v2963_v15 = vpack.c.bf16 %v2955_v58, %v2954_v50  ;;  %3424 = vmatprep.subr.bf16.mxu1 %v9217_v55 }
 0x695   : > { %8818 = vmatmul.mubr.msk.bf16.vlgmr.msra.gmra.mrb[36].mxu0 %vm2163_vm5, %v2963_v15 }
 0x696   : > { %3425 = vmatpush1.bf16.msra.mxu1 %v9215_v33  ;;  %4785 = vmatpush1.bf16.msra.mxu0 %v8205_v19  ;;  %v3248_v19 = vld [vmem:[%s14015_s15] sm:$0x3] }
 0x697   : > { %3426 = vmatprep.subr.bf16.mxu1 %v9220_v46 }
 0x69a   : > { %3427 = vmatpush1.bf16.msra.mxu1 %v9218_v28  ;;  %v3987_v28 = vld [vmem:[%s10157_s26 + $0x68] sm:$0xff] }
 0x69b   : > { %3428 = vmatprep.subr.bf16.mxu1 %v9223_v27  ;;  %v3990_v27 = vld [vmem:[%s10157_s26 + $0x80] sm:$0xff] }
 0x69e   : > { %3429 = vmatpush1.bf16.msra.mxu1 %v9221_v16  ;;  %v3995_v16 = vld [vmem:[%s10157_s26 + $0xa8] sm:$0xff] }
 0x69f   : > { %3430 = vmatprep.subr.bf16.mxu1 %v9226_v44 }
 0x6a2   : > { %3431 = vmatpush1.bf16.msra.mxu1 %v9224_v47 }
 0x6a3   : > { %3432 = vmatprep.subr.bf16.mxu1 %v9229_v1  ;;  %v8222_v1 = vcombine.high %v3990_v27, %v3994_v4 }
 0x6a6   : > { %3433 = vmatpush1.bf16.msra.mxu1 %v9227_v9 }
 0x6a7   : > { %3434 = vmatprep.subr.bf16.mxu1 %v9232_v25  ;;  %v3998_v25 = vld [vmem:[%s10157_s26 + $0xc0] sm:$0xff] }
 0x6aa   : > { %3435 = vmatpush1.bf16.msra.mxu1 %v9230_v5  ;;  %v4002_v5 = vld [vmem:[%s10157_s26 + $0xe0] sm:$0xff] }
 0x6ab   : > { %3436 = vmatprep.subr.bf16.mxu1 %v9235_v13  ;;  %v3999_v13 = vld [vmem:[%s10157_s26 + $0xc8] sm:$0xff] }
 0x6ae   : > { %3437 = vmatpush1.bf16.msra.mxu1 %v9233_v12  ;;  %v4003_v12 = vld [vmem:[%s10157_s26 + $0xe8] sm:$0xff] }
 0x6af   : > { %3438 = vmatprep.subr.bf16.mxu1 %v9238_v36  ;;  %v8221_v36 = vcombine.low %v3990_v27, %v3994_v4 }
 0x6b2   : > { %3439 = vmatpush1.bf16.msra.mxu1 %v9236_v54 }
 0x6b3   : > { %3440 = vmatprep.subr.bf16.mxu1 %v9241_v7  ;;  %v8230_v7 = vcombine.high %v3998_v25, %v4002_v5 }
 0x6b6   : > { %3441 = vmatpush1.bf16.msra.mxu1 %v9239_v3  ;;  %v8232_v3 = vcombine.high %v3999_v13, %v4003_v12 }
 0x6b7   : > { %3442 = vmatprep.subr.bf16.mxu1 %v9244_v14  ;;  %v4006_v14 = vld [vmem:[%s10157_s26 + $0x100] sm:$0xff] }
 0x6ba   : > { %3443 = vmatpush1.bf16.msra.mxu1 %v9242_v51  ;;  %v4010_v51 = vld [vmem:[%s10157_s26 + $0x120] sm:$0xff] }
 0x6bb   : > { %3444 = vmatprep.subr.bf16.mxu1 %v9247_v39  ;;  %v4007_v39 = vld [vmem:[%s10157_s26 + $0x108] sm:$0xff] }
 0x6be   : > { %3445 = vmatpush1.bf16.msra.mxu1 %v9245_v49  ;;  %v4011_v49 = vld [vmem:[%s10157_s26 + $0x128] sm:$0xff] }
 0x6bf   : > { %3446 = vmatprep.subr.bf16.mxu1 %v9250_v63  ;;  %v8229_v63 = vcombine.low %v3998_v25, %v4002_v5 }
 0x6c2   : > { %3447 = vmatpush1.bf16.msra.mxu1 %v9248_v31  ;;  %v8231_v31 = vcombine.low %v3999_v13, %v4003_v12 }
 0x6c3   : > { %3448 = vmatprep.subr.bf16.mxu1 %v9253_v30  ;;  %v8238_v30 = vcombine.high %v4006_v14, %v4010_v51 }
 0x6c6   : > { %3449 = vmatpush1.bf16.msra.mxu1 %v9251_v21  ;;  %v8240_v21 = vcombine.high %v4007_v39, %v4011_v49 }
 0x6c7   : > { %3450 = vmatprep.subr.bf16.mxu1 %v9256_v8  ;;  %v4014_v8 = vld [vmem:[%s10157_s26 + $0x140] sm:$0xff] }
 0x6ca   : > { %3451 = vmatpush1.bf16.msra.mxu1 %v9254_v29  ;;  %v4018_v29 = vld [vmem:[%s10157_s26 + $0x160] sm:$0xff] }
 0x748   : > { %v8795_v37 = vpop.f32.mrb[112].mxu1 }
 0x749   : > { %v3004_v52 = vpop.f32.mrb[113].mxu1 }
 0x74a   : > { %v8796_v40 = vpop.f32.mrb[114].mxu1 }
 0x74b   : > { %v3185_v11 = vpack.c.bf16 %v8796_v40, %v8795_v37  ;;  %v3007_v34 = vpop.f32.mrb[115].mxu1  ;;  %v4015_v37 = vld [vmem:[%s10157_s26 + $0x148] sm:$0xff]  ;;  %v8237_v40 = vcombine.low %v4006_v14, %v4010_v51 }
 0x74c   : > { %v3184_v48 = vpack.c.bf16 %v3007_v34, %v3004_v52  ;;  %v4019_v52 = vld [vmem:[%s10157_s26 + $0x168] sm:$0xff]  ;;  %v8246_v34 = vcombine.high %v4014_v8, %v4018_v29 }
 0x74e   : > { %3452 = vmatprep.mubr.bf16.mxu1 %v3184_v48  ;;  %v8248_v48 = vcombine.high %v4015_v37, %v4019_v52 }
 0x74f   : > { %3453 = vmatmul.mubr.bf16.vlgmr.msra.gmra.mrb[120].mxu1 %v2568_v32 }
 0x750   : > { %3462 = vmatprep.mubr.bf16.mxu1 %v3185_v11  ;;  %v8239_v11 = vcombine.low %v4007_v39, %v4011_v49 }
 0x757   : > { %3463 = vmatmul.mubr.bf16.gmra.mrb[124].mxu1 %v2569_v61 }
 0x758   : > { %v8803_v35 = vpop.f32.mrb[32].mxu0 }
 0x759   : > { %v3059_v57 = vpop.f32.mrb[33].mxu0 }
 0x75a   : > { %v8804_v55 = vpop.f32.mrb[34].mxu0 }
 0x75b   : > { %v3187_v56 = vpack.c.bf16 %v8804_v55, %v8803_v35  ;;  %v3062_v50 = vpop.f32.mrb[35].mxu0  ;;  %v4022_v35 = vld [vmem:[%s10157_s26 + $0x180] sm:$0xff]  ;;  %v4023_v55 = vld [vmem:[%s10157_s26 + $0x188] sm:$0xff] }
 0x75c   : > { %v3186_v58 = vpack.c.bf16 %v3062_v50, %v3059_v57  ;;  %v4026_v57 = vld [vmem:[%s10157_s26 + $0x1a0] sm:$0xff]  ;;  %v8245_v50 = vcombine.low %v4014_v8, %v4018_v29  ;;  %v9646_v29 = vld [vmem:[#allocation2 + $0x28] sm:$0xff] }
 0x75e   : > { %3472 = vmatprep.mubr.bf16.mxu1 %v3186_v58  ;;  %v8247_v58 = vcombine.low %v4015_v37, %v4019_v52 }
 0x75f   : > { %3473 = vmatmul.mubr.bf16.gmra.mrb[128].mxu1 %v2570_v43 }
 0x760   : > { %v8811_v33 = vpop.f32.mrb[116].mxu1  ;;  %3482 = vmatprep.mubr.bf16.mxu1 %v3187_v56  ;;  %v4027_v56 = vld [vmem:[%s10157_s26 + $0x1a8] sm:$0xff] }
 0x761   : > { %v3114_v42 = vpop.f32.mrb[117].mxu1 }
 0x762   : > { %v8812_v22 = vpop.f32.mrb[118].mxu1 }
 0x763   : > { %v3189_v32 = vpack.c.bf16 %v8812_v22, %v8811_v33  ;;  %v3117_v15 = vpop.f32.mrb[119].mxu1  ;;  %v8254_v33 = vcombine.high %v4022_v35, %v4026_v57  ;;  %v4030_v22 = vld [vmem:[%s10157_s26 + $0x1c0] sm:$0xff] }
 0x764   : > { %v3188_v46 = vpack.c.bf16 %v3117_v15, %v3114_v42  ;;  %v8256_v42 = vcombine.high %v4023_v55, %v4027_v56  ;;  %v4031_v15 = vld [vmem:[%s10157_s26 + $0x1c8] sm:$0xff] }
 0x767   : > { %3483 = vmatmul.mubr.bf16.gmra.mrb[132].mxu1 %v2571_v17 }
 0x768   : > { %v8819_v41 = vpop.f32.mrb[36].mxu0  ;;  %3492 = vmatprep.mubr.bf16.mxu1 %v3188_v46  ;;  %v4035_v46 = vld [vmem:[%s10157_s26 + $0x1e8] sm:$0xff] }
 0x769   : > { %v3169_v59 = vpop.f32.mrb[37].mxu0 }
 0x76a   : > { %v8820_v61 = vpop.f32.mrb[38].mxu0 }
 0x76b   : > { %v3191_v62 = vpack.c.bf16 %v8820_v61, %v8819_v41  ;;  %v3172_v20 = vpop.f32.mrb[39].mxu0  ;;  %v8253_v41 = vcombine.low %v4022_v35, %v4026_v57 }
 0x76c   : > { %v3190_v43 = vpack.c.bf16 %v3172_v20, %v3169_v59  ;;  %v8255_v59 = vcombine.low %v4023_v55, %v4027_v56 }
 0x76f   : > { %3493 = vmatmul.mubr.bf16.gmra.mrb[136].mxu1 %v2572_v10  ;;  %v3982_v10 = vld [vmem:[%s10157_s26 + $0x40] sm:$0xff] }
 0x770   : > { %3502 = vmatprep.mubr.bf16.mxu1 %v3189_v32  ;;  %v8214_v45 = vcombine.high %v3982_v10, %v3986_v6  ;;  %v8213_v44 = vcombine.low %v3982_v10, %v3986_v6  ;;  %v4034_v32 = vld [vmem:[%s10157_s26 + $0x1e0] sm:$0xff]  ;;  %v11377_v10 = vrot.slane %v3248_v19, %v11371_v2 }
 0x771   : > { %v8262_v61 = vcombine.high %v4030_v22, %v4034_v32  ;;  %v8261_v20 = vcombine.low %v4030_v22, %v4034_v32 }
 0x772   : > { %4786 = vmatprep.subr.bf16.mxu0 %v8214_v45 }
 0x773   : > { %4787 = vmatpush1.bf16.msra.mxu0 %v8213_v44 }
 0x774   : > { %4788 = vmatprep.subr.bf16.mxu0 %v8222_v1 }
 0x777   : > { %3503 = vmatmul.mubr.bf16.gmra.mrb[140].mxu1 %v2573_v26  ;;  %v3979_v26 = vld [vmem:[%s10157_s26 + $0x28] sm:$0xff]  ;;  %4789 = vmatpush1.bf16.msra.mxu0 %v8221_v36 }
 0x778   : > { %3512 = vmatprep.mubr.bf16.mxu1 %v3190_v43  ;;  %v8207_v17 = vcombine.low %v3975_v38, %v3979_v26  ;;  %v8208_v18 = vcombine.high %v3975_v38, %v3979_v26  ;;  %4790 = vmatprep.subr.bf16.mxu0 %v8230_v7  ;;  %v8263_v43 = vcombine.low %v4031_v15, %v4035_v46  ;;  %v11363_v38 = vsub.s32 0, %v11360_v53 }
 0x77a   : > { %4897 = vmatprep.subr.bf16.mxu1 %v8208_v18  ;;  %14014 = vst [vmem:[#allocation22_spill] sm:$0xff] %v11363_v38  ;;  %v11374_v26 = vrot.slane %v3248_v19, %v11363_v38 }
 0x77b   : > { %4898 = vmatpush1.bf16.msra.mxu1 %v8207_v17  ;;  %4791 = vmatpush1.bf16.msra.mxu0 %v8229_v63 }
 0x77c   : > { %4792 = vmatprep.subr.bf16.mxu0 %v8238_v30 }
 0x77f   : > { %3513 = vmatmul.mubr.bf16.gmra.mrb[144].mxu1 %v2574_v24  ;;  %v3983_v24 = vld [vmem:[%s10157_s26 + $0x48] sm:$0xff]  ;;  %4793 = vmatpush1.bf16.msra.mxu0 %v8237_v40 }
 0x780   : > { %3522 = vmatprep.mubr.bf16.mxu1 %v3191_v62  ;;  %v8216_v60 = vcombine.high %v3983_v24, %v3987_v28  ;;  %v8215_v47 = vcombine.low %v3983_v24, %v3987_v28  ;;  %4794 = vmatprep.subr.bf16.mxu0 %v8246_v34  ;;  %v8264_v62 = vcombine.high %v4031_v15, %v4035_v46  ;;  %v9641_v28 = vld [vmem:[#allocation2] sm:$0xff] }
 0x782   : > { %4899 = vmatprep.subr.bf16.mxu1 %v8216_v60 }
 0x783   : > { %4900 = vmatpush1.bf16.msra.mxu1 %v8215_v47  ;;  %4795 = vmatpush1.bf16.msra.mxu0 %v8245_v50  ;;  %v9643_v47 = vld [vmem:[#allocation2 + $0x10] sm:$0xff] }
 0x784   : > { %4796 = vmatprep.subr.bf16.mxu0 %v8254_v33 }
 0x787   : > { %3523 = vmatmul.mubr.bf16.gmra.mrb[148].mxu1 %v2575_v0  ;;  %v3991_v0 = vld [vmem:[%s10157_s26 + $0x88] sm:$0xff]  ;;  %4797 = vmatpush1.bf16.msra.mxu0 %v8253_v41 }
 0x788   : > { %v8224_v9 = vcombine.high %v3991_v0, %v3995_v16  ;;  %v8223_v54 = vcombine.low %v3991_v0, %v3995_v16  ;;  %4798 = vmatprep.subr.bf16.mxu0 %v8262_v61  ;;  %v9642_v0 = vld [vmem:[#allocation2 + $0x8] sm:$0xff] }
 0x78a   : > { %4901 = vmatprep.subr.bf16.mxu1 %v8224_v9  ;;  %v9644_v9 = vld [vmem:[#allocation2 + $0x18] sm:$0xff] }
 0x78b   : > { %4902 = vmatpush1.bf16.msra.mxu1 %v8223_v54  ;;  %4799 = vmatpush1.bf16.msra.mxu0 %v8261_v20 }
 0x78c   : > { %4903 = vmatprep.subr.bf16.mxu1 %v8232_v3 }
 0x78f   : > { %4904 = vmatpush1.bf16.msra.mxu1 %v8231_v31  ;;  %v9645_v31 = vld [vmem:[#allocation2 + $0x20] sm:$0xff] }
 0x790   : > { %4905 = vmatprep.subr.bf16.mxu1 %v8240_v21 }
 0x793   : > { %4906 = vmatpush1.bf16.msra.mxu1 %v8239_v11  ;;  %v9647_v11 = vld [vmem:[#allocation2 + $0x30] sm:$0xff] }
 0x794   : > { %4907 = vmatprep.subr.bf16.mxu1 %v8248_v48  ;;  %v9648_v48 = vld [vmem:[#allocation2 + $0x38] sm:$0xff] }
 0x797   : > { %4908 = vmatpush1.bf16.msra.mxu1 %v8247_v58 }
 0x798   : > { %4909 = vmatprep.subr.bf16.mxu1 %v8256_v42 }
 0x79b   : > { %4910 = vmatpush1.bf16.msra.mxu1 %v8255_v59  ;;  %v9649_v59 = vld [vmem:[#allocation2 + $0x40] sm:$0xff] }
 0x79c   : > { %4911 = vmatprep.subr.bf16.mxu1 %v8264_v62 }
 0x79f   : > { %4912 = vmatpush1.bf16.msra.mxu1 %v8263_v43  ;;  %v9650_v43 = vld [vmem:[#allocation2 + $0x48] sm:$0xff] }
 0x822   : > { %v3454_v6 = vpop.f32.mrb[120].mxu1 }
 0x823   : > { %v3455_v17 = vadd.f32 %v3454_v6, %v11374_v26  ;;  %v3456_v18 = vpop.f32.mrb[121].mxu1 }
 0x824   : > { %v3457_v45 = vadd.f32 %v3456_v18, %v11377_v10  ;;  %v3458_v24 = vpop.f32.mrb[122].mxu1 }
 0x825   : > { %v11381_v27 = vadd.f32 %v9641_v28, %v3455_v17  ;;  %v3459_v60 = vadd.f32 %v3458_v24, %v11374_v26  ;;  %v3460_v4 = vpop.f32.mrb[123].mxu1  ;;  %v9651_v17 = vld [vmem:[#allocation2 + $0x50] sm:$0xff] }
 0x826   : > { %v11384_v16 = vadd.f32 %v9642_v0, %v3457_v45  ;;  %v3461_v44 = vadd.f32 %v3460_v4, %v11377_v10  ;;  %v9652_v45 = vld [vmem:[#allocation2 + $0x58] sm:$0xff]  ;;  %v4038_v0 = vld [vmem:[%s10157_s26 + $0x200] sm:$0xff] }
 0x827   : > { %v11387_v1 = vadd.f32 %v9643_v47, %v3459_v60  ;;  %v3632_v13 = vmul.f32 %v11381_v27, %v11381_v27  ;;  %v4039_v47 = vld [vmem:[%s10157_s26 + $0x208] sm:$0xff] }
 0x828   : > { %v11389_v25 = vadd.f32 %v9644_v9, %v3461_v44  ;;  %v3567_v5 = vadd.f32 %v11384_v16, %v11381_v27  ;;  %v3633_v12 = vmul.f32 %v11384_v16, %v11384_v16  ;;  %v4042_v44 = vld [vmem:[%s10157_s26 + $0x220] sm:$0xff] }
 0x829   : > { %v3634_v7 = vmul.f32 %v11387_v1, %v11387_v1 }
 0x82a   : > { %v3464_v36 = vpop.f32.mrb[124].mxu1  ;;  %3568 = vadd.xlane.f32.xlu0 %v3567_v5  ;;  %v3570_v54 = vadd.f32 %v11389_v25, %v11387_v1  ;;  %v3635_v3 = vmul.f32 %v11389_v25, %v11389_v25  ;;  %v3664_v63 = vadd.f32 %v3633_v12, %v3632_v13  ;;  %v8270_v5 = vcombine.high %v4038_v0, %v4042_v44  ;;  %v4043_v13 = vld [vmem:[%s10157_s26 + $0x228] sm:$0xff] }
 0x82b   : > { %v3465_v14 = vadd.f32 %v3464_v36, %v11374_v26  ;;  %v3466_v51 = vpop.f32.mrb[125].mxu1 }
 0x82c   : > { %v3467_v39 = vadd.f32 %v3466_v51, %v11377_v10  ;;  %v3468_v49 = vpop.f32.mrb[126].mxu1  ;;  %3571 = vadd.xlane.f32.xlu1 %v3570_v54  ;;  %v3667_v40 = vadd.f32 %v3635_v3, %v3634_v7  ;;  %v8269_v7 = vcombine.low %v4038_v0, %v4042_v44  ;;  %4800 = vmatprep.subr.bf16.mxu0 %v8270_v5 }
 0x82d   : > { %v11405_v30 = vadd.f32 %v9645_v31, %v3465_v14  ;;  %v3469_v21 = vadd.f32 %v3468_v49, %v11374_v26  ;;  %v3470_v8 = vpop.f32.mrb[127].mxu1  ;;  %v8271_v51 = vcombine.low %v4039_v47, %v4043_v13 }
 0x82e   : > { %v11408_v37 = vadd.f32 %v9646_v29, %v3467_v39  ;;  %v3471_v52 = vadd.f32 %v3470_v8, %v11377_v10  ;;  %3665 = vadd.xlane.f32.xlu0 %v3664_v63  ;;  %v8272_v39 = vcombine.high %v4039_v47, %v4043_v13  ;;  %4801 = vmatpush1.bf16.msra.mxu0 %v8269_v7  ;;  %v4050_v8 = vld [vmem:[%s10157_s26 + $0x260] sm:$0xff]  ;;  %v4047_v29 = vld [vmem:[%s10157_s26 + $0x248] sm:$0xff] }
 0x82f   : > { %v11411_v34 = vadd.f32 %v9647_v11, %v3469_v21  ;;  %v3636_v55 = vmul.f32 %v11405_v30, %v11405_v30  ;;  %v4046_v21 = vld [vmem:[%s10157_s26 + $0x240] sm:$0xff] }
 0x830   : > { %v11413_v35 = vadd.f32 %v9648_v48, %v3471_v52  ;;  %3668 = vadd.xlane.f32.xlu1 %v3667_v40  ;;  %v3573_v57 = vadd.f32 %v11408_v37, %v11405_v30  ;;  %v3637_v56 = vmul.f32 %v11408_v37, %v11408_v37  ;;  %v9653_v52 = vld [vmem:[#allocation2 + $0x60] sm:$0xff]  ;;  %4913 = vmatprep.subr.bf16.mxu1 %v8272_v39  ;;  %v4063_v39 = vld [vmem:[%s10157_s26 + $0x2c8] sm:$0xff] }
 0x831   : > { %v3638_v33 = vmul.f32 %v11411_v34, %v11411_v34  ;;  %4914 = vmatpush1.bf16.msra.mxu1 %v8271_v51  ;;  %v4066_v51 = vld [vmem:[%s10157_s26 + $0x2e0] sm:$0xff] }
 0x832   : > { %v3474_v50 = vpop.f32.mrb[128].mxu1  ;;  %3574 = vadd.xlane.f32.xlu0 %v3573_v57  ;;  %v3576_v58 = vadd.f32 %v11413_v35, %v11411_v34  ;;  %v3639_v42 = vmul.f32 %v11413_v35, %v11413_v35  ;;  %v3670_v41 = vadd.f32 %v3637_v56, %v3636_v55  ;;  %v8278_v55 = vcombine.high %v4046_v21, %v4050_v8  ;;  %v4051_v56 = vld [vmem:[%s10157_s26 + $0x268] sm:$0xff] }
 0x833   : > { %v3475_v22 = vadd.f32 %v3474_v50, %v11374_v26  ;;  %v3476_v32 = vpop.f32.mrb[129].mxu1  ;;  %v9654_v50 = vld [vmem:[#allocation2 + $0x68] sm:$0xff] }
 0x834   : > { %v3477_v15 = vadd.f32 %v3476_v32, %v11377_v10  ;;  %v3478_v46 = vpop.f32.mrb[130].mxu1  ;;  %3577 = vadd.xlane.f32.xlu1 %v3576_v58  ;;  %v3673_v6 = vadd.f32 %v3639_v42, %v3638_v33  ;;  %v8277_v42 = vcombine.low %v4046_v21, %v4050_v8  ;;  %4802 = vmatprep.subr.bf16.mxu0 %v8278_v55  ;;  %v9659_v55 = vld [vmem:[#allocation2 + $0x90] sm:$0xff] }
 0x835   : > { %v11429_v61 = vadd.f32 %v9649_v59, %v3475_v22  ;;  %v3479_v62 = vadd.f32 %v3478_v46, %v11374_v26  ;;  %v3480_v20 = vpop.f32.mrb[131].mxu1  ;;  %v9655_v22 = vld [vmem:[#allocation2 + $0x70] sm:$0xff]  ;;  %v8279_v46 = vcombine.low %v4047_v29, %v4051_v56  ;;  %v9656_v59 = vld [vmem:[#allocation2 + $0x78] sm:$0xff] }
 0x836   : > { %v11432_v23 = vadd.f32 %v9650_v43, %v3477_v15  ;;  %v3481_v19 = vadd.f32 %v3480_v20, %v11377_v10  ;;  %3671 = vadd.xlane.f32.xlu0 %v3670_v41  ;;  %v8280_v41 = vcombine.high %v4047_v29, %v4051_v56  ;;  %4803 = vmatpush1.bf16.msra.mxu0 %v8277_v42  ;;  %v4067_v29 = vld [vmem:[%s10157_s26 + $0x2e8] sm:$0xff]  ;;  %v9660_v42 = vld [vmem:[#allocation2 + $0x98] sm:$0xff] }
 0x837   : > { %v11435_v18 = vadd.f32 %v9651_v17, %v3479_v62  ;;  %v3640_v60 = vmul.f32 %v11429_v61, %v11429_v61  ;;  %v4055_v17 = vld [vmem:[%s10157_s26 + $0x288] sm:$0xff] }
 0x838   : > { %v11437_v24 = vadd.f32 %v9652_v45, %v3481_v19  ;;  %3674 = vadd.xlane.f32.xlu1 %v3673_v6  ;;  %v3579_v28 = vadd.f32 %v11432_v23, %v11429_v61  ;;  %v3641_v4 = vmul.f32 %v11432_v23, %v11432_v23  ;;  %v4054_v19 = vld [vmem:[%s10157_s26 + $0x280] sm:$0xff]  ;;  %4915 = vmatprep.subr.bf16.mxu1 %v8280_v41 }
 0x839   : > { %v3642_v9 = vmul.f32 %v11435_v18, %v11435_v18  ;;  %v4058_v6 = vld [vmem:[%s10157_s26 + $0x2a0] sm:$0xff]  ;;  %4916 = vmatpush1.bf16.msra.mxu1 %v8279_v46 }
 0x83a   : > { %v3484_v12 = vpop.f32.mrb[132].mxu1  ;;  %3580 = vadd.xlane.f32.xlu0 %v3579_v28  ;;  %v3582_v36 = vadd.f32 %v11437_v24, %v11435_v18  ;;  %v3643_v54 = vmul.f32 %v11437_v24, %v11437_v24  ;;  %v3676_v31 = vadd.f32 %v3641_v4, %v3640_v60  ;;  %v8286_v28 = vcombine.high %v4054_v19, %v4058_v6  ;;  %v4059_v60 = vld [vmem:[%s10157_s26 + $0x2a8] sm:$0xff] }
 0x83b   : > { %v3485_v3 = vadd.f32 %v3484_v12, %v11374_v26  ;;  %v3486_v14 = vpop.f32.mrb[133].mxu1  ;;  %v8285_v5 = vcombine.low %v4054_v19, %v4058_v6  ;;  %v8287_v13 = vcombine.low %v4055_v17, %v4059_v60  ;;  %v8288_v12 = vcombine.high %v4055_v17, %v4059_v60  ;;  %v4075_v17 = vld [vmem:[%s10157_s26 + $0x328] sm:$0xff] }
 0x83c   : > { %v3487_v49 = vadd.f32 %v3486_v14, %v11377_v10  ;;  %v3488_v63 = vpop.f32.mrb[134].mxu1  ;;  %3583 = vadd.xlane.f32.xlu1 %v3582_v36  ;;  %v3679_v57 = vadd.f32 %v3643_v54, %v3642_v9  ;;  %4804 = vmatprep.subr.bf16.mxu0 %v8286_v28  ;;  %v4062_v14 = vld [vmem:[%s10157_s26 + $0x2c0] sm:$0xff] }
 0x83d   : > { %v11460_v40 = vadd.f32 %v9653_v52, %v3485_v3  ;;  %v3489_v11 = vadd.f32 %v3488_v63, %v11374_v26  ;;  %v3490_v48 = vpop.f32.mrb[135].mxu1  ;;  %4917 = vmatprep.subr.bf16.mxu1 %v8288_v12  ;;  %4805 = vmatpush1.bf16.msra.mxu0 %v8285_v5  ;;  %v8294_v8 = vcombine.high %v4062_v14, %v4066_v51  ;;  %v9658_v52 = vld [vmem:[#allocation2 + $0x88] sm:$0xff] }
 0x83e   : > { %v11464_v58 = vadd.f32 %v9654_v50, %v3487_v49  ;;  %v3491_v33 = vadd.f32 %v3490_v48, %v11377_v10  ;;  %3677 = vadd.xlane.f32.xlu0 %v3676_v31  ;;  %v9657_v49 = vld [vmem:[#allocation2 + $0x80] sm:$0xff]  ;;  %4918 = vmatpush1.bf16.msra.mxu1 %v8287_v13  ;;  %v8295_v50 = vcombine.low %v4063_v39, %v4067_v29 }
 0x83f   : > { %v11467_v32 = vadd.f32 %v9655_v22, %v3489_v11  ;;  %v3644_v15 = vmul.f32 %v11460_v40, %v11460_v40  ;;  %4806 = vmatprep.subr.bf16.mxu0 %v8294_v8  ;;  %v9662_v8 = vld [vmem:[#allocation2 + $0xa8] sm:$0xff] }
 0x840   : > { %v11471_v62 = vadd.f32 %v9656_v59, %v3491_v33  ;;  %3680 = vadd.xlane.f32.xlu1 %v3679_v57  ;;  %v3585_v20 = vadd.f32 %v11464_v58, %v11460_v40  ;;  %v3645_v43 = vmul.f32 %v11464_v58, %v11464_v58  ;;  %v8293_v57 = vcombine.low %v4062_v14, %v4066_v51  ;;  %v4070_v59 = vld [vmem:[%s10157_s26 + $0x300] sm:$0xff] }
 0x841   : > { %v3646_v45 = vmul.f32 %v11467_v32, %v11467_v32  ;;  %v8296_v33 = vcombine.high %v4063_v39, %v4067_v29  ;;  %v9661_v14 = vld [vmem:[#allocation2 + $0xa0] sm:$0xff] }
 0x842   : > { %3586 = vadd.xlane.f32.xlu0 %v3585_v20  ;;  %v3494_v4 = vpop.f32.mrb[136].mxu1  ;;  %v3588_v0 = vadd.f32 %v11471_v62, %v11467_v32  ;;  %v3647_v44 = vmul.f32 %v11471_v62, %v11471_v62  ;;  %v3682_v7 = vadd.f32 %v3645_v43, %v3644_v15  ;;  %v4074_v20 = vld [vmem:[%s10157_s26 + $0x320] sm:$0xff]  ;;  %v4071_v43 = vld [vmem:[%s10157_s26 + $0x308] sm:$0xff]  ;;  %4807 = vmatpush1.bf16.msra.mxu0 %v8293_v57  ;;  %v9663_v57 = vld [vmem:[#allocation2 + $0xb0] sm:$0xff] }
 0x843   : > { %v3495_v47 = vadd.f32 %v3494_v4, %v11374_v26  ;;  %v3496_v9 = vpop.f32.mrb[137].mxu1  ;;  %4919 = vmatprep.subr.bf16.mxu1 %v8296_v33  ;;  %v8302_v6 = vcombine.high %v4070_v59, %v4074_v20 }
 0x844   : > { %v3497_v36 = vadd.f32 %v3496_v9, %v11377_v10  ;;  %3589 = vadd.xlane.f32.xlu1 %v3588_v0  ;;  %v3498_v54 = vpop.f32.mrb[138].mxu1  ;;  %v3685_v3 = vadd.f32 %v3647_v44, %v3646_v45  ;;  %4920 = vmatpush1.bf16.msra.mxu1 %v8295_v50  ;;  %v8301_v44 = vcombine.low %v4070_v59, %v4074_v20  ;;  %v4086_v20 = vld [vmem:[%s10157_s26 + $0x380] sm:$0xff] }
 0x845   : > { %v11492_v63 = vadd.f32 %v9657_v49, %v3495_v47  ;;  %v3499_v31 = vadd.f32 %v3498_v54, %v11374_v26  ;;  %v3500_v21 = vpop.f32.mrb[139].mxu1  ;;  %4808 = vmatprep.subr.bf16.mxu0 %v8302_v6  ;;  %v8303_v47 = vcombine.low %v4071_v43, %v4075_v17  ;;  %v8304_v9 = vcombine.high %v4071_v43, %v4075_v17  ;;  %v4078_v54 = vld [vmem:[%s10157_s26 + $0x340] sm:$0xff] }
 0x846   : > { %v11496_v11 = vadd.f32 %v9658_v52, %v3497_v36  ;;  %v3501_v48 = vadd.f32 %v3500_v21, %v11377_v10  ;;  %3683 = vadd.xlane.f32.xlu0 %v3682_v7  ;;  %v4082_v7 = vld [vmem:[%s10157_s26 + $0x360] sm:$0xff]  ;;  %4809 = vmatpush1.bf16.msra.mxu0 %v8301_v44  ;;  %v4083_v21 = vld [vmem:[%s10157_s26 + $0x368] sm:$0xff] }
 0x847   : > { %v11499_v56 = vadd.f32 %v9659_v55, %v3499_v31  ;;  %v3648_v46 = vmul.f32 %v11492_v63, %v11492_v63  ;;  %4921 = vmatprep.subr.bf16.mxu1 %v8304_v9  ;;  %v8310_v31 = vcombine.high %v4078_v54, %v4082_v7  ;;  %v4090_v43 = vld [vmem:[%s10157_s26 + $0x3a0] sm:$0xff] }
 0x848   : > { %14017 = vst [vmem:[#allocation18_spill] sm:$0xff] %v11496_v11  ;;  %v11501_v22 = vadd.f32 %v9660_v42, %v3501_v48  ;;  %3686 = vadd.xlane.f32.xlu1 %v3685_v3  ;;  %v3591_v15 = vadd.f32 %v11496_v11, %v11492_v63  ;;  %v3649_v41 = vmul.f32 %v11496_v11, %v11496_v11  ;;  %v4079_v3 = vld [vmem:[%s10157_s26 + $0x348] sm:$0xff]  ;;  %v9664_v42 = vld [vmem:[#allocation2 + $0xb8] sm:$0xff] }
 0x849   : > { %14018 = vst [vmem:[#allocation19_spill] sm:$0xff] %v11499_v56  ;;  %v3650_v19 = vmul.f32 %v11499_v56, %v11499_v56  ;;  %4922 = vmatpush1.bf16.msra.mxu1 %v8303_v47  ;;  %v8309_v48 = vcombine.low %v4078_v54, %v4082_v7  ;;  %4810 = vmatprep.subr.bf16.mxu0 %v8310_v31  ;;  %v4094_v7 = vld [vmem:[%s10157_s26 + $0x3c0] sm:$0xff] }
 0x84a   : > { %14019 = vst [vmem:[#allocation23_spill] sm:$0xff] %v11501_v22  ;;  %v3504_v45 = vpop.f32.mrb[140].mxu1  ;;  %3592 = vadd.xlane.f32.xlu0 %v3591_v15  ;;  %v3594_v28 = vadd.f32 %v11501_v22, %v11499_v56  ;;  %v3651_v60 = vmul.f32 %v11501_v22, %v11501_v22  ;;  %v3688_v12 = vadd.f32 %v3649_v41, %v3648_v46  ;;  %v11765_v22 = vld [vmem:[%s10157_s26 + $0x1b8] sm:$0xff] }
 0x84b   : > { %v3505_v4 = vadd.f32 %v3504_v45, %v11374_v26  ;;  %v3506_v0 = vpop.f32.mrb[141].mxu1  ;;  %v8311_v50 = vcombine.low %v4079_v3, %v4083_v21  ;;  %v8312_v33 = vcombine.high %v4079_v3, %v4083_v21  ;;  %4811 = vmatpush1.bf16.msra.mxu0 %v8309_v48  ;;  %v8318_v17 = vcombine.high %v4086_v20, %v4090_v43  ;;  %v4091_v45 = vld [vmem:[%s10157_s26 + $0x3a8] sm:$0xff]  ;;  %v4098_v3 = vld [vmem:[%s10157_s26 + $0x3e0] sm:$0xff] }
 0x84c   : > { %v3507_v5 = vadd.f32 %v3506_v0, %v11377_v10  ;;  %v3508_v13 = vpop.f32.mrb[142].mxu1  ;;  %3595 = vadd.xlane.f32.xlu1 %v3594_v28  ;;  %v3691_v36 = vadd.f32 %v3651_v60, %v3650_v19  ;;  %v4087_v19 = vld [vmem:[%s10157_s26 + $0x388] sm:$0xff]  ;;  %v8317_v47 = vcombine.low %v4086_v20, %v4090_v43  ;;  %v9668_v20 = vld [vmem:[#allocation2 + $0xd8] sm:$0xff]  ;;  %14044 = vst [vmem:[#allocation47_spill] sm:$0xff] %v11765_v22 }
 0x84d   : > { %v11524_v51 = vadd.f32 %v9661_v14, %v3505_v4  ;;  %v3509_v39 = vadd.f32 %v3508_v13, %v11374_v26  ;;  %v3510_v49 = vpop.f32.mrb[143].mxu1  ;;  %4923 = vmatprep.subr.bf16.mxu1 %v8312_v33  ;;  %4812 = vmatprep.subr.bf16.mxu0 %v8318_v17  ;;  %v8319_v9 = vcombine.low %v4087_v19, %v4091_v45  ;;  %v4095_v14 = vld [vmem:[%s10157_s26 + $0x3c8] sm:$0xff]  ;;  %v11823_v22 = vld [vmem:[%s10157_s26 + $0x278] sm:$0xff] }
 0x84e   : > { %v11528_v29 = vadd.f32 %v9662_v8, %v3507_v5  ;;  %v3511_v52 = vadd.f32 %v3510_v49, %v11377_v10  ;;  %3689 = vadd.xlane.f32.xlu0 %v3688_v12  ;;  %4924 = vmatpush1.bf16.msra.mxu1 %v8311_v50  ;;  %v8320_v5 = vcombine.high %v4087_v19, %v4091_v45  ;;  %v9666_v48 = vld [vmem:[#allocation2 + $0xc8] sm:$0xff] }
 0x84f   : > { %14020 = vst [vmem:[#allocation24_spill] sm:$0xff] %v11524_v51  ;;  %v11531_v55 = vadd.f32 %v9663_v57, %v3509_v39  ;;  %v3652_v41 = vmul.f32 %v11524_v51, %v11524_v51  ;;  %v9665_v39 = vld [vmem:[#allocation2 + $0xc0] sm:$0xff]  ;;  %4813 = vmatpush1.bf16.msra.mxu0 %v8317_v47  ;;  %v8326_v8 = vcombine.high %v4094_v7, %v4098_v3  ;;  %v11586_v47 = vld [vmem:[%s10157_s26 + $0x18] sm:$0xff]  ;;  %14054 = vst [vmem:[#allocation57_spill] sm:$0xff] %v11823_v22 }
 0x850   : > { %14021 = vst [vmem:[#allocation25_spill] sm:$0xff] %v11528_v29  ;;  %v11533_v15 = vadd.f32 %v9664_v42, %v3511_v52  ;;  %3692 = vadd.xlane.f32.xlu1 %v3691_v36  ;;  %v3597_v46 = vadd.f32 %v11528_v29, %v11524_v51  ;;  %v3653_v59 = vmul.f32 %v11528_v29, %v11528_v29  ;;  %v4099_v52 = vld [vmem:[%s10157_s26 + $0x3e8] sm:$0xff]  ;;  %v9667_v42 = vld [vmem:[#allocation2 + $0xd0] sm:$0xff] }
 0x851   : > { %14022 = vst [vmem:[#allocation26_spill] sm:$0xff] %v11531_v55  ;;  %v3654_v6 = vmul.f32 %v11531_v55, %v11531_v55  ;;  %4925 = vmatprep.subr.bf16.mxu1 %v8320_v5  ;;  %v8325_v33 = vcombine.low %v4094_v7, %v4098_v3  ;;  %4814 = vmatprep.subr.bf16.mxu0 %v8326_v8 }
 0x852   : > { %14023 = vst [vmem:[#allocation27_spill] sm:$0xff] %v11533_v15  ;;  %3598 = vadd.xlane.f32.xlu0 %v3597_v46  ;;  %v3514_v28 = vpop.f32.mrb[144].mxu1  ;;  %v3600_v60 = vadd.f32 %v11533_v15, %v11531_v55  ;;  %v3655_v4 = vmul.f32 %v11533_v15, %v11533_v15  ;;  %v3694_v36 = vadd.f32 %v3653_v59, %v3652_v41  ;;  %v11746_v15 = vld [vmem:[%s10157_s26 + $0x190] sm:$0xff] }
 0x853   : > { %v3515_v0 = vadd.f32 %v3514_v28, %v11374_v26  ;;  %v3516_v44 = vpop.f32.mrb[145].mxu1  ;;  %4926 = vmatpush1.bf16.msra.mxu1 %v8319_v9  ;;  %v8327_v41 = vcombine.low %v4095_v14, %v4099_v52  ;;  %v8328_v59 = vcombine.high %v4095_v14, %v4099_v52  ;;  %4815 = vmatpush1.bf16.msra.mxu0 %v8325_v33  ;;  %v11688_v14 = vld [vmem:[%s10157_s26 + $0xd8] sm:$0xff] }
 0x854   : > { %v3517_v13 = vadd.f32 %v3516_v44, %v11377_v10  ;;  %3601 = vadd.xlane.f32.xlu1 %v3600_v60  ;;  %v3518_v12 = vpop.f32.mrb[146].mxu1  ;;  %v3697_v54 = vadd.f32 %v3655_v4, %v3654_v6  ;;  %v11583_v44 = vld [vmem:[%s10157_s26 + $0x30] sm:$0xff]  ;;  %14041 = vst [vmem:[#allocation44_spill] sm:$0xff] %v11746_v15 }
 0x855   : > { %v11556_v49 = vadd.f32 %v9665_v39, %v3515_v0  ;;  %v3519_v31 = vadd.f32 %v3518_v12, %v11374_v26  ;;  %v3520_v21 = vpop.f32.mrb[147].mxu1  ;;  %4927 = vmatprep.subr.bf16.mxu1 %v8328_v59  ;;  %v11580_v0 = vld [vmem:[%s10157_s26 + $0x10] sm:$0xff]  ;;  %v11592_v12 = vld [vmem:[%s10157_s26 + $0x38] sm:$0xff]  ;;  %v9669_v39 = vld [vmem:[#allocation2 + $0xe0] sm:$0xff] }
 0x856   : > { %v11560_v57 = vadd.f32 %v9666_v48, %v3517_v13  ;;  %v3521_v50 = vadd.f32 %v3520_v21, %v11377_v10  ;;  %3695 = vadd.xlane.f32.xlu0 %v3694_v36  ;;  %v8210_v13 = vcombine.high %v11580_v0, %v11583_v44  ;;  %v8212_v52 = vcombine.high %v11586_v47, %v11592_v12  ;;  %v9670_v48 = vld [vmem:[#allocation2 + $0xe8] sm:$0xff] }
 0x857   : > { %14024 = vst [vmem:[#allocation28_spill] sm:$0xff] %v11556_v49  ;;  %v11563_v46 = vadd.f32 %v9667_v42, %v3519_v31  ;;  %v3656_v6 = vmul.f32 %v11556_v49, %v11556_v49  ;;  %4928 = vmatpush1.bf16.msra.mxu1 %v8327_v41  ;;  %v9671_v41 = vld [vmem:[#allocation2 + $0xf0] sm:$0xff] }
 0x858   : > { %14025 = vst [vmem:[#allocation29_spill] sm:$0xff] %v11560_v57  ;;  %v11565_v43 = vadd.f32 %v9668_v20, %v3521_v50  ;;  %3698 = vadd.xlane.f32.xlu1 %v3697_v54  ;;  %v3603_v19 = vadd.f32 %v11560_v57, %v11556_v49  ;;  %v3657_v17 = vmul.f32 %v11560_v57, %v11560_v57  ;;  %v9672_v20 = vld [vmem:[#allocation2 + $0xf8] sm:$0xff] }
 0x859   : > { %14026 = vst [vmem:[#allocation30_spill] sm:$0xff] %v11563_v46  ;;  %v3658_v60 = vmul.f32 %v11563_v46, %v11563_v46  ;;  %5010 = vmatprep.subr.bf16.mxu0 %v8210_v13  ;;  %5123 = vmatprep.subr.bf16.mxu1 %v8212_v52  ;;  %v3565_v13 = vld [vmem:[%s14032_s14] sm:$0x3]  ;;  %v11647_v52 = vld [vmem:[%s10157_s26 + $0x78] sm:$0xff] }
 0x85a   : > { %14027 = vst [vmem:[#allocation31_spill] sm:$0xff] %v11565_v43  ;;  %v3524_v45 = vpop.f32.mrb[148].mxu1  ;;  %3604 = vadd.xlane.f32.xlu0 %v3603_v19  ;;  %v3606_v28 = vadd.f32 %v11565_v43, %v11563_v46  ;;  %v3659_v4 = vmul.f32 %v11565_v43, %v11565_v43  ;;  %v3700_v7 = vadd.f32 %v3657_v17, %v3656_v6  ;;  %v11760_v57 = vld [vmem:[%s10157_s26 + $0x198] sm:$0xff] }
 0x85b   : > { %v3525_v9 = vadd.f32 %v3524_v45, %v11374_v26  ;;  %v3526_v5 = vpop.f32.mrb[149].mxu1  ;;  %14043 = vst [vmem:[#allocation46_spill] sm:$0xff] %v11760_v57  ;;  %v11838_v57 = vld [vmem:[%s10157_s26 + $0x290] sm:$0xff] }
 0x85c   : > { %v3527_v36 = vadd.f32 %v3526_v5, %v11377_v10  ;;  %v3528_v54 = vpop.f32.mrb[150].mxu1  ;;  %3607 = vadd.xlane.f32.xlu1 %v3606_v28  ;;  %v3703_v42 = vadd.f32 %v3659_v4, %v3658_v60  ;;  %14055 = vst [vmem:[#allocation58_spill] sm:$0xff] %v11838_v57  ;;  %v11877_v57 = vld [vmem:[%s10157_s26 + $0x2f0] sm:$0xff] }
 0x85d   : > { %v11599_v31 = vadd.f32 %v9669_v39, %v3525_v9  ;;  %v3529_v21 = vadd.f32 %v3528_v54, %v11374_v26  ;;  %v3530_v8 = vpop.f32.mrb[151].mxu1  ;;  %v3566_v54 = vld [vmem:[%s754_s7] sm:$0x3] }
 0x85e   : > { %v11604_v50 = vadd.f32 %v9670_v48, %v3527_v36  ;;  %v3531_v33 = vadd.f32 %v3530_v8, %v11377_v10  ;;  %3701 = vadd.xlane.f32.xlu0 %v3700_v7  ;;  %v11636_v7 = vld [vmem:[%s10157_s26 + $0x50] sm:$0xff]  ;;  %v11644_v8 = vld [vmem:[%s10157_s26 + $0x58] sm:$0xff] }
 0x85f   : > { %14028 = vst [vmem:[#allocation32_spill] sm:$0xff] %v11599_v31  ;;  %v11607_v59 = vadd.f32 %v9671_v41, %v3529_v21  ;;  %v3660_v6 = vmul.f32 %v11599_v31, %v11599_v31  ;;  %v11641_v21 = vld [vmem:[%s10157_s26 + $0x70] sm:$0xff] }
 0x860   : > { %14029 = vst [vmem:[#allocation33_spill] sm:$0xff] %v11604_v50  ;;  %v11609_v19 = vadd.f32 %v9672_v20, %v3531_v33  ;;  %3704 = vadd.xlane.f32.xlu1 %v3703_v42  ;;  %v3609_v26 = vadd.f32 %v11604_v50, %v11599_v31  ;;  %v3661_v10 = vmul.f32 %v11604_v50, %v11604_v50  ;;  %v11653_v42 = vld [vmem:[%s10157_s26 + $0x90] sm:$0xff] }
 0x861   : > { %14030 = vst [vmem:[#allocation34_spill] sm:$0xff] %v11607_v59  ;;  %v3662_v45 = vmul.f32 %v11607_v59, %v11607_v59  ;;  %v11650_v33 = vrot.slane %v3565_v13, %v11371_v2 }
 0x862   : > { %14031 = vst [vmem:[#allocation35_spill] sm:$0xff] %v11609_v19  ;;  %3610 = vadd.xlane.f32.xlu0 %v3609_v26  ;;  %v3612_v17 = vadd.f32 %v11609_v19, %v11607_v59  ;;  %v3663_v28 = vmul.f32 %v11609_v19, %v11609_v19  ;;  %v3706_v60 = vadd.f32 %v3661_v10, %v3660_v6  ;;  %v11664_v10 = vld [vmem:[%s10157_s26 + $0xb0] sm:$0xff]  ;;  %v11715_v19 = vld [vmem:[%s10157_s26 + $0x138] sm:$0xff] }
 0x863   : > { %v11658_v26 = vrot.slane %v3566_v54, %v11371_v2  ;;  %v11661_v6 = vrot.slane %v3565_v13, %v11363_v38  ;;  %v11698_v13 = vld [vmem:[%s10157_s26 + $0x110] sm:$0xff]  ;;  %14036 = vst [vmem:[#allocation39_spill] sm:$0xff] %v11715_v19 }
 0x864   : > { %3613 = vadd.xlane.f32.xlu1 %v3612_v17  ;;  %v3709_v4 = vadd.f32 %v3663_v28, %v3662_v45  ;;  %v11667_v17 = vld [vmem:[%s10157_s26 + $0x98] sm:$0xff]  ;;  %14033 = vst [vmem:[#allocation36_spill] sm:$0xff] %v11698_v13  ;;  %v11788_v19 = vld [vmem:[%s10157_s26 + $0x210] sm:$0xff] }
 0x865   : > { %v11670_v45 = vld [vmem:[%s10157_s26 + $0xb8] sm:$0xff]  ;;  %14047 = vst [vmem:[#allocation50_spill] sm:$0xff] %v11788_v19 }
 0x866   : > { %3707 = vadd.xlane.f32.xlu0 %v3706_v60  ;;  %v11673_v60 = vrot.slane %v3566_v54, %v11363_v38  ;;  %v11701_v38 = vld [vmem:[%s10157_s26 + $0x130] sm:$0xff] }
 0x867   : > { %14034 = vst [vmem:[#allocation37_spill] sm:$0xff] %v11701_v38 }
 0x868   : > { %3710 = vadd.xlane.f32.xlu1 %v3709_v4  ;;  %v11712_v4 = vld [vmem:[%s10157_s26 + $0x118] sm:$0xff] }
 0x869   : > { %14035 = vst [vmem:[#allocation38_spill] sm:$0xff] %v11712_v4 }
 0x8b7   : > { %v3569_v9 = vpop.xlane.xlu0 %3568 }
 0x8b8   : > { %v11623_v5 = vmul.f32 0.00390625, %v3569_v9  ;;  %v11695_v9 = vld [vmem:[%s10157_s26 + $0xf8] sm:$0xff] }
 0x8b9   : > { %v3572_v36 = vpop.xlane.xlu1 %3571 }
 0x8ba   : > { %v11638_v39 = vmul.f32 0.00390625, %v3572_v36  ;;  %v3728_v41 = vmul.f32 %v11623_v5, %v11623_v5  ;;  %v11682_v36 = vld [vmem:[%s10157_s26 + $0xd0] sm:$0xff] }
 0x8bb   : > { %v3666_v48 = vpop.xlane.xlu0 %3665 }
 0x8bc   : > { %v3712_v20 = vmul.f32 0.00390625, %v3666_v48  ;;  %v11685_v48 = vld [vmem:[%s10157_s26 + $0xf0] sm:$0xff]  ;;  %v3729_v54 = vmul.f32 %v11638_v39, %v11638_v39 }
 0x8bd   : > { %v3669_v28 = vpop.xlane.xlu1 %3668 }
 0x8be   : > { %v3744_v3 = vsub.f32 %v3712_v20, %v3728_v41  ;;  %v3713_v2 = vmul.f32 0.00390625, %v3669_v28  ;;  %v11722_v41 = vld [vmem:[%s10157_s26 + $0x150] sm:$0xff] }
 0x8bf   : > { %v3575_v53 = vpop.xlane.xlu0 %3574  ;;  %14037 = vst [vmem:[#allocation40_spill] sm:$0xff] %v11722_v41  ;;  %v11725_v20 = vld [vmem:[%s10157_s26 + $0x170] sm:$0xff]  ;;  %v11785_v41 = vld [vmem:[%s10157_s26 + $0x1f8] sm:$0xff] }
 0x8c0   : > { %v3760_v59 = vmax.f32 %v3744_v3, 0.0  ;;  %v3745_v50 = vsub.f32 %v3713_v2, %v3729_v54  ;;  %v11717_v46 = vmul.f32 0.00390625, %v3575_v53  ;;  %14038 = vst [vmem:[#allocation41_spill] sm:$0xff] %v11725_v20  ;;  %v11736_v54 = vld [vmem:[%s10157_s26 + $0x158] sm:$0xff]  ;;  %v11749_v53 = vld [vmem:[%s10157_s26 + $0x1b0] sm:$0xff] }
 0x8c1   : > { %v3578_v49 = vpop.xlane.xlu1 %3577  ;;  %14039 = vst [vmem:[#allocation42_spill] sm:$0xff] %v11736_v54  ;;  %v11743_v3 = vld [vmem:[%s10157_s26 + $0x178] sm:$0xff]  ;;  %14042 = vst [vmem:[#allocation45_spill] sm:$0xff] %v11749_v53  ;;  %v11813_v54 = vld [vmem:[%s10157_s26 + $0x270] sm:$0xff] }
 0x8c2   : > { %v3808_v31 = vadd.f32 1e-05, %v3760_v59  ;;  %v3761_v43 = vmax.f32 %v3745_v50, 0.0  ;;  %14040 = vst [vmem:[#allocation43_spill] sm:$0xff] %v11743_v3  ;;  %v11751_v2 = vmul.f32 0.00390625, %v3578_v49  ;;  %v3730_v49 = vmul.f32 %v11717_v46, %v11717_v46  ;;  %v11768_v50 = vld [vmem:[%s10157_s26 + $0x1d0] sm:$0xff] }
 0x8c3   : > { %v3672_v55 = vpop.xlane.xlu0 %3671  ;;  %14045 = vst [vmem:[#allocation48_spill] sm:$0xff] %v11768_v50  ;;  %v11771_v59 = vld [vmem:[%s10157_s26 + $0x1f0] sm:$0xff]  ;;  %v11782_v20 = vld [vmem:[%s10157_s26 + $0x1d8] sm:$0xff]  ;;  %14052 = vst [vmem:[#allocation55_spill] sm:$0xff] %v11813_v54 }
 0x8c4   : > { %9577 = vrsqrt.f32 %v3808_v31  ;;  %v3809_v29 = vadd.f32 1e-05, %v3761_v43  ;;  %v3714_v51 = vmul.f32 0.00390625, %v3672_v55  ;;  %14046 = vst [vmem:[#allocation49_spill] sm:$0xff] %v11771_v59  ;;  %v3731_v28 = vmul.f32 %v11751_v2, %v11751_v2  ;;  %v11793_v31 = vld [vmem:[%s10157_s26 + $0x230] sm:$0xff]  ;;  %v11796_v3 = vld [vmem:[%s10157_s26 + $0x218] sm:$0xff] }
 0x8c5   : > { %v3675_v56 = vpop.xlane.xlu1 %3674  ;;  %14048 = vst [vmem:[#allocation51_spill] sm:$0xff] %v11793_v31  ;;  %14049 = vst [vmem:[#allocation52_spill] sm:$0xff] %v11796_v3  ;;  %v11799_v55 = vld [vmem:[%s10157_s26 + $0x238] sm:$0xff]  ;;  %v3777_v3 = vsub.f32 %v11384_v16, %v11623_v5 }
 0x8c6   : > { %9579 = vrsqrt.f32 %v3809_v29  ;;  %v3746_v4 = vsub.f32 %v3714_v51, %v3730_v49  ;;  %v3715_v43 = vmul.f32 0.00390625, %v3675_v56  ;;  %14050 = vst [vmem:[#allocation53_spill] sm:$0xff] %v11799_v55  ;;  %v11810_v49 = vld [vmem:[%s10157_s26 + $0x250] sm:$0xff]  ;;  %v11820_v29 = vld [vmem:[%s10157_s26 + $0x258] sm:$0xff] }
 0x8c7   : > { %v3581_v53 = vpop.xlane.xlu0 %3580  ;;  %14051 = vst [vmem:[#allocation54_spill] sm:$0xff] %v11810_v49  ;;  %14053 = vst [vmem:[#allocation56_spill] sm:$0xff] %v11820_v29  ;;  %v11841_v56 = vld [vmem:[%s10157_s26 + $0x2b0] sm:$0xff] }
 0x8c8   : > { %v3762_v38 = vmax.f32 %v3746_v4, 0.0  ;;  %v3747_v13 = vsub.f32 %v3715_v43, %v3731_v28  ;;  %v11815_v11 = vmul.f32 0.00390625, %v3581_v53  ;;  %14056 = vst [vmem:[#allocation59_spill] sm:$0xff] %v11841_v56  ;;  %v11874_v56 = vld [vmem:[%s10157_s26 + $0x2d0] sm:$0xff] }
 0x8c9   : > { %v3584_v51 = vpop.xlane.xlu1 %3583 }
 0x8ca   : > { %v3810_v53 = vadd.f32 1e-05, %v3762_v38  ;;  %v3763_v43 = vmax.f32 %v3747_v13, 0.0  ;;  %v11843_v59 = vmul.f32 0.00390625, %v3584_v51  ;;  %v3732_v15 = vmul.f32 %v11815_v11, %v11815_v11  ;;  %v11865_v13 = vld [vmem:[%s10157_s26 + $0x2b8] sm:$0xff] }
 0x8cb   : > { %v3678_v4 = vpop.xlane.xlu0 %3677  ;;  %v3776_v51 = vsub.f32 %v11381_v27, %v11623_v5  ;;  %v3778_v5 = vsub.f32 %v11387_v1, %v11638_v39  ;;  %v3779_v38 = vsub.f32 %v11389_v25, %v11638_v39  ;;  %v3784_v39 = vsub.f32 %v11429_v61, %v11815_v11 }
 0x8cc   : > { %9581 = vrsqrt.f32 %v3810_v53  ;;  %v3811_v50 = vadd.f32 1e-05, %v3763_v43  ;;  %v3716_v55 = vmul.f32 0.00390625, %v3678_v4  ;;  %v11862_v43 = vld [vmem:[%s10157_s26 + $0x298] sm:$0xff]  ;;  %v3733_v27 = vmul.f32 %v11843_v59, %v11843_v59 }
 0x8cd   : > { %v3681_v28 = vpop.xlane.xlu1 %3680 }
 0x8ce   : > { %v9578_v4 = vpop.eup %9577  ;;  %9583 = vrsqrt.f32 %v3811_v50  ;;  %v3748_v22 = vsub.f32 %v3716_v55, %v3732_v15  ;;  %v3717_v16 = vmul.f32 0.00390625, %v3681_v28 }
 0x8cf   : > { %v3587_v29 = vpop.xlane.xlu0 %3586  ;;  %v3841_v54 = vmul.f32 %v9578_v4, %v3777_v3  ;;  %v3840_v53 = vmul.f32 %v9578_v4, %v3776_v51  ;;  %v3780_v3 = vsub.f32 %v11405_v30, %v11717_v46 }
 0x8d0   : > { %v9580_v49 = vpop.eup %9579  ;;  %v3764_v50 = vmax.f32 %v3748_v22, 0.0  ;;  %v3749_v15 = vsub.f32 %v3717_v16, %v3733_v27  ;;  %v11879_v55 = vmul.f32 0.00390625, %v3587_v29 }
 0x8d1   : > { %v3590_v31 = vpop.xlane.xlu1 %3589  ;;  %v3843_v1 = vmul.f32 %v9580_v49, %v3779_v38  ;;  %v3884_v19 = vmul.f32 %v11650_v33, %v3841_v54  ;;  %v3842_v25 = vmul.f32 %v9580_v49, %v3778_v5  ;;  %v3883_v49 = vmul.f32 %v11661_v6, %v3840_v53 }
 0x8d2   : > { %v3812_v51 = vadd.f32 1e-05, %v3764_v50  ;;  %v3765_v4 = vmax.f32 %v3749_v15, 0.0  ;;  %v11890_v29 = vmul.f32 0.00390625, %v3590_v31  ;;  %v3734_v27 = vmul.f32 %v11879_v55, %v11879_v55 }
 0x8d3   : > { %v3684_v38 = vpop.xlane.xlu0 %3683  ;;  %v3886_v54 = vmul.f32 %v11650_v33, %v3843_v1  ;;  %v3885_v30 = vmul.f32 %v11661_v6, %v3842_v25  ;;  %v3781_v50 = vsub.f32 %v11408_v37, %v11717_v46  ;;  %v3783_v31 = vsub.f32 %v11413_v35, %v11751_v2 }
 0x8d4   : > { %9585 = vrsqrt.f32 %v3812_v51  ;;  %v3813_v16 = vadd.f32 1e-05, %v3765_v4  ;;  %v3718_v5 = vmul.f32 0.00390625, %v3684_v38  ;;  %v11902_v22 = vadd.f32 %v11658_v26, %v3884_v19 }
 0x8d5   : > { %v3687_v15 = vpop.xlane.xlu1 %3686  ;;  %v11905_v28 = vadd.f32 %v11658_v26, %v3886_v54  ;;  %v3735_v51 = vmul.f32 %v11890_v29, %v11890_v29  ;;  %v11914_v35 = vadd.f32 %v11673_v60, %v3883_v49  ;;  %v11917_v46 = vadd.f32 %v11673_v60, %v3885_v30 }
 0x8d6   : > { %v9582_v1 = vpop.eup %9581  ;;  %9587 = vrsqrt.f32 %v3813_v16  ;;  %v3750_v53 = vsub.f32 %v3718_v5, %v3734_v27  ;;  %v3719_v25 = vmul.f32 0.00390625, %v3687_v15  ;;  %v3782_v27 = vsub.f32 %v11411_v34, %v11751_v2 }
 0x8d7   : > { %14057 = vst [vmem:[#allocation60_spill] sm:$0xff] %v11905_v28  ;;  %v3593_v4 = vpop.xlane.xlu0 %3592  ;;  %v11911_v37 = vpack.c.bf16 %v11905_v28, %v11902_v22  ;;  %v3845_v19 = vmul.f32 %v9582_v1, %v3781_v50  ;;  %v11927_v49 = vpack.c.bf16 %v11917_v46, %v11914_v35  ;;  %v3785_v34 = vsub.f32 %v11432_v23, %v11815_v11 }
 0x8d8   : > { %v9584_v38 = vpop.eup %9583  ;;  %v3766_v54 = vmax.f32 %v3750_v53, 0.0  ;;  %v3751_v16 = vsub.f32 %v3719_v25, %v3735_v51  ;;  %v11921_v5 = vmul.f32 0.00390625, %v3593_v4  ;;  %v14058_v23 = vcombine.low %v11580_v0, %v11583_v44 }
 0x8d9   : > { %v3596_v15 = vpop.xlane.xlu1 %3595  ;;  %4816 = vmatprep.mubr.bf16.mxu0 %v11911_v37  ;;  %4929 = vmatprep.mubr.bf16.mxu1 %v11911_v37  ;;  %v3847_v30 = vmul.f32 %v9584_v38, %v3783_v31  ;;  %v3888_v50 = vmul.f32 %v11650_v33, %v3845_v19  ;;  %v3844_v19 = vmul.f32 %v9582_v1, %v3780_v3 }
 0x8da   : > { %v3814_v2 = vadd.f32 1e-05, %v3766_v54  ;;  %v3767_v53 = vmax.f32 %v3751_v16, 0.0  ;;  %v11934_v51 = vmul.f32 0.00390625, %v3596_v15  ;;  %4817 = vmatmul.mubr.bf16.vlgmr.msra.gmra.mrb[40].mxu0 %v11927_v49  ;;  %4930 = vmatmul.mubr.bf16.vlgmr.msra.gmra.mrb[152].mxu1 %v11927_v49  ;;  %v3736_v25 = vmul.f32 %v11921_v5, %v11921_v5 }
 0x8db   : > { %v3690_v31 = vpop.xlane.xlu0 %3689  ;;  %v3890_v4 = vmul.f32 %v11650_v33, %v3847_v30  ;;  %5011 = vmatpush1.bf16.msra.mxu0 %v14058_v23  ;;  %v14059_v11 = vcombine.low %v11586_v47, %v11592_v12  ;;  %v3846_v54 = vmul.f32 %v9584_v38, %v3782_v27  ;;  %v3786_v16 = vsub.f32 %v11435_v18, %v11843_v59 }
 0x8dc   : > { %9589 = vrsqrt.f32 %v3814_v2  ;;  %v3815_v61 = vadd.f32 1e-05, %v3767_v53  ;;  %v3720_v28 = vmul.f32 0.00390625, %v3690_v31  ;;  %v3737_v15 = vmul.f32 %v11934_v51, %v11934_v51 }
 0x8dd   : > { %5124 = vmatpush1.bf16.msra.mxu1 %v14059_v11  ;;  %v3693_v30 = vpop.xlane.xlu1 %3692  ;;  %v14060_v3 = vcombine.high %v11636_v7, %v11641_v21  ;;  %v14061_v0 = vcombine.high %v11644_v8, %v11647_v52  ;;  %v11958_v44 = vadd.f32 %v11658_v26, %v3888_v50  ;;  %v11961_v38 = vadd.f32 %v11658_v26, %v3890_v4 }
 0x8de   : > { %v9586_v47 = vpop.eup %9585  ;;  %9591 = vrsqrt.f32 %v3815_v61  ;;  %v3752_v12 = vsub.f32 %v3720_v28, %v3736_v25  ;;  %v3721_v1 = vmul.f32 0.00390625, %v3693_v30  ;;  %v3787_v27 = vsub.f32 %v11437_v24, %v11843_v59 }
 0x8df   : > { %5012 = vmatprep.subr.bf16.mxu0 %v14060_v3  ;;  %5125 = vmatprep.subr.bf16.mxu1 %v14061_v0  ;;  %v3599_v2 = vpop.xlane.xlu0 %3598  ;;  %v3887_v53 = vmul.f32 %v11661_v6, %v3844_v19  ;;  %v3889_v31 = vmul.f32 %v11661_v6, %v3846_v54  ;;  %v3849_v23 = vmul.f32 %v9586_v47, %v3785_v34 }
 0x8e0   : > { %v9588_v11 = vpop.eup %9587  ;;  %v3768_v3 = vmax.f32 %v3752_v12, 0.0  ;;  %v3753_v50 = vsub.f32 %v3721_v1, %v3737_v15  ;;  %v11967_v0 = vmul.f32 0.00390625, %v3599_v2  ;;  %v14062_v28 = vcombine.low %v11636_v7, %v11641_v21 }
 0x8e1   : > { %v14063_v25 = vcombine.low %v11644_v8, %v11647_v52  ;;  %v11977_v24 = vpack.c.bf16 %v11961_v38, %v11958_v44  ;;  %v3602_v4 = vpop.xlane.xlu1 %3601  ;;  %v11980_v34 = vadd.f32 %v11673_v60, %v3887_v53  ;;  %v11983_v19 = vadd.f32 %v11673_v60, %v3889_v31 }
 0x8e2   : > { %5013 = vmatpush1.bf16.msra.mxu0 %v14062_v28  ;;  %v14064_v61 = vcombine.high %v11653_v42, %v11664_v10  ;;  %v14065_v7 = vcombine.high %v11667_v17, %v11670_v45  ;;  %v3851_v21 = vmul.f32 %v9588_v11, %v3787_v27  ;;  %v3788_v8 = vsub.f32 %v11460_v40, %v11879_v55 }
 0x8e3   : > { %5126 = vmatpush1.bf16.msra.mxu1 %v14063_v25  ;;  %v3789_v52 = vsub.f32 %v11464_v58, %v11879_v55  ;;  %v3816_v54 = vadd.f32 1e-05, %v3768_v3  ;;  %v3769_v15 = vmax.f32 %v3753_v50, 0.0  ;;  %4826 = vmatprep.mubr.bf16.mxu0 %v11977_v24  ;;  %v11997_v30 = vmul.f32 0.00390625, %v3602_v4  ;;  %v3696_v1 = vpop.xlane.xlu0 %3695 }
 0x8e4   : > { %5014 = vmatprep.subr.bf16.mxu0 %v14064_v61  ;;  %5127 = vmatprep.subr.bf16.mxu1 %v14065_v7  ;;  %v12001_v12 = vpack.c.bf16 %v11983_v19, %v11980_v34  ;;  %v3892_v27 = vmul.f32 %v11650_v33, %v3849_v23  ;;  %v3848_v2 = vmul.f32 %v9586_v47, %v3784_v39  ;;  %v3722_v55 = vmul.f32 0.00390625, %v3696_v1 }
 0x8e5   : > { %4939 = vmatprep.mubr.bf16.mxu1 %v11977_v24  ;;  %v3817_v40 = vadd.f32 1e-05, %v3769_v15  ;;  %v3738_v58 = vmul.f32 %v11967_v0, %v11967_v0  ;;  %v14066_v53 = vcombine.low %v11653_v42, %v11664_v10  ;;  %v14067_v31 = vcombine.low %v11667_v17, %v11670_v45  ;;  %v3699_v42 = vpop.xlane.xlu1 %3698  ;;  %v14072_v15 = vld [vmem:[#allocation18_spill] sm:$0xff] }
 0x8e6   : > { %v3894_v3 = vmul.f32 %v11650_v33, %v3851_v21  ;;  %v3790_v50 = vsub.f32 %v11467_v32, %v11890_v29  ;;  %v3791_v39 = vsub.f32 %v11471_v62, %v11890_v29  ;;  %9593 = vrsqrt.f32 %v3816_v54  ;;  %4827 = vmatmul.mubr.bf16.gmra.mrb[44].mxu0 %v12001_v12  ;;  %4940 = vmatmul.mubr.bf16.gmra.mrb[156].mxu1 %v12001_v12  ;;  %v9590_v10 = vpop.eup %9589  ;;  %v14097_v32 = vld [vmem:[#allocation25_spill] sm:$0xff] }
 0x8e7   : > { %5015 = vmatpush1.bf16.msra.mxu0 %v14066_v53  ;;  %5128 = vmatpush1.bf16.msra.mxu1 %v14067_v31  ;;  %9595 = vrsqrt.f32 %v3817_v40  ;;  %v3754_v17 = vsub.f32 %v3722_v55, %v3738_v58  ;;  %v3739_v45 = vmul.f32 %v11997_v30, %v11997_v30  ;;  %v3723_v23 = vmul.f32 0.00390625, %v3699_v42  ;;  %v3605_v25 = vpop.xlane.xlu0 %3604 }
 0x8e8   : > { %v14068_v28 = vcombine.high %v11682_v36, %v11685_v48  ;;  %v14069_v62 = vcombine.high %v11688_v14, %v11695_v9  ;;  %v12030_v4 = vadd.f32 %v11658_v26, %v3892_v27  ;;  %v12033_v61 = vadd.f32 %v11658_v26, %v3894_v3  ;;  %v9592_v54 = vpop.eup %9591  ;;  %v14078_v3 = vld [vmem:[#allocation38_spill] sm:$0xff] }
 0x8e9   : > { %v3850_v7 = vmul.f32 %v9588_v11, %v3786_v16  ;;  %v3891_v21 = vmul.f32 %v11661_v6, %v3848_v2  ;;  %v3793_v1 = vsub.f32 %v14072_v15, %v11921_v5  ;;  %v3770_v40 = vmax.f32 %v3754_v17, 0.0  ;;  %v3608_v59 = vpop.xlane.xlu1 %3607  ;;  %v14075_v11 = vld [vmem:[#allocation36_spill] sm:$0xff]  ;;  %v14076_v2 = vld [vmem:[#allocation37_spill] sm:$0xff] }
 0x8ea   : > { %5016 = vmatprep.subr.bf16.mxu0 %v14068_v28  ;;  %5129 = vmatprep.subr.bf16.mxu1 %v14069_v62  ;;  %14070 = vst [vmem:[#allocation61_spill] sm:$0xff] %v12030_v4  ;;  %14071 = vst [vmem:[#allocation62_spill] sm:$0xff] %v12033_v61  ;;  %v3755_v58 = vsub.f32 %v3723_v23, %v3739_v45  ;;  %v14073_v55 = vcombine.low %v11682_v36, %v11685_v48  ;;  %v12047_v53 = vmul.f32 0.00390625, %v3605_v25  ;;  %v14079_v36 = vld [vmem:[#allocation39_spill] sm:$0xff] }
 0x8eb   : > { %v14074_v27 = vcombine.low %v11688_v14, %v11695_v9  ;;  %v12051_v18 = vpack.c.bf16 %v12033_v61, %v12030_v4  ;;  %v3893_v16 = vmul.f32 %v11661_v6, %v3850_v7  ;;  %v14077_v31 = vcombine.high %v14075_v11, %v14076_v2  ;;  %v14081_v14 = vld [vmem:[#allocation19_spill] sm:$0xff]  ;;  %v3702_v7 = vpop.xlane.xlu0 %3701 }
 0x8ec   : > { %5017 = vmatpush1.bf16.msra.mxu0 %v14073_v55  ;;  %v14080_v48 = vcombine.high %v14078_v3, %v14079_v36  ;;  %v3853_v42 = vmul.f32 %v9590_v10, %v3789_v52  ;;  %v3818_v17 = vadd.f32 1e-05, %v3770_v40  ;;  %v3771_v45 = vmax.f32 %v3755_v58, 0.0  ;;  %v14086_v58 = vld [vmem:[#allocation23_spill] sm:$0xff] }
 0x8ed   : > { %5130 = vmatpush1.bf16.msra.mxu1 %v14074_v27  ;;  %5018 = vmatprep.subr.bf16.mxu0 %v14077_v31  ;;  %v3852_v23 = vmul.f32 %v9590_v10, %v3788_v8  ;;  %v12064_v28 = vmul.f32 0.00390625, %v3608_v59  ;;  %v12067_v62 = vadd.f32 %v11673_v60, %v3891_v21  ;;  %v12070_v25 = vadd.f32 %v11673_v60, %v3893_v16  ;;  %v3705_v16 = vpop.xlane.xlu1 %3704 }
 0x8ee   : > { %5131 = vmatprep.subr.bf16.mxu1 %v14080_v48  ;;  %4836 = vmatprep.mubr.bf16.mxu0 %v12051_v18  ;;  %v3855_v52 = vmul.f32 %v9592_v54, %v3791_v39  ;;  %9597 = vrsqrt.f32 %v3818_v17  ;;  %v3819_v55 = vadd.f32 1e-05, %v3771_v45  ;;  %v14084_v40 = vcombine.low %v14075_v11, %v14076_v2  ;;  %v14087_v11 = vld [vmem:[#allocation40_spill] sm:$0xff]  ;;  %v14088_v2 = vld [vmem:[#allocation41_spill] sm:$0xff]  ;;  %v14090_v17 = vld [vmem:[#allocation42_spill] sm:$0xff] }
 0x8ef   : > { %4949 = vmatprep.mubr.bf16.mxu1 %v12051_v18  ;;  %14082 = vst [vmem:[#allocation18_spill] sm:$0xff] %v12067_v62  ;;  %14083 = vst [vmem:[#allocation36_spill] sm:$0xff] %v12070_v25  ;;  %v14085_v8 = vcombine.low %v14078_v3, %v14079_v36  ;;  %v3740_v10 = vmul.f32 %v12047_v53, %v12047_v53  ;;  %v3724_v21 = vmul.f32 0.00390625, %v3702_v7  ;;  %v3725_v48 = vmul.f32 0.00390625, %v3705_v16  ;;  %v14091_v45 = vld [vmem:[#allocation43_spill] sm:$0xff] }
 0x8f0   : > { %5019 = vmatpush1.bf16.msra.mxu0 %v14084_v40  ;;  %v3795_v27 = vsub.f32 %v14086_v58, %v11934_v51  ;;  %v12084_v39 = vpack.c.bf16 %v12070_v25, %v12067_v62  ;;  %v3741_v59 = vmul.f32 %v12064_v28, %v12064_v28  ;;  %v14089_v31 = vcombine.high %v14087_v11, %v14088_v2  ;;  %v14093_v58 = vld [vmem:[#allocation24_spill] sm:$0xff] }
 0x8f1   : > { %5132 = vmatpush1.bf16.msra.mxu1 %v14085_v8  ;;  %v3896_v3 = vmul.f32 %v11650_v33, %v3853_v42  ;;  %9599 = vrsqrt.f32 %v3819_v55  ;;  %v3756_v36 = vsub.f32 %v3724_v21, %v3740_v10  ;;  %v14092_v7 = vcombine.high %v14090_v17, %v14091_v45  ;;  %v9594_v8 = vpop.eup %9593 }
 0x8f2   : > { %5020 = vmatprep.subr.bf16.mxu0 %v14089_v31  ;;  %v3898_v40 = vmul.f32 %v11650_v33, %v3855_v52  ;;  %4837 = vmatmul.mubr.bf16.gmra.mrb[48].mxu0 %v12084_v39  ;;  %v3611_v31 = vpop.xlane.xlu0 %3610  ;;  %v3854_v42 = vmul.f32 %v9592_v54, %v3790_v50  ;;  %v3895_v55 = vmul.f32 %v11661_v6, %v3852_v23  ;;  %v9596_v10 = vpop.eup %9595 }
 0x8f3   : > { %5133 = vmatprep.subr.bf16.mxu1 %v14092_v7  ;;  %4950 = vmatmul.mubr.bf16.gmra.mrb[160].mxu1 %v12084_v39  ;;  %v3772_v21 = vmax.f32 %v3756_v36, 0.0  ;;  %v3757_v16 = vsub.f32 %v3725_v48, %v3741_v59  ;;  %v14094_v52 = vcombine.low %v14087_v11, %v14088_v2  ;;  %v14095_v7 = vcombine.low %v14090_v17, %v14091_v45  ;;  %v3614_v54 = vpop.xlane.xlu1 %3613  ;;  %v14099_v59 = vld [vmem:[#allocation44_spill] sm:$0xff]  ;;  %v14100_v11 = vld [vmem:[#allocation45_spill] sm:$0xff]  ;;  %v14102_v36 = vld [vmem:[#allocation46_spill] sm:$0xff] }
 0x8f4   : > { %v12110_v9 = vmul.f32 0.00390625, %v3611_v31  ;;  %v12113_v47 = vadd.f32 %v11658_v26, %v3898_v40  ;;  %v3797_v29 = vsub.f32 %v14097_v32, %v11967_v0  ;;  %v12118_v50 = vadd.f32 %v11658_v26, %v3896_v3  ;;  %v14103_v48 = vld [vmem:[#allocation47_spill] sm:$0xff] }
 0x8f5   : > { %5021 = vmatpush1.bf16.msra.mxu0 %v14094_v52  ;;  %5134 = vmatpush1.bf16.msra.mxu1 %v14095_v7  ;;  %v3897_v23 = vmul.f32 %v11661_v6, %v3854_v42  ;;  %v14101_v2 = vcombine.high %v14099_v59, %v14100_v11  ;;  %v14104_v17 = vcombine.high %v14102_v36, %v14103_v48  ;;  %v3820_v45 = vadd.f32 1e-05, %v3772_v21 }
 0x8f6   : > { %14096 = vst [vmem:[#allocation37_spill] sm:$0xff] %v12113_v47  ;;  %14098 = vst [vmem:[#allocation38_spill] sm:$0xff] %v12118_v50  ;;  %v3773_v40 = vmax.f32 %v3757_v16, 0.0  ;;  %v12128_v31 = vadd.f32 %v11673_v60, %v3895_v55  ;;  %v3857_v3 = vmul.f32 %v9594_v8, %v3793_v1  ;;  %v12135_v42 = vpack.c.bf16 %v12113_v47, %v12118_v50  ;;  %v3708_v16 = vpop.xlane.xlu0 %3707 }
 0x8f7   : > { %5022 = vmatprep.subr.bf16.mxu0 %v14101_v2  ;;  %5135 = vmatprep.subr.bf16.mxu1 %v14104_v17  ;;  %v12137_v52 = vmul.f32 0.00390625, %v3614_v54  ;;  %v12140_v7 = vadd.f32 %v11673_v60, %v3897_v23  ;;  %v3742_v21 = vmul.f32 %v12110_v9, %v12110_v9  ;;  %9601 = vrsqrt.f32 %v3820_v45  ;;  %v14109_v2 = vld [vmem:[#allocation26_spill] sm:$0xff]  ;;  %v14110_v17 = vld [vmem:[#allocation27_spill] sm:$0xff] }
 0x8f8   : > { %14105 = vst [vmem:[#allocation39_spill] sm:$0xff] %v12128_v31  ;;  %v3821_v55 = vadd.f32 1e-05, %v3773_v40  ;;  %v14107_v32 = vcombine.low %v14099_v59, %v14100_v11  ;;  %v14108_v15 = vcombine.low %v14102_v36, %v14103_v48  ;;  %v3726_v1 = vmul.f32 0.00390625, %v3708_v16  ;;  %4846 = vmatprep.mubr.bf16.mxu0 %v12135_v42  ;;  %4959 = vmatprep.mubr.bf16.mxu1 %v12135_v42  ;;  %v3711_v11 = vpop.xlane.xlu1 %3710  ;;  %v9598_v45 = vpop.eup %9597  ;;  %v14111_v40 = vld [vmem:[#allocation48_spill] sm:$0xff]  ;;  %v14112_v16 = vld [vmem:[#allocation49_spill] sm:$0xff] }
 0x8f9   : > { %14106 = vst [vmem:[#allocation19_spill] sm:$0xff] %v12140_v7  ;;  %v3859_v54 = vmul.f32 %v9596_v10, %v3795_v27  ;;  %v3798_v23 = vsub.f32 %v14109_v2, %v11997_v30  ;;  %v3799_v47 = vsub.f32 %v14110_v17, %v11997_v30  ;;  %v12158_v59 = vpack.c.bf16 %v12140_v7, %v12128_v31 }
 0x8fa   : > { %5023 = vmatpush1.bf16.msra.mxu0 %v14107_v32  ;;  %5136 = vmatpush1.bf16.msra.mxu1 %v14108_v15  ;;  %9603 = vrsqrt.f32 %v3821_v55  ;;  %v3758_v36 = vsub.f32 %v3726_v1, %v3742_v21  ;;  %v3743_v27 = vmul.f32 %v12137_v52, %v12137_v52  ;;  %v3727_v48 = vmul.f32 0.00390625, %v3711_v11 }
 0x8fb   : > { %v14113_v32 = vcombine.high %v14111_v40, %v14112_v16  ;;  %v14114_v30 = vcombine.high %v11782_v20, %v11785_v41  ;;  %4847 = vmatmul.mubr.bf16.gmra.mrb[52].mxu0 %v12158_v59  ;;  %4960 = vmatmul.mubr.bf16.gmra.mrb[164].mxu1 %v12158_v59  ;;  %v3900_v15 = vmul.f32 %v11650_v33, %v3857_v3  ;;  %v9600_v2 = vpop.eup %9599 }
 0x8fc   : > { %v3902_v21 = vmul.f32 %v11650_v33, %v3859_v54  ;;  %v14115_v55 = vsub.f32 %v11492_v63, %v11921_v5  ;;  %v3774_v17 = vmax.f32 %v3758_v36, 0.0  ;;  %v3759_v11 = vsub.f32 %v3727_v48, %v3743_v27  ;;  %v14122_v36 = vld [vmem:[#allocation51_spill] sm:$0xff]  ;;  %v14124_v48 = vld [vmem:[#allocation52_spill] sm:$0xff] }
 0x8fd   : > { %5024 = vmatprep.subr.bf16.mxu0 %v14113_v32  ;;  %5137 = vmatprep.subr.bf16.mxu1 %v14114_v30  ;;  %v14116_v32 = vcombine.low %v14111_v40, %v14112_v16  ;;  %v14117_v30 = vcombine.low %v11782_v20, %v11785_v41  ;;  %v14118_v3 = vsub.f32 %v14081_v14, %v11934_v51  ;;  %v14125_v41 = vld [vmem:[#allocation53_spill] sm:$0xff] }
 0x8fe   : > { %v3856_v1 = vmul.f32 %v9594_v8, %v14115_v55  ;;  %v3861_v54 = vmul.f32 %v9598_v45, %v3797_v29  ;;  %v12185_v50 = vadd.f32 %v11658_v26, %v3900_v15  ;;  %v12188_v63 = vadd.f32 %v11658_v26, %v3902_v21  ;;  %v14121_v8 = vld [vmem:[#allocation50_spill] sm:$0xff] }
 0x8ff   : > { %5025 = vmatpush1.bf16.msra.mxu0 %v14116_v32  ;;  %5138 = vmatpush1.bf16.msra.mxu1 %v14117_v30  ;;  %v3858_v7 = vmul.f32 %v9596_v10, %v14118_v3  ;;  %v14123_v27 = vcombine.high %v14121_v8, %v14122_v36  ;;  %v14126_v20 = vcombine.high %v14124_v48, %v14125_v41  ;;  %v3822_v51 = vadd.f32 1e-05, %v3774_v17  ;;  %v12220_v32 = vld [vmem:[%s10157_s26 + $0x2d8] sm:$0xff] }
 0x900   : > { %14119 = vst [vmem:[#allocation23_spill] sm:$0xff] %v12185_v50  ;;  %14120 = vst [vmem:[#allocation40_spill] sm:$0xff] %v12188_v63  ;;  %v3899_v5 = vmul.f32 %v11661_v6, %v3856_v1  ;;  %v3775_v14 = vmax.f32 %v3759_v11, 0.0  ;;  %v3863_v29 = vmul.f32 %v9600_v2, %v3799_v47  ;;  %v12200_v40 = vpack.c.bf16 %v12188_v63, %v12185_v50  ;;  %v12223_v30 = vld [vmem:[%s10157_s26 + $0x2f8] sm:$0xff] }
 0x901   : > { %5026 = vmatprep.subr.bf16.mxu0 %v14123_v27  ;;  %5139 = vmatprep.subr.bf16.mxu1 %v14126_v20  ;;  %v3901_v10 = vmul.f32 %v11661_v6, %v3858_v7  ;;  %v3904_v15 = vmul.f32 %v11650_v33, %v3861_v54  ;;  %v14128_v21 = vsub.f32 %v14093_v58, %v11967_v0  ;;  %9605 = vrsqrt.f32 %v3822_v51  ;;  %v14132_v0 = vld [vmem:[#allocation29_spill] sm:$0xff]  ;;  %v9602_v54 = vpop.eup %9601 }
 0x902   : > { %v12203_v16 = vadd.f32 %v11673_v60, %v3899_v5  ;;  %v3823_v1 = vadd.f32 1e-05, %v3775_v14  ;;  %v14130_v47 = vcombine.low %v14121_v8, %v14122_v36  ;;  %v14131_v7 = vcombine.low %v14124_v48, %v14125_v41  ;;  %4856 = vmatprep.mubr.bf16.mxu0 %v12200_v40  ;;  %4969 = vmatprep.mubr.bf16.mxu1 %v12200_v40  ;;  %v14134_v8 = vld [vmem:[#allocation54_spill] sm:$0xff]  ;;  %v14135_v36 = vld [vmem:[#allocation55_spill] sm:$0xff]  ;;  %v14137_v48 = vld [vmem:[#allocation56_spill] sm:$0xff] }
 0x903   : > { %v3860_v55 = vmul.f32 %v9598_v45, %v14128_v21  ;;  %v12210_v17 = vadd.f32 %v11673_v60, %v3901_v10  ;;  %v3906_v11 = vmul.f32 %v11650_v33, %v3863_v29  ;;  %v3801_v58 = vsub.f32 %v14132_v0, %v12047_v53  ;;  %v14138_v41 = vld [vmem:[#allocation57_spill] sm:$0xff] }
 0x904   : > { %14127 = vst [vmem:[#allocation41_spill] sm:$0xff] %v12203_v16  ;;  %5027 = vmatpush1.bf16.msra.mxu0 %v14130_v47  ;;  %5140 = vmatpush1.bf16.msra.mxu1 %v14131_v7  ;;  %v12230_v45 = vadd.f32 %v11658_v26, %v3904_v15  ;;  %v3862_v3 = vmul.f32 %v9600_v2, %v3798_v23  ;;  %9607 = vrsqrt.f32 %v3823_v1  ;;  %v14141_v23 = vld [vmem:[#allocation31_spill] sm:$0xff]  ;;  %v9604_v21 = vpop.eup %9603  ;;  %v14142_v1 = vld [vmem:[#allocation28_spill] sm:$0xff]  ;;  %v14143_v7 = vld [vmem:[#allocation30_spill] sm:$0xff] }
 0x905   : > { %14129 = vst [vmem:[#allocation42_spill] sm:$0xff] %v12210_v17  ;;  %v12234_v5 = vpack.c.bf16 %v12210_v17, %v12203_v16  ;;  %v14136_v27 = vcombine.high %v14134_v8, %v14135_v36  ;;  %v14139_v20 = vcombine.high %v14137_v48, %v14138_v41  ;;  %v12243_v51 = vadd.f32 %v11658_v26, %v3906_v11 }
 0x906   : > { %14133 = vst [vmem:[#allocation43_spill] sm:$0xff] %v12230_v45  ;;  %v3903_v14 = vmul.f32 %v11661_v6, %v3860_v55  ;;  %v3803_v2 = vsub.f32 %v14141_v23, %v12064_v28  ;;  %v3905_v10 = vmul.f32 %v11661_v6, %v3862_v3  ;;  %v8300_v29 = vcombine.high %v12220_v32, %v12223_v30  ;;  %v14149_v23 = vld [vmem:[#allocation59_spill] sm:$0xff] }
 0x907   : > { %5028 = vmatprep.subr.bf16.mxu0 %v14136_v27  ;;  %5141 = vmatprep.subr.bf16.mxu1 %v14139_v20  ;;  %14140 = vst [vmem:[#allocation24_spill] sm:$0xff] %v12243_v51  ;;  %v3865_v15 = vmul.f32 %v9602_v54, %v3801_v58  ;;  %v3800_v47 = vsub.f32 %v14142_v1, %v12047_v53  ;;  %v12272_v27 = vld [vmem:[%s10157_s26 + $0x310] sm:$0xff] }
 0x908   : > { %v3802_v11 = vsub.f32 %v14143_v7, %v12064_v28  ;;  %4857 = vmatmul.mubr.bf16.gmra.mrb[56].mxu0 %v12234_v5  ;;  %4970 = vmatmul.mubr.bf16.gmra.mrb[168].mxu1 %v12234_v5  ;;  %v12259_v55 = vpack.c.bf16 %v12243_v51, %v12230_v45  ;;  %v14144_v0 = vcombine.low %v14134_v8, %v14135_v36  ;;  %v4076_v20 = vld [vmem:[%s10157_s26 + $0x330] sm:$0xff]  ;;  %v4081_v51 = vld [vmem:[%s10157_s26 + $0x358] sm:$0xff] }
 0x909   : > { %v14145_v58 = vcombine.low %v14137_v48, %v14138_v41  ;;  %v12268_v53 = vadd.f32 %v11673_v60, %v3905_v10  ;;  %v3867_v28 = vmul.f32 %v9604_v21, %v3803_v2  ;;  %v3908_v3 = vmul.f32 %v11650_v33, %v3865_v15  ;;  %v14148_v41 = vld [vmem:[#allocation58_spill] sm:$0xff] }
 0x90a   : > { %5029 = vmatpush1.bf16.msra.mxu0 %v14144_v0  ;;  %4866 = vmatprep.mubr.bf16.mxu0 %v12259_v55  ;;  %v12278_v8 = vadd.f32 %v11673_v60, %v3903_v14  ;;  %v3864_v36 = vmul.f32 %v9602_v54, %v3800_v47  ;;  %v3866_v48 = vmul.f32 %v9604_v21, %v3802_v11  ;;  %v4073_v54 = vld [vmem:[%s10157_s26 + $0x318] sm:$0xff] }
 0x90b   : > { %5142 = vmatpush1.bf16.msra.mxu1 %v14145_v58  ;;  %14146 = vst [vmem:[#allocation25_spill] sm:$0xff] %v12268_v53  ;;  %4979 = vmatprep.mubr.bf16.mxu1 %v12259_v55  ;;  %v14150_v10 = vcombine.high %v14148_v41, %v14149_v23  ;;  %v14151_v2 = vcombine.high %v11862_v43, %v11865_v13  ;;  %v4077_v21 = vld [vmem:[%s10157_s26 + $0x338] sm:$0xff] }
 0x90c   : > { %14147 = vst [vmem:[#allocation44_spill] sm:$0xff] %v12278_v8  ;;  %v8297_v15 = vcombine.low %v11874_v56, %v11877_v57  ;;  %v8299_v1 = vcombine.low %v12220_v32, %v12223_v30  ;;  %v3910_v14 = vmul.f32 %v11650_v33, %v3867_v28  ;;  %v12295_v47 = vpack.c.bf16 %v12268_v53, %v12278_v8  ;;  %v14152_v58 = vld [vmem:[#allocation33_spill] sm:$0xff] }
 0x90d   : > { %5030 = vmatprep.subr.bf16.mxu0 %v14150_v10  ;;  %5143 = vmatprep.subr.bf16.mxu1 %v14151_v2  ;;  %v3909_v7 = vmul.f32 %v11661_v6, %v3866_v48  ;;  %v8305_v11 = vcombine.low %v12272_v27, %v4076_v20  ;;  %v8306_v0 = vcombine.high %v12272_v27, %v4076_v20  ;;  %v4080_v27 = vld [vmem:[%s10157_s26 + $0x350] sm:$0xff]  ;;  %v9606_v2 = vpop.eup %9605  ;;  %v4085_v53 = vld [vmem:[%s10157_s26 + $0x378] sm:$0xff] }
 0x90e   : > { %v3805_v10 = vsub.f32 %v14152_v58, %v12110_v9  ;;  %v14153_v32 = vcombine.low %v14148_v41, %v14149_v23  ;;  %v14154_v30 = vcombine.low %v11862_v43, %v11865_v13  ;;  %v12309_v28 = vadd.f32 %v11658_v26, %v3908_v3  ;;  %v4084_v20 = vld [vmem:[%s10157_s26 + $0x370] sm:$0xff]  ;;  %v14158_v43 = vld [vmem:[#allocation34_spill] sm:$0xff]  ;;  %v14159_v3 = vld [vmem:[#allocation35_spill] sm:$0xff] }
 0x90f   : > { %v12312_v48 = vadd.f32 %v11658_v26, %v3910_v14  ;;  %v14157_v58 = vcombine.high %v11874_v56, %v11877_v57  ;;  %v3907_v41 = vmul.f32 %v11661_v6, %v3864_v36  ;;  %v8307_v23 = vcombine.low %v4073_v54, %v4077_v21  ;;  %v9608_v57 = vpop.eup %9607  ;;  %v14160_v56 = vld [vmem:[#allocation32_spill] sm:$0xff] }
 0x910   : > { %5031 = vmatpush1.bf16.msra.mxu0 %v14153_v32  ;;  %5144 = vmatpush1.bf16.msra.mxu1 %v14154_v30  ;;  %14155 = vst [vmem:[#allocation45_spill] sm:$0xff] %v12309_v28  ;;  %v8308_v13 = vcombine.high %v4073_v54, %v4077_v21  ;;  %v3806_v32 = vsub.f32 %v14158_v43, %v12137_v52 }
 0x911   : > { %14156 = vst [vmem:[#allocation46_spill] sm:$0xff] %v12312_v48  ;;  %5032 = vmatprep.subr.bf16.mxu0 %v14157_v58  ;;  %5145 = vmatprep.subr.bf16.mxu1 %v8300_v29  ;;  %v3807_v30 = vsub.f32 %v14159_v3, %v12137_v52  ;;  %v12326_v14 = vpack.c.bf16 %v12312_v48, %v12309_v28  ;;  %v4092_v3 = vld [vmem:[%s10157_s26 + $0x3b0] sm:$0xff] }
 0x912   : > { %v3869_v45 = vmul.f32 %v9606_v2, %v3805_v10  ;;  %v3804_v29 = vsub.f32 %v14160_v56, %v12110_v9  ;;  %4867 = vmatmul.mubr.bf16.gmra.mrb[60].mxu0 %v12295_v47  ;;  %4980 = vmatmul.mubr.bf16.gmra.mrb[172].mxu1 %v12295_v47  ;;  %v12335_v36 = vadd.f32 %v11673_v60, %v3909_v7 }
 0x913   : > { %v8314_v52 = vcombine.high %v4080_v27, %v4084_v20  ;;  %v3871_v54 = vmul.f32 %v9608_v57, %v3807_v30  ;;  %v3870_v10 = vmul.f32 %v9608_v57, %v3806_v32  ;;  %4876 = vmatprep.mubr.bf16.mxu0 %v12326_v14  ;;  %4989 = vmatprep.mubr.bf16.mxu1 %v12326_v14  ;;  %v4093_v30 = vld [vmem:[%s10157_s26 + $0x3b8] sm:$0xff] }
 0x914   : > { %14161 = vst [vmem:[#allocation47_spill] sm:$0xff] %v12335_v36  ;;  %5033 = vmatpush1.bf16.msra.mxu0 %v8297_v15  ;;  %5146 = vmatpush1.bf16.msra.mxu1 %v8299_v1  ;;  %v3912_v21 = vmul.f32 %v11650_v33, %v3869_v45  ;;  %v12341_v9 = vadd.f32 %v11673_v60, %v3907_v41  ;;  %v4088_v1 = vld [vmem:[%s10157_s26 + $0x390] sm:$0xff]  ;;  %v4089_v41 = vld [vmem:[%s10157_s26 + $0x398] sm:$0xff] }
 0x915   : > { %v8316_v58 = vcombine.high %v4081_v51, %v4085_v53  ;;  %v3868_v7 = vmul.f32 %v9606_v2, %v3804_v29  ;;  %5034 = vmatprep.subr.bf16.mxu0 %v8306_v0  ;;  %5147 = vmatprep.subr.bf16.mxu1 %v8308_v13  ;;  %v3914_v15 = vmul.f32 %v11650_v33, %v3871_v54 }
 0x916   : > { %14162 = vst [vmem:[#allocation26_spill] sm:$0xff] %v12341_v9  ;;  %v12347_v45 = vpack.c.bf16 %v12335_v36, %v12341_v9  ;;  %v8313_v43 = vcombine.low %v4080_v27, %v4084_v20  ;;  %v3913_v32 = vmul.f32 %v11661_v6, %v3870_v10  ;;  %v8315_v0 = vcombine.low %v4081_v51, %v4085_v53  ;;  %v4096_v20 = vld [vmem:[%s10157_s26 + $0x3d0] sm:$0xff]  ;;  %v4101_v51 = vld [vmem:[%s10157_s26 + $0x3f8] sm:$0xff] }
 0x917   : > { %v12354_v33 = vadd.f32 %v11658_v26, %v3912_v21  ;;  %v12357_v2 = vadd.f32 %v11658_v26, %v3914_v15  ;;  %v3911_v27 = vmul.f32 %v11661_v6, %v3868_v7  ;;  %v8322_v57 = vcombine.high %v4088_v1, %v4092_v3  ;;  %v9259_v7 = vld [vmem:[%s10201_s29 + $0x4] ss:$8 sps:$4 sm:$0xff]   ;;  %v9262_v15 = vld [vmem:[%s10201_s29 + $0x14] ss:$8 sps:$4 sm:$0xff]  }
 0x918   : > { %5035 = vmatpush1.bf16.msra.mxu0 %v8305_v11  ;;  %5148 = vmatpush1.bf16.msra.mxu1 %v8307_v23  ;;  %v8324_v56 = vcombine.high %v4089_v41, %v4093_v30  ;;  %v4100_v11 = vld [vmem:[%s10157_s26 + $0x3f0] sm:$0xff]  ;;  %v4097_v23 = vld [vmem:[%s10157_s26 + $0x3d8] sm:$0xff]  ;;  %v12371_v26 = vadd.f32 %v11673_v60, %v3913_v32  ;;  %v8321_v6 = vcombine.low %v4088_v1, %v4092_v3  ;;  %v9269_v3 = vld [vmem:[%s10201_s29 + $0x40] ss:$8 sps:$4 sm:$0xff]  }
 0x919   : > { %14163 = vst [vmem:[#allocation27_spill] sm:$0xff] %v12354_v33  ;;  %14164 = vst [vmem:[#allocation48_spill] sm:$0xff] %v12357_v2  ;;  %5036 = vmatprep.subr.bf16.mxu0 %v8314_v52  ;;  %5149 = vmatprep.subr.bf16.mxu1 %v8316_v58  ;;  %v12363_v13 = vpack.c.bf16 %v12357_v2, %v12354_v33  ;;  %v8323_v53 = vcombine.low %v4089_v41, %v4093_v30  ;;  %v9260_v1 = vld [vmem:[%s10201_s29 + $0x10] ss:$8 sps:$4 sm:$0xff]   ;;  %v9268_v32 = vld [vmem:[%s10201_s29 + $0x34] ss:$8 sps:$4 sm:$0xff]  }
 0x91a   : > { %4877 = vmatmul.mubr.bf16.gmra.mrb[64].mxu0 %v12347_v45  ;;  %4990 = vmatmul.mubr.bf16.gmra.mrb[176].mxu1 %v12347_v45  ;;  %14165 = vst [vmem:[#allocation49_spill] sm:$0xff] %v12371_v26  ;;  %v12376_v29 = vadd.f32 %v11673_v60, %v3911_v27  ;;  %v8330_v52 = vcombine.high %v4096_v20, %v4100_v11  ;;  %v9257_v60 = vld [vmem:[%s10201_s29] ss:$8 sps:$4 sm:$0xff]   ;;  %v9274_v41 = vld [vmem:[%s10201_s29 + $0x54] ss:$8 sps:$4 sm:$0xff]  }
 0x91b   : > { %4886 = vmatprep.mubr.bf16.mxu0 %v12363_v13  ;;  %4999 = vmatprep.mubr.bf16.mxu1 %v12363_v13  ;;  %v8332_v54 = vcombine.high %v4097_v23, %v4101_v51  ;;  %v8329_v10 = vcombine.low %v4096_v20, %v4100_v11  ;;  %v8331_v58 = vcombine.low %v4097_v23, %v4101_v51  ;;  %v9275_v30 = vld [vmem:[%s10201_s29 + $0x60] ss:$8 sps:$4 sm:$0xff]   ;;  %v9286_v20 = vld [vmem:[%s10201_s29 + $0x94] ss:$8 sps:$4 sm:$0xff]  }
 0x91c   : > { %5037 = vmatpush1.bf16.msra.mxu0 %v8313_v43  ;;  %5150 = vmatpush1.bf16.msra.mxu1 %v8315_v0  ;;  %14166 = vst [vmem:[#allocation50_spill] sm:$0xff] %v12376_v29  ;;  %v12380_v21 = vpack.c.bf16 %v12371_v26, %v12376_v29  ;;  %v9263_v43 = vld [vmem:[%s10201_s29 + $0x20] ss:$8 sps:$4 sm:$0xff]   ;;  %v9280_v0 = vld [vmem:[%s10201_s29 + $0x74] ss:$8 sps:$4 sm:$0xff]  }
 0x91d   : > { %5038 = vmatprep.subr.bf16.mxu0 %v8322_v57  ;;  %5151 = vmatprep.subr.bf16.mxu1 %v8324_v56  ;;  %v9281_v27 = vld [vmem:[%s10201_s29 + $0x80] ss:$8 sps:$4 sm:$0xff]   ;;  %v9292_v56 = vld [vmem:[%s10201_s29 + $0xb4] ss:$8 sps:$4 sm:$0xff]   ;;  %v9332_v26 = vld [vmem:[%s10201_s29 + $0x190] ss:$8 sps:$4 sm:$0xff]  }
 0x91e   : > { %v9287_v57 = vld [vmem:[%s10201_s29 + $0xa0] ss:$8 sps:$4 sm:$0xff]   ;;  %v9298_v23 = vld [vmem:[%s10201_s29 + $0xd4] ss:$8 sps:$4 sm:$0xff]  }
 0x91f   : > { %v9293_v11 = vld [vmem:[%s10201_s29 + $0xc0] ss:$8 sps:$4 sm:$0xff]  }
 0x920   : > { %5039 = vmatpush1.bf16.msra.mxu0 %v8321_v6  ;;  %5152 = vmatpush1.bf16.msra.mxu1 %v8323_v53  ;;  %v9299_v51 = vld [vmem:[%s10201_s29 + $0xe0] ss:$8 sps:$4 sm:$0xff]   ;;  %v9304_v6 = vld [vmem:[%s10201_s29 + $0xf4] ss:$8 sps:$4 sm:$0xff]   ;;  %v9307_v53 = vld [vmem:[%s10201_s29 + $0x104] ss:$8 sps:$4 sm:$0xff]  }
 0x921   : > { %5040 = vmatprep.subr.bf16.mxu0 %v8330_v52  ;;  %5153 = vmatprep.subr.bf16.mxu1 %v8332_v54  ;;  %v12451_v54 = vld [vmem:[%s10191_s3] sm:$0xff] }
 0x922   : > { %4887 = vmatmul.mubr.bf16.gmra.mrb[68].mxu0 %v12380_v21  ;;  %5000 = vmatmul.mubr.bf16.gmra.mrb[180].mxu1 %v12380_v21 }
 0x923   : > { %5042 = vmatprep.mubr.bf16.mxu0 %v11911_v37  ;;  %5155 = vmatprep.mubr.bf16.mxu1 %v11911_v37  ;;  %v9265_v37 = vld [vmem:[%s10201_s29 + $0x24] ss:$8 sps:$4 sm:$0xff]  }
 0x924   : > { %5041 = vmatpush1.bf16.msra.mxu0 %v8329_v10  ;;  %5154 = vmatpush1.bf16.msra.mxu1 %v8331_v58  ;;  %v14168_v58 = vld [vmem:[#allocation22_spill] sm:$0xff] }
 0x925   : > { %6208 = vmatprep.subr.bf16.mxu0 %v9259_v7  ;;  %v12456_v7 = vrot.slane %v12451_v54, %v14168_v58 }
 0x92a   : > { %5043 = vmatmul.mubr.bf16.vlgmr.msra.gmra.mrb[72].mxu0 %v11927_v49  ;;  %5156 = vmatmul.mubr.bf16.vlgmr.msra.gmra.mrb[184].mxu1 %v11927_v49  ;;  %v9266_v49 = vld [vmem:[%s10201_s29 + $0x30] ss:$8 sps:$4 sm:$0xff]  }
 0x92b   : > { %5052 = vmatprep.mubr.bf16.mxu0 %v11977_v24  ;;  %5165 = vmatprep.mubr.bf16.mxu1 %v11977_v24  ;;  %v9271_v24 = vld [vmem:[%s10201_s29 + $0x44] ss:$8 sps:$4 sm:$0xff]  }
 0x92c   : > { %6209 = vmatpush1.bf16.msra.mxu0 %v9257_v60 }
 0x92d   : > { %6210 = vmatprep.subr.bf16.mxu0 %v9262_v15 }
 0x930   : > { %6211 = vmatpush1.bf16.msra.mxu0 %v9260_v1 }
 0x931   : > { %6212 = vmatprep.subr.bf16.mxu0 %v9265_v37 }
 0x932   : > { %5053 = vmatmul.mubr.bf16.gmra.mrb[76].mxu0 %v12001_v12  ;;  %5166 = vmatmul.mubr.bf16.gmra.mrb[188].mxu1 %v12001_v12  ;;  %v9272_v12 = vld [vmem:[%s10201_s29 + $0x50] ss:$8 sps:$4 sm:$0xff]  }
 0x933   : > { %5062 = vmatprep.mubr.bf16.mxu0 %v12051_v18  ;;  %5175 = vmatprep.mubr.bf16.mxu1 %v12051_v18  ;;  %v9277_v18 = vld [vmem:[%s10201_s29 + $0x64] ss:$8 sps:$4 sm:$0xff]  }
 0x934   : > { %6213 = vmatpush1.bf16.msra.mxu0 %v9263_v43 }
 0x935   : > { %6214 = vmatprep.subr.bf16.mxu0 %v9268_v32 }
 0x938   : > { %6215 = vmatpush1.bf16.msra.mxu0 %v9266_v49 }
 0x939   : > { %6216 = vmatprep.subr.bf16.mxu0 %v9271_v24 }
 0x93a   : > { %5063 = vmatmul.mubr.bf16.gmra.mrb[80].mxu0 %v12084_v39  ;;  %5176 = vmatmul.mubr.bf16.gmra.mrb[192].mxu1 %v12084_v39  ;;  %v9278_v39 = vld [vmem:[%s10201_s29 + $0x70] ss:$8 sps:$4 sm:$0xff]  }
 0x93b   : > { %5072 = vmatprep.mubr.bf16.mxu0 %v12135_v42  ;;  %5185 = vmatprep.mubr.bf16.mxu1 %v12135_v42  ;;  %v9283_v42 = vld [vmem:[%s10201_s29 + $0x84] ss:$8 sps:$4 sm:$0xff]  }
 0x93c   : > { %6217 = vmatpush1.bf16.msra.mxu0 %v9269_v3 }
 0x93d   : > { %6218 = vmatprep.subr.bf16.mxu0 %v9274_v41 }
 0x940   : > { %6219 = vmatpush1.bf16.msra.mxu0 %v9272_v12 }
 0x941   : > { %6220 = vmatprep.subr.bf16.mxu0 %v9277_v18 }
 0x942   : > { %5073 = vmatmul.mubr.bf16.gmra.mrb[84].mxu0 %v12158_v59  ;;  %5186 = vmatmul.mubr.bf16.gmra.mrb[196].mxu1 %v12158_v59  ;;  %v9284_v59 = vld [vmem:[%s10201_s29 + $0x90] ss:$8 sps:$4 sm:$0xff]  }
 0x943   : > { %5082 = vmatprep.mubr.bf16.mxu0 %v12200_v40  ;;  %5195 = vmatprep.mubr.bf16.mxu1 %v12200_v40  ;;  %v9289_v40 = vld [vmem:[%s10201_s29 + $0xa4] ss:$8 sps:$4 sm:$0xff]  }
 0x944   : > { %6221 = vmatpush1.bf16.msra.mxu0 %v9275_v30 }
 0x945   : > { %6222 = vmatprep.subr.bf16.mxu0 %v9280_v0 }
 0x948   : > { %6223 = vmatpush1.bf16.msra.mxu0 %v9278_v39 }
 0x949   : > { %6224 = vmatprep.subr.bf16.mxu0 %v9283_v42 }
 0x94a   : > { %5083 = vmatmul.mubr.bf16.gmra.mrb[88].mxu0 %v12234_v5  ;;  %5196 = vmatmul.mubr.bf16.gmra.mrb[200].mxu1 %v12234_v5  ;;  %v9290_v5 = vld [vmem:[%s10201_s29 + $0xb0] ss:$8 sps:$4 sm:$0xff]  }
 0x94b   : > { %5092 = vmatprep.mubr.bf16.mxu0 %v12259_v55  ;;  %5205 = vmatprep.mubr.bf16.mxu1 %v12259_v55  ;;  %v9295_v55 = vld [vmem:[%s10201_s29 + $0xc4] ss:$8 sps:$4 sm:$0xff]  }
 0x94c   : > { %6225 = vmatpush1.bf16.msra.mxu0 %v9281_v27 }
 0x94d   : > { %6226 = vmatprep.subr.bf16.mxu0 %v9286_v20 }
 0x950   : > { %6227 = vmatpush1.bf16.msra.mxu0 %v9284_v59 }
 0x951   : > { %6228 = vmatprep.subr.bf16.mxu0 %v9289_v40 }
 0x952   : > { %5093 = vmatmul.mubr.bf16.gmra.mrb[92].mxu0 %v12295_v47  ;;  %5206 = vmatmul.mubr.bf16.gmra.mrb[204].mxu1 %v12295_v47  ;;  %v9296_v47 = vld [vmem:[%s10201_s29 + $0xd0] ss:$8 sps:$4 sm:$0xff]  }
 0x953   : > { %5102 = vmatprep.mubr.bf16.mxu0 %v12326_v14  ;;  %5215 = vmatprep.mubr.bf16.mxu1 %v12326_v14  ;;  %v9301_v14 = vld [vmem:[%s10201_s29 + $0xe4] ss:$8 sps:$4 sm:$0xff]  }
 0x954   : > { %6229 = vmatpush1.bf16.msra.mxu0 %v9287_v57 }
 0x955   : > { %6230 = vmatprep.subr.bf16.mxu0 %v9292_v56 }
 0x958   : > { %6231 = vmatpush1.bf16.msra.mxu0 %v9290_v5 }
 0x959   : > { %6232 = vmatprep.subr.bf16.mxu0 %v9295_v55 }
 0x95a   : > { %5103 = vmatmul.mubr.bf16.gmra.mrb[96].mxu0 %v12347_v45  ;;  %5216 = vmatmul.mubr.bf16.gmra.mrb[208].mxu1 %v12347_v45  ;;  %v9302_v45 = vld [vmem:[%s10201_s29 + $0xf0] ss:$8 sps:$4 sm:$0xff]  }
 0x95b   : > { %5112 = vmatprep.mubr.bf16.mxu0 %v12363_v13  ;;  %5225 = vmatprep.mubr.bf16.mxu1 %v12363_v13  ;;  %v14167_v13 = vld [vmem:[#allocation20_spill] sm:$0xff] }
 0x95c   : > { %6233 = vmatpush1.bf16.msra.mxu0 %v9293_v11  ;;  %v4114_v52 = vsub.s32 2, %v14167_v13  ;;  %v4118_v10 = vsub.s32 3, %v14167_v13 }
 0x95d   : > { %6234 = vmatprep.subr.bf16.mxu0 %v9298_v23 }
 0x95e   : > { %v12459_v60 = vrot.slane %v12451_v54, %v4114_v52  ;;  %v12466_v1 = vrot.slane %v12451_v54, %v4118_v10  ;;  %v9310_v52 = vld [vmem:[%s10201_s29 + $0x114] ss:$8 sps:$4 sm:$0xff]  }
 0x960   : > { %6235 = vmatpush1.bf16.msra.mxu0 %v9296_v47 }
 0x961   : > { %6236 = vmatprep.subr.bf16.mxu0 %v9301_v14 }
 0x962   : > { %5113 = vmatmul.mubr.bf16.gmra.mrb[100].mxu0 %v12380_v21  ;;  %5226 = vmatmul.mubr.bf16.gmra.mrb[212].mxu1 %v12380_v21  ;;  %v14169_v21 = vld [vmem:[#allocation21_spill] sm:$0xff] }
 0x963   : > { %v12463_v15 = vrot.slane %v12451_v54, %v14169_v21 }
 0x964   : > { %6237 = vmatpush1.bf16.msra.mxu0 %v9299_v51 }
 0x965   : > { %6238 = vmatprep.subr.bf16.mxu0 %v9304_v6 }
 0x968   : > { %6239 = vmatpush1.bf16.msra.mxu0 %v9302_v45 }
 0x969   : > { %6321 = vmatprep.subr.bf16.mxu0 %v9307_v53  ;;  %v9305_v53 = vld [vmem:[%s10201_s29 + $0x100] ss:$8 sps:$4 sm:$0xff]  }
 0x9ad   : > { %v4818_v37 = vpop.f32.mrb[40].mxu0  ;;  %v4931_v43 = vpop.f32.mrb[152].mxu1 }
 0x9ae   : > { %v4819_v32 = vadd.f32 %v4818_v37, %v12456_v7  ;;  %v4932_v49 = vadd.f32 %v4931_v43, %v12459_v60  ;;  %v4820_v24 = vpop.f32.mrb[41].mxu0  ;;  %v4933_v3 = vpop.f32.mrb[153].mxu1 }
 0x9af   : > { %v4821_v41 = vadd.f32 %v4820_v24, %v12463_v15  ;;  %v4934_v12 = vadd.f32 %v4933_v3, %v12466_v1  ;;  %v4822_v18 = vpop.f32.mrb[42].mxu0  ;;  %v4935_v30 = vpop.f32.mrb[154].mxu1 }
 0x9b0   : > { %v4823_v0 = vadd.f32 %v4822_v18, %v12456_v7  ;;  %v4936_v39 = vadd.f32 %v4935_v30, %v12459_v60  ;;  %v4824_v42 = vpop.f32.mrb[43].mxu0  ;;  %v4937_v27 = vpop.f32.mrb[155].mxu1  ;;  %v5236_v40 = vmax.f32 %v4819_v32, 0.0  ;;  %v5238_v57 = vmax.f32 %v4932_v49, 0.0  ;;  %v9308_v30 = vld [vmem:[%s10201_s29 + $0x110] ss:$8 sps:$4 sm:$0xff]  }
 0x9b1   : > { %v4825_v20 = vadd.f32 %v4824_v42, %v12463_v15  ;;  %v4938_v59 = vadd.f32 %v4937_v27, %v12466_v1  ;;  %v5237_v55 = vmax.f32 %v4821_v41, 0.0  ;;  %v5239_v11 = vmax.f32 %v4934_v12, 0.0 }
 0x9b2   : > { %v5244_v56 = vmax.f32 %v4823_v0, 0.0  ;;  %v5246_v5 = vmax.f32 %v4936_v39, 0.0 }
 0x9b3   : > { %v5245_v23 = vmax.f32 %v4825_v20, 0.0  ;;  %v5247_v47 = vmax.f32 %v4938_v59, 0.0  ;;  %v9313_v20 = vld [vmem:[%s10201_s29 + $0x124] ss:$8 sps:$4 sm:$0xff]  }
 0x9b4   : > { %v5364_v14 = vpack.c.bf16 %v5244_v56, %v5236_v40  ;;  %v12476_v51 = vpack.c.bf16 %v5246_v5, %v5238_v57 }
 0x9b5   : > { %v5365_v6 = vpack.c.bf16 %v5245_v23, %v5237_v55  ;;  %v12478_v45 = vpack.c.bf16 %v5247_v47, %v5239_v11 }
 0x9b7   : > { %6240 = vmatprep.mubr.bf16.mxu0 %v5365_v6  ;;  %v9311_v6 = vld [vmem:[%s10201_s29 + $0x120] ss:$8 sps:$4 sm:$0xff]  }
 0x9b8   : > { %6241 = vmatmul.mubr.bf16.vlgmr.msra.gmra.mrb[104].mxu0 %v5364_v14 }
 0x9b9   : > { %v4828_v10 = vpop.f32.mrb[44].mxu0  ;;  %v4941_v37 = vpop.f32.mrb[156].mxu1  ;;  %6322 = vmatpush1.bf16.msra.mxu0 %v9305_v53 }
 0x9ba   : > { %v4829_v43 = vadd.f32 %v4828_v10, %v12456_v7  ;;  %v4942_v32 = vadd.f32 %v4941_v37, %v12459_v60  ;;  %v4830_v49 = vpop.f32.mrb[45].mxu0  ;;  %v4943_v24 = vpop.f32.mrb[157].mxu1  ;;  %6323 = vmatprep.subr.bf16.mxu0 %v9310_v52  ;;  %v9316_v52 = vld [vmem:[%s10201_s29 + $0x134] ss:$8 sps:$4 sm:$0xff]  }
 0x9bb   : > { %v4831_v3 = vadd.f32 %v4830_v49, %v12463_v15  ;;  %v4944_v41 = vadd.f32 %v4943_v24, %v12466_v1  ;;  %v4832_v12 = vpop.f32.mrb[46].mxu0  ;;  %v4945_v18 = vpop.f32.mrb[158].mxu1  ;;  %v9314_v24 = vld [vmem:[%s10201_s29 + $0x130] ss:$8 sps:$4 sm:$0xff]  }
 0x9bc   : > { %v4833_v0 = vadd.f32 %v4832_v12, %v12456_v7  ;;  %v4946_v39 = vadd.f32 %v4945_v18, %v12459_v60  ;;  %v4834_v42 = vpop.f32.mrb[47].mxu0  ;;  %v4947_v27 = vpop.f32.mrb[159].mxu1  ;;  %v5252_v57 = vmax.f32 %v4829_v43, 0.0  ;;  %v5254_v56 = vmax.f32 %v4942_v32, 0.0 }
 0x9bd   : > { %v4835_v59 = vadd.f32 %v4834_v42, %v12463_v15  ;;  %v4948_v40 = vadd.f32 %v4947_v27, %v12466_v1  ;;  %v5253_v11 = vmax.f32 %v4831_v3, 0.0  ;;  %v5255_v23 = vmax.f32 %v4944_v41, 0.0  ;;  %6324 = vmatpush1.bf16.msra.mxu0 %v9308_v30  ;;  %v9319_v30 = vld [vmem:[%s10201_s29 + $0x144] ss:$8 sps:$4 sm:$0xff]  }
 0x9be   : > { %v5260_v5 = vmax.f32 %v4833_v0, 0.0  ;;  %v5262_v55 = vmax.f32 %v4946_v39, 0.0  ;;  %6325 = vmatprep.subr.bf16.mxu0 %v9313_v20 }
 0x9bf   : > { %v5261_v47 = vmax.f32 %v4835_v59, 0.0  ;;  %v5263_v14 = vmax.f32 %v4948_v40, 0.0 }
 0x9c0   : > { %v5372_v53 = vpack.c.bf16 %v5260_v5, %v5252_v57  ;;  %v12493_v10 = vpack.c.bf16 %v5262_v55, %v5254_v56  ;;  %v9317_v55 = vld [vmem:[%s10201_s29 + $0x140] ss:$8 sps:$4 sm:$0xff]  }
 0x9c1   : > { %v5373_v37 = vpack.c.bf16 %v5261_v47, %v5253_v11  ;;  %v12496_v49 = vpack.c.bf16 %v5263_v14, %v5255_v23  ;;  %6326 = vmatpush1.bf16.msra.mxu0 %v9311_v6  ;;  %v9322_v6 = vld [vmem:[%s10201_s29 + $0x154] ss:$8 sps:$4 sm:$0xff]  }
 0x9c2   : > { %6327 = vmatprep.subr.bf16.mxu0 %v9316_v52 }
 0x9c3   : > { %6250 = vmatprep.mubr.bf16.mxu0 %v5373_v37 }
 0x9c4   : > { %6251 = vmatmul.mubr.bf16.gmra.mrb[108].mxu0 %v5372_v53 }
 0x9c5   : > { %v4838_v43 = vpop.f32.mrb[48].mxu0  ;;  %6328 = vmatpush1.bf16.msra.mxu0 %v9314_v24 }
 0x9c6   : > { %v4951_v32 = vpop.f32.mrb[160].mxu1  ;;  %v4839_v3 = vadd.f32 %v4838_v43, %v12456_v7  ;;  %v4840_v12 = vpop.f32.mrb[49].mxu0  ;;  %6329 = vmatprep.subr.bf16.mxu0 %v9319_v30 }
 0x9c7   : > { %v4952_v41 = vadd.f32 %v4951_v32, %v12459_v60  ;;  %v4953_v18 = vpop.f32.mrb[161].mxu1  ;;  %v4841_v0 = vadd.f32 %v4840_v12, %v12463_v15  ;;  %v4842_v42 = vpop.f32.mrb[50].mxu0 }
 0x9c8   : > { %v4954_v39 = vadd.f32 %v4953_v18, %v12466_v1  ;;  %v4955_v27 = vpop.f32.mrb[162].mxu1  ;;  %v4843_v20 = vadd.f32 %v4842_v42, %v12456_v7  ;;  %v4844_v40 = vpop.f32.mrb[51].mxu0  ;;  %v5268_v11 = vmax.f32 %v4839_v3, 0.0  ;;  %v9320_v3 = vld [vmem:[%s10201_s29 + $0x150] ss:$8 sps:$4 sm:$0xff]  }
 0x9c9   : > { %v4956_v59 = vadd.f32 %v4955_v27, %v12459_v60  ;;  %v4957_v57 = vpop.f32.mrb[163].mxu1  ;;  %v4845_v56 = vadd.f32 %v4844_v40, %v12463_v15  ;;  %v5270_v23 = vmax.f32 %v4952_v41, 0.0  ;;  %v5269_v53 = vmax.f32 %v4841_v0, 0.0  ;;  %6330 = vmatpush1.bf16.msra.mxu0 %v9317_v55 }
 0x9ca   : > { %v4958_v5 = vadd.f32 %v4957_v57, %v12466_v1  ;;  %v5276_v47 = vmax.f32 %v4843_v20, 0.0  ;;  %v5271_v52 = vmax.f32 %v4954_v39, 0.0  ;;  %6331 = vmatprep.subr.bf16.mxu0 %v9322_v6  ;;  %v9325_v39 = vld [vmem:[%s10201_s29 + $0x164] ss:$8 sps:$4 sm:$0xff]   ;;  %v9323_v6 = vld [vmem:[%s10201_s29 + $0x160] ss:$8 sps:$4 sm:$0xff]  }
 0x9cb   : > { %v5278_v14 = vmax.f32 %v4956_v59, 0.0  ;;  %v5277_v37 = vmax.f32 %v4845_v56, 0.0 }
 0x9cc   : > { %v5279_v43 = vmax.f32 %v4958_v5, 0.0  ;;  %v5380_v32 = vpack.c.bf16 %v5276_v47, %v5268_v11 }
 0x9cd   : > { %v12510_v12 = vpack.c.bf16 %v5278_v14, %v5270_v23  ;;  %v5381_v18 = vpack.c.bf16 %v5277_v37, %v5269_v53  ;;  %6332 = vmatpush1.bf16.msra.mxu0 %v9320_v3  ;;  %v9326_v3 = vld [vmem:[%s10201_s29 + $0x170] ss:$8 sps:$4 sm:$0xff]  }
 0x9ce   : > { %v12512_v42 = vpack.c.bf16 %v5279_v43, %v5271_v52  ;;  %v4848_v24 = vpop.f32.mrb[52].mxu0  ;;  %v4961_v27 = vpop.f32.mrb[164].mxu1  ;;  %6333 = vmatprep.subr.bf16.mxu0 %v9325_v39 }
 0x9cf   : > { %v4849_v41 = vadd.f32 %v4848_v24, %v12456_v7  ;;  %v4962_v30 = vadd.f32 %v4961_v27, %v12459_v60  ;;  %v4850_v20 = vpop.f32.mrb[53].mxu0  ;;  %v4963_v0 = vpop.f32.mrb[165].mxu1  ;;  %6260 = vmatprep.mubr.bf16.mxu0 %v5381_v18  ;;  %v9328_v18 = vld [vmem:[%s10201_s29 + $0x174] ss:$8 sps:$4 sm:$0xff]  }
 0x9d0   : > { %v4851_v59 = vadd.f32 %v4850_v20, %v12463_v15  ;;  %v4964_v40 = vadd.f32 %v4963_v0, %v12466_v1  ;;  %v4852_v57 = vpop.f32.mrb[54].mxu0  ;;  %v4965_v56 = vpop.f32.mrb[166].mxu1  ;;  %6261 = vmatmul.mubr.bf16.gmra.mrb[112].mxu0 %v5380_v32 }
 0x9d1   : > { %v4853_v5 = vadd.f32 %v4852_v57, %v12456_v7  ;;  %v4966_v55 = vadd.f32 %v4965_v56, %v12459_v60  ;;  %v4854_v11 = vpop.f32.mrb[55].mxu0  ;;  %v4967_v23 = vpop.f32.mrb[167].mxu1  ;;  %v5284_v53 = vmax.f32 %v4849_v41, 0.0  ;;  %v5286_v52 = vmax.f32 %v4962_v30, 0.0  ;;  %6334 = vmatpush1.bf16.msra.mxu0 %v9323_v6  ;;  %v9331_v30 = vld [vmem:[%s10201_s29 + $0x184] ss:$8 sps:$4 sm:$0xff]  }
 0x9d2   : > { %v4855_v47 = vadd.f32 %v4854_v11, %v12463_v15  ;;  %v4968_v14 = vadd.f32 %v4967_v23, %v12466_v1  ;;  %v5285_v24 = vmax.f32 %v4851_v59, 0.0  ;;  %v5287_v27 = vmax.f32 %v4964_v40, 0.0  ;;  %6335 = vmatprep.subr.bf16.mxu0 %v9328_v18  ;;  %v9329_v18 = vld [vmem:[%s10201_s29 + $0x180] ss:$8 sps:$4 sm:$0xff]  }
 0x9d3   : > { %v5292_v37 = vmax.f32 %v4853_v5, 0.0  ;;  %v5294_v43 = vmax.f32 %v4966_v55, 0.0 }
 0x9d4   : > { %v5293_v20 = vmax.f32 %v4855_v47, 0.0  ;;  %v5295_v0 = vmax.f32 %v4968_v14, 0.0 }
 0x9d5   : > { %v5388_v57 = vpack.c.bf16 %v5292_v37, %v5284_v53  ;;  %v12526_v32 = vpack.c.bf16 %v5294_v43, %v5286_v52  ;;  %6336 = vmatpush1.bf16.msra.mxu0 %v9326_v3 }
 0x9d6   : > { %v5389_v56 = vpack.c.bf16 %v5293_v20, %v5285_v24  ;;  %v12528_v11 = vpack.c.bf16 %v5295_v0, %v5287_v27  ;;  %6337 = vmatprep.subr.bf16.mxu0 %v9331_v30  ;;  %v9334_v20 = vld [vmem:[%s10201_s29 + $0x194] ss:$8 sps:$4 sm:$0xff]  }
 0x9d8   : > { %6270 = vmatprep.mubr.bf16.mxu0 %v5389_v56 }
 0x9d9   : > { %6271 = vmatmul.mubr.bf16.gmra.mrb[116].mxu0 %v5388_v57 }
 0x9da   : > { %6338 = vmatpush1.bf16.msra.mxu0 %v9329_v18 }
 0x9db   : > { %v4858_v23 = vpop.f32.mrb[56].mxu0  ;;  %v4971_v41 = vpop.f32.mrb[168].mxu1  ;;  %6339 = vmatprep.subr.bf16.mxu0 %v9334_v20 }
 0x9dc   : > { %v4859_v39 = vadd.f32 %v4858_v23, %v12456_v7  ;;  %v4972_v59 = vadd.f32 %v4971_v41, %v12459_v60  ;;  %v4860_v40 = vpop.f32.mrb[57].mxu0  ;;  %v4973_v5 = vpop.f32.mrb[169].mxu1 }
 0x9dd   : > { %v4861_v55 = vadd.f32 %v4860_v40, %v12463_v15  ;;  %v4974_v47 = vadd.f32 %v4973_v5, %v12466_v1  ;;  %v4862_v14 = vpop.f32.mrb[58].mxu0  ;;  %v4975_v6 = vpop.f32.mrb[170].mxu1 }
 0x9de   : > { %v4863_v53 = vadd.f32 %v4862_v14, %v12456_v7  ;;  %v4976_v52 = vadd.f32 %v4975_v6, %v12459_v60  ;;  %v4864_v37 = vpop.f32.mrb[59].mxu0  ;;  %v4977_v43 = vpop.f32.mrb[171].mxu1  ;;  %v5300_v0 = vmax.f32 %v4859_v39, 0.0  ;;  %v5302_v56 = vmax.f32 %v4972_v59, 0.0  ;;  %6340 = vmatpush1.bf16.msra.mxu0 %v9332_v26 }
 0x9df   : > { %v4865_v24 = vadd.f32 %v4864_v37, %v12463_v15  ;;  %v4978_v27 = vadd.f32 %v4977_v43, %v12466_v1  ;;  %v5301_v57 = vmax.f32 %v4861_v55, 0.0  ;;  %v5303_v40 = vmax.f32 %v4974_v47, 0.0 }
 0x9e0   : > { %v5308_v23 = vmax.f32 %v4863_v53, 0.0  ;;  %v5310_v41 = vmax.f32 %v4976_v52, 0.0  ;;  %v9337_v53 = vld [vmem:[%s10201_s29 + $0x1a4] ss:$8 sps:$4 sm:$0xff]  }
 0x9e1   : > { %v5309_v5 = vmax.f32 %v4865_v24, 0.0  ;;  %v5311_v14 = vmax.f32 %v4978_v27, 0.0  ;;  %6341 = vmatprep.subr.bf16.mxu0 %v9337_v53 }
 0x9e2   : > { %v5396_v6 = vpack.c.bf16 %v5308_v23, %v5300_v0  ;;  %v12542_v2 = vpack.c.bf16 %v5310_v41, %v5302_v56 }
 0x9e3   : > { %v5397_v3 = vpack.c.bf16 %v5309_v5, %v5301_v57  ;;  %v12544_v37 = vpack.c.bf16 %v5311_v14, %v5303_v40  ;;  %v9335_v40 = vld [vmem:[%s10201_s29 + $0x1a0] ss:$8 sps:$4 sm:$0xff]  }
 0x9e4   : > { %6342 = vmatpush1.bf16.msra.mxu0 %v9335_v40 }
 0x9e5   : > { %v4868_v43 = vpop.f32.mrb[60].mxu0  ;;  %v4981_v30 = vpop.f32.mrb[172].mxu1  ;;  %6280 = vmatprep.mubr.bf16.mxu0 %v5397_v3  ;;  %v9340_v3 = vld [vmem:[%s10201_s29 + $0x1b4] ss:$8 sps:$4 sm:$0xff]  }
 0x9e6   : > { %v4869_v39 = vadd.f32 %v4868_v43, %v12456_v7  ;;  %v4982_v59 = vadd.f32 %v4981_v30, %v12459_v60  ;;  %v4870_v55 = vpop.f32.mrb[61].mxu0  ;;  %v4983_v47 = vpop.f32.mrb[173].mxu1  ;;  %6281 = vmatmul.mubr.bf16.gmra.mrb[120].mxu0 %v5396_v6  ;;  %6343 = vmatprep.subr.bf16.mxu0 %v9340_v3 }
 0x9e7   : > { %v4871_v52 = vadd.f32 %v4870_v55, %v12463_v15  ;;  %v4984_v24 = vadd.f32 %v4983_v47, %v12466_v1  ;;  %v4872_v18 = vpop.f32.mrb[62].mxu0  ;;  %v4985_v27 = vpop.f32.mrb[174].mxu1 }
 0x9e8   : > { %v4873_v0 = vadd.f32 %v4872_v18, %v12456_v7  ;;  %v4986_v20 = vadd.f32 %v4985_v27, %v12459_v60  ;;  %v4874_v56 = vpop.f32.mrb[63].mxu0  ;;  %v4987_v23 = vpop.f32.mrb[175].mxu1  ;;  %v5316_v5 = vmax.f32 %v4869_v39, 0.0  ;;  %v5318_v14 = vmax.f32 %v4982_v59, 0.0  ;;  %v9338_v39 = vld [vmem:[%s10201_s29 + $0x1b0] ss:$8 sps:$4 sm:$0xff]  }
 0x9e9   : > { %v4875_v41 = vadd.f32 %v4874_v56, %v12463_v15  ;;  %v4988_v57 = vadd.f32 %v4987_v23, %v12466_v1  ;;  %v5317_v55 = vmax.f32 %v4871_v52, 0.0  ;;  %v5319_v47 = vmax.f32 %v4984_v24, 0.0  ;;  %v9343_v24 = vld [vmem:[%s10201_s29 + $0x1c4] ss:$8 sps:$4 sm:$0xff]   ;;  %6344 = vmatpush1.bf16.msra.mxu0 %v9338_v39 }
 0x9ea   : > { %v5324_v43 = vmax.f32 %v4873_v0, 0.0  ;;  %v5326_v30 = vmax.f32 %v4986_v20, 0.0  ;;  %6345 = vmatprep.subr.bf16.mxu0 %v9343_v24  ;;  %v4130_v39 = vsub.s32 6, %v14167_v13  ;;  %v9344_v24 = vld [vmem:[%s10201_s29 + $0x1d0] ss:$8 sps:$4 sm:$0xff]  }
 0x9eb   : > { %v5325_v18 = vmax.f32 %v4875_v41, 0.0  ;;  %v5327_v27 = vmax.f32 %v4988_v57, 0.0 }
 0x9ec   : > { %v5404_v33 = vpack.c.bf16 %v5324_v43, %v5316_v5  ;;  %v12558_v6 = vpack.c.bf16 %v5326_v30, %v5318_v14 }
 0x9ed   : > { %v5405_v56 = vpack.c.bf16 %v5325_v18, %v5317_v55  ;;  %v12560_v29 = vpack.c.bf16 %v5327_v27, %v5319_v47  ;;  %v4878_v26 = vpop.f32.mrb[64].mxu0  ;;  %v4991_v23 = vpop.f32.mrb[176].mxu1  ;;  %v9341_v47 = vld [vmem:[%s10201_s29 + $0x1c0] ss:$8 sps:$4 sm:$0xff]  }
 0x9ee   : > { %v4879_v59 = vadd.f32 %v4878_v26, %v12456_v7  ;;  %v4992_v53 = vadd.f32 %v4991_v23, %v12459_v60  ;;  %v4880_v0 = vpop.f32.mrb[65].mxu0  ;;  %v4993_v52 = vpop.f32.mrb[177].mxu1  ;;  %6346 = vmatpush1.bf16.msra.mxu0 %v9341_v47 }
 0x9ef   : > { %v4881_v20 = vadd.f32 %v4880_v0, %v12463_v15  ;;  %v4994_v41 = vadd.f32 %v4993_v52, %v12466_v1  ;;  %v4882_v57 = vpop.f32.mrb[66].mxu0  ;;  %v4995_v5 = vpop.f32.mrb[178].mxu1  ;;  %6290 = vmatprep.mubr.bf16.mxu0 %v5405_v56  ;;  %v9346_v56 = vld [vmem:[%s10201_s29 + $0x1d4] ss:$8 sps:$4 sm:$0xff]  }
 0x9f0   : > { %v4883_v40 = vadd.f32 %v4882_v57, %v12456_v7  ;;  %v4996_v14 = vadd.f32 %v4995_v5, %v12459_v60  ;;  %v4884_v43 = vpop.f32.mrb[67].mxu0  ;;  %v4997_v30 = vpop.f32.mrb[179].mxu1  ;;  %6291 = vmatmul.mubr.bf16.gmra.mrb[124].mxu0 %v5404_v33  ;;  %v5332_v18 = vmax.f32 %v4879_v59, 0.0  ;;  %v5334_v27 = vmax.f32 %v4992_v53, 0.0  ;;  %6347 = vmatprep.subr.bf16.mxu0 %v9346_v56 }
 0x9f1   : > { %v4885_v55 = vadd.f32 %v4884_v43, %v12463_v15  ;;  %v4998_v3 = vadd.f32 %v4997_v30, %v12466_v1  ;;  %v5333_v0 = vmax.f32 %v4881_v20, 0.0  ;;  %v5335_v52 = vmax.f32 %v4994_v41, 0.0 }
 0x9f2   : > { %v5340_v26 = vmax.f32 %v4883_v40, 0.0  ;;  %v5342_v23 = vmax.f32 %v4996_v14, 0.0  ;;  %v4122_v33 = vsub.s32 4, %v14167_v13  ;;  %v4126_v20 = vsub.s32 5, %v14167_v13  ;;  %6348 = vmatpush1.bf16.msra.mxu0 %v9344_v24 }
 0x9f3   : > { %v5341_v57 = vmax.f32 %v4885_v55, 0.0  ;;  %v5343_v5 = vmax.f32 %v4998_v3, 0.0  ;;  %v4134_v41 = vsub.s32 7, %v14167_v13  ;;  %v12594_v56 = vrot.slane %v12451_v54, %v4130_v39  ;;  %v9352_v39 = vld [vmem:[%s10201_s29 + $0x1f4] ss:$8 sps:$4 sm:$0xff]  }
 0x9f4   : > { %v5412_v48 = vpack.c.bf16 %v5340_v26, %v5332_v18  ;;  %v12574_v36 = vpack.c.bf16 %v5342_v23, %v5334_v27  ;;  %v9349_v18 = vld [vmem:[%s10201_s29 + $0x1e4] ss:$8 sps:$4 sm:$0xff]  }
 0x9f5   : > { %v5413_v43 = vpack.c.bf16 %v5341_v57, %v5333_v0  ;;  %v12578_v59 = vpack.c.bf16 %v5343_v5, %v5335_v52  ;;  %v4888_v53 = vpop.f32.mrb[68].mxu0  ;;  %v5001_v40 = vpop.f32.mrb[180].mxu1  ;;  %v12591_v5 = vrot.slane %v12451_v54, %v4122_v33  ;;  %6349 = vmatprep.subr.bf16.mxu0 %v9349_v18 }
 0x9f6   : > { %v4889_v14 = vadd.f32 %v4888_v53, %v12456_v7  ;;  %v5002_v30 = vadd.f32 %v5001_v40, %v12459_v60  ;;  %v4890_v55 = vpop.f32.mrb[69].mxu0  ;;  %v5003_v3 = vpop.f32.mrb[181].mxu1 }
 0x9f7   : > { %v4891_v27 = vadd.f32 %v4890_v55, %v12463_v15  ;;  %v5004_v26 = vadd.f32 %v5003_v3, %v12466_v1  ;;  %v4892_v23 = vpop.f32.mrb[70].mxu0  ;;  %v5005_v47 = vpop.f32.mrb[182].mxu1  ;;  %6300 = vmatprep.mubr.bf16.mxu0 %v5413_v43  ;;  %v12599_v43 = vrot.slane %v12451_v54, %v4126_v20 }
 0x9f8   : > { %v4893_v0 = vadd.f32 %v4892_v23, %v12456_v7  ;;  %v5006_v13 = vadd.f32 %v5005_v47, %v12459_v60  ;;  %v4894_v52 = vpop.f32.mrb[71].mxu0  ;;  %v5007_v57 = vpop.f32.mrb[183].mxu1  ;;  %6301 = vmatmul.mubr.bf16.gmra.mrb[128].mxu0 %v5412_v48  ;;  %v12602_v7 = vrot.slane %v12451_v54, %v4134_v41  ;;  %v9347_v60 = vld [vmem:[%s10201_s29 + $0x1e0] ss:$8 sps:$4 sm:$0xff]   ;;  %v5348_v55 = vmax.f32 %v4889_v14, 0.0 }
 0x9f9   : > { %v4895_v53 = vadd.f32 %v4894_v52, %v12463_v15  ;;  %v5008_v40 = vadd.f32 %v5007_v57, %v12466_v1  ;;  %v5350_v48 = vmax.f32 %v5002_v30, 0.0  ;;  %v5349_v23 = vmax.f32 %v4891_v27, 0.0  ;;  %6350 = vmatpush1.bf16.msra.mxu0 %v9347_v60  ;;  %v9350_v14 = vld [vmem:[%s10201_s29 + $0x1f0] ss:$8 sps:$4 sm:$0xff]  }
 0x9fa   : > { %v5356_v33 = vmax.f32 %v4893_v0, 0.0  ;;  %v5358_v3 = vmax.f32 %v5006_v13, 0.0  ;;  %v5351_v47 = vmax.f32 %v5004_v26, 0.0  ;;  %6351 = vmatprep.subr.bf16.mxu0 %v9352_v39  ;;  %v9355_v26 = vld [vmem:[%s10201_s29 + $0x204] ss:$8 sps:$4 sm:$0xff]  }
 0x9fb   : > { %v5357_v15 = vmax.f32 %v4895_v53, 0.0  ;;  %v5359_v1 = vmax.f32 %v5008_v40, 0.0 }
 0x9fc   : > { %v5420_v24 = vpack.c.bf16 %v5356_v33, %v5348_v55  ;;  %v12606_v52 = vpack.c.bf16 %v5358_v3, %v5350_v48 }
 0x9fd   : > { %v5421_v20 = vpack.c.bf16 %v5357_v15, %v5349_v23  ;;  %v12608_v57 = vpack.c.bf16 %v5359_v1, %v5351_v47  ;;  %v5044_v54 = vpop.f32.mrb[72].mxu0  ;;  %v5157_v41 = vpop.f32.mrb[184].mxu1  ;;  %6352 = vmatpush1.bf16.msra.mxu0 %v9350_v14 }
 0x9fe   : > { %v5045_v30 = vadd.f32 %v5044_v54, %v12591_v5  ;;  %v5158_v18 = vadd.f32 %v5157_v41, %v12594_v56  ;;  %v5046_v0 = vpop.f32.mrb[73].mxu0  ;;  %v5159_v27 = vpop.f32.mrb[185].mxu1  ;;  %6434 = vmatprep.subr.bf16.mxu0 %v9355_v26 }
 0x9ff   : > { %v5047_v13 = vadd.f32 %v5046_v0, %v12599_v43  ;;  %v5160_v53 = vadd.f32 %v5159_v27, %v12602_v7  ;;  %v5048_v40 = vpop.f32.mrb[74].mxu0  ;;  %v5161_v55 = vpop.f32.mrb[186].mxu1  ;;  %6310 = vmatprep.mubr.bf16.mxu0 %v5421_v20 }
 0xa00   : > { %v5049_v48 = vadd.f32 %v5048_v40, %v12591_v5  ;;  %v5162_v60 = vadd.f32 %v5161_v55, %v12594_v56  ;;  %v5050_v33 = vpop.f32.mrb[75].mxu0  ;;  %v5163_v3 = vpop.f32.mrb[187].mxu1  ;;  %6311 = vmatmul.mubr.bf16.gmra.mrb[132].mxu0 %v5420_v24  ;;  %v5240_v39 = vmax.f32 %v5045_v30, 0.0  ;;  %v5242_v15 = vmax.f32 %v5158_v18, 0.0  ;;  %v9353_v30 = vld [vmem:[%s10201_s29 + $0x200] ss:$8 sps:$4 sm:$0xff]  }
 0xa01   : > { %v5051_v23 = vadd.f32 %v5050_v33, %v12599_v43  ;;  %v5164_v47 = vadd.f32 %v5163_v3, %v12602_v7  ;;  %6353 = vmatprep.mubr.bf16.mxu0 %v12478_v45  ;;  %v5241_v20 = vmax.f32 %v5047_v13, 0.0  ;;  %v5243_v41 = vmax.f32 %v5160_v53, 0.0  ;;  %v9358_v53 = vld [vmem:[%s10201_s29 + $0x214] ss:$8 sps:$4 sm:$0xff]  }
 0xa02   : > { %v5248_v1 = vmax.f32 %v5049_v48, 0.0  ;;  %v5250_v54 = vmax.f32 %v5162_v60, 0.0 }
 0xa03   : > { %v5249_v0 = vmax.f32 %v5051_v23, 0.0  ;;  %v5251_v27 = vmax.f32 %v5164_v47, 0.0 }
 0xa04   : > { %v12621_v40 = vpack.c.bf16 %v5248_v1, %v5240_v39  ;;  %v12623_v24 = vpack.c.bf16 %v5250_v54, %v5242_v15 }
 0xa05   : > { %v12625_v55 = vpack.c.bf16 %v5249_v0, %v5241_v20  ;;  %v12627_v33 = vpack.c.bf16 %v5251_v27, %v5243_v41  ;;  %v5054_v45 = vpop.f32.mrb[76].mxu0  ;;  %v5167_v14 = vpop.f32.mrb[188].mxu1  ;;  %v9356_v0 = vld [vmem:[%s10201_s29 + $0x210] ss:$8 sps:$4 sm:$0xff]  }
 0xa06   : > { %v5055_v18 = vadd.f32 %v5054_v45, %v12591_v5  ;;  %v5168_v26 = vadd.f32 %v5167_v14, %v12594_v56  ;;  %v5056_v48 = vpop.f32.mrb[77].mxu0  ;;  %v5169_v13 = vpop.f32.mrb[189].mxu1 }
 0xa07   : > { %v5057_v60 = vadd.f32 %v5056_v48, %v12599_v43  ;;  %v5170_v3 = vadd.f32 %v5169_v13, %v12602_v7  ;;  %v5058_v23 = vpop.f32.mrb[78].mxu0  ;;  %v5171_v47 = vpop.f32.mrb[190].mxu1  ;;  %v9361_v13 = vld [vmem:[%s10201_s29 + $0x224] ss:$8 sps:$4 sm:$0xff]  }
 0xa08   : > { %v5059_v39 = vadd.f32 %v5058_v23, %v12591_v5  ;;  %v5172_v15 = vadd.f32 %v5171_v47, %v12594_v56  ;;  %v5060_v1 = vpop.f32.mrb[79].mxu0  ;;  %v5173_v54 = vpop.f32.mrb[191].mxu1  ;;  %6354 = vmatmul.mubr.bf16.vlgmr.msra.gmra.mrb[104].mxu0 %v12476_v51  ;;  %v5256_v27 = vmax.f32 %v5055_v18, 0.0  ;;  %v5258_v45 = vmax.f32 %v5168_v26, 0.0  ;;  %v9359_v26 = vld [vmem:[%s10201_s29 + $0x220] ss:$8 sps:$4 sm:$0xff]  }
 0xa09   : > { %v5061_v20 = vadd.f32 %v5060_v1, %v12599_v43  ;;  %v5174_v41 = vadd.f32 %v5173_v54, %v12602_v7  ;;  %6363 = vmatprep.mubr.bf16.mxu0 %v12496_v49  ;;  %6435 = vmatpush1.bf16.msra.mxu0 %v9353_v30  ;;  %v5257_v23 = vmax.f32 %v5057_v60, 0.0  ;;  %v5259_v47 = vmax.f32 %v5170_v3, 0.0 }
 0xa0a   : > { %v5264_v14 = vmax.f32 %v5059_v39, 0.0  ;;  %v5266_v48 = vmax.f32 %v5172_v15, 0.0  ;;  %6436 = vmatprep.subr.bf16.mxu0 %v9358_v53  ;;  %v9364_v15 = vld [vmem:[%s10201_s29 + $0x234] ss:$8 sps:$4 sm:$0xff]  }
 0xa0b   : > { %v5265_v28 = vmax.f32 %v5061_v20, 0.0  ;;  %v5267_v51 = vmax.f32 %v5174_v41, 0.0 }
 0xa0c   : > { %v12643_v9 = vpack.c.bf16 %v5264_v14, %v5256_v27  ;;  %v12645_v1 = vpack.c.bf16 %v5266_v48, %v5258_v45 }
 0xa0d   : > { %v12647_v54 = vpack.c.bf16 %v5265_v28, %v5257_v23  ;;  %v12649_v49 = vpack.c.bf16 %v5267_v51, %v5259_v47  ;;  %v5064_v30 = vpop.f32.mrb[80].mxu0  ;;  %v5177_v18 = vpop.f32.mrb[192].mxu1  ;;  %6437 = vmatpush1.bf16.msra.mxu0 %v9356_v0  ;;  %v9362_v47 = vld [vmem:[%s10201_s29 + $0x230] ss:$8 sps:$4 sm:$0xff]  }
 0xa0e   : > { %v5065_v53 = vadd.f32 %v5064_v30, %v12591_v5  ;;  %v5178_v60 = vadd.f32 %v5177_v18, %v12594_v56  ;;  %v5066_v3 = vpop.f32.mrb[81].mxu0  ;;  %v5179_v39 = vpop.f32.mrb[193].mxu1  ;;  %6438 = vmatprep.subr.bf16.mxu0 %v9361_v13 }
 0xa0f   : > { %v5067_v20 = vadd.f32 %v5066_v3, %v12599_v43  ;;  %v5180_v28 = vadd.f32 %v5179_v39, %v12602_v7  ;;  %v5068_v41 = vpop.f32.mrb[82].mxu0  ;;  %v5181_v27 = vpop.f32.mrb[194].mxu1  ;;  %v9367_v39 = vld [vmem:[%s10201_s29 + $0x244] ss:$8 sps:$4 sm:$0xff]  }
 0xa10   : > { %v5069_v45 = vadd.f32 %v5068_v41, %v12591_v5  ;;  %v5182_v0 = vadd.f32 %v5181_v27, %v12594_v56  ;;  %v5070_v14 = vpop.f32.mrb[83].mxu0  ;;  %v5183_v48 = vpop.f32.mrb[195].mxu1  ;;  %6364 = vmatmul.mubr.bf16.gmra.mrb[108].mxu0 %v12493_v10  ;;  %v5272_v51 = vmax.f32 %v5065_v53, 0.0  ;;  %v5274_v30 = vmax.f32 %v5178_v60, 0.0  ;;  %v9365_v60 = vld [vmem:[%s10201_s29 + $0x240] ss:$8 sps:$4 sm:$0xff]  }
 0xa11   : > { %v5071_v23 = vadd.f32 %v5070_v14, %v12599_v43  ;;  %v5184_v13 = vadd.f32 %v5183_v48, %v12602_v7  ;;  %6373 = vmatprep.mubr.bf16.mxu0 %v12512_v42  ;;  %6439 = vmatpush1.bf16.msra.mxu0 %v9359_v26  ;;  %v5273_v41 = vmax.f32 %v5067_v20, 0.0  ;;  %v5275_v27 = vmax.f32 %v5180_v28, 0.0 }
 0xa12   : > { %v5280_v18 = vmax.f32 %v5069_v45, 0.0  ;;  %v5282_v3 = vmax.f32 %v5182_v0, 0.0  ;;  %6440 = vmatprep.subr.bf16.mxu0 %v9364_v15  ;;  %v9370_v0 = vld [vmem:[%s10201_s29 + $0x254] ss:$8 sps:$4 sm:$0xff]  }
 0xa13   : > { %v5281_v8 = vmax.f32 %v5071_v23, 0.0  ;;  %v5283_v10 = vmax.f32 %v5184_v13, 0.0 }
 0xa14   : > { %v12665_v63 = vpack.c.bf16 %v5280_v18, %v5272_v51  ;;  %v12667_v14 = vpack.c.bf16 %v5282_v3, %v5274_v30 }
 0xa15   : > { %v12669_v48 = vpack.c.bf16 %v5281_v8, %v5273_v41  ;;  %v12671_v42 = vpack.c.bf16 %v5283_v10, %v5275_v27  ;;  %v5074_v26 = vpop.f32.mrb[84].mxu0  ;;  %v5187_v53 = vpop.f32.mrb[196].mxu1  ;;  %6441 = vmatpush1.bf16.msra.mxu0 %v9362_v47  ;;  %v9368_v27 = vld [vmem:[%s10201_s29 + $0x250] ss:$8 sps:$4 sm:$0xff]  }
 0xa16   : > { %v5075_v15 = vadd.f32 %v5074_v26, %v12591_v5  ;;  %v5188_v20 = vadd.f32 %v5187_v53, %v12594_v56  ;;  %v5076_v28 = vpop.f32.mrb[85].mxu0  ;;  %v5189_v45 = vpop.f32.mrb[197].mxu1  ;;  %6442 = vmatprep.subr.bf16.mxu0 %v9367_v39 }
 0xa17   : > { %v5077_v23 = vadd.f32 %v5076_v28, %v12599_v43  ;;  %v5190_v8 = vadd.f32 %v5189_v45, %v12602_v7  ;;  %v5078_v13 = vpop.f32.mrb[86].mxu0  ;;  %v5191_v51 = vpop.f32.mrb[198].mxu1  ;;  %v9373_v45 = vld [vmem:[%s10201_s29 + $0x264] ss:$8 sps:$4 sm:$0xff]  }
 0xa18   : > { %v5079_v30 = vadd.f32 %v5078_v13, %v12591_v5  ;;  %v5192_v47 = vadd.f32 %v5191_v51, %v12594_v56  ;;  %v5080_v18 = vpop.f32.mrb[87].mxu0  ;;  %v5193_v3 = vpop.f32.mrb[199].mxu1  ;;  %6374 = vmatmul.mubr.bf16.gmra.mrb[112].mxu0 %v12510_v12  ;;  %v5288_v10 = vmax.f32 %v5075_v15, 0.0  ;;  %v5290_v26 = vmax.f32 %v5188_v20, 0.0  ;;  %v9371_v20 = vld [vmem:[%s10201_s29 + $0x260] ss:$8 sps:$4 sm:$0xff]  }
 0xa19   : > { %v5081_v41 = vadd.f32 %v5080_v18, %v12599_v43  ;;  %v5194_v39 = vadd.f32 %v5193_v3, %v12602_v7  ;;  %6383 = vmatprep.mubr.bf16.mxu0 %v12528_v11  ;;  %6443 = vmatpush1.bf16.msra.mxu0 %v9365_v60  ;;  %v5289_v13 = vmax.f32 %v5077_v23, 0.0  ;;  %v5291_v51 = vmax.f32 %v5190_v8, 0.0 }
 0xa1a   : > { %v5296_v53 = vmax.f32 %v5079_v30, 0.0  ;;  %v5298_v28 = vmax.f32 %v5192_v47, 0.0  ;;  %6444 = vmatprep.subr.bf16.mxu0 %v9370_v0  ;;  %v9376_v47 = vld [vmem:[%s10201_s29 + $0x274] ss:$8 sps:$4 sm:$0xff]  }
 0xa1b   : > { %v5297_v17 = vmax.f32 %v5081_v41, 0.0  ;;  %v5299_v12 = vmax.f32 %v5194_v39, 0.0 }
 0xa1c   : > { %v12687_v50 = vpack.c.bf16 %v5296_v53, %v5288_v10  ;;  %v12689_v18 = vpack.c.bf16 %v5298_v28, %v5290_v26 }
 0xa1d   : > { %v12691_v3 = vpack.c.bf16 %v5297_v17, %v5289_v13  ;;  %v12693_v11 = vpack.c.bf16 %v5299_v12, %v5291_v51  ;;  %v5084_v60 = vpop.f32.mrb[88].mxu0  ;;  %v5197_v15 = vpop.f32.mrb[200].mxu1  ;;  %6445 = vmatpush1.bf16.msra.mxu0 %v9368_v27  ;;  %v9374_v51 = vld [vmem:[%s10201_s29 + $0x270] ss:$8 sps:$4 sm:$0xff]  }
 0xa1e   : > { %v5085_v0 = vadd.f32 %v5084_v60, %v12591_v5  ;;  %v5198_v23 = vadd.f32 %v5197_v15, %v12594_v56  ;;  %v5086_v8 = vpop.f32.mrb[89].mxu0  ;;  %v5199_v30 = vpop.f32.mrb[201].mxu1  ;;  %6446 = vmatprep.subr.bf16.mxu0 %v9373_v45 }
 0xa1f   : > { %v5087_v41 = vadd.f32 %v5086_v8, %v12599_v43  ;;  %v5200_v17 = vadd.f32 %v5199_v30, %v12602_v7  ;;  %v5088_v39 = vpop.f32.mrb[90].mxu0  ;;  %v5201_v10 = vpop.f32.mrb[202].mxu1  ;;  %v9379_v30 = vld [vmem:[%s10201_s29 + $0x284] ss:$8 sps:$4 sm:$0xff]  }
 0xa20   : > { %v5089_v26 = vadd.f32 %v5088_v39, %v12591_v5  ;;  %v5202_v27 = vadd.f32 %v5201_v10, %v12594_v56  ;;  %v5090_v53 = vpop.f32.mrb[91].mxu0  ;;  %v5203_v28 = vpop.f32.mrb[203].mxu1  ;;  %6384 = vmatmul.mubr.bf16.gmra.mrb[116].mxu0 %v12526_v32  ;;  %v5304_v12 = vmax.f32 %v5085_v0, 0.0  ;;  %v5306_v60 = vmax.f32 %v5198_v23, 0.0  ;;  %v9377_v23 = vld [vmem:[%s10201_s29 + $0x280] ss:$8 sps:$4 sm:$0xff]  }
 0xa21   : > { %v5091_v13 = vadd.f32 %v5090_v53, %v12599_v43  ;;  %v5204_v45 = vadd.f32 %v5203_v28, %v12602_v7  ;;  %6393 = vmatprep.mubr.bf16.mxu0 %v12544_v37  ;;  %6447 = vmatpush1.bf16.msra.mxu0 %v9371_v20  ;;  %v5305_v39 = vmax.f32 %v5087_v41, 0.0  ;;  %v5307_v10 = vmax.f32 %v5200_v17, 0.0 }
 0xa22   : > { %v5312_v15 = vmax.f32 %v5089_v26, 0.0  ;;  %v5314_v8 = vmax.f32 %v5202_v27, 0.0  ;;  %6448 = vmatprep.subr.bf16.mxu0 %v9376_v47  ;;  %v9382_v27 = vld [vmem:[%s10201_s29 + $0x294] ss:$8 sps:$4 sm:$0xff]  }
 0xa23   : > { %v5313_v16 = vmax.f32 %v5091_v13, 0.0  ;;  %v5315_v32 = vmax.f32 %v5204_v45, 0.0 }
 0xa24   : > { %v12709_v31 = vpack.c.bf16 %v5312_v15, %v5304_v12  ;;  %v12711_v53 = vpack.c.bf16 %v5314_v8, %v5306_v60 }
 0xa25   : > { %v12713_v28 = vpack.c.bf16 %v5313_v16, %v5305_v39  ;;  %v12715_v37 = vpack.c.bf16 %v5315_v32, %v5307_v10  ;;  %v5094_v20 = vpop.f32.mrb[92].mxu0  ;;  %v5207_v0 = vpop.f32.mrb[204].mxu1  ;;  %6449 = vmatpush1.bf16.msra.mxu0 %v9374_v51  ;;  %v9380_v10 = vld [vmem:[%s10201_s29 + $0x290] ss:$8 sps:$4 sm:$0xff]  }
 0xa26   : > { %v5095_v47 = vadd.f32 %v5094_v20, %v12591_v5  ;;  %v5208_v41 = vadd.f32 %v5207_v0, %v12594_v56  ;;  %v5096_v17 = vpop.f32.mrb[93].mxu0  ;;  %v5209_v26 = vpop.f32.mrb[205].mxu1  ;;  %6450 = vmatprep.subr.bf16.mxu0 %v9379_v30 }
 0xa27   : > { %v5097_v13 = vadd.f32 %v5096_v17, %v12599_v43  ;;  %v5210_v16 = vadd.f32 %v5209_v26, %v12602_v7  ;;  %v5098_v45 = vpop.f32.mrb[94].mxu0  ;;  %v5211_v12 = vpop.f32.mrb[206].mxu1  ;;  %v9385_v26 = vld [vmem:[%s10201_s29 + $0x2a4] ss:$8 sps:$4 sm:$0xff]  }
 0xa28   : > { %v5099_v60 = vadd.f32 %v5098_v45, %v12591_v5  ;;  %v5212_v51 = vadd.f32 %v5211_v12, %v12594_v56  ;;  %v5100_v15 = vpop.f32.mrb[95].mxu0  ;;  %v5213_v8 = vpop.f32.mrb[207].mxu1  ;;  %6394 = vmatmul.mubr.bf16.gmra.mrb[120].mxu0 %v12542_v2  ;;  %v5320_v32 = vmax.f32 %v5095_v47, 0.0  ;;  %v5322_v20 = vmax.f32 %v5208_v41, 0.0  ;;  %v9383_v41 = vld [vmem:[%s10201_s29 + $0x2a0] ss:$8 sps:$4 sm:$0xff]  }
 0xa29   : > { %v5101_v39 = vadd.f32 %v5100_v15, %v12599_v43  ;;  %v5214_v30 = vadd.f32 %v5213_v8, %v12602_v7  ;;  %6403 = vmatprep.mubr.bf16.mxu0 %v12560_v29  ;;  %6451 = vmatpush1.bf16.msra.mxu0 %v9377_v23  ;;  %v5321_v45 = vmax.f32 %v5097_v13, 0.0  ;;  %v5323_v12 = vmax.f32 %v5210_v16, 0.0 }
 0xa2a   : > { %v5328_v0 = vmax.f32 %v5099_v60, 0.0  ;;  %v5330_v17 = vmax.f32 %v5212_v51, 0.0  ;;  %6452 = vmatprep.subr.bf16.mxu0 %v9382_v27  ;;  %v9388_v51 = vld [vmem:[%s10201_s29 + $0x2b4] ss:$8 sps:$4 sm:$0xff]  }
 0xa2b   : > { %v5329_v61 = vmax.f32 %v5101_v39, 0.0  ;;  %v5331_v2 = vmax.f32 %v5214_v30, 0.0 }
 0xa2c   : > { %v12731_v25 = vpack.c.bf16 %v5328_v0, %v5320_v32  ;;  %v12733_v15 = vpack.c.bf16 %v5330_v17, %v5322_v20 }
 0xa2d   : > { %v12735_v8 = vpack.c.bf16 %v5329_v61, %v5321_v45  ;;  %v12737_v29 = vpack.c.bf16 %v5331_v2, %v5323_v12  ;;  %v5104_v23 = vpop.f32.mrb[96].mxu0  ;;  %v5217_v47 = vpop.f32.mrb[208].mxu1  ;;  %6453 = vmatpush1.bf16.msra.mxu0 %v9380_v10  ;;  %v9386_v12 = vld [vmem:[%s10201_s29 + $0x2b0] ss:$8 sps:$4 sm:$0xff]  }
 0xa2e   : > { %v5105_v27 = vadd.f32 %v5104_v23, %v12591_v5  ;;  %v5218_v13 = vadd.f32 %v5217_v47, %v12594_v56  ;;  %v5106_v16 = vpop.f32.mrb[97].mxu0  ;;  %v5219_v60 = vpop.f32.mrb[209].mxu1  ;;  %6454 = vmatprep.subr.bf16.mxu0 %v9385_v26 }
 0xa2f   : > { %v5107_v39 = vadd.f32 %v5106_v16, %v12599_v43  ;;  %v5220_v61 = vadd.f32 %v5219_v60, %v12602_v7  ;;  %v5108_v30 = vpop.f32.mrb[98].mxu0  ;;  %v5221_v32 = vpop.f32.mrb[210].mxu1  ;;  %v9391_v60 = vld [vmem:[%s10201_s29 + $0x2c4] ss:$8 sps:$4 sm:$0xff]  }
 0xa30   : > { %v5109_v20 = vadd.f32 %v5108_v30, %v12591_v5  ;;  %v5222_v10 = vadd.f32 %v5221_v32, %v12594_v56  ;;  %v5110_v0 = vpop.f32.mrb[99].mxu0  ;;  %v5223_v17 = vpop.f32.mrb[211].mxu1  ;;  %6404 = vmatmul.mubr.bf16.gmra.mrb[124].mxu0 %v12558_v6  ;;  %v5336_v2 = vmax.f32 %v5105_v27, 0.0  ;;  %v5338_v23 = vmax.f32 %v5218_v13, 0.0  ;;  %v9389_v13 = vld [vmem:[%s10201_s29 + $0x2c0] ss:$8 sps:$4 sm:$0xff]  }
 0xa31   : > { %v5111_v45 = vadd.f32 %v5110_v0, %v12599_v43  ;;  %v5224_v26 = vadd.f32 %v5223_v17, %v12602_v7  ;;  %6413 = vmatprep.mubr.bf16.mxu0 %v12578_v59  ;;  %6455 = vmatpush1.bf16.msra.mxu0 %v9383_v41  ;;  %v5337_v30 = vmax.f32 %v5107_v39, 0.0  ;;  %v5339_v32 = vmax.f32 %v5220_v61, 0.0 }
 0xa32   : > { %v5344_v47 = vmax.f32 %v5109_v20, 0.0  ;;  %v5346_v16 = vmax.f32 %v5222_v10, 0.0  ;;  %6456 = vmatprep.subr.bf16.mxu0 %v9388_v51  ;;  %v9394_v10 = vld [vmem:[%s10201_s29 + $0x2d4] ss:$8 sps:$4 sm:$0xff]  }
 0xa33   : > { %v5345_v4 = vmax.f32 %v5111_v45, 0.0  ;;  %v5347_v6 = vmax.f32 %v5224_v26, 0.0 }
 0xa34   : > { %v12753_v62 = vpack.c.bf16 %v5344_v47, %v5336_v2  ;;  %v12755_v0 = vpack.c.bf16 %v5346_v16, %v5338_v23 }
 0xa35   : > { %v12757_v17 = vpack.c.bf16 %v5345_v4, %v5337_v30  ;;  %v12759_v59 = vpack.c.bf16 %v5347_v6, %v5339_v32  ;;  %v5114_v41 = vpop.f32.mrb[100].mxu0  ;;  %v5227_v27 = vpop.f32.mrb[212].mxu1  ;;  %6457 = vmatpush1.bf16.msra.mxu0 %v9386_v12  ;;  %v9392_v32 = vld [vmem:[%s10201_s29 + $0x2d0] ss:$8 sps:$4 sm:$0xff]  }
 0xa36   : > { %v5115_v51 = vadd.f32 %v5114_v41, %v12591_v5  ;;  %v5228_v39 = vadd.f32 %v5227_v27, %v12594_v56  ;;  %v5116_v61 = vpop.f32.mrb[101].mxu0  ;;  %v5229_v20 = vpop.f32.mrb[213].mxu1  ;;  %6458 = vmatprep.subr.bf16.mxu0 %v9391_v60 }
 0xa37   : > { %v5117_v45 = vadd.f32 %v5116_v61, %v12599_v43  ;;  %v5230_v4 = vadd.f32 %v5229_v20, %v12602_v7  ;;  %v5118_v26 = vpop.f32.mrb[102].mxu0  ;;  %v5231_v2 = vpop.f32.mrb[214].mxu1 }
 0xa38   : > { %v5119_v23 = vadd.f32 %v5118_v26, %v12591_v5  ;;  %v5232_v12 = vadd.f32 %v5231_v2, %v12594_v56  ;;  %v5120_v47 = vpop.f32.mrb[103].mxu0  ;;  %v5233_v16 = vpop.f32.mrb[215].mxu1  ;;  %6414 = vmatmul.mubr.bf16.gmra.mrb[128].mxu0 %v12574_v36  ;;  %v5352_v6 = vmax.f32 %v5115_v51, 0.0  ;;  %v5354_v41 = vmax.f32 %v5228_v39, 0.0  ;;  %v9397_v56 = vld [vmem:[%s10201_s29 + $0x2e4] ss:$8 sps:$4 sm:$0xff]  }
 0xa39   : > { %v5121_v30 = vadd.f32 %v5120_v47, %v12599_v43  ;;  %v5234_v60 = vadd.f32 %v5233_v16, %v12602_v7  ;;  %6423 = vmatprep.mubr.bf16.mxu0 %v12608_v57  ;;  %6459 = vmatpush1.bf16.msra.mxu0 %v9389_v13  ;;  %v5353_v61 = vmax.f32 %v5117_v45, 0.0  ;;  %v5355_v20 = vmax.f32 %v5230_v4, 0.0  ;;  %v9395_v39 = vld [vmem:[%s10201_s29 + $0x2e0] ss:$8 sps:$4 sm:$0xff]   ;;  %v9398_v45 = vld [vmem:[%s10201_s29 + $0x2f0] ss:$8 sps:$4 sm:$0xff]  }
 0xa3a   : > { %v5360_v27 = vmax.f32 %v5119_v23, 0.0  ;;  %v5362_v5 = vmax.f32 %v5232_v12, 0.0  ;;  %6460 = vmatprep.subr.bf16.mxu0 %v9394_v10  ;;  %v9400_v10 = vld [vmem:[%s10201_s29 + $0x2f4] ss:$8 sps:$4 sm:$0xff]   ;;  %v9403_v4 = vld [vmem:[%s10201_s29 + $0x304] ss:$8 sps:$4 sm:$0xff]  }
 0xa3b   : > { %v5361_v36 = vmax.f32 %v5121_v30, 0.0  ;;  %v5363_v43 = vmax.f32 %v5234_v60, 0.0  ;;  %v9401_v26 = vld [vmem:[%s10201_s29 + $0x300] ss:$8 sps:$4 sm:$0xff]   ;;  %v9406_v2 = vld [vmem:[%s10201_s29 + $0x314] ss:$8 sps:$4 sm:$0xff]  }
 0xa3c   : > { %v12775_v7 = vpack.c.bf16 %v5360_v27, %v5352_v6  ;;  %v12777_v57 = vpack.c.bf16 %v5362_v5, %v5354_v41  ;;  %v9407_v23 = vld [vmem:[%s10201_s29 + $0x320] ss:$8 sps:$4 sm:$0xff]   ;;  %v9412_v12 = vld [vmem:[%s10201_s29 + $0x334] ss:$8 sps:$4 sm:$0xff]  }
 0xa3d   : > { %v12779_v13 = vpack.c.bf16 %v5361_v36, %v5353_v61  ;;  %v12781_v51 = vpack.c.bf16 %v5363_v43, %v5355_v20  ;;  %6461 = vmatpush1.bf16.msra.mxu0 %v9392_v32  ;;  %v9413_v47 = vld [vmem:[%s10201_s29 + $0x340] ss:$8 sps:$4 sm:$0xff]   ;;  %v9418_v16 = vld [vmem:[%s10201_s29 + $0x354] ss:$8 sps:$4 sm:$0xff]   ;;  %v9440_v61 = vld [vmem:[%s10201_s29 + $0x3d0] ss:$8 sps:$4 sm:$0xff]  }
 0xa3e   : > { %6462 = vmatprep.subr.bf16.mxu0 %v9397_v56  ;;  %v9419_v30 = vld [vmem:[%s10201_s29 + $0x360] ss:$8 sps:$4 sm:$0xff]   ;;  %v9424_v60 = vld [vmem:[%s10201_s29 + $0x374] ss:$8 sps:$4 sm:$0xff]   ;;  %v9446_v36 = vld [vmem:[%s10201_s29 + $0x3f0] ss:$8 sps:$4 sm:$0xff]  }
 0xa3f   : > { %v9425_v32 = vld [vmem:[%s10201_s29 + $0x380] ss:$8 sps:$4 sm:$0xff]   ;;  %v9430_v6 = vld [vmem:[%s10201_s29 + $0x394] ss:$8 sps:$4 sm:$0xff]  }
 0xa40   : > { %6424 = vmatmul.mubr.bf16.gmra.mrb[132].mxu0 %v12606_v52  ;;  %v9404_v52 = vld [vmem:[%s10201_s29 + $0x310] ss:$8 sps:$4 sm:$0xff]   ;;  %v9431_v41 = vld [vmem:[%s10201_s29 + $0x3a0] ss:$8 sps:$4 sm:$0xff]   ;;  %v9436_v27 = vld [vmem:[%s10201_s29 + $0x3b4] ss:$8 sps:$4 sm:$0xff]  }
 0xa41   : > { %6463 = vmatpush1.bf16.msra.mxu0 %v9395_v39  ;;  %6466 = vmatprep.mubr.bf16.mxu0 %v12625_v55  ;;  %v9409_v55 = vld [vmem:[%s10201_s29 + $0x324] ss:$8 sps:$4 sm:$0xff]   ;;  %v9437_v5 = vld [vmem:[%s10201_s29 + $0x3c0] ss:$8 sps:$4 sm:$0xff]   ;;  %v9442_v56 = vld [vmem:[%s10201_s29 + $0x3d4] ss:$8 sps:$4 sm:$0xff]  }
 0xa42   : > { %6464 = vmatprep.subr.bf16.mxu0 %v9400_v10  ;;  %v9448_v20 = vld [vmem:[%s10201_s29 + $0x3f4] ss:$8 sps:$4 sm:$0xff]  }
 0xa45   : > { %6465 = vmatpush1.bf16.msra.mxu0 %v9398_v45 }
 0xa46   : > { %6547 = vmatprep.subr.bf16.mxu0 %v9403_v4 }
 0xa48   : > { %6467 = vmatmul.mubr.bf16.vlgmr.msra.gmra.mrb[104].mxu0 %v12621_v40  ;;  %v9410_v40 = vld [vmem:[%s10201_s29 + $0x330] ss:$8 sps:$4 sm:$0xff]  }
 0xa49   : > { %6476 = vmatprep.mubr.bf16.mxu0 %v12647_v54  ;;  %6548 = vmatpush1.bf16.msra.mxu0 %v9401_v26  ;;  %v9415_v54 = vld [vmem:[%s10201_s29 + $0x344] ss:$8 sps:$4 sm:$0xff]  }
 0xa4a   : > { %6549 = vmatprep.subr.bf16.mxu0 %v9406_v2 }
 0xa4d   : > { %6550 = vmatpush1.bf16.msra.mxu0 %v9404_v52 }
 0xa4e   : > { %6551 = vmatprep.subr.bf16.mxu0 %v9409_v55 }
 0xa50   : > { %6477 = vmatmul.mubr.bf16.gmra.mrb[108].mxu0 %v12643_v9  ;;  %v9416_v9 = vld [vmem:[%s10201_s29 + $0x350] ss:$8 sps:$4 sm:$0xff]  }
 0xa51   : > { %6486 = vmatprep.mubr.bf16.mxu0 %v12669_v48  ;;  %6552 = vmatpush1.bf16.msra.mxu0 %v9407_v23  ;;  %v9421_v48 = vld [vmem:[%s10201_s29 + $0x364] ss:$8 sps:$4 sm:$0xff]  }
 0xa52   : > { %6553 = vmatprep.subr.bf16.mxu0 %v9412_v12 }
 0xa55   : > { %6554 = vmatpush1.bf16.msra.mxu0 %v9410_v40 }
 0xa56   : > { %6555 = vmatprep.subr.bf16.mxu0 %v9415_v54 }
 0xa58   : > { %6487 = vmatmul.mubr.bf16.gmra.mrb[112].mxu0 %v12665_v63  ;;  %v9422_v63 = vld [vmem:[%s10201_s29 + $0x370] ss:$8 sps:$4 sm:$0xff]  }
 0xa59   : > { %6496 = vmatprep.mubr.bf16.mxu0 %v12691_v3  ;;  %6556 = vmatpush1.bf16.msra.mxu0 %v9413_v47  ;;  %v9427_v3 = vld [vmem:[%s10201_s29 + $0x384] ss:$8 sps:$4 sm:$0xff]  }
 0xa5a   : > { %6557 = vmatprep.subr.bf16.mxu0 %v9418_v16 }
 0xa5d   : > { %6558 = vmatpush1.bf16.msra.mxu0 %v9416_v9 }
 0xa5e   : > { %6559 = vmatprep.subr.bf16.mxu0 %v9421_v48 }
 0xa60   : > { %6497 = vmatmul.mubr.bf16.gmra.mrb[116].mxu0 %v12687_v50  ;;  %v9428_v50 = vld [vmem:[%s10201_s29 + $0x390] ss:$8 sps:$4 sm:$0xff]  }
 0xa61   : > { %6506 = vmatprep.mubr.bf16.mxu0 %v12713_v28  ;;  %6560 = vmatpush1.bf16.msra.mxu0 %v9419_v30  ;;  %v9433_v28 = vld [vmem:[%s10201_s29 + $0x3a4] ss:$8 sps:$4 sm:$0xff]  }
 0xa62   : > { %6561 = vmatprep.subr.bf16.mxu0 %v9424_v60 }
 0xa65   : > { %6562 = vmatpush1.bf16.msra.mxu0 %v9422_v63 }
 0xa66   : > { %6563 = vmatprep.subr.bf16.mxu0 %v9427_v3 }
 0xa68   : > { %6507 = vmatmul.mubr.bf16.gmra.mrb[120].mxu0 %v12709_v31  ;;  %v9434_v31 = vld [vmem:[%s10201_s29 + $0x3b0] ss:$8 sps:$4 sm:$0xff]  }
 0xa69   : > { %6516 = vmatprep.mubr.bf16.mxu0 %v12735_v8  ;;  %6564 = vmatpush1.bf16.msra.mxu0 %v9425_v32  ;;  %v9439_v8 = vld [vmem:[%s10201_s29 + $0x3c4] ss:$8 sps:$4 sm:$0xff]  }
 0xa6a   : > { %6565 = vmatprep.subr.bf16.mxu0 %v9430_v6  ;;  %v14171_v6 = vld [vmem:[#allocation18_spill] sm:$0xff] }
 0xa6d   : > { %6566 = vmatpush1.bf16.msra.mxu0 %v9428_v50 }
 0xa6e   : > { %6567 = vmatprep.subr.bf16.mxu0 %v9433_v28 }
 0xa70   : > { %6517 = vmatmul.mubr.bf16.gmra.mrb[124].mxu0 %v12731_v25  ;;  %v9445_v25 = vld [vmem:[%s10201_s29 + $0x3e4] ss:$8 sps:$4 sm:$0xff]  }
 0xa71   : > { %6526 = vmatprep.mubr.bf16.mxu0 %v12757_v17  ;;  %6568 = vmatpush1.bf16.msra.mxu0 %v9431_v41  ;;  %v9443_v17 = vld [vmem:[%s10201_s29 + $0x3e0] ss:$8 sps:$4 sm:$0xff]  }
 0xa72   : > { %6569 = vmatprep.subr.bf16.mxu0 %v9436_v27  ;;  %v14172_v27 = vld [vmem:[#allocation61_spill] sm:$0xff] }
 0xa75   : > { %6570 = vmatpush1.bf16.msra.mxu0 %v9434_v31 }
 0xa76   : > { %6571 = vmatprep.subr.bf16.mxu0 %v9439_v8 }
 0xa78   : > { %6527 = vmatmul.mubr.bf16.gmra.mrb[128].mxu0 %v12753_v62  ;;  %v5556_v62 = vld [vmem:[%s762_s2] sm:$0x3]  ;;  %s14199_s2 = sld [smem:[#allocation69_spill]] (!%p8461_p7) }
 0xa79   : > { %6536 = vmatprep.mubr.bf16.mxu0 %v12779_v13  ;;  %6572 = vmatpush1.bf16.msra.mxu0 %v9437_v5 }
 0xa7a   : > { %6573 = vmatprep.subr.bf16.mxu0 %v9442_v56  ;;  %v14173_v56 = vld [vmem:[#allocation36_spill] sm:$0xff] }
 0xa7d   : > { %6574 = vmatpush1.bf16.msra.mxu0 %v9440_v61 }
 0xa7e   : > { %6575 = vmatprep.subr.bf16.mxu0 %v9445_v25  ;;  %v14174_v25 = vld [vmem:[#allocation62_spill] sm:$0xff] }
 0xa80   : > { %6537 = vmatmul.mubr.bf16.gmra.mrb[132].mxu0 %v12775_v7 }
 0xa81   : > { %6576 = vmatpush1.bf16.msra.mxu0 %v9443_v17  ;;  %6579 = vmatprep.mubr.bf16.mxu0 %v12627_v33  ;;  %v12860_v33 = vrot.slane %v5556_v62, %v14169_v21 }
 0xa82   : > { %6577 = vmatprep.subr.bf16.mxu0 %v9448_v20 }
 0xa85   : > { %6578 = vmatpush1.bf16.msra.mxu0 %v9446_v36 }
 0xa88   : > { %6580 = vmatmul.mubr.bf16.vlgmr.msra.gmra.mrb[104].mxu0 %v12623_v24  ;;  %v12857_v24 = vrot.slane %v5556_v62, %v14168_v58 }
 0xa89   : > { %6589 = vmatprep.mubr.bf16.mxu0 %v12649_v49 }
 0xa90   : > { %6590 = vmatmul.mubr.bf16.gmra.mrb[108].mxu0 %v12645_v1 }
 0xa91   : > { %6599 = vmatprep.mubr.bf16.mxu0 %v12671_v42 }
 0xa98   : > { %6600 = vmatmul.mubr.bf16.gmra.mrb[112].mxu0 %v12667_v14 }
 0xa99   : > { %6609 = vmatprep.mubr.bf16.mxu0 %v12693_v11 }
 0xaa0   : > { %6610 = vmatmul.mubr.bf16.gmra.mrb[116].mxu0 %v12689_v18 }
 0xaa1   : > { %6619 = vmatprep.mubr.bf16.mxu0 %v12715_v37 }
 0xaa8   : > { %6620 = vmatmul.mubr.bf16.gmra.mrb[120].mxu0 %v12711_v53 }
 0xaa9   : > { %6629 = vmatprep.mubr.bf16.mxu0 %v12737_v29 }
 0xab0   : > { %6630 = vmatmul.mubr.bf16.gmra.mrb[124].mxu0 %v12733_v15 }
 0xab1   : > { %6639 = vmatprep.mubr.bf16.mxu0 %v12759_v59  ;;  %v14170_v59 = vld [vmem:[#allocation60_spill] sm:$0xff] }
 0xab8   : > { %6640 = vmatmul.mubr.bf16.gmra.mrb[128].mxu0 %v12755_v0 }
 0xab9   : > { %6649 = vmatprep.mubr.bf16.mxu0 %v12781_v51 }
 0xac0   : > { %6650 = vmatmul.mubr.bf16.gmra.mrb[132].mxu0 %v12777_v57 }
 0xb5b   : > { %v6581_v1 = vpop.f32.mrb[104].mxu0 }
 0xb5c   : > { %v8853_v49 = vadd.f32 %v6581_v1, %v12857_v24  ;;  %v6583_v14 = vpop.f32.mrb[105].mxu0 }
 0xb5d   : > { %v8854_v42 = vadd.f32 %v6583_v14, %v12860_v33  ;;  %v6585_v18 = vpop.f32.mrb[106].mxu0 }
 0xb5e   : > { %v12865_v11 = vadd.f32 %v8853_v49, %v11914_v35  ;;  %v8855_v53 = vadd.f32 %v6585_v18, %v12857_v24  ;;  %v6587_v37 = vpop.f32.mrb[107].mxu0 }
 0xb5f   : > { %v12869_v15 = vadd.f32 %v8854_v42, %v11902_v22  ;;  %v8856_v29 = vadd.f32 %v6587_v37, %v12860_v33 }
 0xb60   : > { %v12873_v0 = vadd.f32 %v8855_v53, %v11917_v46  ;;  %v6758_v35 = vmul.f32 %v12865_v11, %v12865_v11 }
 0xb61   : > { %v12876_v43 = vadd.f32 %v8856_v29, %v14170_v59  ;;  %v6694_v7 = vadd.f32 %v12869_v15, %v12865_v11  ;;  %v6759_v57 = vmul.f32 %v12869_v15, %v12869_v15 }
 0xb62   : > { %v6760_v46 = vmul.f32 %v12873_v0, %v12873_v0 }
 0xb63   : > { %v6591_v13 = vpop.f32.mrb[108].mxu0  ;;  %6695 = vadd.xlane.f32.xlu0 %v6694_v7  ;;  %v6697_v22 = vadd.f32 %v12876_v43, %v12873_v0  ;;  %v6761_v51 = vmul.f32 %v12876_v43, %v12876_v43  ;;  %v6790_v26 = vadd.f32 %v6759_v57, %v6758_v35  ;;  %v14175_v7 = vld [vmem:[#allocation39_spill] sm:$0xff] }
 0xb64   : > { %v8857_v39 = vadd.f32 %v6591_v13, %v12857_v24  ;;  %v6593_v10 = vpop.f32.mrb[109].mxu0 }
 0xb65   : > { %v8858_v45 = vadd.f32 %v6593_v10, %v12860_v33  ;;  %v6595_v4 = vpop.f32.mrb[110].mxu0  ;;  %6698 = vadd.xlane.f32.xlu1 %v6697_v22  ;;  %v6793_v40 = vadd.f32 %v6761_v51, %v6760_v46  ;;  %v14176_v22 = vld [vmem:[#allocation38_spill] sm:$0xff]  ;;  %v14177_v10 = vld [vmem:[#allocation19_spill] sm:$0xff] }
 0xb66   : > { %v12893_v2 = vadd.f32 %v8857_v39, %v11980_v34  ;;  %v8859_v52 = vadd.f32 %v6595_v4, %v12857_v24  ;;  %v6597_v55 = vpop.f32.mrb[111].mxu0  ;;  %v14178_v4 = vld [vmem:[#allocation37_spill] sm:$0xff] }
 0xb67   : > { %v12897_v23 = vadd.f32 %v8858_v45, %v11958_v44  ;;  %v8860_v12 = vadd.f32 %v6597_v55, %v12860_v33  ;;  %6791 = vadd.xlane.f32.xlu0 %v6790_v26 }
 0xb68   : > { %v12901_v54 = vadd.f32 %v8859_v52, %v11983_v19  ;;  %v6762_v16 = vmul.f32 %v12893_v2, %v12893_v2 }
 0xb69   : > { %v12904_v47 = vadd.f32 %v8860_v12, %v11961_v38  ;;  %6794 = vadd.xlane.f32.xlu1 %v6793_v40  ;;  %v6700_v34 = vadd.f32 %v12897_v23, %v12893_v2  ;;  %v6763_v44 = vmul.f32 %v12897_v23, %v12897_v23 }
 0xb6a   : > { %v6764_v19 = vmul.f32 %v12901_v54, %v12901_v54 }
 0xb6b   : > { %v6601_v9 = vpop.f32.mrb[112].mxu0  ;;  %6701 = vadd.xlane.f32.xlu0 %v6700_v34  ;;  %v6703_v48 = vadd.f32 %v12904_v47, %v12901_v54  ;;  %v6765_v38 = vmul.f32 %v12904_v47, %v12904_v47  ;;  %v6796_v32 = vadd.f32 %v6763_v44, %v6762_v16 }
 0xb6c   : > { %v8861_v30 = vadd.f32 %v6601_v9, %v12857_v24  ;;  %v6603_v60 = vpop.f32.mrb[113].mxu0 }
 0xb6d   : > { %v8862_v63 = vadd.f32 %v6603_v60, %v12860_v33  ;;  %v6605_v3 = vpop.f32.mrb[114].mxu0  ;;  %6704 = vadd.xlane.f32.xlu1 %v6703_v48  ;;  %v6799_v5 = vadd.f32 %v6765_v38, %v6764_v19  ;;  %v14179_v60 = vld [vmem:[#allocation41_spill] sm:$0xff] }
 0xb6e   : > { %v12921_v50 = vadd.f32 %v8861_v30, %v14171_v6  ;;  %v8863_v28 = vadd.f32 %v6605_v3, %v12857_v24  ;;  %v6607_v41 = vpop.f32.mrb[115].mxu0  ;;  %v14180_v6 = vld [vmem:[#allocation23_spill] sm:$0xff] }
 0xb6f   : > { %v12925_v31 = vadd.f32 %v8862_v63, %v14172_v27  ;;  %v8864_v8 = vadd.f32 %v6607_v41, %v12860_v33  ;;  %6797 = vadd.xlane.f32.xlu0 %v6796_v32 }
 0xb70   : > { %v12929_v61 = vadd.f32 %v8863_v28, %v14173_v56  ;;  %v6766_v36 = vmul.f32 %v12921_v50, %v12921_v50  ;;  %v14182_v56 = vld [vmem:[#allocation40_spill] sm:$0xff] }
 0xb71   : > { %v12932_v17 = vadd.f32 %v8864_v8, %v14174_v25  ;;  %6800 = vadd.xlane.f32.xlu1 %v6799_v5  ;;  %v6706_v20 = vadd.f32 %v12925_v31, %v12921_v50  ;;  %v6767_v62 = vmul.f32 %v12925_v31, %v12925_v31  ;;  %v14181_v8 = vld [vmem:[#allocation42_spill] sm:$0xff] }
 0xb72   : > { %v6768_v14 = vmul.f32 %v12929_v61, %v12929_v61 }
 0xb73   : > { %v6611_v1 = vpop.f32.mrb[116].mxu0  ;;  %6707 = vadd.xlane.f32.xlu0 %v6706_v20  ;;  %v6709_v49 = vadd.f32 %v12932_v17, %v12929_v61  ;;  %v6769_v42 = vmul.f32 %v12932_v17, %v12932_v17  ;;  %v6802_v59 = vadd.f32 %v6767_v62, %v6766_v36 }
 0xb74   : > { %v8865_v18 = vadd.f32 %v6611_v1, %v12857_v24  ;;  %v6613_v53 = vpop.f32.mrb[117].mxu0 }
 0xb75   : > { %v8866_v37 = vadd.f32 %v6613_v53, %v12860_v33  ;;  %v6615_v29 = vpop.f32.mrb[118].mxu0  ;;  %6710 = vadd.xlane.f32.xlu1 %v6709_v49  ;;  %v6805_v39 = vadd.f32 %v6769_v42, %v6768_v14 }
 0xb76   : > { %v12949_v35 = vadd.f32 %v8865_v18, %v14175_v7  ;;  %v8867_v57 = vadd.f32 %v6615_v29, %v12857_v24  ;;  %v6617_v13 = vpop.f32.mrb[119].mxu0  ;;  %v14183_v7 = vld [vmem:[#allocation44_spill] sm:$0xff] }
 0xb77   : > { %v12953_v46 = vadd.f32 %v8866_v37, %v14176_v22  ;;  %v8868_v51 = vadd.f32 %v6617_v13, %v12860_v33  ;;  %6803 = vadd.xlane.f32.xlu0 %v6802_v59 }
 0xb78   : > { %v12957_v45 = vadd.f32 %v8867_v57, %v14177_v10  ;;  %v6770_v55 = vmul.f32 %v12949_v35, %v12949_v35 }
 0xb79   : > { %v12960_v26 = vadd.f32 %v8868_v51, %v14178_v4  ;;  %6806 = vadd.xlane.f32.xlu1 %v6805_v39  ;;  %v6712_v52 = vadd.f32 %v12953_v46, %v12949_v35  ;;  %v6771_v12 = vmul.f32 %v12953_v46, %v12953_v46  ;;  %v14184_v51 = vld [vmem:[#allocation43_spill] sm:$0xff] }
 0xb7a   : > { %v6772_v16 = vmul.f32 %v12957_v45, %v12957_v45 }
 0xb7b   : > { %v6621_v40 = vpop.f32.mrb[120].mxu0  ;;  %6713 = vadd.xlane.f32.xlu0 %v6712_v52  ;;  %v6715_v34 = vadd.f32 %v12960_v26, %v12957_v45  ;;  %v6773_v44 = vmul.f32 %v12960_v26, %v12960_v26  ;;  %v6808_v30 = vadd.f32 %v6771_v12, %v6770_v55  ;;  %v14185_v52 = vld [vmem:[#allocation25_spill] sm:$0xff]  ;;  %v14186_v12 = vld [vmem:[#allocation24_spill] sm:$0xff] }
 0xb7c   : > { %v8869_v9 = vadd.f32 %v6621_v40, %v12857_v24  ;;  %v6623_v48 = vpop.f32.mrb[121].mxu0 }
 0xb7d   : > { %v8870_v19 = vadd.f32 %v6623_v48, %v12860_v33  ;;  %v6625_v38 = vpop.f32.mrb[122].mxu0  ;;  %6716 = vadd.xlane.f32.xlu1 %v6715_v34  ;;  %v6811_v27 = vadd.f32 %v6773_v44, %v6772_v16 }
 0xb7e   : > { %v12977_v63 = vadd.f32 %v8869_v9, %v14179_v60  ;;  %v8871_v3 = vadd.f32 %v6625_v38, %v12857_v24  ;;  %v6627_v32 = vpop.f32.mrb[123].mxu0 }
 0xb7f   : > { %v12981_v28 = vadd.f32 %v8870_v19, %v14180_v6  ;;  %v8872_v41 = vadd.f32 %v6627_v32, %v12860_v33  ;;  %6809 = vadd.xlane.f32.xlu0 %v6808_v30 }
 0xb80   : > { %v12985_v5 = vadd.f32 %v8871_v3, %v14181_v8  ;;  %v6774_v36 = vmul.f32 %v12977_v63, %v12977_v63 }
 0xb81   : > { %v12988_v25 = vadd.f32 %v8872_v41, %v14182_v56  ;;  %6812 = vadd.xlane.f32.xlu1 %v6811_v27  ;;  %v6718_v20 = vadd.f32 %v12981_v28, %v12977_v63  ;;  %v6775_v62 = vmul.f32 %v12981_v28, %v12981_v28  ;;  %v14187_v41 = vld [vmem:[#allocation26_spill] sm:$0xff] }
 0xb82   : > { %v6776_v14 = vmul.f32 %v12985_v5, %v12985_v5 }
 0xb83   : > { %v6631_v1 = vpop.f32.mrb[124].mxu0  ;;  %6719 = vadd.xlane.f32.xlu0 %v6718_v20  ;;  %v6721_v49 = vadd.f32 %v12988_v25, %v12985_v5  ;;  %v6777_v42 = vmul.f32 %v12988_v25, %v12988_v25  ;;  %v6814_v59 = vadd.f32 %v6775_v62, %v6774_v36  ;;  %v14188_v20 = vld [vmem:[#allocation45_spill] sm:$0xff] }
 0xb84   : > { %v8873_v18 = vadd.f32 %v6631_v1, %v12857_v24  ;;  %v6633_v53 = vpop.f32.mrb[125].mxu0 }
 0xb85   : > { %v8874_v37 = vadd.f32 %v6633_v53, %v12860_v33  ;;  %v6635_v29 = vpop.f32.mrb[126].mxu0  ;;  %6722 = vadd.xlane.f32.xlu1 %v6721_v49  ;;  %v6817_v4 = vadd.f32 %v6777_v42, %v6776_v14  ;;  %v14189_v49 = vld [vmem:[#allocation47_spill] sm:$0xff]  ;;  %v14190_v42 = vld [vmem:[#allocation46_spill] sm:$0xff] }
 0xb86   : > { %v13005_v57 = vadd.f32 %v8873_v18, %v14183_v7  ;;  %v8875_v13 = vadd.f32 %v6635_v29, %v12857_v24  ;;  %v6637_v22 = vpop.f32.mrb[127].mxu0 }
 0xb87   : > { %v13009_v39 = vadd.f32 %v8874_v37, %v14184_v51  ;;  %v8876_v10 = vadd.f32 %v6637_v22, %v12860_v33  ;;  %6815 = vadd.xlane.f32.xlu0 %v6814_v59 }
 0xb88   : > { %v13013_v55 = vadd.f32 %v8875_v13, %v14185_v52  ;;  %v6778_v16 = vmul.f32 %v13005_v57, %v13005_v57 }
 0xb89   : > { %v13016_v40 = vadd.f32 %v8876_v10, %v14186_v12  ;;  %6818 = vadd.xlane.f32.xlu1 %v6817_v4  ;;  %v6724_v34 = vadd.f32 %v13009_v39, %v13005_v57  ;;  %v6779_v44 = vmul.f32 %v13009_v39, %v13009_v39 }
 0xb8a   : > { %v6780_v19 = vmul.f32 %v13013_v55, %v13013_v55 }
 0xb8b   : > { %v6641_v9 = vpop.f32.mrb[128].mxu0  ;;  %6725 = vadd.xlane.f32.xlu0 %v6724_v34  ;;  %v6727_v48 = vadd.f32 %v13016_v40, %v13013_v55  ;;  %v6781_v38 = vmul.f32 %v13016_v40, %v13016_v40  ;;  %v6820_v6 = vadd.f32 %v6779_v44, %v6778_v16  ;;  %v14191_v34 = vld [vmem:[#allocation50_spill] sm:$0xff] }
 0xb8c   : > { %v8877_v30 = vadd.f32 %v6641_v9, %v12857_v24  ;;  %v6643_v60 = vpop.f32.mrb[129].mxu0 }
 0xb8d   : > { %v8878_v3 = vadd.f32 %v6643_v60, %v12860_v33  ;;  %v6645_v32 = vpop.f32.mrb[130].mxu0  ;;  %6728 = vadd.xlane.f32.xlu1 %v6727_v48  ;;  %v6823_v1 = vadd.f32 %v6781_v38, %v6780_v19  ;;  %v14192_v48 = vld [vmem:[#allocation27_spill] sm:$0xff]  ;;  %v14193_v60 = vld [vmem:[#allocation49_spill] sm:$0xff] }
 0xb8e   : > { %v13033_v27 = vadd.f32 %v8877_v30, %v14187_v41  ;;  %v8879_v8 = vadd.f32 %v6645_v32, %v12857_v24  ;;  %v6647_v56 = vpop.f32.mrb[131].mxu0  ;;  %v14194_v32 = vld [vmem:[#allocation48_spill] sm:$0xff] }
 0xb8f   : > { %v13037_v36 = vadd.f32 %v8878_v3, %v14188_v20  ;;  %v8880_v62 = vadd.f32 %v6647_v56, %v12860_v33  ;;  %6821 = vadd.xlane.f32.xlu0 %v6820_v6 }
 0xb90   : > { %v13041_v14 = vadd.f32 %v8879_v8, %v14189_v49  ;;  %v6782_v37 = vmul.f32 %v13033_v27, %v13033_v27 }
 0xb91   : > { %v13044_v18 = vadd.f32 %v8880_v62, %v14190_v42  ;;  %6824 = vadd.xlane.f32.xlu1 %v6823_v1  ;;  %v6730_v53 = vadd.f32 %v13037_v36, %v13033_v27  ;;  %v6783_v29 = vmul.f32 %v13037_v36, %v13037_v36 }
 0xb92   : > { %v6784_v13 = vmul.f32 %v13041_v14, %v13041_v14 }
 0xb93   : > { %v6651_v59 = vpop.f32.mrb[132].mxu0  ;;  %6731 = vadd.xlane.f32.xlu0 %v6730_v53  ;;  %v6733_v7 = vadd.f32 %v13044_v18, %v13041_v14  ;;  %v6785_v22 = vmul.f32 %v13044_v18, %v13044_v18  ;;  %v6826_v12 = vadd.f32 %v6783_v29, %v6782_v37 }
 0xb94   : > { %v8881_v51 = vadd.f32 %v6651_v59, %v12857_v24  ;;  %v6653_v10 = vpop.f32.mrb[133].mxu0 }
 0xb95   : > { %v8882_v4 = vadd.f32 %v6653_v10, %v12860_v33  ;;  %v6655_v52 = vpop.f32.mrb[134].mxu0  ;;  %6734 = vadd.xlane.f32.xlu1 %v6733_v7  ;;  %v6829_v30 = vadd.f32 %v6785_v22, %v6784_v13 }
 0xb96   : > { %v13061_v16 = vadd.f32 %v8881_v51, %v14191_v34  ;;  %v8883_v44 = vadd.f32 %v6655_v52, %v12857_v24  ;;  %v6657_v9 = vpop.f32.mrb[135].mxu0 }
 0xb97   : > { %v13065_v19 = vadd.f32 %v8882_v4, %v14192_v48  ;;  %v8884_v38 = vadd.f32 %v6657_v9, %v12860_v33  ;;  %6827 = vadd.xlane.f32.xlu0 %v6826_v12 }
 0xb98   : > { %v13069_v3 = vadd.f32 %v8883_v44, %v14193_v60  ;;  %v6786_v24 = vmul.f32 %v13061_v16, %v13061_v16 }
 0xb99   : > { %v13072_v6 = vadd.f32 %v8884_v38, %v14194_v32  ;;  %6830 = vadd.xlane.f32.xlu1 %v6829_v30  ;;  %v6736_v41 = vadd.f32 %v13065_v19, %v13061_v16  ;;  %v6787_v8 = vmul.f32 %v13065_v19, %v13065_v19 }
 0xb9a   : > { %v6788_v56 = vmul.f32 %v13069_v3, %v13069_v3 }
 0xb9b   : > { %6737 = vadd.xlane.f32.xlu0 %v6736_v41  ;;  %v6739_v33 = vadd.f32 %v13072_v6, %v13069_v3  ;;  %v6789_v20 = vmul.f32 %v13072_v6, %v13072_v6  ;;  %v6832_v62 = vadd.f32 %v6787_v8, %v6786_v24 }
 0xb9d   : > { %6740 = vadd.xlane.f32.xlu1 %v6739_v33  ;;  %v6835_v1 = vadd.f32 %v6789_v20, %v6788_v56 }
 0xb9f   : > { %6833 = vadd.xlane.f32.xlu0 %v6832_v62  ;;  %v6692_v62 = vld [vmem:[%s766_s21] sm:$0x3] }
 0xba1   : > { %6836 = vadd.xlane.f32.xlu1 %v6835_v1 }
 0xbf0   : > { %v6696_v49 = vpop.xlane.xlu0 %6695 }
 0xbf1   : > { %v6742_v42 = vmul.f32 0.00390625, %v6696_v49 }
 0xbf2   : > { %v6699_v53 = vpop.xlane.xlu1 %6698 }
 0xbf3   : > { %v13086_v37 = vmul.f32 0.00390625, %v6699_v53  ;;  %v6854_v59 = vmul.f32 %v6742_v42, %v6742_v42 }
 0xbf4   : > { %v6792_v29 = vpop.xlane.xlu0 %6791 }
 0xbf5   : > { %v6838_v7 = vmul.f32 0.00390625, %v6792_v29  ;;  %v6855_v51 = vmul.f32 %v13086_v37, %v13086_v37 }
 0xbf6   : > { %v6795_v13 = vpop.xlane.xlu1 %6794 }
 0xbf7   : > { %v6870_v22 = vsub.f32 %v6838_v7, %v6854_v59  ;;  %v6839_v10 = vmul.f32 0.00390625, %v6795_v13  ;;  %v6693_v59 = vld [vmem:[%s770_s22] sm:$0x3]  ;;  %s14198_s22 = sld [smem:[#allocation71_spill]] (!%p8461_p7) }
 0xbf8   : > { %v6702_v4 = vpop.xlane.xlu0 %6701 }
 0xbf9   : > { %v6886_v52 = vmax.f32 %v6870_v22, 0.0  ;;  %v6871_v12 = vsub.f32 %v6839_v10, %v6855_v51  ;;  %v13090_v34 = vmul.f32 0.00390625, %v6702_v4  ;;  %v13111_v22 = vrot.slane %v6692_v62, %v14168_v58 }
 0xbfa   : > { %v6705_v44 = vpop.xlane.xlu1 %6704  ;;  %v13114_v51 = vrot.slane %v6692_v62, %v14169_v21 }
 0xbfb   : > { %v6934_v9 = vadd.f32 1e-05, %v6886_v52  ;;  %v6887_v48 = vmax.f32 %v6871_v12, 0.0  ;;  %v13092_v38 = vmul.f32 0.00390625, %v6705_v44  ;;  %v6856_v32 = vmul.f32 %v13090_v34, %v13090_v34 }
 0xbfc   : > { %v6798_v30 = vpop.xlane.xlu0 %6797 }
 0xbfd   : > { %9609 = vrsqrt.f32 %v6934_v9  ;;  %v6935_v60 = vadd.f32 1e-05, %v6887_v48  ;;  %v6840_v41 = vmul.f32 0.00390625, %v6798_v30  ;;  %v6857_v33 = vmul.f32 %v13092_v38, %v13092_v38 }
 0xbfe   : > { %v6801_v24 = vpop.xlane.xlu1 %6800  ;;  %v6902_v9 = vsub.f32 %v12865_v11, %v6742_v42  ;;  %v6903_v48 = vsub.f32 %v12869_v15, %v6742_v42  ;;  %v13123_v30 = vrot.slane %v6693_v59, %v14168_v58  ;;  %v6905_v11 = vsub.f32 %v12876_v43, %v13086_v37 }
 0xbff   : > { %9611 = vrsqrt.f32 %v6935_v60  ;;  %v6872_v8 = vsub.f32 %v6840_v41, %v6856_v32  ;;  %v6841_v56 = vmul.f32 0.00390625, %v6801_v24  ;;  %v13126_v60 = vrot.slane %v6693_v59, %v14169_v21 }
 0xc00   : > { %v6708_v20 = vpop.xlane.xlu0 %6707 }
 0xc01   : > { %v6888_v1 = vmax.f32 %v6872_v8, 0.0  ;;  %v6873_v49 = vsub.f32 %v6841_v56, %v6857_v33  ;;  %v13103_v53 = vmul.f32 0.00390625, %v6708_v20  ;;  %v6904_v56 = vsub.f32 %v12873_v0, %v13086_v37 }
 0xc02   : > { %v6711_v29 = vpop.xlane.xlu1 %6710  ;;  %v6906_v0 = vsub.f32 %v12893_v2, %v13090_v34 }
 0xc03   : > { %v6936_v7 = vadd.f32 1e-05, %v6888_v1  ;;  %v6889_v13 = vmax.f32 %v6873_v49, 0.0  ;;  %v13116_v10 = vmul.f32 0.00390625, %v6711_v29  ;;  %v6858_v12 = vmul.f32 %v13103_v53, %v13103_v53 }
 0xc04   : > { %v6804_v4 = vpop.xlane.xlu0 %6803 }
 0xc05   : > { %9613 = vrsqrt.f32 %v6936_v7  ;;  %v6937_v52 = vadd.f32 1e-05, %v6889_v13  ;;  %v6842_v44 = vmul.f32 0.00390625, %v6804_v4  ;;  %v6859_v8 = vmul.f32 %v13116_v10, %v13116_v10 }
 0xc06   : > { %v6807_v32 = vpop.xlane.xlu1 %6806 }
 0xc07   : > { %v9610_v41 = vpop.eup %9609  ;;  %9615 = vrsqrt.f32 %v6937_v52  ;;  %v6874_v24 = vsub.f32 %v6842_v44, %v6858_v12  ;;  %v6843_v33 = vmul.f32 0.00390625, %v6807_v32 }
 0xc08   : > { %v6966_v15 = vmul.f32 %v9610_v41, %v6902_v9  ;;  %v6967_v58 = vmul.f32 %v9610_v41, %v6903_v48  ;;  %v6714_v42 = vpop.xlane.xlu0 %6713  ;;  %v6907_v48 = vsub.f32 %v12897_v23, %v13090_v34  ;;  %v6908_v34 = vsub.f32 %v12901_v54, %v13092_v38 }
 0xc09   : > { %v9612_v20 = vpop.eup %9611  ;;  %v6890_v21 = vmax.f32 %v6874_v24, 0.0  ;;  %v6875_v62 = vsub.f32 %v6843_v33, %v6859_v8  ;;  %v13134_v1 = vmul.f32 0.00390625, %v6714_v42 }
 0xc0a   : > { %v7009_v49 = vmul.f32 %v13111_v22, %v6966_v15  ;;  %v7010_v29 = vmul.f32 %v13114_v51, %v6967_v58  ;;  %v6968_v59 = vmul.f32 %v9612_v20, %v6904_v56  ;;  %v6969_v7 = vmul.f32 %v9612_v20, %v6905_v11  ;;  %v6717_v13 = vpop.xlane.xlu1 %6716 }
 0xc0b   : > { %v6938_v4 = vadd.f32 1e-05, %v6890_v21  ;;  %v6891_v43 = vmax.f32 %v6875_v62, 0.0  ;;  %v13150_v41 = vmul.f32 0.00390625, %v6717_v13  ;;  %v6860_v8 = vmul.f32 %v13134_v1, %v13134_v1 }
 0xc0c   : > { %v13141_v37 = vadd.f32 %v13123_v30, %v7009_v49  ;;  %v13144_v52 = vadd.f32 %v13126_v60, %v7010_v29  ;;  %v7011_v12 = vmul.f32 %v13111_v22, %v6968_v59  ;;  %v7012_v44 = vmul.f32 %v13114_v51, %v6969_v7  ;;  %v6810_v9 = vpop.xlane.xlu0 %6809 }
 0xc0d   : > { %9617 = vrsqrt.f32 %v6938_v4  ;;  %v6939_v32 = vadd.f32 1e-05, %v6891_v43  ;;  %v6844_v33 = vmul.f32 0.00390625, %v6810_v9  ;;  %v6909_v11 = vsub.f32 %v12904_v47, %v13092_v38 }
 0xc0e   : > { %7084 = vst [vmem:[#allocation2] sm:$0xff] %v13141_v37  ;;  %7085 = vst [vmem:[#allocation2 + $0x8] sm:$0xff] %v13144_v52  ;;  %v13155_v2 = vadd.f32 %v13123_v30, %v7011_v12  ;;  %v13158_v24 = vadd.f32 %v13126_v60, %v7012_v44  ;;  %v6813_v56 = vpop.xlane.xlu1 %6812  ;;  %v6861_v49 = vmul.f32 %v13150_v41, %v13150_v41 }
 0xc0f   : > { %v9614_v23 = vpop.eup %9613  ;;  %9619 = vrsqrt.f32 %v6939_v32  ;;  %v6876_v42 = vsub.f32 %v6844_v33, %v6860_v8  ;;  %v6845_v20 = vmul.f32 0.00390625, %v6813_v56  ;;  %v6910_v13 = vsub.f32 %v12921_v50, %v13103_v53 }
 0xc10   : > { %7086 = vst [vmem:[#allocation2 + $0x10] sm:$0xff] %v13155_v2  ;;  %7087 = vst [vmem:[#allocation2 + $0x18] sm:$0xff] %v13158_v24  ;;  %v6970_v15 = vmul.f32 %v9614_v23, %v6906_v0  ;;  %v6971_v58 = vmul.f32 %v9614_v23, %v6907_v48  ;;  %v6720_v21 = vpop.xlane.xlu0 %6719  ;;  %v6911_v32 = vsub.f32 %v12925_v31, %v13103_v53 }
 0xc11   : > { %v9616_v62 = vpop.eup %9615  ;;  %v13170_v29 = vmul.f32 0.00390625, %v6720_v21  ;;  %v6892_v0 = vmax.f32 %v6876_v42, 0.0  ;;  %v6877_v4 = vsub.f32 %v6845_v20, %v6861_v49  ;;  %v6912_v53 = vsub.f32 %v12929_v61, %v13116_v10 }
 0xc12   : > { %v7013_v54 = vmul.f32 %v13111_v22, %v6970_v15  ;;  %v7014_v47 = vmul.f32 %v13114_v51, %v6971_v58  ;;  %v6972_v38 = vmul.f32 %v9616_v62, %v6908_v34  ;;  %v6973_v59 = vmul.f32 %v9616_v62, %v6909_v11  ;;  %v6723_v7 = vpop.xlane.xlu1 %6722 }
 0xc13   : > { %v6940_v8 = vadd.f32 1e-05, %v6892_v0  ;;  %v6893_v33 = vmax.f32 %v6877_v4, 0.0  ;;  %v13186_v56 = vmul.f32 0.00390625, %v6723_v7  ;;  %v6862_v34 = vmul.f32 %v13170_v29, %v13170_v29 }
 0xc14   : > { %v13177_v43 = vadd.f32 %v13123_v30, %v7013_v54  ;;  %v13180_v12 = vadd.f32 %v13126_v60, %v7014_v47  ;;  %v7015_v44 = vmul.f32 %v13111_v22, %v6972_v38  ;;  %v7016_v9 = vmul.f32 %v13114_v51, %v6973_v59  ;;  %v6816_v48 = vpop.xlane.xlu0 %6815 }
 0xc15   : > { %v6846_v11 = vmul.f32 0.00390625, %v6816_v48  ;;  %9621 = vrsqrt.f32 %v6940_v8  ;;  %v6941_v58 = vadd.f32 1e-05, %v6893_v33  ;;  %v6913_v42 = vsub.f32 %v12932_v17, %v13116_v10 }
 0xc16   : > { %7088 = vst [vmem:[#allocation2 + $0x20] sm:$0xff] %v13177_v43  ;;  %7089 = vst [vmem:[#allocation2 + $0x28] sm:$0xff] %v13180_v12  ;;  %v13191_v50 = vadd.f32 %v13123_v30, %v7015_v44  ;;  %v13194_v23 = vadd.f32 %v13126_v60, %v7016_v9  ;;  %v6819_v15 = vpop.xlane.xlu1 %6818  ;;  %v6863_v47 = vmul.f32 %v13186_v56, %v13186_v56 }
 0xc17   : > { %v9618_v31 = vpop.eup %9617  ;;  %v6878_v62 = vsub.f32 %v6846_v11, %v6862_v34  ;;  %9623 = vrsqrt.f32 %v6941_v58  ;;  %v6847_v38 = vmul.f32 0.00390625, %v6819_v15 }
 0xc18   : > { %7090 = vst [vmem:[#allocation2 + $0x30] sm:$0xff] %v13191_v50  ;;  %7091 = vst [vmem:[#allocation2 + $0x38] sm:$0xff] %v13194_v23  ;;  %v6974_v20 = vmul.f32 %v9618_v31, %v6910_v13  ;;  %v6975_v21 = vmul.f32 %v9618_v31, %v6911_v32  ;;  %v6726_v49 = vpop.xlane.xlu0 %6725 }
 0xc19   : > { %v9620_v54 = vpop.eup %9619  ;;  %v13206_v61 = vmul.f32 0.00390625, %v6726_v49  ;;  %v6894_v17 = vmax.f32 %v6878_v62, 0.0  ;;  %v6879_v10 = vsub.f32 %v6847_v38, %v6863_v47  ;;  %v6915_v62 = vsub.f32 %v12953_v46, %v13134_v1 }
 0xc1a   : > { %v7017_v59 = vmul.f32 %v13111_v22, %v6974_v20  ;;  %v7018_v7 = vmul.f32 %v13114_v51, %v6975_v21  ;;  %v6976_v0 = vmul.f32 %v9620_v54, %v6912_v53  ;;  %v6977_v4 = vmul.f32 %v9620_v54, %v6913_v42  ;;  %v6729_v44 = vpop.xlane.xlu1 %6728 }
 0xc1b   : > { %v6942_v33 = vadd.f32 1e-05, %v6894_v17  ;;  %v6895_v34 = vmax.f32 %v6879_v10, 0.0  ;;  %v13218_v11 = vmul.f32 0.00390625, %v6729_v44  ;;  %v6864_v53 = vmul.f32 %v13206_v61, %v13206_v61 }
 0xc1c   : > { %v13211_v13 = vadd.f32 %v13123_v30, %v7017_v59  ;;  %v13214_v9 = vadd.f32 %v13126_v60, %v7018_v7  ;;  %v7019_v48 = vmul.f32 %v13111_v22, %v6976_v0  ;;  %v7020_v32 = vmul.f32 %v13114_v51, %v6977_v4  ;;  %v6822_v8 = vpop.xlane.xlu0 %6821 }
 0xc1d   : > { %v6848_v58 = vmul.f32 0.00390625, %v6822_v8  ;;  %v6914_v20 = vsub.f32 %v12949_v35, %v13134_v1  ;;  %9625 = vrsqrt.f32 %v6942_v33  ;;  %v6943_v21 = vadd.f32 1e-05, %v6895_v34 }
 0xc1e   : > { %7092 = vst [vmem:[#allocation2 + $0x40] sm:$0xff] %v13211_v13  ;;  %7093 = vst [vmem:[#allocation2 + $0x48] sm:$0xff] %v13214_v9  ;;  %v13223_v15 = vadd.f32 %v13123_v30, %v7019_v48  ;;  %v13226_v31 = vadd.f32 %v13126_v60, %v7020_v32  ;;  %v6825_v42 = vpop.xlane.xlu1 %6824  ;;  %v6865_v54 = vmul.f32 %v13218_v11, %v13218_v11 }
 0xc1f   : > { %v6880_v49 = vsub.f32 %v6848_v58, %v6864_v53  ;;  %v6849_v47 = vmul.f32 0.00390625, %v6825_v42  ;;  %v9622_v59 = vpop.eup %9621  ;;  %v6916_v7 = vsub.f32 %v12957_v45, %v13150_v41  ;;  %v6917_v35 = vsub.f32 %v12960_v26, %v13150_v41 }
 0xc20   : > { %7094 = vst [vmem:[#allocation2 + $0x50] sm:$0xff] %v13223_v15  ;;  %7095 = vst [vmem:[#allocation2 + $0x58] sm:$0xff] %v13226_v31  ;;  %v6732_v38 = vpop.xlane.xlu0 %6731  ;;  %9627 = vrsqrt.f32 %v6943_v21  ;;  %v6978_v0 = vmul.f32 %v9622_v59, %v6914_v20  ;;  %v6979_v4 = vmul.f32 %v9622_v59, %v6915_v62  ;;  %v6918_v26 = vsub.f32 %v12977_v63, %v13170_v29 }
 0xc21   : > { %v6896_v44 = vmax.f32 %v6880_v49, 0.0  ;;  %v6881_v17 = vsub.f32 %v6849_v47, %v6865_v54  ;;  %v9624_v46 = vpop.eup %9623  ;;  %v13242_v1 = vmul.f32 0.00390625, %v6732_v38  ;;  %v6919_v41 = vsub.f32 %v12981_v28, %v13170_v29 }
 0xc22   : > { %v6735_v10 = vpop.xlane.xlu1 %6734  ;;  %v7021_v32 = vmul.f32 %v13111_v22, %v6978_v0  ;;  %v7022_v8 = vmul.f32 %v13114_v51, %v6979_v4  ;;  %v6980_v33 = vmul.f32 %v9624_v46, %v6916_v7  ;;  %v6981_v45 = vmul.f32 %v9624_v46, %v6917_v35 }
 0xc23   : > { %v13244_v48 = vmul.f32 0.00390625, %v6735_v10  ;;  %v6944_v53 = vadd.f32 1e-05, %v6896_v44  ;;  %v6897_v58 = vmax.f32 %v6881_v17, 0.0  ;;  %v6866_v63 = vmul.f32 %v13242_v1, %v13242_v1 }
 0xc24   : > { %v6828_v34 = vpop.xlane.xlu0 %6827  ;;  %v13253_v42 = vadd.f32 %v13123_v30, %v7021_v32  ;;  %v13256_v20 = vadd.f32 %v13126_v60, %v7022_v8  ;;  %v7023_v21 = vmul.f32 %v13111_v22, %v6980_v33  ;;  %v7024_v62 = vmul.f32 %v13114_v51, %v6981_v45 }
 0xc25   : > { %9629 = vrsqrt.f32 %v6944_v53  ;;  %v6945_v54 = vadd.f32 1e-05, %v6897_v58  ;;  %v6850_v47 = vmul.f32 0.00390625, %v6828_v34  ;;  %v6867_v38 = vmul.f32 %v13244_v48, %v13244_v48 }
 0xc26   : > { %v6831_v49 = vpop.xlane.xlu1 %6830  ;;  %7096 = vst [vmem:[#allocation2 + $0x60] sm:$0xff] %v13253_v42  ;;  %7097 = vst [vmem:[#allocation2 + $0x68] sm:$0xff] %v13256_v20  ;;  %v13265_v28 = vadd.f32 %v13123_v30, %v7023_v21  ;;  %v13268_v29 = vadd.f32 %v13126_v60, %v7024_v62  ;;  %v6920_v0 = vsub.f32 %v12985_v5, %v13186_v56 }
 0xc27   : > { %v6851_v59 = vmul.f32 0.00390625, %v6831_v49  ;;  %v9626_v35 = vpop.eup %9625  ;;  %9631 = vrsqrt.f32 %v6945_v54  ;;  %v6882_v4 = vsub.f32 %v6850_v47, %v6866_v63  ;;  %v6921_v44 = vsub.f32 %v12988_v25, %v13186_v56 }
 0xc28   : > { %v6738_v7 = vpop.xlane.xlu0 %6737  ;;  %7098 = vst [vmem:[#allocation2 + $0x70] sm:$0xff] %v13265_v28  ;;  %7099 = vst [vmem:[#allocation2 + $0x78] sm:$0xff] %v13268_v29  ;;  %v6982_v17 = vmul.f32 %v9626_v35, %v6918_v26  ;;  %v6983_v10 = vmul.f32 %v9626_v35, %v6919_v41  ;;  %v6922_v25 = vsub.f32 %v13005_v57, %v13206_v61 }
 0xc29   : > { %v6883_v46 = vsub.f32 %v6851_v59, %v6867_v38  ;;  %v6898_v33 = vmax.f32 %v6882_v4, 0.0  ;;  %v13278_v45 = vmul.f32 0.00390625, %v6738_v7  ;;  %v6923_v56 = vsub.f32 %v13009_v39, %v13206_v61 }
 0xc2a   : > { %v6741_v32 = vpop.xlane.xlu1 %6740  ;;  %v9628_v8 = vpop.eup %9627  ;;  %v7025_v5 = vmul.f32 %v13111_v22, %v6982_v17  ;;  %v7026_v53 = vmul.f32 %v13114_v51, %v6983_v10  ;;  %v6925_v10 = vsub.f32 %v13016_v40, %v13218_v11 }
 0xc2b   : > { %v13280_v34 = vmul.f32 0.00390625, %v6741_v32  ;;  %v6984_v58 = vmul.f32 %v9628_v8, %v6920_v0  ;;  %v6985_v21 = vmul.f32 %v9628_v8, %v6921_v44  ;;  %v6946_v26 = vadd.f32 1e-05, %v6898_v33 }
 0xc2c   : > { %v6834_v62 = vpop.xlane.xlu0 %6833  ;;  %v6899_v41 = vmax.f32 %v6883_v46, 0.0  ;;  %v13289_v49 = vadd.f32 %v13123_v30, %v7025_v5  ;;  %v13292_v54 = vadd.f32 %v13126_v60, %v7026_v53  ;;  %v6868_v57 = vmul.f32 %v13278_v45, %v13278_v45 }
 0xc2d   : > { %v7027_v63 = vmul.f32 %v13111_v22, %v6984_v58  ;;  %v7028_v47 = vmul.f32 %v13114_v51, %v6985_v21  ;;  %9633 = vrsqrt.f32 %v6946_v26  ;;  %v6852_v7 = vmul.f32 0.00390625, %v6834_v62 }
 0xc2e   : > { %v6837_v38 = vpop.xlane.xlu1 %6836  ;;  %v6947_v59 = vadd.f32 1e-05, %v6899_v41  ;;  %7100 = vst [vmem:[#allocation2 + $0x80] sm:$0xff] %v13289_v49  ;;  %7101 = vst [vmem:[#allocation2 + $0x88] sm:$0xff] %v13292_v54  ;;  %v6869_v35 = vmul.f32 %v13280_v34, %v13280_v34  ;;  %v6924_v44 = vsub.f32 %v13013_v55, %v13218_v11 }
 0xc2f   : > { %v13301_v39 = vadd.f32 %v13123_v30, %v7027_v63  ;;  %v13304_v61 = vadd.f32 %v13126_v60, %v7028_v47  ;;  %v6853_v0 = vmul.f32 0.00390625, %v6837_v38  ;;  %v9630_v4 = vpop.eup %9629  ;;  %v6884_v17 = vsub.f32 %v6852_v7, %v6868_v57 }
 0xc30   : > { %9635 = vrsqrt.f32 %v6947_v59  ;;  %v6986_v46 = vmul.f32 %v9630_v4, %v6922_v25  ;;  %v6987_v32 = vmul.f32 %v9630_v4, %v6923_v56  ;;  %v6926_v38 = vsub.f32 %v13033_v27, %v13242_v1 }
 0xc31   : > { %7102 = vst [vmem:[#allocation2 + $0x90] sm:$0xff] %v13301_v39  ;;  %7103 = vst [vmem:[#allocation2 + $0x98] sm:$0xff] %v13304_v61  ;;  %v6885_v8 = vsub.f32 %v6853_v0, %v6869_v35  ;;  %v9632_v33 = vpop.eup %9631  ;;  %v6900_v5 = vmax.f32 %v6884_v17, 0.0  ;;  %v6927_v59 = vsub.f32 %v13037_v36, %v13242_v1  ;;  %v6928_v7 = vsub.f32 %v13041_v14, %v13244_v48 }
 0xc32   : > { %v7029_v53 = vmul.f32 %v13111_v22, %v6986_v46  ;;  %v7030_v58 = vmul.f32 %v13114_v51, %v6987_v32  ;;  %v6988_v21 = vmul.f32 %v9632_v33, %v6924_v44  ;;  %v6989_v55 = vmul.f32 %v9632_v33, %v6925_v10 }
 0xc33   : > { %v6948_v62 = vadd.f32 1e-05, %v6900_v5  ;;  %v6901_v26 = vmax.f32 %v6885_v8, 0.0  ;;  %v6929_v35 = vsub.f32 %v13044_v18, %v13244_v48  ;;  %v6930_v8 = vsub.f32 %v13061_v16, %v13278_v45 }
 0xc34   : > { %v13317_v41 = vadd.f32 %v13123_v30, %v7029_v53  ;;  %v13320_v63 = vadd.f32 %v13126_v60, %v7030_v58  ;;  %v7031_v40 = vmul.f32 %v13111_v22, %v6988_v21  ;;  %v7032_v11 = vmul.f32 %v13114_v51, %v6989_v55 }
 0xc35   : > { %9637 = vrsqrt.f32 %v6948_v62  ;;  %v6949_v25 = vadd.f32 1e-05, %v6901_v26  ;;  %v6931_v33 = vsub.f32 %v13065_v19, %v13278_v45  ;;  %v6932_v53 = vsub.f32 %v13069_v3, %v13280_v34 }
 0xc36   : > { %7104 = vst [vmem:[#allocation2 + $0xa0] sm:$0xff] %v13317_v41  ;;  %7105 = vst [vmem:[#allocation2 + $0xa8] sm:$0xff] %v13320_v63  ;;  %v13327_v56 = vadd.f32 %v13123_v30, %v7031_v40  ;;  %v13330_v47 = vadd.f32 %v13126_v60, %v7032_v11  ;;  %v6933_v58 = vsub.f32 %v13072_v6, %v13280_v34 }
 0xc37   : > { %v9634_v57 = vpop.eup %9633  ;;  %9639 = vrsqrt.f32 %v6949_v25 }
 0xc38   : > { %7106 = vst [vmem:[#allocation2 + $0xb0] sm:$0xff] %v13327_v56  ;;  %7107 = vst [vmem:[#allocation2 + $0xb8] sm:$0xff] %v13330_v47  ;;  %v6990_v0 = vmul.f32 %v9634_v57, %v6926_v38  ;;  %v6991_v4 = vmul.f32 %v9634_v57, %v6927_v59  ;;  %v7188_v38 = vmul.f32 (!%p8461_p7), %v13155_v2, %v13155_v2 }
 0xc39   : > { %v7189_v59 = vmul.f32 (!%p8461_p7), %v13158_v24, %v13158_v24  ;;  %v7186_v57 = vmul.f32 (!%p8461_p7), %v13141_v37, %v13141_v37 }
 0xc3a   : > { %v9636_v44 = vpop.eup %9635  ;;  %v7033_v27 = vmul.f32 %v13111_v22, %v6990_v0  ;;  %v7034_v17 = vmul.f32 %v13114_v51, %v6991_v4  ;;  %v7205_v0 = vmul.f32 (!%p8461_p7), %v13304_v61, %v13304_v61  ;;  %v7202_v4 = vmul.f32 (!%p8461_p7), %v13289_v49, %v13289_v49 }
 0xc3b   : > { %v6992_v36 = vmul.f32 %v9636_v44, %v6928_v7  ;;  %v6993_v1 = vmul.f32 %v9636_v44, %v6929_v35  ;;  %v7187_v7 = vmul.f32 (!%p8461_p7), %v13144_v52, %v13144_v52  ;;  %v7204_v35 = vmul.f32 (!%p8461_p7), %v13301_v39, %v13301_v39 }
 0xc3c   : > { %v13345_v10 = vadd.f32 %v13123_v30, %v7033_v27  ;;  %v13348_v46 = vadd.f32 %v13126_v60, %v7034_v17  ;;  %v7221_v44 = vadd.f32 (!%p8461_p7), %v7189_v59, %v7188_v38  ;;  %v7203_v17 = vmul.f32 (!%p8461_p7), %v13292_v54, %v13292_v54  ;;  %v9677_v38 = vld [vmem:[%s14198_s22 + $0x50] sm:$0xff] (!%p8461_p7)  }
 0xc3d   : > { %v7035_v14 = vmul.f32 %v13111_v22, %v6992_v36  ;;  %v7036_v32 = vmul.f32 %v13114_v51, %v6993_v1  ;;  %v7218_v27 = vadd.f32 (!%p8461_p7), %v7187_v7, %v7186_v57  ;;  %v7245_v36 = vadd.f32 (!%p8461_p7), %v7205_v0, %v7204_v35  ;;  %v9678_v59 = vld [vmem:[%s14198_s22 + $0x10] sm:$0xff] (!%p8461_p7)   ;;  %v9679_v35 = vld [vmem:[%s14198_s22 + $0x58] sm:$0xff] (!%p8461_p7)  }
 0xc3e   : > { %7108 = vst [vmem:[#allocation2 + $0xc0] sm:$0xff] %v13345_v10  ;;  %7109 = vst [vmem:[#allocation2 + $0xc8] sm:$0xff] %v13348_v46  ;;  %v7242_v1 = vadd.f32 (!%p8461_p7), %v7203_v17, %v7202_v4  ;;  %v7137_v57 = vadd.f32 (!%p8461_p7), %v13226_v31, %v13223_v15  ;;  %v7134_v7 = vadd.f32 (!%p8461_p7), %v13214_v9, %v13211_v13  ;;  %v9680_v0 = vld [vmem:[%s14198_s22 + $0x18] sm:$0xff] (!%p8461_p7)  }
 0xc3f   : > { %v13355_v18 = vadd.f32 %v13123_v30, %v7035_v14  ;;  %v13358_v48 = vadd.f32 %v13126_v60, %v7036_v32  ;;  %v9638_v5 = vpop.eup %9637  ;;  %v7131_v14 = vadd.f32 (!%p8461_p7), %v13194_v23, %v13191_v50  ;;  %v7128_v32 = vadd.f32 (!%p8461_p7), %v13180_v12, %v13177_v43 }
 0xc40   : > { %v6994_v21 = vmul.f32 %v9638_v5, %v6930_v8  ;;  %v6995_v55 = vmul.f32 %v9638_v5, %v6931_v33  ;;  %v7155_v8 = vadd.f32 (!%p8461_p7), %v13330_v47, %v13327_v56  ;;  %v7192_v33 = vmul.f32 (!%p8461_p7), %v13191_v50, %v13191_v50 }
 0xc41   : > { %7110 = vst [vmem:[#allocation2 + $0xd0] sm:$0xff] %v13355_v18  ;;  %7111 = vst [vmem:[#allocation2 + $0xd8] sm:$0xff] %v13358_v48  ;;  %v9640_v62 = vpop.eup %9639  ;;  %v7193_v5 = vmul.f32 (!%p8461_p7), %v13194_v23, %v13194_v23  ;;  %v7161_v4 = vadd.f32 (!%p8461_p7), %v13358_v48, %v13355_v18  ;;  %v7158_v17 = vadd.f32 (!%p8461_p7), %v13348_v46, %v13345_v10 }
 0xc42   : > { %v7037_v26 = vmul.f32 %v13111_v22, %v6994_v21  ;;  %v7038_v16 = vmul.f32 %v13114_v51, %v6995_v55  ;;  %v6996_v40 = vmul.f32 %v9640_v62, %v6932_v53  ;;  %v6997_v19 = vmul.f32 %v9640_v62, %v6933_v58  ;;  %v9673_v55 = vld [vmem:[%s14198_s22 + $0x40] sm:$0xff] (!%p8461_p7)  }
 0xc43   : > { %7119 = sbr.rel (%p8461_p7) target bundleno = 3596 (0xe0c), region = 108  ;;  %v7152_v53 = vadd.f32 (!%p8461_p7), %v13320_v63, %v13317_v41  ;;  %v7190_v58 = vmul.f32 (!%p8461_p7), %v13177_v43, %v13177_v43  ;;  %v7191_v21 = vmul.f32 (!%p8461_p7), %v13180_v12, %v13180_v12  ;;  %v9674_v62 = vld [vmem:[%s14198_s22] sm:$0xff] (!%p8461_p7)   ;;  %8629 = vmatprep.subr.bf16.mxu0 (!%p8461_p7), %v9673_v55  ;;  %8981 = vmatprep.subr.bf16.mxu1 (!%p8461_p7), %v9673_v55  ;;  %v9683_v55 = vld [vmem:[%s14198_s22 + $0x68] sm:$0xff] (!%p8461_p7)  }
 0xc44   : > { %v13373_v45 = vadd.f32 %v13123_v30, %v7037_v26  ;;  %v13376_v11 = vadd.f32 %v13126_v60, %v7038_v16  ;;  %v7039_v3 = vmul.f32 %v13111_v22, %v6996_v40  ;;  %v7040_v25 = vmul.f32 %v13114_v51, %v6997_v19  ;;  %8630 = vmatpush3.bf16.msra.mxu0 (!%p8461_p7), %v9674_v62 }
 0xc45   : > { %v7146_v22 = vadd.f32 (!%p8461_p7), %v13292_v54, %v13289_v49  ;;  %v7122_v51 = vadd.f32 (!%p8461_p7), %v13144_v52, %v13141_v37  ;;  %v7227_v26 = vadd.f32 (!%p8461_p7), %v7193_v5, %v7192_v33  ;;  %v7208_v16 = vmul.f32 (!%p8461_p7), %v13327_v56, %v13327_v56  ;;  %8989 = vmatpush3.bf16.msra.mxu1 (!%p8461_p7), %v9674_v62  ;;  %v9684_v62 = vld [vmem:[%s14198_s22 + $0x28] sm:$0xff] (!%p8461_p7)  }
 0xc46   : > { %14195 = vst [vmem:[#allocation51_spill] sm:$0xff] %v13373_v45  ;;  %14196 = vst [vmem:[#allocation52_spill] sm:$0xff] %v13376_v11  ;;  %v13383_v6 = vadd.f32 %v13123_v30, %v7039_v3  ;;  %v13386_v34 = vadd.f32 %v13126_v60, %v7040_v25  ;;  %v7149_v30 = vadd.f32 (!%p8461_p7), %v13304_v61, %v13301_v39 }
 0xc47   : > { %7112 = vst [vmem:[#allocation2 + $0xe0] sm:$0xff] %v13373_v45  ;;  %7113 = vst [vmem:[#allocation2 + $0xe8] sm:$0xff] %v13376_v11  ;;  %v7125_v60 = vadd.f32 (!%p8461_p7), %v13158_v24, %v13155_v2  ;;  %7147 = vadd.xlane.f32.xlu1 (!%p8461_p7), %v7146_v22  ;;  %7123 = vadd.xlane.f32.xlu0 (!%p8461_p7), %v7122_v51  ;;  %v7209_v40 = vmul.f32 (!%p8461_p7), %v13330_v47, %v13330_v47  ;;  %v9675_v22 = vld [vmem:[%s14198_s22 + $0x48] sm:$0xff] (!%p8461_p7)  }
 0xc48   : > { %14197 = vst [vmem:[#allocation53_spill] sm:$0xff] %v13386_v34  ;;  %7114 = vst [vmem:[#allocation2 + $0xf0] sm:$0xff] %v13383_v6  ;;  %v7224_v19 = vadd.f32 (!%p8461_p7), %v7191_v21, %v7190_v58  ;;  %v7206_v3 = vmul.f32 (!%p8461_p7), %v13317_v41, %v13317_v41  ;;  %v7207_v25 = vmul.f32 (!%p8461_p7), %v13320_v63, %v13320_v63  ;;  %v9676_v51 = vld [vmem:[%s14198_s22 + $0x8] sm:$0xff] (!%p8461_p7)   ;;  %8631 = vmatprep.subr.bf16.mxu0 (!%p8461_p7), %v9675_v22 }
 0xc49   : > { %7115 = vst [vmem:[#allocation2 + $0xf8] sm:$0xff] %v13386_v34  ;;  %8982 = vmatprep.subr.bf16.mxu1 (!%p8461_p7), %v9675_v22  ;;  %8632 = vmatpush3.bf16.msra.mxu0 (!%p8461_p7), %v9676_v51  ;;  %v7212_v33 = vmul.f32 (!%p8461_p7), %v13355_v18, %v13355_v18  ;;  %v7213_v5 = vmul.f32 (!%p8461_p7), %v13358_v48, %v13358_v48  ;;  %v9687_v22 = vld [vmem:[%s14198_s22 + $0x78] sm:$0xff] (!%p8461_p7)  }
 0xc4a   : > { %8990 = vmatpush3.bf16.msra.mxu1 %v9676_v51  ;;  %8633 = vmatprep.subr.bf16.mxu0 %v9677_v38  ;;  %v7210_v58 = vmul.f32 %v13345_v10, %v13345_v10  ;;  %v7211_v21 = vmul.f32 %v13348_v46, %v13348_v46  ;;  %v9688_v51 = vld [vmem:[%s14198_s22 + $0x38] sm:$0xff]  }
 0xc4b   : > { %7150 = vadd.xlane.f32.xlu1 %v7149_v30  ;;  %7126 = vadd.xlane.f32.xlu0 %v7125_v60  ;;  %v7251_v30 = vadd.f32 %v7209_v40, %v7208_v16  ;;  %v7248_v60 = vadd.f32 %v7207_v25, %v7206_v3  ;;  %v9685_v40 = vld [vmem:[%s14198_s22 + $0x70] sm:$0xff]   ;;  %v7143_v3 = vadd.f32 %v13268_v29, %v13265_v28 }
 0xc4c   : > { %8983 = vmatprep.subr.bf16.mxu1 %v9677_v38  ;;  %v7254_v16 = vadd.f32 %v7211_v21, %v7210_v58  ;;  %v7140_v25 = vadd.f32 %v13256_v20, %v13253_v42  ;;  %v7200_v38 = vmul.f32 %v13265_v28, %v13265_v28 }
 0xc4d   : > { %8634 = vmatpush3.bf16.msra.mxu0 %v9678_v59 }
 0xc4e   : > { %8991 = vmatpush3.bf16.msra.mxu1 %v9678_v59  ;;  %8635 = vmatprep.subr.bf16.mxu0 %v9679_v35  ;;  %v7201_v59 = vmul.f32 %v13268_v29, %v13268_v29 }
 0xc4f   : > { %7222 = vadd.xlane.f32.xlu1 %v7221_v44  ;;  %7219 = vadd.xlane.f32.xlu0 %v7218_v27  ;;  %v7196_v44 = vmul.f32 %v13223_v15, %v13223_v15  ;;  %v7197_v27 = vmul.f32 %v13226_v31, %v13226_v31 }
 0xc50   : > { %8984 = vmatprep.subr.bf16.mxu1 %v9679_v35  ;;  %v7216_v35 = vmul.f32 %v13383_v6, %v13383_v6 }
 0xc51   : > { %8636 = vmatpush3.bf16.msra.mxu0 %v9680_v0 }
 0xc52   : > { %8992 = vmatpush3.bf16.msra.mxu1 %v9680_v0  ;;  %v7217_v0 = vmul.f32 %v13386_v34, %v13386_v34 }
 0xc53   : > { %7246 = vadd.xlane.f32.xlu1 %v7245_v36  ;;  %7243 = vadd.xlane.f32.xlu0 %v7242_v1  ;;  %v7194_v36 = vmul.f32 %v13211_v13, %v13211_v13  ;;  %v7195_v1 = vmul.f32 %v13214_v9, %v13214_v9 }
 0xc57   : > { %7132 = vadd.xlane.f32.xlu1 %v7131_v14  ;;  %7129 = vadd.xlane.f32.xlu0 %v7128_v32  ;;  %v9681_v14 = vld [vmem:[%s14198_s22 + $0x60] sm:$0xff]  }
 0xc58   : > { %v9682_v32 = vld [vmem:[%s14198_s22 + $0x20] sm:$0xff]   ;;  %8637 = vmatprep.subr.bf16.mxu0 %v9681_v14  ;;  %8985 = vmatprep.subr.bf16.mxu1 %v9681_v14 }
 0xc59   : > { %8638 = vmatpush3.bf16.msra.mxu0 %v9682_v32  ;;  %8993 = vmatpush3.bf16.msra.mxu1 %v9682_v32 }
 0xc5a   : > { %8639 = vmatprep.subr.bf16.mxu0 %v9683_v55  ;;  %8986 = vmatprep.subr.bf16.mxu1 %v9683_v55 }
 0xc5b   : > { %7156 = vadd.xlane.f32.xlu1 %v7155_v8  ;;  %7153 = vadd.xlane.f32.xlu0 %v7152_v53  ;;  %v7233_v8 = vadd.f32 %v7197_v27, %v7196_v44  ;;  %v7230_v53 = vadd.f32 %v7195_v1, %v7194_v36  ;;  %v7239_v44 = vadd.f32 %v7201_v59, %v7200_v38 }
 0xc5c   : > { %v7263_v36 = vadd.f32 %v7217_v0, %v7216_v35 }
 0xc5d   : > { %8640 = vmatpush3.bf16.msra.mxu0 %v9684_v62  ;;  %8994 = vmatpush3.bf16.msra.mxu1 %v9684_v62 }
 0xc5e   : > { %8641 = vmatprep.subr.bf16.mxu0 %v9685_v40  ;;  %8987 = vmatprep.subr.bf16.mxu1 %v9685_v40 }
 0xc5f   : > { %7228 = vadd.xlane.f32.xlu1 %v7227_v26  ;;  %7225 = vadd.xlane.f32.xlu0 %v7224_v19  ;;  %v7257_v26 = vadd.f32 %v7213_v5, %v7212_v33  ;;  %v9686_v19 = vld [vmem:[%s14198_s22 + $0x30] sm:$0xff]  }
 0xc61   : > { %8642 = vmatpush3.bf16.msra.mxu0 %v9686_v19  ;;  %8995 = vmatpush3.bf16.msra.mxu1 %v9686_v19 }
 0xc62   : > { %8643 = vmatprep.subr.bf16.mxu0 %v9687_v22  ;;  %8988 = vmatprep.subr.bf16.mxu1 %v9687_v22 }
 0xc63   : > { %7252 = vadd.xlane.f32.xlu1 %v7251_v30  ;;  %7249 = vadd.xlane.f32.xlu0 %v7248_v60  ;;  %v7167_v30 = vadd.f32 %v13386_v34, %v13383_v6  ;;  %v7164_v60 = vadd.f32 %v13376_v11, %v13373_v45 }
 0xc65   : > { %8644 = vmatpush3.bf16.msra.mxu0 %v9688_v51  ;;  %8996 = vmatpush3.bf16.msra.mxu1 %v9688_v51 }
 0xc67   : > { %7138 = vadd.xlane.f32.xlu1 %v7137_v57  ;;  %7135 = vadd.xlane.f32.xlu0 %v7134_v7  ;;  %v7198_v57 = vmul.f32 %v13253_v42, %v13253_v42  ;;  %v7199_v7 = vmul.f32 %v13256_v20, %v13256_v20 }
 0xc69   : > { %v7236_v27 = vadd.f32 %v7199_v7, %v7198_v57 }
 0xc6b   : > { %7162 = vadd.xlane.f32.xlu1 %v7161_v4  ;;  %7159 = vadd.xlane.f32.xlu0 %v7158_v17  ;;  %v7214_v4 = vmul.f32 %v13373_v45, %v13373_v45  ;;  %v7215_v17 = vmul.f32 %v13376_v11, %v13376_v11 }
 0xc6d   : > { %v7260_v1 = vadd.f32 %v7215_v17, %v7214_v4 }
 0xc6f   : > { %7234 = vadd.xlane.f32.xlu1 %v7233_v8  ;;  %7231 = vadd.xlane.f32.xlu0 %v7230_v53 }
 0xc73   : > { %7258 = vadd.xlane.f32.xlu1 %v7257_v26  ;;  %7255 = vadd.xlane.f32.xlu0 %v7254_v16 }
 0xc77   : > { %7144 = vadd.xlane.f32.xlu1 %v7143_v3  ;;  %7141 = vadd.xlane.f32.xlu0 %v7140_v25 }
 0xc7b   : > { %7168 = vadd.xlane.f32.xlu1 %v7167_v30  ;;  %7165 = vadd.xlane.f32.xlu0 %v7164_v60 }
 0xc7f   : > { %7240 = vadd.xlane.f32.xlu1 %v7239_v44  ;;  %7237 = vadd.xlane.f32.xlu0 %v7236_v27 }
 0xc83   : > { %7264 = vadd.xlane.f32.xlu1 %v7263_v36  ;;  %7261 = vadd.xlane.f32.xlu0 %v7260_v1 }
 0xcd4   : > { %v7148_v14 = vpop.xlane.xlu1 %7147  ;;  %v7124_v32 = vpop.xlane.xlu0 %7123 }
 0xcd5   : > { %v13535_v5 = vmul.f32 0.00390625, %v7124_v32  ;;  %v13539_v58 = vmul.f32 0.00390625, %v7148_v14  ;;  %v7120_v14 = vld [vmem:[%s14199_s2] sm:$0x3] }
 0xcd7   : > { %v7282_v40 = vmul.f32 %v13535_v5, %v13535_v5  ;;  %v7290_v30 = vmul.f32 %v13539_v58, %v13539_v58 }
 0xcd8   : > { %v7151_v8 = vpop.xlane.xlu1 %7150  ;;  %v7127_v33 = vpop.xlane.xlu0 %7126 }
 0xcd9   : > { %v13537_v53 = vmul.f32 0.00390625, %v7127_v33  ;;  %v13541_v21 = vmul.f32 0.00390625, %v7151_v8 }
 0xcdb   : > { %v7283_v16 = vmul.f32 %v13537_v53, %v13537_v53  ;;  %v7291_v22 = vmul.f32 %v13541_v21, %v13541_v21 }
 0xcdc   : > { %v7223_v55 = vpop.xlane.xlu1 %7222  ;;  %v7220_v62 = vpop.xlane.xlu0 %7219 }
 0xcdd   : > { %v7267_v26 = vmul.f32 0.00390625, %v7223_v55  ;;  %v7266_v19 = vmul.f32 0.00390625, %v7220_v62  ;;  %v7121_v62 = vld [vmem:[%s14200_s20] sm:$0x3] }
 0xcdf   : > { %v7299_v3 = vsub.f32 %v7267_v26, %v7283_v16  ;;  %v7298_v25 = vsub.f32 %v7266_v19, %v7282_v40  ;;  %v14201_v40 = vld [vmem:[#allocation22_spill] sm:$0xff] }
 0xce0   : > { %v7247_v51 = vpop.xlane.xlu1 %7246  ;;  %v7244_v60 = vpop.xlane.xlu0 %7243  ;;  %v13562_v19 = vrot.slane %v7120_v14, %v14201_v40 }
 0xce1   : > { %v7315_v38 = vmax.f32 %v7299_v3, 0.0  ;;  %v7314_v59 = vmax.f32 %v7298_v25, 0.0  ;;  %v7275_v57 = vmul.f32 0.00390625, %v7247_v51  ;;  %v7274_v7 = vmul.f32 0.00390625, %v7244_v60  ;;  %v14202_v3 = vld [vmem:[#allocation21_spill] sm:$0xff] }
 0xce2   : > { %v13565_v25 = vrot.slane %v7120_v14, %v14202_v3 }
 0xce3   : > { %v7363_v35 = vadd.f32 1e-05, %v7315_v38  ;;  %v7362_v0 = vadd.f32 1e-05, %v7314_v59  ;;  %v7307_v4 = vsub.f32 %v7275_v57, %v7291_v22  ;;  %v7306_v44 = vsub.f32 %v7274_v7, %v7290_v30 }
 0xce4   : > { %v7133_v27 = vpop.xlane.xlu1 %7132  ;;  %v7130_v17 = vpop.xlane.xlu0 %7129  ;;  %v13568_v22 = vrot.slane %v7121_v62, %v14201_v40 }
 0xce5   : > { %9689 = vrsqrt.f32 %v7363_v35  ;;  %v7323_v36 = vmax.f32 %v7307_v4, 0.0  ;;  %v7322_v1 = vmax.f32 %v7306_v44, 0.0  ;;  %v13554_v8 = vmul.f32 0.00390625, %v7133_v27 }
 0xce6   : > { %9691 = vrsqrt.f32 %v7362_v0  ;;  %v13559_v16 = vmul.f32 0.00390625, %v7130_v17  ;;  %v7332_v4 = vsub.f32 %v13155_v2, %v13537_v53  ;;  %v7333_v44 = vsub.f32 %v13158_v24, %v13537_v53 }
 0xce7   : > { %v7371_v32 = vadd.f32 1e-05, %v7323_v36  ;;  %v7370_v26 = vadd.f32 1e-05, %v7322_v1  ;;  %v7285_v60 = vmul.f32 %v13554_v8, %v13554_v8  ;;  %v13585_v27 = vrot.slane %v7121_v62, %v14202_v3 }
 0xce8   : > { %v7157_v33 = vpop.xlane.xlu1 %7156  ;;  %v7154_v55 = vpop.xlane.xlu0 %7153  ;;  %v7284_v7 = vmul.f32 %v13559_v16, %v13559_v16  ;;  %v7330_v36 = vsub.f32 %v13141_v37, %v13535_v5  ;;  %v7331_v1 = vsub.f32 %v13144_v52, %v13535_v5 }
 0xce9   : > { %9693 = vrsqrt.f32 %v7371_v32  ;;  %v13570_v51 = vmul.f32 0.00390625, %v7157_v33  ;;  %v13572_v30 = vmul.f32 0.00390625, %v7154_v55 }
 0xcea   : > { %9695 = vrsqrt.f32 %v7370_v26 }
 0xceb   : > { %v7293_v55 = vmul.f32 %v13570_v51, %v13570_v51  ;;  %v7292_v24 = vmul.f32 %v13572_v30, %v13572_v30 }
 0xcec   : > { %v7229_v38 = vpop.xlane.xlu1 %7228  ;;  %v7226_v59 = vpop.xlane.xlu0 %7225 }
 0xced   : > { %v7269_v57 = vmul.f32 0.00390625, %v7229_v38  ;;  %v7268_v35 = vmul.f32 0.00390625, %v7226_v59 }
 0xcef   : > { %v9690_v17 = vpop.eup %9689  ;;  %v7301_v14 = vsub.f32 %v7269_v57, %v7285_v60  ;;  %v7300_v32 = vsub.f32 %v7268_v35, %v7284_v7 }
 0xcf0   : > { %v9692_v33 = vpop.eup %9691  ;;  %v7253_v2 = vpop.xlane.xlu1 %7252  ;;  %v7397_v62 = vmul.f32 %v9690_v17, %v7333_v44  ;;  %v7396_v26 = vmul.f32 %v9690_v17, %v7332_v4 }
 0xcf1   : > { %v7250_v53 = vpop.xlane.xlu0 %7249  ;;  %v7317_v40 = vmax.f32 %v7301_v14, 0.0  ;;  %v7316_v3 = vmax.f32 %v7300_v32, 0.0  ;;  %v7277_v38 = vmul.f32 0.00390625, %v7253_v2  ;;  %v7395_v59 = vmul.f32 %v9692_v33, %v7331_v1 }
 0xcf2   : > { %v7276_v37 = vmul.f32 0.00390625, %v7250_v53  ;;  %v7440_v52 = vmul.f32 %v13565_v25, %v7397_v62  ;;  %v7394_v5 = vmul.f32 %v9692_v33, %v7330_v36  ;;  %v7439_v60 = vmul.f32 %v13562_v19, %v7396_v26 }
 0xcf3   : > { %v7365_v57 = vadd.f32 1e-05, %v7317_v40  ;;  %v7364_v7 = vadd.f32 1e-05, %v7316_v3  ;;  %v7309_v35 = vsub.f32 %v7277_v38, %v7293_v55  ;;  %v7438_v34 = vmul.f32 %v13565_v25, %v7395_v59  ;;  %v9694_v32 = vpop.eup %9693 }
 0xcf4   : > { %v7308_v0 = vsub.f32 %v7276_v37, %v7292_v24  ;;  %v7139_v11 = vpop.xlane.xlu1 %7138  ;;  %v7483_v4 = vadd.f32 %v13585_v27, %v7440_v52  ;;  %v7437_v44 = vmul.f32 %v13562_v19, %v7394_v5  ;;  %v7482_v17 = vadd.f32 %v13568_v22, %v7439_v60  ;;  %v9696_v24 = vpop.eup %9695 }
 0xcf5   : > { %v7136_v45 = vpop.xlane.xlu0 %7135  ;;  %v7347_v1 = vsub.f32 %v13292_v54, %v13539_v58  ;;  %9697 = vrsqrt.f32 %v7365_v57  ;;  %v7325_v36 = vmax.f32 %v7309_v35, 0.0  ;;  %v7348_v33 = vsub.f32 %v13301_v39, %v13541_v21 }
 0xcf6   : > { %v7324_v14 = vmax.f32 %v7308_v0, 0.0  ;;  %9699 = vrsqrt.f32 %v7364_v7  ;;  %v7481_v55 = vadd.f32 %v13585_v27, %v7438_v34  ;;  %v7480_v2 = vadd.f32 %v13568_v22, %v7437_v44 }
 0xcf7   : > { %v7349_v53 = vsub.f32 %v13304_v61, %v13541_v21  ;;  %v7336_v62 = vsub.f32 %v13191_v50, %v13554_v8  ;;  %v7373_v54 = vadd.f32 1e-05, %v7325_v36  ;;  %v13611_v26 = vmul.f32 0.00390625, %v7139_v11 }
 0xcf8   : > { %v7337_v0 = vsub.f32 %v13194_v23, %v13554_v8  ;;  %v7334_v39 = vsub.f32 %v13177_v43, %v13559_v16  ;;  %v7163_v40 = vpop.xlane.xlu1 %7162  ;;  %v7513_v3 = vpack.c.bf16 %v7483_v4, %v7481_v55  ;;  %v7512_v38 = vpack.c.bf16 %v7482_v17, %v7480_v2 }
 0xcf9   : > { %v7160_v34 = vpop.xlane.xlu0 %7159  ;;  %v7335_v37 = vsub.f32 %v13180_v12, %v13559_v16  ;;  %v7352_v61 = vsub.f32 %v13327_v56, %v13570_v51  ;;  %v7372_v21 = vadd.f32 1e-05, %v7324_v14  ;;  %v13621_v59 = vmul.f32 0.00390625, %v7136_v45 }
 0xcfa   : > { %v7353_v11 = vsub.f32 %v13330_v47, %v13570_v51  ;;  %v7350_v23 = vsub.f32 %v13317_v41, %v13572_v30  ;;  %7695 = vmatprep.mubr.bf16.mxu0 %v7513_v3  ;;  %v7411_v43 = vmul.f32 %v9696_v24, %v7347_v1  ;;  %v7413_v52 = vmul.f32 %v9694_v32, %v7349_v53 }
 0xcfb   : > { %9701 = vrsqrt.f32 %v7373_v54  ;;  %v13627_v5 = vmul.f32 0.00390625, %v7163_v40  ;;  %v13629_v60 = vmul.f32 0.00390625, %v7160_v34  ;;  %7696 = vmatmul.mubr.bf16.vlgmr.msra.gmra.mrb[0].mxu0 %v7512_v38  ;;  %v7287_v12 = vmul.f32 %v13611_v26, %v13611_v26 }
 0xcfc   : > { %v7235_v45 = vpop.xlane.xlu1 %7234  ;;  %v7454_v57 = vmul.f32 %v13565_v25, %v7411_v43  ;;  %v7456_v7 = vmul.f32 %v13565_v25, %v7413_v52  ;;  %v14203_v35 = vsub.f32 %v13289_v49, %v13539_v58  ;;  %v7412_v44 = vmul.f32 %v9694_v32, %v7348_v33 }
 0xcfd   : > { %v7232_v16 = vpop.xlane.xlu0 %7231  ;;  %9703 = vrsqrt.f32 %v7372_v21  ;;  %v7271_v17 = vmul.f32 0.00390625, %v7235_v45  ;;  %v7286_v1 = vmul.f32 %v13621_v59, %v13621_v59  ;;  %v7295_v49 = vmul.f32 %v13627_v5, %v13627_v5 }
 0xcfe   : > { %v7410_v4 = vmul.f32 %v9696_v24, %v14203_v35  ;;  %v7270_v36 = vmul.f32 0.00390625, %v7232_v16  ;;  %v7497_v14 = vadd.f32 %v13585_v27, %v7454_v57  ;;  %v7499_v55 = vadd.f32 %v13585_v27, %v7456_v7 }
 0xcff   : > { %v7455_v53 = vmul.f32 %v13562_v19, %v7412_v44  ;;  %v9698_v54 = vpop.eup %9697  ;;  %v7303_v40 = vsub.f32 %v7271_v17, %v7287_v12  ;;  %v7294_v58 = vmul.f32 %v13629_v60, %v13629_v60  ;;  %v7341_v50 = vsub.f32 %v13226_v31, %v13611_v26 }
 0xd00   : > { %v7453_v2 = vmul.f32 %v13562_v19, %v7410_v4  ;;  %v7302_v34 = vsub.f32 %v7270_v36, %v7286_v1  ;;  %v9700_v32 = vpop.eup %9699  ;;  %v7521_v33 = vpack.c.bf16 %v7499_v55, %v7497_v14  ;;  %v7259_v38 = vpop.xlane.xlu1 %7258  ;;  %v7401_v43 = vmul.f32 %v9698_v54, %v7337_v0 }
 0xd01   : > { %v7498_v3 = vadd.f32 %v13568_v22, %v7455_v53  ;;  %v7256_v21 = vpop.xlane.xlu0 %7255  ;;  %v7319_v52 = vmax.f32 %v7303_v40, 0.0  ;;  %v7279_v16 = vmul.f32 0.00390625, %v7259_v38  ;;  %v7399_v7 = vmul.f32 %v9700_v32, %v7335_v37 }
 0xd02   : > { %v7496_v24 = vadd.f32 %v13568_v22, %v7453_v2  ;;  %v7318_v45 = vmax.f32 %v7302_v34, 0.0  ;;  %v7278_v12 = vmul.f32 0.00390625, %v7256_v21  ;;  %7727 = vmatprep.mubr.bf16.mxu1 %v7521_v33  ;;  %v7444_v35 = vmul.f32 %v13565_v25, %v7401_v43 }
 0xd03   : > { %v7398_v4 = vmul.f32 %v9700_v32, %v7334_v39  ;;  %v7367_v44 = vadd.f32 1e-05, %v7319_v52  ;;  %v7311_v1 = vsub.f32 %v7279_v16, %v7295_v49  ;;  %v7442_v2 = vmul.f32 %v13565_v25, %v7399_v7 }
 0xd04   : > { %v7520_v57 = vpack.c.bf16 %v7498_v3, %v7496_v24  ;;  %v7366_v17 = vadd.f32 1e-05, %v7318_v45  ;;  %v7310_v36 = vsub.f32 %v7278_v12, %v7294_v58  ;;  %v7145_v14 = vpop.xlane.xlu1 %7144  ;;  %v7487_v0 = vadd.f32 %v13585_v27, %v7444_v35 }
 0xd05   : > { %v7142_v55 = vpop.xlane.xlu0 %7141  ;;  %v7400_v53 = vmul.f32 %v9698_v54, %v7336_v62  ;;  %v7441_v37 = vmul.f32 %v13562_v19, %v7398_v4  ;;  %v9702_v40 = vpop.eup %9701  ;;  %v7351_v39 = vsub.f32 %v13320_v63, %v13572_v30  ;;  %9705 = vrsqrt.f32 %v7367_v44 }
 0xd06   : > { %7728 = vmatmul.mubr.bf16.vlgmr.msra.gmra.mrb[0].mxu1 %v7520_v57  ;;  %v7327_v34 = vmax.f32 %v7311_v1, 0.0  ;;  %v7326_v49 = vmax.f32 %v7310_v36, 0.0  ;;  %v7340_v58 = vsub.f32 %v13223_v15, %v13611_v26  ;;  %9707 = vrsqrt.f32 %v7366_v17 }
 0xd07   : > { %v7485_v32 = vadd.f32 %v13585_v27, %v7442_v2  ;;  %v7443_v33 = vmul.f32 %v13562_v19, %v7400_v53  ;;  %v9704_v24 = vpop.eup %9703  ;;  %v13665_v54 = vmul.f32 0.00390625, %v7145_v14  ;;  %v7338_v63 = vsub.f32 %v13211_v13, %v13621_v59 }
 0xd08   : > { %v7375_v8 = vadd.f32 1e-05, %v7327_v34  ;;  %v7374_v62 = vadd.f32 1e-05, %v7326_v49  ;;  %v7339_v3 = vsub.f32 %v13214_v9, %v13621_v59  ;;  %v7169_v15 = vpop.xlane.xlu1 %7168  ;;  %v7484_v43 = vadd.f32 %v13568_v22, %v7441_v37 }
 0xd09   : > { %v7166_v38 = vpop.xlane.xlu0 %7165  ;;  %v7515_v21 = vpack.c.bf16 %v7487_v0, %v7485_v32  ;;  %v7356_v52 = vsub.f32 %v13355_v18, %v13627_v5  ;;  %v13674_v31 = vmul.f32 0.00390625, %v7142_v55  ;;  %v7486_v26 = vadd.f32 %v13568_v22, %v7443_v33 }
 0xd0a   : > { %9709 = vrsqrt.f32 %v7375_v8  ;;  %v7357_v45 = vsub.f32 %v13358_v48, %v13627_v5  ;;  %v13679_v16 = vmul.f32 0.00390625, %v7169_v15  ;;  %v7415_v9 = vmul.f32 %v9704_v24, %v7351_v39 }
 0xd0b   : > { %9711 = vrsqrt.f32 %v7374_v62  ;;  %7703 = vmatprep.mubr.bf16.mxu0 %v7515_v21  ;;  %v7354_v12 = vsub.f32 %v13345_v10, %v13629_v60  ;;  %v7355_v57 = vsub.f32 %v13348_v46, %v13629_v60  ;;  %v13685_v7 = vmul.f32 0.00390625, %v7166_v38 }
 0xd0c   : > { %v7289_v35 = vmul.f32 %v13665_v54, %v13665_v54  ;;  %v7514_v4 = vpack.c.bf16 %v7486_v26, %v7484_v43  ;;  %v7241_v44 = vpop.xlane.xlu1 %7240  ;;  %v7417_v1 = vmul.f32 %v9702_v40, %v7353_v11  ;;  %v7458_v36 = vmul.f32 %v13565_v25, %v7415_v9 }
 0xd0d   : > { %v7238_v17 = vpop.xlane.xlu0 %7237  ;;  %v7414_v14 = vmul.f32 %v9704_v24, %v7350_v23  ;;  %v7273_v55 = vmul.f32 0.00390625, %v7241_v44  ;;  %v7288_v46 = vmul.f32 %v13674_v31, %v13674_v31  ;;  %v7416_v0 = vmul.f32 %v9702_v40, %v7352_v61 }
 0xd0e   : > { %v7272_v2 = vmul.f32 0.00390625, %v7238_v17  ;;  %7704 = vmatmul.mubr.bf16.gmra.mrb[4].mxu0 %v7514_v4  ;;  %v7460_v53 = vmul.f32 %v13565_v25, %v7417_v1  ;;  %v7501_v47 = vadd.f32 %v13585_v27, %v7458_v36  ;;  %v7297_v41 = vmul.f32 %v13679_v16, %v13679_v16 }
 0xd0f   : > { %v7457_v11 = vmul.f32 %v13562_v19, %v7414_v14  ;;  %v9706_v30 = vpop.eup %9705  ;;  %v7305_v23 = vsub.f32 %v7273_v55, %v7289_v35  ;;  %v7459_v39 = vmul.f32 %v13562_v19, %v7416_v0  ;;  %v7296_v34 = vmul.f32 %v13685_v7, %v13685_v7 }
 0xd10   : > { %v7304_v37 = vsub.f32 %v7272_v2, %v7288_v46  ;;  %v9708_v56 = vpop.eup %9707  ;;  %v7503_v51 = vadd.f32 %v13585_v27, %v7460_v53  ;;  %v7265_v40 = vpop.xlane.xlu1 %7264  ;;  %v7405_v32 = vmul.f32 %v9706_v30, %v7341_v50  ;;  %v7404_v33 = vmul.f32 %v9706_v30, %v7340_v58 }
 0xd11   : > { %v7500_v61 = vadd.f32 %v13568_v22, %v7457_v11  ;;  %v7262_v49 = vpop.xlane.xlu0 %7261  ;;  %v7321_v24 = vmax.f32 %v7305_v23, 0.0  ;;  %v7502_v62 = vadd.f32 %v13568_v22, %v7459_v39  ;;  %v7281_v15 = vmul.f32 0.00390625, %v7265_v40 }
 0xd12   : > { %v7320_v8 = vmax.f32 %v7304_v37, 0.0  ;;  %v7523_v38 = vpack.c.bf16 %v7503_v51, %v7501_v47  ;;  %v7280_v21 = vmul.f32 0.00390625, %v7262_v49  ;;  %v7403_v43 = vmul.f32 %v9708_v56, %v7339_v3 }
 0xd13   : > { %v7448_v26 = vmul.f32 %v13565_v25, %v7405_v32  ;;  %v7369_v35 = vadd.f32 1e-05, %v7321_v24  ;;  %v7522_v44 = vpack.c.bf16 %v7502_v62, %v7500_v61  ;;  %v7313_v17 = vsub.f32 %v7281_v15, %v7297_v41 }
 0xd14   : > { %v9710_v9 = vpop.eup %9709  ;;  %v7368_v4 = vadd.f32 1e-05, %v7320_v8  ;;  %7735 = vmatprep.mubr.bf16.mxu1 %v7523_v38  ;;  %v7312_v36 = vsub.f32 %v7280_v21, %v7296_v34  ;;  %v7446_v58 = vmul.f32 %v13565_v25, %v7403_v43  ;;  %v7402_v14 = vmul.f32 %v9708_v56, %v7338_v63  ;;  %v14206_v38 = vld [vmem:[#allocation52_spill] sm:$0xff] }
 0xd15   : > { %v9712_v1 = vpop.eup %9711  ;;  %v7491_v50 = vadd.f32 %v13585_v27, %v7448_v26  ;;  %9713 = vrsqrt.f32 %v7369_v35  ;;  %7736 = vmatmul.mubr.bf16.gmra.mrb[4].mxu1 %v7522_v44  ;;  %v7329_v3 = vmax.f32 %v7313_v17, 0.0  ;;  %v7447_v55 = vmul.f32 %v13562_v19, %v7404_v33 }
 0xd16   : > { %v7419_v46 = vmul.f32 %v9712_v1, %v7355_v57  ;;  %9715 = vrsqrt.f32 %v7368_v4  ;;  %v7328_v2 = vmax.f32 %v7312_v36, 0.0  ;;  %v7489_v0 = vadd.f32 %v13585_v27, %v7446_v58 }
 0xd17   : > { %v7445_v53 = vmul.f32 %v13562_v19, %v7402_v14  ;;  %v7377_v47 = vadd.f32 1e-05, %v7329_v3  ;;  %v7490_v11 = vadd.f32 %v13568_v22, %v7447_v55  ;;  %v7421_v13 = vmul.f32 %v9710_v9, %v7357_v45 }
 0xd18   : > { %v7462_v59 = vmul.f32 %v13565_v25, %v7419_v46  ;;  %v7376_v63 = vadd.f32 1e-05, %v7328_v2  ;;  %v7517_v41 = vpack.c.bf16 %v7491_v50, %v7489_v0  ;;  %v7418_v57 = vmul.f32 %v9712_v1, %v7354_v12 }
 0xd19   : > { %v7488_v30 = vadd.f32 %v13568_v22, %v7445_v53  ;;  %9717 = vrsqrt.f32 %v7377_v47  ;;  %v7464_v23 = vmul.f32 %v13565_v25, %v7421_v13  ;;  %v7420_v48 = vmul.f32 %v9710_v9, %v7356_v52 }
 0xd1a   : > { %v7505_v37 = vadd.f32 %v13585_v27, %v7462_v59  ;;  %9719 = vrsqrt.f32 %v7376_v63  ;;  %7711 = vmatprep.mubr.bf16.mxu0 %v7517_v41  ;;  %v7461_v39 = vmul.f32 %v13562_v19, %v7418_v57  ;;  %v7344_v51 = vsub.f32 %v13265_v28, %v13665_v54 }
 0xd1b   : > { %v7516_v45 = vpack.c.bf16 %v7490_v11, %v7488_v30  ;;  %v7507_v34 = vadd.f32 %v13585_v27, %v7464_v23  ;;  %v7463_v56 = vmul.f32 %v13562_v19, %v7420_v48  ;;  %v7345_v18 = vsub.f32 %v13268_v29, %v13665_v54  ;;  %v14204_v29 = vld [vmem:[#allocation53_spill] sm:$0xff] }
 0xd1c   : > { %v7504_v10 = vadd.f32 %v13568_v22, %v7461_v39  ;;  %v7342_v52 = vsub.f32 %v13253_v42, %v13674_v31  ;;  %v7343_v61 = vsub.f32 %v13256_v20, %v13674_v31  ;;  %v7360_v28 = vsub.f32 %v13383_v6, %v13679_v16  ;;  %v14205_v20 = vld [vmem:[#allocation51_spill] sm:$0xff] }
 0xd1d   : > { %7712 = vmatmul.mubr.bf16.gmra.mrb[8].mxu0 %v7516_v45  ;;  %v7525_v60 = vpack.c.bf16 %v7507_v34, %v7505_v37  ;;  %v7506_v12 = vadd.f32 %v13568_v22, %v7463_v56  ;;  %v7361_v54 = vsub.f32 %v14204_v29, %v13679_v16  ;;  %v7358_v31 = vsub.f32 %v14205_v20, %v13685_v7 }
 0xd1e   : > { %v7359_v21 = vsub.f32 %v14206_v38, %v13685_v7 }
 0xd1f   : > { %v9714_v5 = vpop.eup %9713  ;;  %7743 = vmatprep.mubr.bf16.mxu1 %v7525_v60  ;;  %v7524_v40 = vpack.c.bf16 %v7506_v12, %v7504_v10 }
 0xd20   : > { %v9716_v49 = vpop.eup %9715  ;;  %v7409_v32 = vmul.f32 %v9714_v5, %v7345_v18  ;;  %v7408_v33 = vmul.f32 %v9714_v5, %v7344_v51 }
 0xd21   : > { %7744 = vmatmul.mubr.bf16.gmra.mrb[8].mxu1 %v7524_v40  ;;  %v7407_v24 = vmul.f32 %v9716_v49, %v7343_v61  ;;  %v7406_v8 = vmul.f32 %v9716_v49, %v7342_v52 }
 0xd22   : > { %v7452_v62 = vmul.f32 %v13565_v25, %v7409_v32  ;;  %v7451_v42 = vmul.f32 %v13562_v19, %v7408_v33 }
 0xd23   : > { %v9718_v15 = vpop.eup %9717  ;;  %v7450_v43 = vmul.f32 %v13565_v25, %v7407_v24  ;;  %v7449_v26 = vmul.f32 %v13562_v19, %v7406_v8 }
 0xd24   : > { %v9720_v9 = vpop.eup %9719  ;;  %v7495_v6 = vadd.f32 %v13585_v27, %v7452_v62  ;;  %v7494_v16 = vadd.f32 %v13568_v22, %v7451_v42  ;;  %v7425_v35 = vmul.f32 %v9718_v15, %v7361_v54  ;;  %v7424_v4 = vmul.f32 %v9718_v15, %v7360_v28 }
 0xd25   : > { %v7493_v44 = vadd.f32 %v13585_v27, %v7450_v43  ;;  %v7492_v17 = vadd.f32 %v13568_v22, %v7449_v26  ;;  %v7423_v1 = vmul.f32 %v9720_v9, %v7359_v21  ;;  %v7422_v36 = vmul.f32 %v9720_v9, %v7358_v31 }
 0xd26   : > { %v7468_v58 = vmul.f32 %v13565_v25, %v7425_v35  ;;  %v7467_v7 = vmul.f32 %v13562_v19, %v7424_v4 }
 0xd27   : > { %v7519_v50 = vpack.c.bf16 %v7495_v6, %v7493_v44  ;;  %v7518_v14 = vpack.c.bf16 %v7494_v16, %v7492_v17  ;;  %v7466_v3 = vmul.f32 %v13565_v25, %v7423_v1  ;;  %v7465_v55 = vmul.f32 %v13562_v19, %v7422_v36  ;;  %v13775_v19 = vld [vmem:[%s14207_s30] ss:$0 sm:$0xff] }
 0xd28   : > { %v7511_v46 = vadd.f32 %v13585_v27, %v7468_v58  ;;  %v7510_v2 = vadd.f32 %v13568_v22, %v7467_v7 }
 0xd29   : > { %7719 = vmatprep.mubr.bf16.mxu0 %v7519_v50  ;;  %v7509_v0 = vadd.f32 %v13585_v27, %v7466_v3  ;;  %v7508_v53 = vadd.f32 %v13568_v22, %v7465_v55 }
 0xd2a   : > { %7720 = vmatmul.mubr.bf16.gmra.mrb[12].mxu0 %v7518_v14 }
 0xd2b   : > { %v7527_v47 = vpack.c.bf16 %v7511_v46, %v7509_v0  ;;  %v7526_v11 = vpack.c.bf16 %v7510_v2, %v7508_v53 }
 0xd2d   : > { %7751 = vmatprep.mubr.bf16.mxu1 %v7527_v47 }
 0xd2e   : > { %7752 = vmatmul.mubr.bf16.gmra.mrb[12].mxu1 %v7526_v11 }
 0xdce   : > { %v8645_v13 = vpop.f32.mrb[0].mxu0 }
 0xdcf   : > { %v8646_v59 = vpop.f32.mrb[1].mxu0 }
 0xdd0   : > { %v8647_v63 = vadd.f32 %v8646_v59, %v8645_v13  ;;  %v8648_v25 = vpop.f32.mrb[2].mxu0 }
 0xdd1   : > { %v8649_v41 = vpop.f32.mrb[3].mxu0 }
 0xdd2   : > { %v8650_v30 = vadd.f32 %v8649_v41, %v8648_v25  ;;  %v7698_v27 = vadd.f32 %v8647_v63, %v13775_v19 }
 0xdd4   : > { %v7701_v22 = vadd.f32 %v8650_v30, %v13775_v19 }
 0xdd6   : > { %v8521_v57 = vpack.c.bf16 %v7701_v22, %v7698_v27 }
 0xdd8   : > { %8522 = vst [vmem:[#allocation11] sm:$0xff] %v8521_v57  }
 0xdd9   : > { %v8669_v23 = vpop.f32.mrb[0].mxu1 }
 0xdda   : > { %v8670_v37 = vpop.f32.mrb[1].mxu1 }
 0xddb   : > { %v8671_v48 = vadd.f32 %v8670_v37, %v8669_v23  ;;  %v8672_v45 = vpop.f32.mrb[2].mxu1 }
 0xddc   : > { %v8673_v39 = vpop.f32.mrb[3].mxu1 }
 0xddd   : > { %v8674_v34 = vadd.f32 %v8673_v39, %v8672_v45  ;;  %v7730_v56 = vadd.f32 %v8671_v48, %v13775_v19 }
 0xddf   : > { %v7733_v10 = vadd.f32 %v8674_v34, %v13775_v19 }
 0xde1   : > { %v8541_v60 = vpack.c.bf16 %v7733_v10, %v7730_v56  ;;  %v8651_v12 = vpop.f32.mrb[4].mxu0 }
 0xde2   : > { %v8652_v51 = vpop.f32.mrb[5].mxu0 }
 0xde3   : > { %8561 = vst [vmem:[#allocation11 + $0x20] sm:$0xff] %v8541_v60   ;;  %v8653_v18 = vadd.f32 %v8652_v51, %v8651_v12  ;;  %v8654_v5 = vpop.f32.mrb[6].mxu0 }
 0xde4   : > { %v8655_v52 = vpop.f32.mrb[7].mxu0 }
 0xde5   : > { %v8656_v61 = vadd.f32 %v8655_v52, %v8654_v5  ;;  %v7706_v40 = vadd.f32 %v8653_v18, %v13775_v19 }
 0xde7   : > { %v7709_v49 = vadd.f32 %v8656_v61, %v13775_v19 }
 0xde8   : > { %v8675_v32 = vpop.f32.mrb[4].mxu1 }
 0xde9   : > { %v8526_v33 = vpack.c.bf16 %v7709_v49, %v7706_v40  ;;  %v8676_v24 = vpop.f32.mrb[5].mxu1 }
 0xdea   : > { %v8677_v8 = vadd.f32 %v8676_v24, %v8675_v32  ;;  %v8678_v28 = vpop.f32.mrb[6].mxu1 }
 0xdeb   : > { %8558 = vst [vmem:[#allocation11 + $0x8] sm:$0xff] %v8526_v33   ;;  %v8679_v29 = vpop.f32.mrb[7].mxu1 }
 0xdec   : > { %v8680_v54 = vadd.f32 %v8679_v29, %v8678_v28  ;;  %v7738_v62 = vadd.f32 %v8677_v8, %v13775_v19 }
 0xdee   : > { %v7741_v42 = vadd.f32 %v8680_v54, %v13775_v19 }
 0xdf0   : > { %v8657_v15 = vpop.f32.mrb[8].mxu0  ;;  %v8546_v20 = vpack.c.bf16 %v7741_v42, %v7738_v62 }
 0xdf1   : > { %v8658_v31 = vpop.f32.mrb[9].mxu0 }
 0xdf2   : > { %v8659_v38 = vadd.f32 %v8658_v31, %v8657_v15  ;;  %v8660_v21 = vpop.f32.mrb[10].mxu0  ;;  %8562 = vst [vmem:[#allocation11 + $0x28] sm:$0xff] %v8546_v20  }
 0xdf3   : > { %v8661_v43 = vpop.f32.mrb[11].mxu0 }
 0xdf4   : > { %v8662_v26 = vadd.f32 %v8661_v43, %v8660_v21  ;;  %v8681_v9 = vpop.f32.mrb[8].mxu1  ;;  %v7714_v6 = vadd.f32 %v8659_v38, %v13775_v19 }
 0xdf5   : > { %v8682_v35 = vpop.f32.mrb[9].mxu1 }
 0xdf6   : > { %v7717_v16 = vadd.f32 %v8662_v26, %v13775_v19  ;;  %v8683_v4 = vadd.f32 %v8682_v35, %v8681_v9  ;;  %v8684_v44 = vpop.f32.mrb[10].mxu1 }
 0xdf7   : > { %v8685_v1 = vpop.f32.mrb[11].mxu1 }
 0xdf8   : > { %v8531_v17 = vpack.c.bf16 %v7717_v16, %v7714_v6  ;;  %v8686_v36 = vadd.f32 %v8685_v1, %v8684_v44  ;;  %v7746_v58 = vadd.f32 %v8683_v4, %v13775_v19 }
 0xdfa   : > { %8559 = vst [vmem:[#allocation11 + $0x10] sm:$0xff] %v8531_v17   ;;  %v7749_v7 = vadd.f32 %v8686_v36, %v13775_v19 }
 0xdfc   : > { %v8551_v50 = vpack.c.bf16 %v7749_v7, %v7746_v58 }
 0xdfd   : > { %v8663_v14 = vpop.f32.mrb[12].mxu0 }
 0xdfe   : > { %8563 = vst [vmem:[#allocation11 + $0x30] sm:$0xff] %v8551_v50   ;;  %v8664_v3 = vpop.f32.mrb[13].mxu0 }
 0xdff   : > { %v8665_v55 = vadd.f32 %v8664_v3, %v8663_v14  ;;  %v8666_v46 = vpop.f32.mrb[14].mxu0 }
 0xe00   : > { %v8667_v2 = vpop.f32.mrb[15].mxu0 }
 0xe01   : > { %v8668_v0 = vadd.f32 %v8667_v2, %v8666_v46  ;;  %v8687_v53 = vpop.f32.mrb[12].mxu1  ;;  %v7722_v11 = vadd.f32 %v8665_v55, %v13775_v19 }
 0xe02   : > { %v8688_v47 = vpop.f32.mrb[13].mxu1 }
 0xe03   : > { %v7725_v13 = vadd.f32 %v8668_v0, %v13775_v19  ;;  %v8689_v59 = vadd.f32 %v8688_v47, %v8687_v53  ;;  %v8690_v63 = vpop.f32.mrb[14].mxu1 }
 0xe04   : > { %v8691_v25 = vpop.f32.mrb[15].mxu1 }
 0xe05   : > { %v8536_v41 = vpack.c.bf16 %v7725_v13, %v7722_v11  ;;  %v8692_v30 = vadd.f32 %v8691_v25, %v8690_v63  ;;  %v7754_v27 = vadd.f32 %v8689_v59, %v13775_v19 }
 0xe07   : > { %8560 = vst [vmem:[#allocation11 + $0x18] sm:$0xff] %v8536_v41   ;;  %v7757_v22 = vadd.f32 %v8692_v30, %v13775_v19 }
 0xe09   : > { %v8556_v57 = vpack.c.bf16 %v7757_v22, %v7754_v27 }
 0xe0b   : > { %8564 = vst [vmem:[#allocation11 + $0x38] sm:$0xff] %v8556_v57  }
 0xe0c PF: > { %p9021_p12 = scmp.eq.s32.totalorder %s10003_s28, 1  ;;  %s9891_s18 = smov [#allocation11]  }
 0xe0d   : > { %s7846_s0 = sshll.u32 %s9891_s18, 4  ;;  %s7847_s0 = int_to_ptr.vmem [resolvable:$true] %s7846_s0 }
 0xe0e   : > { %s9811_s13 = scalar_lea.vmem %s7847_s0, 1024  ;;  %p9818_p6 = scmp.lt.s32.totalorder %s7847_s0, %s7847_s0 }
 0xe0f   : > { %p9812_p2 = scmp.ne.s32.totalorder %s7847_s0, %s9811_s13  ;;  %p9819_p4 = scmp.lt.s32.totalorder %s9811_s13, %s9811_s13 }
 0xe11   : > { %p9813_p3 = pnand %p9812_p2, %p9021_p12  ;;  %p9820_p1 = por %p9819_p4, %p9818_p6 }
 0xe13   : > { %p9814_p5 = pneg %p9813_p3 }
 0xe15   : > { %p9821_p11 = pnand %p9820_p1, %p9814_p5 }
 0xe17   : > { %9824 = shalt.err (!%p9821_p11)
}
 0xe18   : > { %s14208_s17 = sld [smem:[#allocation73_spill]] }
 0xe1e   : > { %s9825_s9 = scalar_lea.hbm %s14208_s17, 1024 }
 0xe1f   : > { %p9826_p13 = scmp.ne.s32.totalorder %s14208_s17, %s9825_s9  ;;  %p9831_p8 = scmp.lt.u32.totalorder %s9825_s9, %s14208_s17 }
 0xe21   : > { %p9827_p10 = pnand %p9826_p13, %p9021_p12 }
 0xe23   : > { %p9828_p9 = pneg %p9827_p10 }
 0xe25   : > { %p9833_p0 = pnand %p9831_p8, %p9828_p9 }
 0xe27   : > { %9836 = shalt.err (!%p9833_p0)
}
 0xe28   : > { %s9892_s26 = smov 64   ;;  %s9893_s2 = smov 4  }
 0xe29   : > { %9007 = dma.vmem_to_hbm [thread:$0]  (%p9021_p12), %s7847_s0, 1024, %s14208_s17, [#allocation7], %s9892_s26, %s9892_s26, %s9893_s2  }
 0xe2a   : > { %9862 = dma.done.wait (%p9021_p12), [#allocation7], 1024  }
 0xe2b   : > { %9864 = vsyncadd (%p9021_p12), [#allocation7], 4294966272 }
 0xe2c PF: > { %s14209_s27 = sld [smem:[#allocation16_spill]]  ;;  %s14210_s20 = sld [smem:[#allocation15_spill]] }
 0xe2d   : > { %s14211_s26 = sld [smem:[#allocation17_spill]]  ;;  %s14212_s24 = smov %s9871_s25 }
 0xe32   : > { %p31_p7 = scmp.ge.s32.totalorder %s14209_s27, 4   ;;  %s14213_s25 = smov %s14210_s20 }
 0xe34   :  { %33 = sbr.rel (!%p31_p7) target bundleno = 18 (0x12), region = 181 }
 0xe3b   :  { %7862 = vsyncpa [#allocation6], 1 }
 0xe3c   :  { %7864 = vsyncpa [#allocation6 + $0x1], 1 }
 0xe3d   :  { %7865 = vsyncpa [#allocation9], 1 }
 0xe3e   :  { %7867 = vsyncpa [#allocation9 + $0x1], 1 }
 0xe3f   :  { %7868 = vsyncpa [#allocation7], 1 }
 0xe40   :  { %7870 = vsyncpa [#allocation7 + $0x1], 1 }

</bundles_post_ra>
